<compile_context>
chip_gen: v7x
topology: tpu7x:2x2x1
jax: 0.10.0
libtpu: 0.0.40
codegen_flags: <defaults>
</compile_context>

<pallas_src>
import functools

import numpy as np
import jax
import jax.numpy as jnp
from jax import lax
from jax.experimental import pallas as pl
from jax.experimental.pallas import tpu as pltpu

# ----------------------------- configuration -----------------------------
N, H, W = 2, 16, 16
C_IN, C_OUT = 16, 16
EXPAND_RATIO = 2
C_EXP = C_IN * EXPAND_RATIO                      # 32
KSIZES = (3, 5)                                  # mixed depthwise kernel sizes
# _SplitChannels(C_EXP, 2) -> [16, 16]
C1 = C_EXP // 2 + (C_EXP - 2 * (C_EXP // 2))
C2 = C_EXP // 2
KMAX = max(KSIZES)                               # 3x3 group embedded in 5x5
BN_EPS = 1e-5


def make_divisible(v, divisor, min_value=None):
    if min_value is None:
        min_value = divisor
    new_v = max(min_value, int(v + divisor / 2) // divisor * divisor)
    if new_v < 0.9 * v:
        new_v += divisor
    return new_v


C_SQ = make_divisible(C_IN // 4, 8)              # SE squeeze channels -> 8


# ----------------------------- fused Pallas kernel -----------------------------
def _mixnet_block_kernel(x_ref, we_ref, wmd_ref, mask_ref, wse1_ref, wse2_ref,
                         wp_ref, bias_ref, o_ref, *, N, H, W, K):
    """Whole MixNetBlock for the whole batch, one kernel invocation.

    Channel-major, lane-dense layout: activations are (C, N*H*W).

    x_ref    : (N, C_in, H*W)   input (pure reshape of NCHW)
    we_ref   : (C_exp, C_in)    1x1 expand weight^T (BN1 scale folded)
    wmd_ref  : (C_exp, K*K)     depthwise taps, 3x3 group zero-embedded in KxK
                                (BN2 scale folded)
    mask_ref : (K*K, N*H*W)     0/1 spatial validity per tap (constant)
    wse1_ref : (C_sq, C_exp)    SE reduce weight^T
    wse2_ref : (C_exp, C_sq)    SE expand weight^T
    wp_ref   : (C_out, C_exp)   1x1 project weight^T (BN3 scale folded)
    bias_ref : (C_exp, 5)       packed biases [b1, b2, b_se1, b_se2, b3]
    o_ref    : (N, C_out, H*W)
    """
    C_exp, C_in = we_ref.shape
    C_out = wp_ref.shape[0]
    C_sq = wse1_ref.shape[0]
    HW = H * W
    M = N * HW
    c = K // 2
    KK = K * K
    tc = c * K + c                               # centre tap index

    b1 = bias_ref[:, 0:1]                        # (C_exp, 1)
    b2 = bias_ref[:, 1:2]                        # (C_exp, 1)
    bse1 = bias_ref[:C_sq, 2:3]                  # (C_sq, 1)
    bse2 = bias_ref[:, 3:4]                      # (C_exp, 1)
    b3 = bias_ref[:C_out, 4:5]                   # (C_out, 1)

    # Lane-dense channel-major activation slab: (C_in, N*H*W) = 512 lanes.
    # Concats are at 128-aligned lane offsets (multiples of H*W = 256).
    x_all = jnp.concatenate([x_ref[n] for n in range(N)], axis=1)

    # ---- 1) 1x1 expansion (BN1 folded) + bias + ReLU, whole batch at once ---
    y = jnp.dot(we_ref[...], x_all, preferred_element_type=jnp.float32)
    y = jnp.maximum(y + b1, 0.0)                                  # (C_exp, M)

    # ---- 2) mixed depthwise conv as K*K lane rolls (no padded scratch) ------
    # out[ch, l] = sum_t w[ch, t] * mask[t, l] * y[ch, l + dk*W + dj]
    # The validity mask zeroes both spatial-halo taps and cross-image bleed.
    acc = y * wmd_ref[:, tc:tc + 1]              # centre tap from registers
    for t in range(KK):
        if t == tc:
            continue
        dk = t // K - c
        dj = t % K - c
        shift = (-(dk * W + dj)) % M             # pltpu.roll == jnp.roll sign
        wm = wmd_ref[:, t:t + 1] * mask_ref[t:t + 1, :]           # (C_exp, M)
        acc = acc + pltpu.roll(y, shift, axis=1) * wm
    y = jnp.maximum(acc + b2, 0.0)                                # (C_exp, M)

    # ---- 3) squeeze-and-excite (per image, aligned lane slices) -------------
    gates = []
    for n in range(N):
        pooled = jnp.mean(y[:, n * HW:(n + 1) * HW], axis=1, keepdims=True)
        s = jnp.dot(wse1_ref[...], pooled,
                    preferred_element_type=jnp.float32) + bse1    # (C_sq, 1)
        s = s * jax.nn.sigmoid(s)                                 # Swish
        g = jax.nn.sigmoid(
            jnp.dot(wse2_ref[...], s,
                    preferred_element_type=jnp.float32) + bse2)   # (C_exp, 1)
        gates.append(jnp.broadcast_to(g, (C_exp, HW)))
    y = y * jnp.concatenate(gates, axis=1)                        # (C_exp, M)

    # ---- 4) 1x1 projection (BN3 folded) + bias + residual -------------------
    z = jnp.dot(wp_ref[...], y, preferred_element_type=jnp.float32) + b3
    z = (z + x_all).astype(o_ref.dtype)          # residual: stride 1, C_in==C_out
    for n in range(N):
        o_ref[n] = z[:, n * HW:(n + 1) * HW]


# ----------------------------- one-time parameter prep -----------------------------
def _fold_bn(gamma, beta, mean, var):
    scale = gamma / jnp.sqrt(var + BN_EPS)
    bias = beta - mean * scale
    return scale, bias


def _tap_masks(n, h, w, k):
    """(K*K, N*H*W) 0/1 validity mask per depthwise tap (host-side constant)."""
    hw = h * w
    hh = np.arange(hw) // w
    ww = np.arange(hw) % w
    c = k // 2
    rows = []
    for t in range(k * k):
        dk = t // k - c
        dj = t % k - c
        valid = ((hh + dk >= 0) & (hh + dk < h) &
                 (ww + dj >= 0) & (ww + dj < w))
        rows.append(valid.astype(np.float32))
    m = np.stack(rows, axis=0)                   # (K*K, H*W)
    return jnp.asarray(np.tile(m, (1, n)))       # (K*K, N*H*W)


def prepare_params(p):
    """BN folding / weight repacking -- run ONCE, outside the jitted hot path."""
    s1, b1 = _fold_bn(*p["bn1"])
    s2, b2 = _fold_bn(*p["bn2"])
    s3, b3 = _fold_bn(*p["bn3"])

    fp = {
        "we":   jnp.asarray((p["w_exp"] * s1[None, :]).T, jnp.float32),   # (C_exp, C_in)
        "wmd":  jnp.asarray((p["w_md"] * s2[None, :]).T, jnp.float32),    # (C_exp, K*K)
        "wse1": jnp.asarray(p["w_se1"].T, jnp.float32),                   # (C_sq, C_exp)
        "wse2": jnp.asarray(p["w_se2"].T, jnp.float32),                   # (C_exp, C_sq)
        "wp":   jnp.asarray((p["w_proj"] * s3[None, :]).T, jnp.float32),  # (C_out, C_exp)
        "mask": _tap_masks(N, H, W, KMAX),                                # (K*K, N*H*W)
    }
    bias = jnp.zeros((C_EXP, 5), jnp.float32)
    bias = bias.at[:C_EXP, 0].set(b1)
    bias = bias.at[:C_EXP, 1].set(b2)
    bias = bias.at[:C_SQ, 2].set(p["b_se1"])
    bias = bias.at[:C_EXP, 3].set(p["b_se2"])
    bias = bias.at[:C_OUT, 4].set(b3)
    fp["bias"] = bias
    return fp


# ----------------------------- wrapper -----------------------------
def mixnet_block_forward(x_nchw, fp):
    """MixNetBlock.forward (inference). Input/output NCHW (PyTorch convention)."""
    n, cin, h, w = x_nchw.shape
    hw = h * w
    kk = KMAX * KMAX
    x3 = x_nchw.reshape(n, cin, hw)              # pure reshape, no transpose

    kern = functools.partial(_mixnet_block_kernel, N=n, H=h, W=w, K=KMAX)
    out = pl.pallas_call(
        kern,
        out_shape=jax.ShapeDtypeStruct((n, C_OUT, hw), x_nchw.dtype),
        grid=(1,),
        in_specs=[
            pl.BlockSpec((n, cin, hw), lambda i: (0, 0, 0)),
            pl.BlockSpec((C_EXP, C_IN), lambda i: (0, 0)),
            pl.BlockSpec((C_EXP, kk), lambda i: (0, 0)),
            pl.BlockSpec((kk, n * hw), lambda i: (0, 0)),
            pl.BlockSpec((C_SQ, C_EXP), lambda i: (0, 0)),
            pl.BlockSpec((C_EXP, C_SQ), lambda i: (0, 0)),
            pl.BlockSpec((C_OUT, C_EXP), lambda i: (0, 0)),
            pl.BlockSpec((C_EXP, 5), lambda i: (0, 0)),
        ],
        out_specs=pl.BlockSpec((n, C_OUT, hw), lambda i: (0, 0, 0)),
        compiler_params=pltpu.CompilerParams(dimension_semantics=("arbitrary",)),
    )(x3, fp["we"], fp["wmd"], fp["mask"], fp["wse1"], fp["wse2"],
      fp["wp"], fp["bias"])

    return out.reshape(n, C_OUT, h, w)


# ----------------------------- pure-JAX reference -----------------------------
def reference_forward(x_nchw, p):
    x = jnp.transpose(x_nchw, (0, 2, 3, 1))

    def bn(v, g, b, m, var):
        return (v - m) / jnp.sqrt(var + BN_EPS) * g + b

    y = jnp.einsum("nhwc,cd->nhwd", x, p["w_exp"])
    y = jnp.maximum(bn(y, *p["bn1"]), 0.0)

    dn = ("NHWC", "HWIO", "NHWC")
    y1 = lax.conv_general_dilated(y[..., :C1], p["dw3"][:, :, None, :],
                                  (1, 1), ((1, 1), (1, 1)),
                                  dimension_numbers=dn, feature_group_count=C1)
    y2 = lax.conv_general_dilated(y[..., C1:], p["dw5"][:, :, None, :],
                                  (1, 1), ((2, 2), (2, 2)),
                                  dimension_numbers=dn, feature_group_count=C2)
    y = jnp.concatenate([y1, y2], axis=-1)
    y = jnp.maximum(bn(y, *p["bn2"]), 0.0)

    pooled = jnp.mean(y, axis=(1, 2))
    s = pooled @ p["w_se1"] + p["b_se1"]
    s = s * jax.nn.sigmoid(s)
    s = jax.nn.sigmoid(s @ p["w_se2"] + p["b_se2"])
    y = y * s[:, None, None, :]

    z = jnp.einsum("nhwc,cd->nhwd", y, p["w_proj"])
    z = bn(z, *p["bn3"])
    return jnp.transpose(x + z, (0, 3, 1, 2))


# ----------------------------- parameter init -----------------------------
def init_params(key):
    ks = jax.random.split(key, 20)

    def bn_params(k, c):
        k1, k2, k3, k4 = jax.random.split(k, 4)
        gamma = 1.0 + 0.1 * jax.random.normal(k1, (c,), jnp.float32)
        beta = 0.1 * jax.random.normal(k2, (c,), jnp.float32)
        mean = 0.1 * jax.random.normal(k3, (c,), jnp.float32)
        var = jax.random.uniform(k4, (c,), jnp.float32, 0.5, 1.5)
        return (gamma, beta, mean, var)

    p = {}
    p["w_exp"] = 0.1 * jax.random.normal(ks[0], (C_IN, C_EXP), jnp.float32)
    p["bn1"] = bn_params(ks[1], C_EXP)
    p["dw3"] = 0.1 * jax.random.normal(ks[2], (3, 3, C1), jnp.float32)
    p["dw5"] = 0.1 * jax.random.normal(ks[3], (5, 5, C2), jnp.float32)
    p["bn2"] = bn_params(ks[4], C_EXP)
    p["w_se1"] = 0.1 * jax.random.normal(ks[5], (C_EXP, C_SQ), jnp.float32)
    p["b_se1"] = 0.1 * jax.random.normal(ks[6], (C_SQ,), jnp.float32)
    p["w_se2"] = 0.1 * jax.random.normal(ks[7], (C_SQ, C_EXP), jnp.float32)
    p["b_se2"] = 0.1 * jax.random.normal(ks[8], (C_EXP,), jnp.float32)
    p["w_proj"] = 0.1 * jax.random.normal(ks[9], (C_EXP, C_OUT), jnp.float32)
    p["bn3"] = bn_params(ks[10], C_OUT)

    # Embed the 3x3 and 5x5 depthwise kernels into a single 5x5-per-channel
    # stencil (zero border for the 3x3 group) -> equivalent to MDConv with
    # per-group padding k//2 and stride 1.
    w5 = jnp.zeros((5, 5, C_EXP), jnp.float32)
    w5 = w5.at[1:4, 1:4, :C1].set(p["dw3"])
    w5 = w5.at[:, :, C1:].set(p["dw5"])
    p["w_md"] = w5.reshape(25, C_EXP)
    return p


# ----------------------------- main -----------------------------
if __name__ == "__main__":
    key = jax.random.PRNGKey(0)
    kx, kp = jax.random.split(key)
    x = jax.random.normal(kx, (N, C_IN, H, W), jnp.float32)   # NCHW, like PyTorch
    params = init_params(kp)
    folded = prepare_params(params)                           # once, off the hot path

    fwd = jax.jit(mixnet_block_forward)
    out = jax.block_until_ready(fwd(x, folded))

    ref = jax.block_until_ready(reference_forward(x, params))
    max_err = float(jnp.max(jnp.abs(out - ref)))
    assert out.shape == (N, C_OUT, H, W), out.shape
    assert max_err < 1e-3, f"mismatch vs reference: {max_err}"

    print("KERNEL_OK")
</pallas_src>

<mosaic_0001>
module attributes {stable_mosaic.version = 11 : i64} {
  func.func @_mixnet_block_kernel(%arg0: i32, %arg1: memref<2x16x256xf32, #tpu.memory_space<vmem>>, %arg2: memref<32x16xf32, #tpu.memory_space<vmem>>, %arg3: memref<32x25xf32, #tpu.memory_space<vmem>>, %arg4: memref<25x512xf32, #tpu.memory_space<vmem>>, %arg5: memref<8x32xf32, #tpu.memory_space<vmem>>, %arg6: memref<32x8xf32, #tpu.memory_space<vmem>>, %arg7: memref<16x32xf32, #tpu.memory_space<vmem>>, %arg8: memref<32x5xf32, #tpu.memory_space<vmem>>, %arg9: memref<2x16x256xf32, #tpu.memory_space<vmem>>) attributes {dimension_semantics = [#tpu.dimension_semantics<arbitrary>], iteration_bounds = array<i64: 1>, scalar_prefetch = 0 : i64, scratch_operands = 0 : i64, tpu.core_type = #tpu.core_type<tc>, window_params = [{pipeline_mode = #tpu.pipeline_mode<synchronous>, transform_indices = @transform_0, window_bounds = array<i64: 2, 16, 256>}, {pipeline_mode = #tpu.pipeline_mode<synchronous>, transform_indices = @transform_1, window_bounds = array<i64: 32, 16>}, {pipeline_mode = #tpu.pipeline_mode<synchronous>, transform_indices = @transform_2, window_bounds = array<i64: 32, 25>}, {pipeline_mode = #tpu.pipeline_mode<synchronous>, transform_indices = @transform_3, window_bounds = array<i64: 25, 512>}, {pipeline_mode = #tpu.pipeline_mode<synchronous>, transform_indices = @transform_4, window_bounds = array<i64: 8, 32>}, {pipeline_mode = #tpu.pipeline_mode<synchronous>, transform_indices = @transform_5, window_bounds = array<i64: 32, 8>}, {pipeline_mode = #tpu.pipeline_mode<synchronous>, transform_indices = @transform_6, window_bounds = array<i64: 16, 32>}, {pipeline_mode = #tpu.pipeline_mode<synchronous>, transform_indices = @transform_7, window_bounds = array<i64: 32, 5>}, {pipeline_mode = #tpu.pipeline_mode<synchronous>, transform_indices = @transform_8, window_bounds = array<i64: 2, 16, 256>}]} {
    %c0 = arith.constant 0 : index
    %c0_0 = arith.constant 0 : index
    %0 = vector.load %arg8[%c0, %c0_0] : memref<32x5xf32, #tpu.memory_space<vmem>>, vector<32x1xf32>
    %c0_1 = arith.constant 0 : index
    %c1 = arith.constant 1 : index
    %1 = vector.load %arg8[%c0_1, %c1] : memref<32x5xf32, #tpu.memory_space<vmem>>, vector<32x1xf32>
    %c0_2 = arith.constant 0 : index
    %c2 = arith.constant 2 : index
    %2 = vector.load %arg8[%c0_2, %c2] : memref<32x5xf32, #tpu.memory_space<vmem>>, vector<8x1xf32>
    %c0_3 = arith.constant 0 : index
    %c3 = arith.constant 3 : index
    %3 = vector.load %arg8[%c0_3, %c3] : memref<32x5xf32, #tpu.memory_space<vmem>>, vector<32x1xf32>
    %c0_4 = arith.constant 0 : index
    %c4 = arith.constant 4 : index
    %4 = vector.load %arg8[%c0_4, %c4] : memref<32x5xf32, #tpu.memory_space<vmem>>, vector<16x1xf32>
    %c0_5 = arith.constant 0 : index
    %c0_6 = arith.constant 0 : index
    %c0_7 = arith.constant 0 : index
    %5 = vector.load %arg1[%c0_5, %c0_6, %c0_7] : memref<2x16x256xf32, #tpu.memory_space<vmem>>, vector<1x16x256xf32>
    %6 = vector.shape_cast %5 : vector<1x16x256xf32> to vector<16x256xf32>
    %c1_8 = arith.constant 1 : index
    %c0_9 = arith.constant 0 : index
    %c0_10 = arith.constant 0 : index
    %7 = vector.load %arg1[%c1_8, %c0_9, %c0_10] : memref<2x16x256xf32, #tpu.memory_space<vmem>>, vector<1x16x256xf32>
    %8 = vector.shape_cast %7 : vector<1x16x256xf32> to vector<16x256xf32>
    %9 = tpu.concatenate %6, %8 in 1 : vector<16x256xf32>, vector<16x256xf32> -> vector<16x512xf32>
    %c0_11 = arith.constant 0 : index
    %c0_12 = arith.constant 0 : index
    %10 = vector.load %arg2[%c0_11, %c0_12] : memref<32x16xf32, #tpu.memory_space<vmem>>, vector<32x16xf32>
    %cst = arith.constant dense<0.000000e+00> : vector<32x512xf32>
    %11 = tpu.matmul %10, %9, %cst {dimension_numbers = #tpu.dot_dimension_numbers<[1], [0], [0], [1], [0, 0, 1, 1], [], []>} : vector<32x16xf32>, vector<16x512xf32>, vector<32x512xf32> -> vector<32x512xf32>
    %12 = vector.broadcast %0 : vector<32x1xf32> to vector<32x512xf32>
    %13 = arith.addf %11, %12 : vector<32x512xf32>
    %cst_13 = arith.constant 0.000000e+00 : f32
    %14 = vector.broadcast %cst_13 : f32 to vector<32x512xf32>
    %15 = arith.maximumf %13, %14 : vector<32x512xf32>
    %c0_14 = arith.constant 0 : index
    %c12 = arith.constant 12 : index
    %16 = vector.load %arg3[%c0_14, %c12] : memref<32x25xf32, #tpu.memory_space<vmem>>, vector<32x1xf32>
    %17 = vector.broadcast %16 : vector<32x1xf32> to vector<32x512xf32>
    %18 = arith.mulf %15, %17 : vector<32x512xf32>
    %c0_15 = arith.constant 0 : index
    %c0_16 = arith.constant 0 : index
    %19 = vector.load %arg3[%c0_15, %c0_16] : memref<32x25xf32, #tpu.memory_space<vmem>>, vector<32x1xf32>
    %c0_17 = arith.constant 0 : index
    %c0_18 = arith.constant 0 : index
    %20 = vector.load %arg4[%c0_17, %c0_18] : memref<25x512xf32, #tpu.memory_space<vmem>>, vector<1x512xf32>
    %21 = vector.broadcast %19 : vector<32x1xf32> to vector<32x512xf32>
    %22 = vector.broadcast %20 : vector<1x512xf32> to vector<32x512xf32>
    %23 = arith.mulf %21, %22 : vector<32x512xf32>
    %c34_i32 = arith.constant 34 : i32
    %24 = tpu.dynamic_rotate %15 by %c34_i32 dim 1 : vector<32x512xf32>, i32 -> vector<32x512xf32>
    %25 = arith.mulf %24, %23 : vector<32x512xf32>
    %26 = arith.addf %18, %25 : vector<32x512xf32>
    %c0_19 = arith.constant 0 : index
    %c1_20 = arith.constant 1 : index
    %27 = vector.load %arg3[%c0_19, %c1_20] : memref<32x25xf32, #tpu.memory_space<vmem>>, vector<32x1xf32>
    %c1_21 = arith.constant 1 : index
    %c0_22 = arith.constant 0 : index
    %28 = vector.load %arg4[%c1_21, %c0_22] : memref<25x512xf32, #tpu.memory_space<vmem>>, vector<1x512xf32>
    %29 = vector.broadcast %27 : vector<32x1xf32> to vector<32x512xf32>
    %30 = vector.broadcast %28 : vector<1x512xf32> to vector<32x512xf32>
    %31 = arith.mulf %29, %30 : vector<32x512xf32>
    %c33_i32 = arith.constant 33 : i32
    %32 = tpu.dynamic_rotate %15 by %c33_i32 dim 1 : vector<32x512xf32>, i32 -> vector<32x512xf32>
    %33 = arith.mulf %32, %31 : vector<32x512xf32>
    %34 = arith.addf %26, %33 : vector<32x512xf32>
    %c0_23 = arith.constant 0 : index
    %c2_24 = arith.constant 2 : index
    %35 = vector.load %arg3[%c0_23, %c2_24] : memref<32x25xf32, #tpu.memory_space<vmem>>, vector<32x1xf32>
    %c2_25 = arith.constant 2 : index
    %c0_26 = arith.constant 0 : index
    %36 = vector.load %arg4[%c2_25, %c0_26] : memref<25x512xf32, #tpu.memory_space<vmem>>, vector<1x512xf32>
    %37 = vector.broadcast %35 : vector<32x1xf32> to vector<32x512xf32>
    %38 = vector.broadcast %36 : vector<1x512xf32> to vector<32x512xf32>
    %39 = arith.mulf %37, %38 : vector<32x512xf32>
    %c32_i32 = arith.constant 32 : i32
    %40 = tpu.dynamic_rotate %15 by %c32_i32 dim 1 : vector<32x512xf32>, i32 -> vector<32x512xf32>
    %41 = arith.mulf %40, %39 : vector<32x512xf32>
    %42 = arith.addf %34, %41 : vector<32x512xf32>
    %c0_27 = arith.constant 0 : index
    %c3_28 = arith.constant 3 : index
    %43 = vector.load %arg3[%c0_27, %c3_28] : memref<32x25xf32, #tpu.memory_space<vmem>>, vector<32x1xf32>
    %c3_29 = arith.constant 3 : index
    %c0_30 = arith.constant 0 : index
    %44 = vector.load %arg4[%c3_29, %c0_30] : memref<25x512xf32, #tpu.memory_space<vmem>>, vector<1x512xf32>
    %45 = vector.broadcast %43 : vector<32x1xf32> to vector<32x512xf32>
    %46 = vector.broadcast %44 : vector<1x512xf32> to vector<32x512xf32>
    %47 = arith.mulf %45, %46 : vector<32x512xf32>
    %c31_i32 = arith.constant 31 : i32
    %48 = tpu.dynamic_rotate %15 by %c31_i32 dim 1 : vector<32x512xf32>, i32 -> vector<32x512xf32>
    %49 = arith.mulf %48, %47 : vector<32x512xf32>
    %50 = arith.addf %42, %49 : vector<32x512xf32>
    %c0_31 = arith.constant 0 : index
    %c4_32 = arith.constant 4 : index
    %51 = vector.load %arg3[%c0_31, %c4_32] : memref<32x25xf32, #tpu.memory_space<vmem>>, vector<32x1xf32>
    %c4_33 = arith.constant 4 : index
    %c0_34 = arith.constant 0 : index
    %52 = vector.load %arg4[%c4_33, %c0_34] : memref<25x512xf32, #tpu.memory_space<vmem>>, vector<1x512xf32>
    %53 = vector.broadcast %51 : vector<32x1xf32> to vector<32x512xf32>
    %54 = vector.broadcast %52 : vector<1x512xf32> to vector<32x512xf32>
    %55 = arith.mulf %53, %54 : vector<32x512xf32>
    %c30_i32 = arith.constant 30 : i32
    %56 = tpu.dynamic_rotate %15 by %c30_i32 dim 1 : vector<32x512xf32>, i32 -> vector<32x512xf32>
    %57 = arith.mulf %56, %55 : vector<32x512xf32>
    %58 = arith.addf %50, %57 : vector<32x512xf32>
    %c0_35 = arith.constant 0 : index
    %c5 = arith.constant 5 : index
    %59 = vector.load %arg3[%c0_35, %c5] : memref<32x25xf32, #tpu.memory_space<vmem>>, vector<32x1xf32>
    %c5_36 = arith.constant 5 : index
    %c0_37 = arith.constant 0 : index
    %60 = vector.load %arg4[%c5_36, %c0_37] : memref<25x512xf32, #tpu.memory_space<vmem>>, vector<1x512xf32>
    %61 = vector.broadcast %59 : vector<32x1xf32> to vector<32x512xf32>
    %62 = vector.broadcast %60 : vector<1x512xf32> to vector<32x512xf32>
    %63 = arith.mulf %61, %62 : vector<32x512xf32>
    %c18_i32 = arith.constant 18 : i32
    %64 = tpu.dynamic_rotate %15 by %c18_i32 dim 1 : vector<32x512xf32>, i32 -> vector<32x512xf32>
    %65 = arith.mulf %64, %63 : vector<32x512xf32>
    %66 = arith.addf %58, %65 : vector<32x512xf32>
    %c0_38 = arith.constant 0 : index
    %c6 = arith.constant 6 : index
    %67 = vector.load %arg3[%c0_38, %c6] : memref<32x25xf32, #tpu.memory_space<vmem>>, vector<32x1xf32>
    %c6_39 = arith.constant 6 : index
    %c0_40 = arith.constant 0 : index
    %68 = vector.load %arg4[%c6_39, %c0_40] : memref<25x512xf32, #tpu.memory_space<vmem>>, vector<1x512xf32>
    %69 = vector.broadcast %67 : vector<32x1xf32> to vector<32x512xf32>
    %70 = vector.broadcast %68 : vector<1x512xf32> to vector<32x512xf32>
    %71 = arith.mulf %69, %70 : vector<32x512xf32>
    %c17_i32 = arith.constant 17 : i32
    %72 = tpu.dynamic_rotate %15 by %c17_i32 dim 1 : vector<32x512xf32>, i32 -> vector<32x512xf32>
    %73 = arith.mulf %72, %71 : vector<32x512xf32>
    %74 = arith.addf %66, %73 : vector<32x512xf32>
    %c0_41 = arith.constant 0 : index
    %c7 = arith.constant 7 : index
    %75 = vector.load %arg3[%c0_41, %c7] : memref<32x25xf32, #tpu.memory_space<vmem>>, vector<32x1xf32>
    %c7_42 = arith.constant 7 : index
    %c0_43 = arith.constant 0 : index
    %76 = vector.load %arg4[%c7_42, %c0_43] : memref<25x512xf32, #tpu.memory_space<vmem>>, vector<1x512xf32>
    %77 = vector.broadcast %75 : vector<32x1xf32> to vector<32x512xf32>
    %78 = vector.broadcast %76 : vector<1x512xf32> to vector<32x512xf32>
    %79 = arith.mulf %77, %78 : vector<32x512xf32>
    %c16_i32 = arith.constant 16 : i32
    %80 = tpu.dynamic_rotate %15 by %c16_i32 dim 1 : vector<32x512xf32>, i32 -> vector<32x512xf32>
    %81 = arith.mulf %80, %79 : vector<32x512xf32>
    %82 = arith.addf %74, %81 : vector<32x512xf32>
    %c0_44 = arith.constant 0 : index
    %c8 = arith.constant 8 : index
    %83 = vector.load %arg3[%c0_44, %c8] : memref<32x25xf32, #tpu.memory_space<vmem>>, vector<32x1xf32>
    %c8_45 = arith.constant 8 : index
    %c0_46 = arith.constant 0 : index
    %84 = vector.load %arg4[%c8_45, %c0_46] : memref<25x512xf32, #tpu.memory_space<vmem>>, vector<1x512xf32>
    %85 = vector.broadcast %83 : vector<32x1xf32> to vector<32x512xf32>
    %86 = vector.broadcast %84 : vector<1x512xf32> to vector<32x512xf32>
    %87 = arith.mulf %85, %86 : vector<32x512xf32>
    %c15_i32 = arith.constant 15 : i32
    %88 = tpu.dynamic_rotate %15 by %c15_i32 dim 1 : vector<32x512xf32>, i32 -> vector<32x512xf32>
    %89 = arith.mulf %88, %87 : vector<32x512xf32>
    %90 = arith.addf %82, %89 : vector<32x512xf32>
    %c0_47 = arith.constant 0 : index
    %c9 = arith.constant 9 : index
    %91 = vector.load %arg3[%c0_47, %c9] : memref<32x25xf32, #tpu.memory_space<vmem>>, vector<32x1xf32>
    %c9_48 = arith.constant 9 : index
    %c0_49 = arith.constant 0 : index
    %92 = vector.load %arg4[%c9_48, %c0_49] : memref<25x512xf32, #tpu.memory_space<vmem>>, vector<1x512xf32>
    %93 = vector.broadcast %91 : vector<32x1xf32> to vector<32x512xf32>
    %94 = vector.broadcast %92 : vector<1x512xf32> to vector<32x512xf32>
    %95 = arith.mulf %93, %94 : vector<32x512xf32>
    %c14_i32 = arith.constant 14 : i32
    %96 = tpu.dynamic_rotate %15 by %c14_i32 dim 1 : vector<32x512xf32>, i32 -> vector<32x512xf32>
    %97 = arith.mulf %96, %95 : vector<32x512xf32>
    %98 = arith.addf %90, %97 : vector<32x512xf32>
    %c0_50 = arith.constant 0 : index
    %c10 = arith.constant 10 : index
    %99 = vector.load %arg3[%c0_50, %c10] : memref<32x25xf32, #tpu.memory_space<vmem>>, vector<32x1xf32>
    %c10_51 = arith.constant 10 : index
    %c0_52 = arith.constant 0 : index
    %100 = vector.load %arg4[%c10_51, %c0_52] : memref<25x512xf32, #tpu.memory_space<vmem>>, vector<1x512xf32>
    %101 = vector.broadcast %99 : vector<32x1xf32> to vector<32x512xf32>
    %102 = vector.broadcast %100 : vector<1x512xf32> to vector<32x512xf32>
    %103 = arith.mulf %101, %102 : vector<32x512xf32>
    %c2_i32 = arith.constant 2 : i32
    %104 = tpu.dynamic_rotate %15 by %c2_i32 dim 1 : vector<32x512xf32>, i32 -> vector<32x512xf32>
    %105 = arith.mulf %104, %103 : vector<32x512xf32>
    %106 = arith.addf %98, %105 : vector<32x512xf32>
    %c0_53 = arith.constant 0 : index
    %c11 = arith.constant 11 : index
    %107 = vector.load %arg3[%c0_53, %c11] : memref<32x25xf32, #tpu.memory_space<vmem>>, vector<32x1xf32>
    %c11_54 = arith.constant 11 : index
    %c0_55 = arith.constant 0 : index
    %108 = vector.load %arg4[%c11_54, %c0_55] : memref<25x512xf32, #tpu.memory_space<vmem>>, vector<1x512xf32>
    %109 = vector.broadcast %107 : vector<32x1xf32> to vector<32x512xf32>
    %110 = vector.broadcast %108 : vector<1x512xf32> to vector<32x512xf32>
    %111 = arith.mulf %109, %110 : vector<32x512xf32>
    %c1_i32 = arith.constant 1 : i32
    %112 = tpu.dynamic_rotate %15 by %c1_i32 dim 1 : vector<32x512xf32>, i32 -> vector<32x512xf32>
    %113 = arith.mulf %112, %111 : vector<32x512xf32>
    %114 = arith.addf %106, %113 : vector<32x512xf32>
    %c0_56 = arith.constant 0 : index
    %c13 = arith.constant 13 : index
    %115 = vector.load %arg3[%c0_56, %c13] : memref<32x25xf32, #tpu.memory_space<vmem>>, vector<32x1xf32>
    %c13_57 = arith.constant 13 : index
    %c0_58 = arith.constant 0 : index
    %116 = vector.load %arg4[%c13_57, %c0_58] : memref<25x512xf32, #tpu.memory_space<vmem>>, vector<1x512xf32>
    %117 = vector.broadcast %115 : vector<32x1xf32> to vector<32x512xf32>
    %118 = vector.broadcast %116 : vector<1x512xf32> to vector<32x512xf32>
    %119 = arith.mulf %117, %118 : vector<32x512xf32>
    %c511_i32 = arith.constant 511 : i32
    %120 = tpu.dynamic_rotate %15 by %c511_i32 dim 1 : vector<32x512xf32>, i32 -> vector<32x512xf32>
    %121 = arith.mulf %120, %119 : vector<32x512xf32>
    %122 = arith.addf %114, %121 : vector<32x512xf32>
    %c0_59 = arith.constant 0 : index
    %c14 = arith.constant 14 : index
    %123 = vector.load %arg3[%c0_59, %c14] : memref<32x25xf32, #tpu.memory_space<vmem>>, vector<32x1xf32>
    %c14_60 = arith.constant 14 : index
    %c0_61 = arith.constant 0 : index
    %124 = vector.load %arg4[%c14_60, %c0_61] : memref<25x512xf32, #tpu.memory_space<vmem>>, vector<1x512xf32>
    %125 = vector.broadcast %123 : vector<32x1xf32> to vector<32x512xf32>
    %126 = vector.broadcast %124 : vector<1x512xf32> to vector<32x512xf32>
    %127 = arith.mulf %125, %126 : vector<32x512xf32>
    %c510_i32 = arith.constant 510 : i32
    %128 = tpu.dynamic_rotate %15 by %c510_i32 dim 1 : vector<32x512xf32>, i32 -> vector<32x512xf32>
    %129 = arith.mulf %128, %127 : vector<32x512xf32>
    %130 = arith.addf %122, %129 : vector<32x512xf32>
    %c0_62 = arith.constant 0 : index
    %c15 = arith.constant 15 : index
    %131 = vector.load %arg3[%c0_62, %c15] : memref<32x25xf32, #tpu.memory_space<vmem>>, vector<32x1xf32>
    %c15_63 = arith.constant 15 : index
    %c0_64 = arith.constant 0 : index
    %132 = vector.load %arg4[%c15_63, %c0_64] : memref<25x512xf32, #tpu.memory_space<vmem>>, vector<1x512xf32>
    %133 = vector.broadcast %131 : vector<32x1xf32> to vector<32x512xf32>
    %134 = vector.broadcast %132 : vector<1x512xf32> to vector<32x512xf32>
    %135 = arith.mulf %133, %134 : vector<32x512xf32>
    %c498_i32 = arith.constant 498 : i32
    %136 = tpu.dynamic_rotate %15 by %c498_i32 dim 1 : vector<32x512xf32>, i32 -> vector<32x512xf32>
    %137 = arith.mulf %136, %135 : vector<32x512xf32>
    %138 = arith.addf %130, %137 : vector<32x512xf32>
    %c0_65 = arith.constant 0 : index
    %c16 = arith.constant 16 : index
    %139 = vector.load %arg3[%c0_65, %c16] : memref<32x25xf32, #tpu.memory_space<vmem>>, vector<32x1xf32>
    %c16_66 = arith.constant 16 : index
    %c0_67 = arith.constant 0 : index
    %140 = vector.load %arg4[%c16_66, %c0_67] : memref<25x512xf32, #tpu.memory_space<vmem>>, vector<1x512xf32>
    %141 = vector.broadcast %139 : vector<32x1xf32> to vector<32x512xf32>
    %142 = vector.broadcast %140 : vector<1x512xf32> to vector<32x512xf32>
    %143 = arith.mulf %141, %142 : vector<32x512xf32>
    %c497_i32 = arith.constant 497 : i32
    %144 = tpu.dynamic_rotate %15 by %c497_i32 dim 1 : vector<32x512xf32>, i32 -> vector<32x512xf32>
    %145 = arith.mulf %144, %143 : vector<32x512xf32>
    %146 = arith.addf %138, %145 : vector<32x512xf32>
    %c0_68 = arith.constant 0 : index
    %c17 = arith.constant 17 : index
    %147 = vector.load %arg3[%c0_68, %c17] : memref<32x25xf32, #tpu.memory_space<vmem>>, vector<32x1xf32>
    %c17_69 = arith.constant 17 : index
    %c0_70 = arith.constant 0 : index
    %148 = vector.load %arg4[%c17_69, %c0_70] : memref<25x512xf32, #tpu.memory_space<vmem>>, vector<1x512xf32>
    %149 = vector.broadcast %147 : vector<32x1xf32> to vector<32x512xf32>
    %150 = vector.broadcast %148 : vector<1x512xf32> to vector<32x512xf32>
    %151 = arith.mulf %149, %150 : vector<32x512xf32>
    %c496_i32 = arith.constant 496 : i32
    %152 = tpu.dynamic_rotate %15 by %c496_i32 dim 1 : vector<32x512xf32>, i32 -> vector<32x512xf32>
    %153 = arith.mulf %152, %151 : vector<32x512xf32>
    %154 = arith.addf %146, %153 : vector<32x512xf32>
    %c0_71 = arith.constant 0 : index
    %c18 = arith.constant 18 : index
    %155 = vector.load %arg3[%c0_71, %c18] : memref<32x25xf32, #tpu.memory_space<vmem>>, vector<32x1xf32>
    %c18_72 = arith.constant 18 : index
    %c0_73 = arith.constant 0 : index
    %156 = vector.load %arg4[%c18_72, %c0_73] : memref<25x512xf32, #tpu.memory_space<vmem>>, vector<1x512xf32>
    %157 = vector.broadcast %155 : vector<32x1xf32> to vector<32x512xf32>
    %158 = vector.broadcast %156 : vector<1x512xf32> to vector<32x512xf32>
    %159 = arith.mulf %157, %158 : vector<32x512xf32>
    %c495_i32 = arith.constant 495 : i32
    %160 = tpu.dynamic_rotate %15 by %c495_i32 dim 1 : vector<32x512xf32>, i32 -> vector<32x512xf32>
    %161 = arith.mulf %160, %159 : vector<32x512xf32>
    %162 = arith.addf %154, %161 : vector<32x512xf32>
    %c0_74 = arith.constant 0 : index
    %c19 = arith.constant 19 : index
    %163 = vector.load %arg3[%c0_74, %c19] : memref<32x25xf32, #tpu.memory_space<vmem>>, vector<32x1xf32>
    %c19_75 = arith.constant 19 : index
    %c0_76 = arith.constant 0 : index
    %164 = vector.load %arg4[%c19_75, %c0_76] : memref<25x512xf32, #tpu.memory_space<vmem>>, vector<1x512xf32>
    %165 = vector.broadcast %163 : vector<32x1xf32> to vector<32x512xf32>
    %166 = vector.broadcast %164 : vector<1x512xf32> to vector<32x512xf32>
    %167 = arith.mulf %165, %166 : vector<32x512xf32>
    %c494_i32 = arith.constant 494 : i32
    %168 = tpu.dynamic_rotate %15 by %c494_i32 dim 1 : vector<32x512xf32>, i32 -> vector<32x512xf32>
    %169 = arith.mulf %168, %167 : vector<32x512xf32>
    %170 = arith.addf %162, %169 : vector<32x512xf32>
    %c0_77 = arith.constant 0 : index
    %c20 = arith.constant 20 : index
    %171 = vector.load %arg3[%c0_77, %c20] : memref<32x25xf32, #tpu.memory_space<vmem>>, vector<32x1xf32>
    %c20_78 = arith.constant 20 : index
    %c0_79 = arith.constant 0 : index
    %172 = vector.load %arg4[%c20_78, %c0_79] : memref<25x512xf32, #tpu.memory_space<vmem>>, vector<1x512xf32>
    %173 = vector.broadcast %171 : vector<32x1xf32> to vector<32x512xf32>
    %174 = vector.broadcast %172 : vector<1x512xf32> to vector<32x512xf32>
    %175 = arith.mulf %173, %174 : vector<32x512xf32>
    %c482_i32 = arith.constant 482 : i32
    %176 = tpu.dynamic_rotate %15 by %c482_i32 dim 1 : vector<32x512xf32>, i32 -> vector<32x512xf32>
    %177 = arith.mulf %176, %175 : vector<32x512xf32>
    %178 = arith.addf %170, %177 : vector<32x512xf32>
    %c0_80 = arith.constant 0 : index
    %c21 = arith.constant 21 : index
    %179 = vector.load %arg3[%c0_80, %c21] : memref<32x25xf32, #tpu.memory_space<vmem>>, vector<32x1xf32>
    %c21_81 = arith.constant 21 : index
    %c0_82 = arith.constant 0 : index
    %180 = vector.load %arg4[%c21_81, %c0_82] : memref<25x512xf32, #tpu.memory_space<vmem>>, vector<1x512xf32>
    %181 = vector.broadcast %179 : vector<32x1xf32> to vector<32x512xf32>
    %182 = vector.broadcast %180 : vector<1x512xf32> to vector<32x512xf32>
    %183 = arith.mulf %181, %182 : vector<32x512xf32>
    %c481_i32 = arith.constant 481 : i32
    %184 = tpu.dynamic_rotate %15 by %c481_i32 dim 1 : vector<32x512xf32>, i32 -> vector<32x512xf32>
    %185 = arith.mulf %184, %183 : vector<32x512xf32>
    %186 = arith.addf %178, %185 : vector<32x512xf32>
    %c0_83 = arith.constant 0 : index
    %c22 = arith.constant 22 : index
    %187 = vector.load %arg3[%c0_83, %c22] : memref<32x25xf32, #tpu.memory_space<vmem>>, vector<32x1xf32>
    %c22_84 = arith.constant 22 : index
    %c0_85 = arith.constant 0 : index
    %188 = vector.load %arg4[%c22_84, %c0_85] : memref<25x512xf32, #tpu.memory_space<vmem>>, vector<1x512xf32>
    %189 = vector.broadcast %187 : vector<32x1xf32> to vector<32x512xf32>
    %190 = vector.broadcast %188 : vector<1x512xf32> to vector<32x512xf32>
    %191 = arith.mulf %189, %190 : vector<32x512xf32>
    %c480_i32 = arith.constant 480 : i32
    %192 = tpu.dynamic_rotate %15 by %c480_i32 dim 1 : vector<32x512xf32>, i32 -> vector<32x512xf32>
    %193 = arith.mulf %192, %191 : vector<32x512xf32>
    %194 = arith.addf %186, %193 : vector<32x512xf32>
    %c0_86 = arith.constant 0 : index
    %c23 = arith.constant 23 : index
    %195 = vector.load %arg3[%c0_86, %c23] : memref<32x25xf32, #tpu.memory_space<vmem>>, vector<32x1xf32>
    %c23_87 = arith.constant 23 : index
    %c0_88 = arith.constant 0 : index
    %196 = vector.load %arg4[%c23_87, %c0_88] : memref<25x512xf32, #tpu.memory_space<vmem>>, vector<1x512xf32>
    %197 = vector.broadcast %195 : vector<32x1xf32> to vector<32x512xf32>
    %198 = vector.broadcast %196 : vector<1x512xf32> to vector<32x512xf32>
    %199 = arith.mulf %197, %198 : vector<32x512xf32>
    %c479_i32 = arith.constant 479 : i32
    %200 = tpu.dynamic_rotate %15 by %c479_i32 dim 1 : vector<32x512xf32>, i32 -> vector<32x512xf32>
    %201 = arith.mulf %200, %199 : vector<32x512xf32>
    %202 = arith.addf %194, %201 : vector<32x512xf32>
    %c0_89 = arith.constant 0 : index
    %c24 = arith.constant 24 : index
    %203 = vector.load %arg3[%c0_89, %c24] : memref<32x25xf32, #tpu.memory_space<vmem>>, vector<32x1xf32>
    %c24_90 = arith.constant 24 : index
    %c0_91 = arith.constant 0 : index
    %204 = vector.load %arg4[%c24_90, %c0_91] : memref<25x512xf32, #tpu.memory_space<vmem>>, vector<1x512xf32>
    %205 = vector.broadcast %203 : vector<32x1xf32> to vector<32x512xf32>
    %206 = vector.broadcast %204 : vector<1x512xf32> to vector<32x512xf32>
    %207 = arith.mulf %205, %206 : vector<32x512xf32>
    %c478_i32 = arith.constant 478 : i32
    %208 = tpu.dynamic_rotate %15 by %c478_i32 dim 1 : vector<32x512xf32>, i32 -> vector<32x512xf32>
    %209 = arith.mulf %208, %207 : vector<32x512xf32>
    %210 = arith.addf %202, %209 : vector<32x512xf32>
    %211 = vector.broadcast %1 : vector<32x1xf32> to vector<32x512xf32>
    %212 = arith.addf %210, %211 : vector<32x512xf32>
    %cst_92 = arith.constant 0.000000e+00 : f32
    %213 = vector.broadcast %cst_92 : f32 to vector<32x512xf32>
    %214 = arith.maximumf %212, %213 : vector<32x512xf32>
    %215 = vector.extract_strided_slice %214 {offsets = [0, 0], sizes = [32, 256], strides = [1, 1]} : vector<32x512xf32> to vector<32x256xf32>
    %cst_93 = arith.constant dense<0.000000e+00> : vector<32xf32>
    %216 = vector.multi_reduction <add>, %215, %cst_93 [1] : vector<32x256xf32> to vector<32xf32>
    %217 = vector.shape_cast %216 : vector<32xf32> to vector<32x1xf32>
    %cst_94 = arith.constant 2.560000e+02 : f32
    %218 = vector.broadcast %cst_94 : f32 to vector<32x1xf32>
    %219 = arith.divf %217, %218 : vector<32x1xf32>
    %c0_95 = arith.constant 0 : index
    %c0_96 = arith.constant 0 : index
    %220 = vector.load %arg5[%c0_95, %c0_96] : memref<8x32xf32, #tpu.memory_space<vmem>>, vector<8x32xf32>
    %cst_97 = arith.constant dense<0.000000e+00> : vector<8x1xf32>
    %221 = tpu.matmul %220, %219, %cst_97 {dimension_numbers = #tpu.dot_dimension_numbers<[1], [0], [0], [1], [0, 0, 1, 1], [], []>} : vector<8x32xf32>, vector<32x1xf32>, vector<8x1xf32> -> vector<8x1xf32>
    %222 = arith.addf %221, %2 : vector<8x1xf32>
    %223 = arith.negf %222 : vector<8x1xf32>
    %224 = math.exp %223 : vector<8x1xf32>
    %cst_98 = arith.constant 1.000000e+00 : f32
    %225 = vector.broadcast %cst_98 : f32 to vector<8x1xf32>
    %226 = arith.addf %225, %224 : vector<8x1xf32>
    %227 = arith.divf %225, %226 : vector<8x1xf32>
    %228 = arith.mulf %222, %227 : vector<8x1xf32>
    %c0_99 = arith.constant 0 : index
    %c0_100 = arith.constant 0 : index
    %229 = vector.load %arg6[%c0_99, %c0_100] : memref<32x8xf32, #tpu.memory_space<vmem>>, vector<32x8xf32>
    %cst_101 = arith.constant dense<0.000000e+00> : vector<32x1xf32>
    %230 = tpu.matmul %229, %228, %cst_101 {dimension_numbers = #tpu.dot_dimension_numbers<[1], [0], [0], [1], [0, 0, 1, 1], [], []>} : vector<32x8xf32>, vector<8x1xf32>, vector<32x1xf32> -> vector<32x1xf32>
    %231 = arith.addf %230, %3 : vector<32x1xf32>
    %232 = arith.negf %231 : vector<32x1xf32>
    %233 = math.exp %232 : vector<32x1xf32>
    %cst_102 = arith.constant 1.000000e+00 : f32
    %234 = vector.broadcast %cst_102 : f32 to vector<32x1xf32>
    %235 = arith.addf %234, %233 : vector<32x1xf32>
    %236 = arith.divf %234, %235 : vector<32x1xf32>
    %237 = vector.shape_cast %236 : vector<32x1xf32> to vector<32x1xf32>
    %238 = vector.broadcast %237 : vector<32x1xf32> to vector<32x256xf32>
    %239 = vector.extract_strided_slice %214 {offsets = [0, 256], sizes = [32, 256], strides = [1, 1]} : vector<32x512xf32> to vector<32x256xf32>
    %cst_103 = arith.constant dense<0.000000e+00> : vector<32xf32>
    %240 = vector.multi_reduction <add>, %239, %cst_103 [1] : vector<32x256xf32> to vector<32xf32>
    %241 = vector.shape_cast %240 : vector<32xf32> to vector<32x1xf32>
    %cst_104 = arith.constant 2.560000e+02 : f32
    %242 = vector.broadcast %cst_104 : f32 to vector<32x1xf32>
    %243 = arith.divf %241, %242 : vector<32x1xf32>
    %c0_105 = arith.constant 0 : index
    %c0_106 = arith.constant 0 : index
    %244 = vector.load %arg5[%c0_105, %c0_106] : memref<8x32xf32, #tpu.memory_space<vmem>>, vector<8x32xf32>
    %cst_107 = arith.constant dense<0.000000e+00> : vector<8x1xf32>
    %245 = tpu.matmul %244, %243, %cst_107 {dimension_numbers = #tpu.dot_dimension_numbers<[1], [0], [0], [1], [0, 0, 1, 1], [], []>} : vector<8x32xf32>, vector<32x1xf32>, vector<8x1xf32> -> vector<8x1xf32>
    %246 = arith.addf %245, %2 : vector<8x1xf32>
    %247 = arith.negf %246 : vector<8x1xf32>
    %248 = math.exp %247 : vector<8x1xf32>
    %cst_108 = arith.constant 1.000000e+00 : f32
    %249 = vector.broadcast %cst_108 : f32 to vector<8x1xf32>
    %250 = arith.addf %249, %248 : vector<8x1xf32>
    %251 = arith.divf %249, %250 : vector<8x1xf32>
    %252 = arith.mulf %246, %251 : vector<8x1xf32>
    %c0_109 = arith.constant 0 : index
    %c0_110 = arith.constant 0 : index
    %253 = vector.load %arg6[%c0_109, %c0_110] : memref<32x8xf32, #tpu.memory_space<vmem>>, vector<32x8xf32>
    %cst_111 = arith.constant dense<0.000000e+00> : vector<32x1xf32>
    %254 = tpu.matmul %253, %252, %cst_111 {dimension_numbers = #tpu.dot_dimension_numbers<[1], [0], [0], [1], [0, 0, 1, 1], [], []>} : vector<32x8xf32>, vector<8x1xf32>, vector<32x1xf32> -> vector<32x1xf32>
    %255 = arith.addf %254, %3 : vector<32x1xf32>
    %256 = arith.negf %255 : vector<32x1xf32>
    %257 = math.exp %256 : vector<32x1xf32>
    %cst_112 = arith.constant 1.000000e+00 : f32
    %258 = vector.broadcast %cst_112 : f32 to vector<32x1xf32>
    %259 = arith.addf %258, %257 : vector<32x1xf32>
    %260 = arith.divf %258, %259 : vector<32x1xf32>
    %261 = vector.shape_cast %260 : vector<32x1xf32> to vector<32x1xf32>
    %262 = vector.broadcast %261 : vector<32x1xf32> to vector<32x256xf32>
    %263 = tpu.concatenate %238, %262 in 1 : vector<32x256xf32>, vector<32x256xf32> -> vector<32x512xf32>
    %264 = arith.mulf %214, %263 : vector<32x512xf32>
    %c0_113 = arith.constant 0 : index
    %c0_114 = arith.constant 0 : index
    %265 = vector.load %arg7[%c0_113, %c0_114] : memref<16x32xf32, #tpu.memory_space<vmem>>, vector<16x32xf32>
    %cst_115 = arith.constant dense<0.000000e+00> : vector<16x512xf32>
    %266 = tpu.matmul %265, %264, %cst_115 {dimension_numbers = #tpu.dot_dimension_numbers<[1], [0], [0], [1], [0, 0, 1, 1], [], []>} : vector<16x32xf32>, vector<32x512xf32>, vector<16x512xf32> -> vector<16x512xf32>
    %267 = vector.broadcast %4 : vector<16x1xf32> to vector<16x512xf32>
    %268 = arith.addf %266, %267 : vector<16x512xf32>
    %269 = arith.addf %268, %9 : vector<16x512xf32>
    %270 = vector.extract_strided_slice %269 {offsets = [0, 0], sizes = [16, 256], strides = [1, 1]} : vector<16x512xf32> to vector<16x256xf32>
    %c0_116 = arith.constant 0 : index
    %c0_117 = arith.constant 0 : index
    %c0_118 = arith.constant 0 : index
    %271 = vector.load %arg9[%c0_116, %c0_117, %c0_118] : memref<2x16x256xf32, #tpu.memory_space<vmem>>, vector<1x16x256xf32>
    %272 = vector.shape_cast %271 : vector<1x16x256xf32> to vector<16x256xf32>
    %273 = vector.shape_cast %270 : vector<16x256xf32> to vector<1x16x256xf32>
    tpu.vector_store %arg9[%c0_116, %c0_117, %c0_118], %273 {strides = array<i32>} : memref<2x16x256xf32, #tpu.memory_space<vmem>>, vector<1x16x256xf32>,
    %274 = vector.extract_strided_slice %269 {offsets = [0, 256], sizes = [16, 256], strides = [1, 1]} : vector<16x512xf32> to vector<16x256xf32>
    %c1_119 = arith.constant 1 : index
    %c0_120 = arith.constant 0 : index
    %c0_121 = arith.constant 0 : index
    %275 = vector.load %arg9[%c1_119, %c0_120, %c0_121] : memref<2x16x256xf32, #tpu.memory_space<vmem>>, vector<1x16x256xf32>
    %276 = vector.shape_cast %275 : vector<1x16x256xf32> to vector<16x256xf32>
    %277 = vector.shape_cast %274 : vector<16x256xf32> to vector<1x16x256xf32>
    tpu.vector_store %arg9[%c1_119, %c0_120, %c0_121], %277 {strides = array<i32>} : memref<2x16x256xf32, #tpu.memory_space<vmem>>, vector<1x16x256xf32>,
    return
  }
  func.func @transform_0(%arg0: i32) -> (i32, i32, i32) {
    %c0_i32 = arith.constant 0 : i32
    %c0_i32_0 = arith.constant 0 : i32
    %c0_i32_1 = arith.constant 0 : i32
    %c0_i32_2 = arith.constant 0 : i32
    return %c0_i32, %c0_i32_0, %c0_i32_1 : i32, i32, i32
  }
  func.func @transform_1(%arg0: i32) -> (i32, i32) {
    %c0_i32 = arith.constant 0 : i32
    %c0_i32_0 = arith.constant 0 : i32
    %c0_i32_1 = arith.constant 0 : i32
    return %c0_i32, %c0_i32_0 : i32, i32
  }
  func.func @transform_2(%arg0: i32) -> (i32, i32) {
    %c0_i32 = arith.constant 0 : i32
    %c0_i32_0 = arith.constant 0 : i32
    %c0_i32_1 = arith.constant 0 : i32
    return %c0_i32, %c0_i32_0 : i32, i32
  }
  func.func @transform_3(%arg0: i32) -> (i32, i32) {
    %c0_i32 = arith.constant 0 : i32
    %c0_i32_0 = arith.constant 0 : i32
    %c0_i32_1 = arith.constant 0 : i32
    return %c0_i32, %c0_i32_0 : i32, i32
  }
  func.func @transform_4(%arg0: i32) -> (i32, i32) {
    %c0_i32 = arith.constant 0 : i32
    %c0_i32_0 = arith.constant 0 : i32
    %c0_i32_1 = arith.constant 0 : i32
    return %c0_i32, %c0_i32_0 : i32, i32
  }
  func.func @transform_5(%arg0: i32) -> (i32, i32) {
    %c0_i32 = arith.constant 0 : i32
    %c0_i32_0 = arith.constant 0 : i32
    %c0_i32_1 = arith.constant 0 : i32
    return %c0_i32, %c0_i32_0 : i32, i32
  }
  func.func @transform_6(%arg0: i32) -> (i32, i32) {
    %c0_i32 = arith.constant 0 : i32
    %c0_i32_0 = arith.constant 0 : i32
    %c0_i32_1 = arith.constant 0 : i32
    return %c0_i32, %c0_i32_0 : i32, i32
  }
  func.func @transform_7(%arg0: i32) -> (i32, i32) {
    %c0_i32 = arith.constant 0 : i32
    %c0_i32_0 = arith.constant 0 : i32
    %c0_i32_1 = arith.constant 0 : i32
    return %c0_i32, %c0_i32_0 : i32, i32
  }
  func.func @transform_8(%arg0: i32) -> (i32, i32, i32) {
    %c0_i32 = arith.constant 0 : i32
    %c0_i32_0 = arith.constant 0 : i32
    %c0_i32_1 = arith.constant 0 : i32
    %c0_i32_2 = arith.constant 0 : i32
    return %c0_i32, %c0_i32_0, %c0_i32_1 : i32, i32, i32
  }
}

</mosaic_0001>

<bundles_post_ra>
// kernel: mixnet_block_forward.1
= control target key start
LH: loop header
LB: loop body
LE: loop exit
PB: predicated region body
PF: predicated region fallthrough
CT: control target
= control target key end

     0   :  { %v11428_v3 = vmov 0.0   ;;  %v4673_v8 = vmov 12   ;;  %v11430_v9 = vmov 0   ;;  %vm66_vm0 = vcmask 130048   ;;  %s4681_s23 = smov 34   ;;  %s4682_s24 = smov 31   ;;  %s11417_s0 = inlined_call_operand.vmem [shape: f32[2,16,256], index: 0, kind: input, shape index: {}]   ;;  %s11418_s1 = inlined_call_operand.vmem [shape: f32[32,16], index: 1, kind: input, shape index: {}]   ;;  %s11419_s2 = inlined_call_operand.vmem [shape: f32[32,25], index: 2, kind: input, shape index: {}]   ;;  %s11420_s7 = inlined_call_operand.vmem [shape: f32[32,5], index: 7, kind: input, shape index: {}]   ;;  %s11421_s3 = inlined_call_operand.vmem [shape: f32[25,512], index: 3, kind: input, shape index: {}]   ;;  %s11422_s4 = inlined_call_operand.vmem [shape: f32[8,32], index: 4, kind: input, shape index: {}]   ;;  %s11423_s5 = inlined_call_operand.vmem [shape: f32[32,8], index: 5, kind: input, shape index: {}]   ;;  %s11424_s6 = inlined_call_operand.vmem [shape: f32[16,32], index: 6, kind: input, shape index: {}]   ;;  %s11425_s8 = inlined_call_operand.vmem [shape: f32[2,16,256], index: 8, kind: output, shape index: {}]  }
   0x1   :  { %v34_v0 = vld [vmem:[%s11417_s0 + $0x8] sm:$0xff]  ;;  %v36_v1 = vld [vmem:[%s11417_s0 + $0x18] sm:$0xff]  ;;  %143 = vmatprep.mubr.f32.mxu0 %v11428_v3  ;;  %232 = vmatprep.mubr.f32.mxu1 %v11428_v3  ;;  %v33_v6 = vld [vmem:[%s11417_s0] sm:$0xff]  ;;  %v4675_v27 = vmov 2   ;;  %v4676_v28 = vmov 3   ;;  %v11432_v29 = vmov 1  }
   0x2   :  { %v4316_v2 = vld [vmem:[%s11417_s0 + $0x28] sm:$0xff]  ;;  %v4436_v4 = vpack.c.bf16 %v36_v1, %v34_v0  ;;  %v4318_v5 = vld [vmem:[%s11417_s0 + $0x38] sm:$0xff]  ;;  %v35_v7 = vld [vmem:[%s11417_s0 + $0x10] sm:$0xff]  ;;  %4526 = vset.pattern.permute.xlu0 %v4673_v8  ;;  %4525 = vset.pattern.permute.xlu1 %v11430_v9  ;;  %v11426_v30 = vmov 4   ;;  %v4679_v31 = vmov 5   ;;  %s4683_s25 = smov 32  }
   0x3   :  { %v4440_v10 = vpack.c.bf16 %v4318_v5, %v4316_v2  ;;  %v4438_v11 = vpack.c.bf16 %v35_v7, %v33_v6  ;;  %v4315_v12 = vld [vmem:[%s11417_s0 + $0x20] sm:$0xff]  ;;  %v4317_v13 = vld [vmem:[%s11417_s0 + $0x30] sm:$0xff]  ;;  %v4812_v18 = vld [vmem:[%s11419_s2 + $0x18] sm:$0xff]  ;;  %s4684_s26 = smov 18   ;;  %s4685_s27 = smov 30  }
   0x4   :  { %4437 = vmatprep.subr.bf16.mxu0 %v4436_v4  ;;  %v4442_v14 = vpack.c.bf16 %v4317_v13, %v4315_v12  ;;  %v42_v15 = vld [vmem:[%s11418_s1] sm:$0xff]  ;;  %v31_v17 = vld [vmem:[%s11420_s7 + $0x10] sm:$0xff]  ;;  %v32_v19 = vld [vmem:[%s11420_s7 + $0x18] sm:$0xff]  ;;  %s4687_s28 = smov 17   ;;  %s4691_s29 = smov 16  }
   0x5   :  { %4441 = vmatprep.subr.bf16.mxu1 %v4440_v10  ;;  %4439 = vmatpush1.bf16.msra.mxu0 %v4438_v11  ;;  %v4803_v16 = vld [vmem:[%s11419_s2] sm:$0xff]  ;;  %v43_v20 = vld [vmem:[%s11418_s1 + $0x8] sm:$0xff]  ;;  %v44_v22 = vld [vmem:[%s11418_s1 + $0x10] sm:$0xff]  ;;  %s4693_s30 = smov 15   ;;  %s4695_s21 = smov 14  }
   0x6   :  { %4443 = vmatpush1.bf16.msra.mxu1 %v4442_v14  ;;  %279 = vperm.xlu0 %4526, %v4803_v16   ;;  %v29_v21 = vld [vmem:[%s11420_s7] sm:$0xff]  ;;  %v4839_v23 = vld [vmem:[%s11419_s2 + $0x8] sm:$0xff]  ;;  %v45_v25 = vld [vmem:[%s11418_s1 + $0x18] sm:$0xff]  ;;  %s4680_s1 = smov 33   ;;  %s4699_s9 = smov 1  }
   0x7   :  { %58 = vperm.xlu1 %4525, %v31_v17   ;;  %v30_v24 = vld [vmem:[%s11420_s7 + $0x8] sm:$0xff]  ;;  %v4854_v26 = vld [vmem:[%s11419_s2 + $0x10] sm:$0xff]  ;;  %s4701_s12 = smov 127   ;;  %s4703_s15 = smov 126  }
   0x8   :  { %4319 = vmatmul.mubr.msk.f32.vlgmr.msra.gmra.mrb[0].mxu0 %vm66_vm0, %v42_v15 }
   0x9   :  { %4323 = vmatmul.mubr.msk.f32.vlgmr.msra.gmra.mrb[0].mxu1 %vm66_vm0, %v42_v15  ;;  %149 = vmatprep.mubr.f32.mxu0 %v11428_v3 }
   0xa   :  { %238 = vmatprep.mubr.f32.mxu1 %v11428_v3  ;;  %294 = vperm.xlu0 %4526, %v4812_v18  }
   0xb   :  { %63 = vperm.xlu1 %4525, %v32_v19  }
   0xc   :  { %4320 = vmatmul.mubr.msk.f32.gmra.mrb[2].mxu0 %vm66_vm0, %v43_v20 }
   0xd   :  { %4324 = vmatmul.mubr.msk.f32.gmra.mrb[2].mxu1 %vm66_vm0, %v43_v20  ;;  %155 = vmatprep.mubr.f32.mxu0 %v11428_v3  ;;  %v4686_v20 = vmov 6  }
   0xe   :  { %244 = vmatprep.mubr.f32.mxu1 %v11428_v3  ;;  %4528 = vset.pattern.permute.xlu0 %v11430_v9 }
   0xf   :  { %48 = vperm.xlu0 %4528, %v29_v21   ;;  %4527 = vset.pattern.permute.xlu1 %v4673_v8 }
  0x10   :  { %4321 = vmatmul.mubr.msk.f32.gmra.mrb[4].mxu0 %vm66_vm0, %v44_v22  ;;  %284 = vperm.xlu1 %4527, %v4839_v23  }
  0x11   :  { %4325 = vmatmul.mubr.msk.f32.gmra.mrb[4].mxu1 %vm66_vm0, %v44_v22  ;;  %161 = vmatprep.mubr.f32.mxu0 %v11428_v3 }
  0x12   :  { %250 = vmatprep.mubr.f32.mxu1 %v11428_v3 }
  0x13   :  { %53 = vperm.xlu0 %4528, %v30_v24  }
  0x14   :  { %4322 = vmatmul.mubr.msk.f32.gmra.mrb[6].mxu0 %vm66_vm0, %v45_v25  ;;  %289 = vperm.xlu1 %4527, %v4854_v26  }
  0x15   :  { %4326 = vmatmul.mubr.msk.f32.gmra.mrb[6].mxu1 %vm66_vm0, %v45_v25 }
  0x17   :  { %319 = vperm.xlu0 %4528, %v4839_v23  }
  0x18   :  { %4529 = vset.pattern.permute.xlu1 %v11430_v9 }
  0x19   :  { %315 = vperm.xlu1 %4529, %v4803_v16  }
  0x1b   :  { %4532 = vset.pattern.permute.xlu0 %v4675_v27 }
  0x1c   :  { %593 = vperm.xlu0 %4532, %v4839_v23  }
  0x1d   :  { %323 = vperm.xlu1 %4529, %v4854_v26  }
  0x20   :  { %4533 = vset.pattern.permute.xlu0 %v4676_v28 }
  0x21   :  { %327 = vperm.xlu1 %4529, %v4812_v18   ;;  %725 = vperm.xlu0 %4533, %v4803_v16  }
  0x25   :  { %4530 = vset.pattern.permute.xlu1 %v11432_v29  ;;  %737 = vperm.xlu0 %4533, %v4812_v18  }
  0x26   :  { %457 = vperm.xlu1 %4530, %v4839_v23  }
  0x29   :  { %4536 = vset.pattern.permute.xlu0 %v11426_v30 }
  0x2a   :  { %461 = vperm.xlu1 %4530, %v4854_v26   ;;  %865 = vperm.xlu0 %4536, %v4839_v23  }
  0x2e   :  { %4531 = vset.pattern.permute.xlu1 %v4675_v27  ;;  %4537 = vset.pattern.permute.xlu0 %v4679_v31 }
  0x2f   :  { %589 = vperm.xlu1 %4531, %v4803_v16   ;;  %997 = vperm.xlu0 %4537, %v4803_v16  }
  0x33   :  { %597 = vperm.xlu1 %4531, %v4854_v26   ;;  %1009 = vperm.xlu0 %4537, %v4812_v18  }
  0x37   :  { %601 = vperm.xlu1 %4531, %v4812_v18   ;;  %4540 = vset.pattern.permute.xlu0 %v4686_v20 }
  0x3b   :  { %4534 = vset.pattern.permute.xlu1 %v4676_v28 }
  0x3c   :  { %729 = vperm.xlu1 %4534, %v4839_v23  }
  0x40   :  { %733 = vperm.xlu1 %4534, %v4854_v26  }
  0x44   :  { %4535 = vset.pattern.permute.xlu1 %v11426_v30 }
  0x45   :  { %861 = vperm.xlu1 %4535, %v4803_v16  }
  0x49   :  { %869 = vperm.xlu1 %4535, %v4854_v26  }
  0x4d   :  { %873 = vperm.xlu1 %4535, %v4812_v18  }
  0x51   :  { %4538 = vset.pattern.permute.xlu1 %v4679_v31 }
  0x52   :  { %1001 = vperm.xlu1 %4538, %v4839_v23  }
  0x56   :  { %1005 = vperm.xlu1 %4538, %v4854_v26  }
  0x5a   :  { %4539 = vset.pattern.permute.xlu1 %v4686_v20 }
  0x85   :  { %v4886_v32 = vpop.permute.xlu0 %279 }
  0x86   :  { %12037 = vst [vmem:[#allocation2_spill] sm:$0xff] %v4886_v32  ;;  %v4902_v47 = vpop.permute.xlu1 %58 }
  0x89   :  { %v4888_v33 = vpop.permute.xlu0 %294 }
  0x8a   :  { %12038 = vst [vmem:[#allocation3_spill] sm:$0xff] %v4888_v33  ;;  %v4926_v55 = vpop.permute.xlu1 %63  ;;  %v5434_v33 = vld [vmem:[%s11421_s3 + $0x2] ss:$8 sm:$0xf] }
  0x8e   :  { %v49_v34 = vpop.permute.xlu0 %48 }
  0x8f   :  { %v4935_v59 = vpop.permute.xlu1 %284 }
  0x90   :  { %12041 = vst [vmem:[#allocation6_spill] sm:$0xff] %v4935_v59 }
  0x92   :  { %v54_v1 = vpop.permute.xlu0 %53 }
  0x93   :  { %v4947_v62 = vpop.permute.xlu1 %289 }
  0x94   :  { %12043 = vst [vmem:[#allocation8_spill] sm:$0xff] %v4947_v62 }
  0x96   :  { %v5031_v24 = vpop.permute.xlu0 %319 }
  0x98   :  { %v4955_v0 = vpop.permute.xlu1 %315 }
  0x99   :  { %12045 = vst [vmem:[#allocation10_spill] sm:$0xff] %v4955_v0 }
  0x9b   :  { %v5041_v28 = vpop.permute.xlu0 %593 }
  0x9c   :  { %v4961_v4 = vpop.permute.xlu1 %323  ;;  %12054 = vst [vmem:[#allocation19_spill] sm:$0xff] %v5041_v28 }
  0xa0   :  { %v4973_v7 = vpop.permute.xlu1 %327 }
  0xa1   :  { %12047 = vst [vmem:[#allocation12_spill] sm:$0xff] %v4973_v7 }
  0xa5   :  { %v4981_v10 = vpop.permute.xlu1 %457 }
  0xa6   :  { %12049 = vst [vmem:[#allocation14_spill] sm:$0xff] %v4981_v10 }
  0xa9   :  { %v4991_v11 = vpop.permute.xlu1 %461 }
  0xae   :  { %v4998_v13 = vpop.permute.xlu1 %589 }
  0xaf   :  { %12050 = vst [vmem:[#allocation15_spill] sm:$0xff] %v4998_v13 }
  0xb2   :  { %v5011_v17 = vpop.permute.xlu1 %597 }
  0xb6   :  { %v5019_v21 = vpop.permute.xlu1 %601 }
  0xb7   :  { %12052 = vst [vmem:[#allocation17_spill] sm:$0xff] %v5019_v21 }
  0xbb   :  { %v5029_v22 = vpop.permute.xlu1 %729 }
  0xbc   :  { %12053 = vst [vmem:[#allocation18_spill] sm:$0xff] %v5029_v22 }
  0xbf   :  { %v5039_v27 = vpop.permute.xlu1 %733 }
  0xdb   :  { %v145_v35 = vpop.f32.mrb[0].mxu0 }
  0xdc   :  { %v146_v36 = vadd.f32 %v145_v35, %v49_v34  ;;  %v234_v37 = vpop.f32.mrb[0].mxu1  ;;  %v147_v38 = vpop.f32.mrb[1].mxu0 }
  0xdd   :  { %v236_v39 = vpop.f32.mrb[1].mxu1  ;;  %v235_v41 = vadd.f32 %v234_v37, %v49_v34  ;;  %v148_v58 = vadd.f32 %v147_v38, %v49_v34  ;;  %v5055_v35 = vpop.permute.xlu1 %861 }
  0xde   :  { %v4890_v40 = vmax.f32 %v146_v36, 0.0  ;;  %v237_v61 = vadd.f32 %v236_v39, %v49_v34  ;;  %12056 = vst [vmem:[#allocation21_spill] sm:$0xff] %v5055_v35  ;;  %v5057_v36 = vpop.permute.xlu0 %725 }
  0xdf   :  { %v151_v42 = vpop.f32.mrb[2].mxu0  ;;  %v4900_v46 = vmax.f32 %v235_v41, 0.0  ;;  %v4941_v60 = vmax.f32 %v148_v58, 0.0  ;;  %12057 = vst [vmem:[#allocation22_spill] sm:$0xff] %v5057_v36  ;;  %v11503_v36 = vmov 11  }
  0xe0   :  { %12039 = vst [vmem:[#allocation4_spill] sm:$0xff] %v4890_v40  ;;  %v240_v43 = vpop.f32.mrb[2].mxu1  ;;  %v4892_v44 = vpop.f32.mrb[3].mxu0  ;;  %505 = vrot.lane.b32.xlu1 %v4890_v40, %s4680_s1  ;;  %367 = vrot.lane.b32.xlu0 %v4890_v40, %s4681_s23  ;;  %v4949_v63 = vmax.f32 %v237_v61, 0.0  ;;  %v152_v2 = vadd.f32 %v151_v42, %v54_v1 }
  0xe1   :  { %v4898_v45 = vpop.f32.mrb[3].mxu1  ;;  %12040 = vst [vmem:[#allocation5_spill] sm:$0xff] %v4900_v46  ;;  %12042 = vst [vmem:[#allocation7_spill] sm:$0xff] %v4941_v60  ;;  %v241_v6 = vadd.f32 %v240_v43, %v54_v1  ;;  %v154_v12 = vadd.f32 %v4892_v44, %v54_v1  ;;  %v5065_v38 = vpop.permute.xlu1 %869 }
  0xe2   :  { %12044 = vst [vmem:[#allocation9_spill] sm:$0xff] %v4949_v63  ;;  %v4967_v5 = vmax.f32 %v152_v2, 0.0  ;;  %v243_v15 = vadd.f32 %v4898_v45, %v54_v1  ;;  %v5067_v39 = vpop.permute.xlu0 %737 }
  0xe3   :  { %v4904_v48 = vpop.f32.mrb[4].mxu0  ;;  %v4975_v8 = vmax.f32 %v241_v6, 0.0  ;;  %v5004_v14 = vmax.f32 %v154_v12, 0.0  ;;  %12059 = vst [vmem:[#allocation24_spill] sm:$0xff] %v5067_v39 }
  0xe4   :  { %521 = vrot.lane.b32.xlu1 %v4900_v46, %s4680_s1  ;;  %383 = vrot.lane.b32.xlu0 %v4900_v46, %s4681_s23  ;;  %v4910_v49 = vpop.f32.mrb[4].mxu1  ;;  %v4912_v50 = vpop.f32.mrb[5].mxu0  ;;  %12046 = vst [vmem:[#allocation11_spill] sm:$0xff] %v4967_v5  ;;  %v5013_v19 = vmax.f32 %v243_v15, 0.0  ;;  %v158_v25 = vadd.f32 %v4904_v48, %v4902_v47 }
  0xe5   :  { %v4914_v51 = vpop.f32.mrb[5].mxu1  ;;  %12048 = vst [vmem:[#allocation13_spill] sm:$0xff] %v4975_v8  ;;  %12051 = vst [vmem:[#allocation16_spill] sm:$0xff] %v5004_v14  ;;  %v247_v34 = vadd.f32 %v4910_v49, %v4902_v47  ;;  %v160_v41 = vadd.f32 %v4912_v50, %v4902_v47  ;;  %v5079_v42 = vpop.permute.xlu1 %873 }
  0xe6   :  { %v5047_v31 = vmax.f32 %v158_v25, 0.0  ;;  %12060 = vst [vmem:[#allocation25_spill] sm:$0xff] %v5079_v42  ;;  %v5081_v43 = vpop.permute.xlu0 %865  ;;  %v249_v45 = vadd.f32 %v4914_v51, %v4902_v47 }
  0xe7   :  { %v4916_v52 = vpop.f32.mrb[6].mxu0  ;;  %v5059_v37 = vmax.f32 %v247_v34, 0.0  ;;  %12061 = vst [vmem:[#allocation26_spill] sm:$0xff] %v5081_v43  ;;  %v5083_v44 = vmax.f32 %v160_v41, 0.0 }
  0xe8   :  { %v4918_v53 = vpop.f32.mrb[6].mxu1  ;;  %v4920_v54 = vpop.f32.mrb[7].mxu0  ;;  %777 = vrot.lane.b32.xlu1 %v4890_v40, %s4682_s24  ;;  %641 = vrot.lane.b32.xlu0 %v4890_v40, %s4683_s25  ;;  %12055 = vst [vmem:[#allocation20_spill] sm:$0xff] %v5047_v31  ;;  %v5091_v48 = vmax.f32 %v249_v45, 0.0 }
  0xe9   :  { %v254_v56 = vpop.f32.mrb[7].mxu1  ;;  %12058 = vst [vmem:[#allocation23_spill] sm:$0xff] %v5059_v37  ;;  %12062 = vst [vmem:[#allocation27_spill] sm:$0xff] %v5083_v44  ;;  %v5093_v49 = vpop.permute.xlu1 %1001  ;;  %v253_v61 = vadd.f32 %v4918_v53, %v4926_v55  ;;  %v166_v45 = vadd.f32 %v4920_v54, %v4926_v55 }
  0xea   :  { %v4929_v57 = vadd.f32 %v254_v56, %v4926_v55  ;;  %12063 = vst [vmem:[#allocation28_spill] sm:$0xff] %v5091_v48  ;;  %12064 = vst [vmem:[#allocation29_spill] sm:$0xff] %v5093_v49  ;;  %v5095_v50 = vpop.permute.xlu0 %997  ;;  %v164_v56 = vadd.f32 %v4916_v52, %v4926_v55 }
  0xeb   :  { %12065 = vst [vmem:[#allocation30_spill] sm:$0xff] %v5095_v50  ;;  %v5127_v52 = vmax.f32 %v253_v61, 0.0  ;;  %v5171_v30 = vmax.f32 %v166_v45, 0.0 }
  0xec   :  { %793 = vrot.lane.b32.xlu1 %v4900_v46, %s4682_s24  ;;  %657 = vrot.lane.b32.xlu0 %v4900_v46, %s4683_s25  ;;  %v5115_v58 = vmax.f32 %v164_v56, 0.0  ;;  %v5182_v54 = vmax.f32 %v4929_v57, 0.0 }
  0xed   :  { %v5105_v47 = vpop.permute.xlu1 %1005  ;;  %12080 = vst [vmem:[#allocation45_spill] sm:$0xff] %v5171_v30 }
  0xee   :  { %v5107_v51 = vpop.permute.xlu0 %1009  ;;  %12067 = vst [vmem:[#allocation32_spill] sm:$0xff] %v5115_v58 }
  0xef   :  { %12066 = vst [vmem:[#allocation31_spill] sm:$0xff] %v5107_v51 }
  0xf0   :  { %1049 = vrot.lane.b32.xlu1 %v4890_v40, %s4684_s26  ;;  %913 = vrot.lane.b32.xlu0 %v4890_v40, %s4685_s27 }
  0xf4   :  { %513 = vrot.lane.b32.xlu1 %v4941_v60, %s4680_s1  ;;  %929 = vrot.lane.b32.xlu0 %v4900_v46, %s4685_s27 }
  0xf8   :  { %529 = vrot.lane.b32.xlu1 %v4949_v63, %s4680_s1  ;;  %375 = vrot.lane.b32.xlu0 %v4941_v60, %s4681_s23 }
  0xfc   :  { %785 = vrot.lane.b32.xlu1 %v4941_v60, %s4682_s24  ;;  %391 = vrot.lane.b32.xlu0 %v4949_v63, %s4681_s23 }
 0x100   :  { %801 = vrot.lane.b32.xlu1 %v4949_v63, %s4682_s24  ;;  %649 = vrot.lane.b32.xlu0 %v4941_v60, %s4683_s25 }
 0x104   :  { %369 = vrot.lane.b32.xlu1 %v4967_v5, %s4681_s23  ;;  %665 = vrot.lane.b32.xlu0 %v4949_v63, %s4683_s25 }
 0x108   :  { %385 = vrot.lane.b32.xlu1 %v4975_v8, %s4681_s23  ;;  %921 = vrot.lane.b32.xlu0 %v4941_v60, %s4685_s27 }
 0x10c   :  { %643 = vrot.lane.b32.xlu1 %v4967_v5, %s4683_s25  ;;  %937 = vrot.lane.b32.xlu0 %v4949_v63, %s4685_s27 }
 0x110   :  { %659 = vrot.lane.b32.xlu1 %v4975_v8, %s4683_s25  ;;  %507 = vrot.lane.b32.xlu0 %v4967_v5, %s4680_s1 }
 0x114   :  { %915 = vrot.lane.b32.xlu1 %v4967_v5, %s4685_s27  ;;  %523 = vrot.lane.b32.xlu0 %v4975_v8, %s4680_s1 }
 0x118   :  { %931 = vrot.lane.b32.xlu1 %v4975_v8, %s4685_s27  ;;  %779 = vrot.lane.b32.xlu0 %v4967_v5, %s4682_s24 }
 0x11c   :  { %377 = vrot.lane.b32.xlu1 %v5004_v14, %s4681_s23  ;;  %795 = vrot.lane.b32.xlu0 %v4975_v8, %s4682_s24 }
 0x120   :  { %393 = vrot.lane.b32.xlu1 %v5013_v19, %s4681_s23  ;;  %1051 = vrot.lane.b32.xlu0 %v4967_v5, %s4684_s26 }
 0x124   :  { %651 = vrot.lane.b32.xlu1 %v5004_v14, %s4683_s25  ;;  %515 = vrot.lane.b32.xlu0 %v5004_v14, %s4680_s1 }
 0x128   :  { %667 = vrot.lane.b32.xlu1 %v5013_v19, %s4683_s25  ;;  %531 = vrot.lane.b32.xlu0 %v5013_v19, %s4680_s1 }
 0x12c   :  { %923 = vrot.lane.b32.xlu1 %v5004_v14, %s4685_s27  ;;  %787 = vrot.lane.b32.xlu0 %v5004_v14, %s4682_s24 }
 0x130   :  { %939 = vrot.lane.b32.xlu1 %v5013_v19, %s4685_s27  ;;  %803 = vrot.lane.b32.xlu0 %v5013_v19, %s4682_s24 }
 0x134   :  { %509 = vrot.lane.b32.xlu1 %v5047_v31, %s4680_s1  ;;  %371 = vrot.lane.b32.xlu0 %v5047_v31, %s4681_s23 }
 0x138   :  { %525 = vrot.lane.b32.xlu1 %v5059_v37, %s4680_s1  ;;  %387 = vrot.lane.b32.xlu0 %v5059_v37, %s4681_s23 }
 0x13c   :  { %781 = vrot.lane.b32.xlu1 %v5047_v31, %s4682_s24  ;;  %645 = vrot.lane.b32.xlu0 %v5047_v31, %s4683_s25 }
 0x140   :  { %797 = vrot.lane.b32.xlu1 %v5059_v37, %s4682_s24  ;;  %661 = vrot.lane.b32.xlu0 %v5059_v37, %s4683_s25 }
 0x144   :  { %517 = vrot.lane.b32.xlu1 %v5083_v44, %s4680_s1  ;;  %917 = vrot.lane.b32.xlu0 %v5047_v31, %s4685_s27 }
 0x148   :  { %533 = vrot.lane.b32.xlu1 %v5091_v48, %s4680_s1  ;;  %933 = vrot.lane.b32.xlu0 %v5059_v37, %s4685_s27 }
 0x14c   :  { %789 = vrot.lane.b32.xlu1 %v5083_v44, %s4682_s24  ;;  %379 = vrot.lane.b32.xlu0 %v5083_v44, %s4681_s23 }
 0x150   :  { %805 = vrot.lane.b32.xlu1 %v5091_v48, %s4682_s24  ;;  %395 = vrot.lane.b32.xlu0 %v5091_v48, %s4681_s23 }
 0x152   :  { %v5119_v1 = vpop.permute.xlu1 %505  ;;  %v5121_v2 = vpop.permute.xlu0 %367 }
 0x153   :  { %12068 = vst [vmem:[#allocation33_spill] sm:$0xff] %v5119_v1  ;;  %12069 = vst [vmem:[#allocation34_spill] sm:$0xff] %v5121_v2 }
 0x154   :  { %373 = vrot.lane.b32.xlu1 %v5115_v58, %s4681_s23  ;;  %653 = vrot.lane.b32.xlu0 %v5083_v44, %s4683_s25 }
 0x156   :  { %v5129_v6 = vpop.permute.xlu1 %521  ;;  %v5131_v12 = vpop.permute.xlu0 %383 }
 0x157   :  { %12070 = vst [vmem:[#allocation35_spill] sm:$0xff] %v5129_v6  ;;  %12071 = vst [vmem:[#allocation36_spill] sm:$0xff] %v5131_v12 }
 0x158   :  { %389 = vrot.lane.b32.xlu1 %v5127_v52, %s4681_s23  ;;  %669 = vrot.lane.b32.xlu0 %v5091_v48, %s4683_s25 }
 0x15a   :  { %v5137_v53 = vpop.permute.xlu1 %777  ;;  %v5139_v15 = vpop.permute.xlu0 %641 }
 0x15b   :  { %12072 = vst [vmem:[#allocation37_spill] sm:$0xff] %v5137_v53  ;;  %12073 = vst [vmem:[#allocation38_spill] sm:$0xff] %v5139_v15 }
 0x15c   :  { %647 = vrot.lane.b32.xlu1 %v5115_v58, %s4683_s25  ;;  %925 = vrot.lane.b32.xlu0 %v5083_v44, %s4685_s27 }
 0x15e   :  { %v5145_v20 = vpop.permute.xlu1 %793  ;;  %v5147_v25 = vpop.permute.xlu0 %657 }
 0x15f   :  { %12074 = vst [vmem:[#allocation39_spill] sm:$0xff] %v5145_v20  ;;  %12075 = vst [vmem:[#allocation40_spill] sm:$0xff] %v5147_v25  ;;  %v4689_v20 = vmov 8  }
 0x160   :  { %663 = vrot.lane.b32.xlu1 %v5127_v52, %s4683_s25  ;;  %941 = vrot.lane.b32.xlu0 %v5091_v48, %s4685_s27 }
 0x162   :  { %v5153_v34 = vpop.permute.xlu1 %1049  ;;  %v5155_v41 = vpop.permute.xlu0 %913 }
 0x163   :  { %12076 = vst [vmem:[#allocation41_spill] sm:$0xff] %v5153_v34  ;;  %12077 = vst [vmem:[#allocation42_spill] sm:$0xff] %v5155_v41 }
 0x164   :  { %919 = vrot.lane.b32.xlu1 %v5115_v58, %s4685_s27  ;;  %511 = vrot.lane.b32.xlu0 %v5115_v58, %s4680_s1 }
 0x166   :  { %v5163_v56 = vpop.permute.xlu1 %513  ;;  %v5165_v61 = vpop.permute.xlu0 %929 }
 0x167   :  { %12078 = vst [vmem:[#allocation43_spill] sm:$0xff] %v5163_v56  ;;  %12079 = vst [vmem:[#allocation44_spill] sm:$0xff] %v5165_v61 }
 0x168   :  { %935 = vrot.lane.b32.xlu1 %v5127_v52, %s4685_s27  ;;  %527 = vrot.lane.b32.xlu0 %v5127_v52, %s4680_s1 }
 0x16a   :  { %v5173_v3 = vpop.permute.xlu1 %529  ;;  %v5175_v9 = vpop.permute.xlu0 %375 }
 0x16b   :  { %12081 = vst [vmem:[#allocation46_spill] sm:$0xff] %v5173_v3  ;;  %12082 = vst [vmem:[#allocation47_spill] sm:$0xff] %v5175_v9 }
 0x16c   :  { %381 = vrot.lane.b32.xlu1 %v5171_v30, %s4681_s23  ;;  %783 = vrot.lane.b32.xlu0 %v5115_v58, %s4682_s24 }
 0x16e   :  { %v5184_v55 = vpop.permute.xlu1 %785  ;;  %v5186_v29 = vpop.permute.xlu0 %391 }
 0x16f   :  { %12083 = vst [vmem:[#allocation48_spill] sm:$0xff] %v5184_v55  ;;  %12084 = vst [vmem:[#allocation49_spill] sm:$0xff] %v5186_v29 }
 0x170   :  { %397 = vrot.lane.b32.xlu1 %v5182_v54, %s4681_s23  ;;  %799 = vrot.lane.b32.xlu0 %v5127_v52, %s4682_s24  ;;  %s4697_s23 = smov 2  }
 0x172   :  { %v5192_v45 = vpop.permute.xlu1 %801  ;;  %v5194_v34 = vpop.permute.xlu0 %649 }
 0x173   :  { %12085 = vst [vmem:[#allocation50_spill] sm:$0xff] %v5192_v45  ;;  %12086 = vst [vmem:[#allocation51_spill] sm:$0xff] %v5194_v34 }
 0x174   :  { %655 = vrot.lane.b32.xlu1 %v5171_v30, %s4683_s25  ;;  %519 = vrot.lane.b32.xlu0 %v5171_v30, %s4680_s1 }
 0x176   :  { %v5200_v57 = vpop.permute.xlu1 %369  ;;  %v5202_v41 = vpop.permute.xlu0 %665 }
 0x177   :  { %12087 = vst [vmem:[#allocation52_spill] sm:$0xff] %v5200_v57  ;;  %12088 = vst [vmem:[#allocation53_spill] sm:$0xff] %v5202_v41 }
 0x178   :  { %671 = vrot.lane.b32.xlu1 %v5182_v54, %s4683_s25  ;;  %535 = vrot.lane.b32.xlu0 %v5182_v54, %s4680_s1  ;;  %s4709_s25 = smov 112  }
 0x17a   :  { %v5208_v61 = vpop.permute.xlu1 %385  ;;  %v5210_v15 = vpop.permute.xlu0 %921 }
 0x17b   :  { %12089 = vst [vmem:[#allocation54_spill] sm:$0xff] %v5208_v61  ;;  %12090 = vst [vmem:[#allocation55_spill] sm:$0xff] %v5210_v15 }
 0x17c   :  { %927 = vrot.lane.b32.xlu1 %v5171_v30, %s4685_s27  ;;  %791 = vrot.lane.b32.xlu0 %v5171_v30, %s4682_s24 }
 0x17e   :  { %v5216_v34 = vpop.permute.xlu1 %643  ;;  %v5218_v57 = vpop.permute.xlu0 %937 }
 0x17f   :  { %12091 = vst [vmem:[#allocation56_spill] sm:$0xff] %v5216_v34  ;;  %12092 = vst [vmem:[#allocation57_spill] sm:$0xff] %v5218_v57 }
 0x180   :  { %943 = vrot.lane.b32.xlu1 %v5182_v54, %s4685_s27  ;;  %807 = vrot.lane.b32.xlu0 %v5182_v54, %s4682_s24  ;;  %s4720_s27 = smov 95  }
 0x182   :  { %v5224_v41 = vpop.permute.xlu1 %659  ;;  %v5226_v61 = vpop.permute.xlu0 %507 }
 0x183   :  { %12093 = vst [vmem:[#allocation58_spill] sm:$0xff] %v5224_v41  ;;  %12094 = vst [vmem:[#allocation59_spill] sm:$0xff] %v5226_v61 }
 0x184   :  { %1053 = vrot.lane.b32.xlu1 %v5047_v31, %s4684_s26  ;;  %1055 = vrot.lane.b32.xlu0 %v5115_v58, %s4684_s26 }
 0x186   :  { %v5232_v15 = vpop.permute.xlu1 %915  ;;  %v5234_v34 = vpop.permute.xlu0 %523 }
 0x187   :  { %12095 = vst [vmem:[#allocation60_spill] sm:$0xff] %v5232_v15  ;;  %12096 = vst [vmem:[#allocation61_spill] sm:$0xff] %v5234_v34 }
 0x188   :  { %1057 = vrot.lane.b32.xlu1 %v4941_v60, %s4684_s26  ;;  %1059 = vrot.lane.b32.xlu0 %v5004_v14, %s4684_s26 }
 0x18a   :  { %v5240_v57 = vpop.permute.xlu1 %931  ;;  %v5242_v41 = vpop.permute.xlu0 %779 }
 0x18b   :  { %12097 = vst [vmem:[#allocation62_spill] sm:$0xff] %v5240_v57  ;;  %12098 = vst [vmem:[#allocation63_spill] sm:$0xff] %v5242_v41 }
 0x18c   :  { %1061 = vrot.lane.b32.xlu1 %v5083_v44, %s4684_s26  ;;  %1063 = vrot.lane.b32.xlu0 %v5171_v30, %s4684_s26 }
 0x18e   :  { %v5248_v61 = vpop.permute.xlu1 %377  ;;  %v5250_v15 = vpop.permute.xlu0 %795 }
 0x18f   :  { %12099 = vst [vmem:[#allocation64_spill] sm:$0xff] %v5248_v61  ;;  %12100 = vst [vmem:[#allocation65_spill] sm:$0xff] %v5250_v15 }
 0x190   :  { %1065 = vrot.lane.b32.xlu1 %v4900_v46, %s4684_s26  ;;  %1067 = vrot.lane.b32.xlu0 %v4975_v8, %s4684_s26 }
 0x192   :  { %v5256_v34 = vpop.permute.xlu1 %393  ;;  %v5258_v57 = vpop.permute.xlu0 %1051 }
 0x193   :  { %12101 = vst [vmem:[#allocation66_spill] sm:$0xff] %v5256_v34  ;;  %12102 = vst [vmem:[#allocation67_spill] sm:$0xff] %v5258_v57 }
 0x194   :  { %1069 = vrot.lane.b32.xlu1 %v5059_v37, %s4684_s26  ;;  %1071 = vrot.lane.b32.xlu0 %v5127_v52, %s4684_s26 }
 0x196   :  { %v5264_v41 = vpop.permute.xlu1 %651  ;;  %v5266_v61 = vpop.permute.xlu0 %515 }
 0x197   :  { %12103 = vst [vmem:[#allocation68_spill] sm:$0xff] %v5264_v41  ;;  %12104 = vst [vmem:[#allocation69_spill] sm:$0xff] %v5266_v61 }
 0x198   :  { %1073 = vrot.lane.b32.xlu1 %v4949_v63, %s4684_s26  ;;  %1075 = vrot.lane.b32.xlu0 %v5013_v19, %s4684_s26 }
 0x19a   :  { %v5272_v15 = vpop.permute.xlu1 %667  ;;  %v5274_v34 = vpop.permute.xlu0 %531 }
 0x19b   :  { %12105 = vst [vmem:[#allocation70_spill] sm:$0xff] %v5272_v15  ;;  %12106 = vst [vmem:[#allocation71_spill] sm:$0xff] %v5274_v34 }
 0x19c   :  { %1077 = vrot.lane.b32.xlu1 %v5091_v48, %s4684_s26  ;;  %1079 = vrot.lane.b32.xlu0 %v5182_v54, %s4684_s26  ;;  %s4717_s26 = smov 97  }
 0x19e   :  { %v5280_v57 = vpop.permute.xlu1 %923  ;;  %v5282_v41 = vpop.permute.xlu0 %787 }
 0x19f   :  { %12107 = vst [vmem:[#allocation72_spill] sm:$0xff] %v5280_v57  ;;  %12108 = vst [vmem:[#allocation73_spill] sm:$0xff] %v5282_v41  ;;  %v4688_v57 = vmov 7  }
 0x1a0   :  { %1133 = vperm.xlu1 %4539, %v4803_v16   ;;  %1137 = vperm.xlu0 %4540, %v4839_v23  }
 0x1a2   :  { %v5286_v61 = vpop.permute.xlu1 %939  ;;  %v5288_v25 = vpop.permute.xlu0 %803 }
 0x1a3   :  { %12109 = vst [vmem:[#allocation74_spill] sm:$0xff] %v5286_v61  ;;  %12110 = vst [vmem:[#allocation75_spill] sm:$0xff] %v5288_v25 }
 0x1a4   :  { %1141 = vperm.xlu1 %4539, %v4854_v26   ;;  %1185 = vrot.lane.b32.xlu0 %v4890_v40, %s4687_s28 }
 0x1a5   :  { %4542 = vset.pattern.permute.xlu0 %v4688_v57 }
 0x1a6   :  { %v5293_v15 = vpop.permute.xlu1 %509  ;;  %v5295_v34 = vpop.permute.xlu0 %371 }
 0x1a8   :  { %1145 = vperm.xlu1 %4539, %v4812_v18   ;;  %1273 = vperm.xlu0 %4542, %v4839_v23  }
 0x1aa   :  { %v5299_v41 = vpop.permute.xlu1 %525  ;;  %v5301_v61 = vpop.permute.xlu0 %387 }
 0x1ab   :  { %12111 = vst [vmem:[#allocation76_spill] sm:$0xff] %v5299_v41  ;;  %12112 = vst [vmem:[#allocation77_spill] sm:$0xff] %v5301_v61 }
 0x1ac   :  { %4541 = vset.pattern.permute.xlu1 %v4688_v57  ;;  %1277 = vperm.xlu0 %4542, %v4854_v26  }
 0x1ad   :  { %1269 = vperm.xlu1 %4541, %v4803_v16  }
 0x1ae   :  { %v5305_v25 = vpop.permute.xlu1 %781  ;;  %v5307_v45 = vpop.permute.xlu0 %645 }
 0x1b0   :  { %1193 = vrot.lane.b32.xlu0 %v4941_v60, %s4687_s28 }
 0x1b1   :  { %4543 = vset.pattern.permute.xlu1 %v4689_v20  ;;  %4546 = vset.pattern.permute.xlu0 %v4689_v20 }
 0x1b2   :  { %1405 = vperm.xlu1 %4543, %v4803_v16   ;;  %v5312_v3 = vpop.permute.xlu1 %797  ;;  %v5314_v41 = vpop.permute.xlu0 %661 }
 0x1b3   :  { %12113 = vst [vmem:[#allocation78_spill] sm:$0xff] %v5312_v3  ;;  %12114 = vst [vmem:[#allocation79_spill] sm:$0xff] %v5314_v41  ;;  %v4690_v3 = vmov 9  }
 0x1b4   :  { %1209 = vrot.lane.b32.xlu0 %v4949_v63, %s4687_s28 }
 0x1b6   :  { %1409 = vperm.xlu1 %4543, %v4839_v23   ;;  %v5319_v61 = vpop.permute.xlu1 %517  ;;  %v5321_v53 = vpop.permute.xlu0 %917 }
 0x1b7   :  { %12115 = vst [vmem:[#allocation80_spill] sm:$0xff] %v5319_v61 }
 0x1b8   :  { %1413 = vperm.xlu0 %4546, %v4854_v26  }
 0x1ba   :  { %4544 = vset.pattern.permute.xlu1 %v4688_v57  ;;  %v5324_v55 = vpop.permute.xlu1 %533  ;;  %v5326_v1 = vpop.permute.xlu0 %933 }
 0x1bb   :  { %12116 = vst [vmem:[#allocation81_spill] sm:$0xff] %v5324_v55  ;;  %12117 = vst [vmem:[#allocation82_spill] sm:$0xff] %v5326_v1  ;;  %1281 = vperm.xlu1 %4544, %v4812_v18  }
 0x1bc   :  { %4547 = vset.pattern.permute.xlu0 %v4690_v3 }
 0x1bd   :  { %1541 = vperm.xlu0 %4547, %v4803_v16  }
 0x1be   :  { %v5330_v41 = vpop.permute.xlu1 %789  ;;  %v5332_v56 = vpop.permute.xlu0 %379 }
 0x1bf   :  { %12118 = vst [vmem:[#allocation83_spill] sm:$0xff] %v5330_v41  ;;  %12119 = vst [vmem:[#allocation84_spill] sm:$0xff] %v5332_v56  ;;  %4545 = vset.pattern.permute.xlu1 %v4690_v3 }
 0x1c0   :  { %1545 = vperm.xlu1 %4545, %v4839_v23  }
 0x1c1   :  { %1329 = vrot.lane.b32.xlu0 %v4941_v60, %s4691_s29 }
 0x1c2   :  { %v5337_v57 = vpop.permute.xlu1 %805  ;;  %v5339_v1 = vpop.permute.xlu0 %395 }
 0x1c3   :  { %12120 = vst [vmem:[#allocation85_spill] sm:$0xff] %v5337_v57  ;;  %12121 = vst [vmem:[#allocation86_spill] sm:$0xff] %v5339_v1 }
 0x1c4   :  { %1187 = vrot.lane.b32.xlu1 %v4967_v5, %s4687_s28 }
 0x1c5   :  { %4548 = vset.pattern.permute.xlu1 %v4689_v20  ;;  %1345 = vrot.lane.b32.xlu0 %v4949_v63, %s4691_s29  ;;  %v11488_v20 = vmov 10  }
 0x1c6   :  { %v5345_v6 = vpop.permute.xlu1 %373  ;;  %v5347_v29 = vpop.permute.xlu0 %653 }
 0x1c7   :  { %12122 = vst [vmem:[#allocation87_spill] sm:$0xff] %v5345_v6  ;;  %12123 = vst [vmem:[#allocation88_spill] sm:$0xff] %v5347_v29 }
 0x1c8   :  { %1195 = vrot.lane.b32.xlu1 %v5004_v14, %s4687_s28 }
 0x1c9   :  { %1549 = vperm.xlu0 %4547, %v4854_v26  }
 0x1ca   :  { %v5352_v51 = vpop.permute.xlu1 %389  ;;  %v5354_v50 = vpop.permute.xlu0 %669 }
 0x1cb   :  { %12124 = vst [vmem:[#allocation89_spill] sm:$0xff] %v5352_v51  ;;  %12125 = vst [vmem:[#allocation90_spill] sm:$0xff] %v5354_v50 }
 0x1cc   :  { %1211 = vrot.lane.b32.xlu1 %v5013_v19, %s4687_s28 }
 0x1cd   :  { %4550 = vset.pattern.permute.xlu0 %v11488_v20 }
 0x1ce   :  { %v5359_v2 = vpop.permute.xlu1 %647  ;;  %v5361_v6 = vpop.permute.xlu0 %925  ;;  %1681 = vperm.xlu0 %4550, %v4839_v23  }
 0x1cf   :  { %12126 = vst [vmem:[#allocation91_spill] sm:$0xff] %v5359_v2  ;;  %12127 = vst [vmem:[#allocation92_spill] sm:$0xff] %v5361_v6 }
 0x1d0   :  { %1417 = vperm.xlu1 %4548, %v4812_v18  }
 0x1d2   :  { %v5365_v9 = vpop.permute.xlu1 %663  ;;  %v5367_v12 = vpop.permute.xlu0 %941  ;;  %1197 = vrot.lane.b32.xlu0 %v5083_v44, %s4687_s28 }
 0x1d3   :  { %12128 = vst [vmem:[#allocation93_spill] sm:$0xff] %v5365_v9  ;;  %12129 = vst [vmem:[#allocation94_spill] sm:$0xff] %v5367_v12 }
 0x1d4   :  { %4549 = vset.pattern.permute.xlu1 %v11488_v20 }
 0x1d5   :  { %1677 = vperm.xlu1 %4549, %v4803_v16  }
 0x1d6   :  { %v5373_v51 = vpop.permute.xlu1 %919  ;;  %v5375_v2 = vpop.permute.xlu0 %511  ;;  %1213 = vrot.lane.b32.xlu0 %v5091_v48, %s4687_s28 }
 0x1d7   :  { %12130 = vst [vmem:[#allocation95_spill] sm:$0xff] %v5373_v51  ;;  %12131 = vst [vmem:[#allocation96_spill] sm:$0xff] %v5375_v2  ;;  %v331_v2 = vlaneseq }
 0x1d9   :  { %1321 = vrot.lane.b32.xlu1 %v4890_v40, %s4691_s29 }
 0x1da   :  { %v5381_v9 = vpop.permute.xlu1 %935  ;;  %v5383_v39 = vpop.permute.xlu0 %527  ;;  %4551 = vset.pattern.permute.xlu1 %v4690_v3  ;;  %1457 = vrot.lane.b32.xlu0 %v4890_v40, %s4693_s30 }
 0x1db   :  { %12132 = vst [vmem:[#allocation97_spill] sm:$0xff] %v5381_v9  ;;  %12133 = vst [vmem:[#allocation98_spill] sm:$0xff] %v5383_v39  ;;  %v5403_v39 = vshrl.u32 %v331_v2, 7 }
 0x1dd   :  { %1323 = vrot.lane.b32.xlu1 %v4967_v5, %s4691_s29  ;;  %v5413_v43 = vsub.s32 1, %v5403_v39 }
 0x1de   :  { %v5389_v20 = vpop.permute.xlu1 %381  ;;  %v5391_v51 = vpop.permute.xlu0 %783  ;;  %1465 = vrot.lane.b32.xlu0 %v4941_v60, %s4693_s30 }
 0x1df   :  { %12134 = vst [vmem:[#allocation99_spill] sm:$0xff] %v5389_v20  ;;  %12135 = vst [vmem:[#allocation100_spill] sm:$0xff] %v5391_v51  ;;  %v5453_v49 = vrot.slane %v5434_v33, %v5413_v43 }
 0x1e0   :  { %12140 = vst [vmem:[#allocation105_spill] sm:$0xff] %v5413_v43 }
 0x1e1   :  { %1331 = vrot.lane.b32.xlu1 %v5004_v14, %s4691_s29  ;;  %12146 = vst [vmem:[#allocation110_spill] sm:$0xff] %v5453_v49  ;;  %v634_v10 = vmul.f32 %v5453_v49, %v5011_v17 }
 0x1e2   :  { %v5397_v9 = vpop.permute.xlu1 %397  ;;  %1481 = vrot.lane.b32.xlu0 %v4949_v63, %s4693_s30  ;;  %v5401_v3 = vpop.permute.xlu0 %799 }
 0x1e3   :  { %12136 = vst [vmem:[#allocation101_spill] sm:$0xff] %v5397_v9  ;;  %12137 = vst [vmem:[#allocation102_spill] sm:$0xff] %v5401_v3  ;;  %v313_v9 = vld [vmem:[%s11421_s3] ss:$8 sm:$0xf]  ;;  %v5419_v3 = vand.u32 127, %v331_v2 }
 0x1e4   :  { %v4327_v2 = vld [vmem:[%s11421_s3 + $0x1] ss:$8 sm:$0xf] }
 0x1e5   :  { %1347 = vrot.lane.b32.xlu1 %v5013_v19, %s4691_s29  ;;  %vm401_vm1 = vcmp.lt.s32.totalorder %v5419_v3, 34  ;;  %v5456_v42 = vrot.slane %v4327_v2, %v5413_v43  ;;  %vm537_vm2 = vcmp.lt.s32.totalorder %v5419_v3, 33  ;;  %vm673_vm3 = vcmp.lt.s32.totalorder %v5419_v3, 32 }
 0x1e6   :  { %v5407_v51 = vpop.permute.xlu1 %655  ;;  %1685 = vperm.xlu0 %4550, %v4854_v26   ;;  %v5410_v20 = vpop.permute.xlu0 %519  ;;  %vm809_vm4 = vcmp.lt.s32.totalorder %v5419_v3, 31  ;;  %vm945_vm5 = vcmp.lt.s32.totalorder %v5419_v3, 30  ;;  %vm1081_vm6 = vcmp.lt.s32.totalorder %v5419_v3, 18  ;;  %vm1217_vm7 = vcmp.lt.s32.totalorder %v5419_v3, 17 }
 0x1e7   :  { %12138 = vst [vmem:[#allocation103_spill] sm:$0xff] %v5407_v51  ;;  %12139 = vst [vmem:[#allocation104_spill] sm:$0xff] %v5410_v20  ;;  %v5427_v20 = vrot.slane %v313_v9, %v5413_v43  ;;  %v498_v21 = vmul.f32 %v5456_v42, %v4991_v11  ;;  %vm1353_vm8 = vcmp.lt.s32.totalorder %v5419_v3, 16  ;;  %vm1489_vm9 = vcmp.lt.s32.totalorder %v5419_v3, 15 }
 0x1e8   :  { %12147 = vst [vmem:[#allocation111_spill] sm:$0xff] %v5456_v42  ;;  %vm1625_vm10 = vcmp.lt.s32.totalorder %v5419_v3, 14  ;;  %vm1761_vm11 = vcmp.lt.s32.totalorder %v5419_v3, 2  ;;  %vm1897_vm12 = vcmp.lt.s32.totalorder %v5419_v3, 1  ;;  %vm2033_vm13 = vcmp.lt.s32.totalorder %v5419_v3, 127 }
 0x1e9   :  { %1553 = vperm.xlu1 %4551, %v4812_v18   ;;  %vm2169_vm14 = vcmp.lt.s32.totalorder %v5419_v3, 126  ;;  %vm2305_vm15 = vcmp.lt.s32.totalorder %v5419_v3, 114  ;;  %vm2441_vm0 = vcmp.lt.s32.totalorder %v5419_v3, 113 }
 0x1ea   :  { %v5421_v28 = vpop.permute.xlu1 %671  ;;  %4553 = vset.pattern.permute.xlu0 %v11503_v36  ;;  %v5424_v51 = vpop.permute.xlu0 %535  ;;  %v412_v36 = vsel %vm401_vm1, %v5295_v34, %v5332_v56  ;;  %v684_v56 = vsel %vm673_vm3, %v5307_v45, %v5347_v29 }
 0x1eb   :  { %12141 = vst [vmem:[#allocation106_spill] sm:$0xff] %v5421_v28  ;;  %12142 = vst [vmem:[#allocation107_spill] sm:$0xff] %v5424_v51  ;;  %1817 = vperm.xlu0 %4553, %v4839_v23   ;;  %v12143_v51 = vmov 11   ;;  %v360_v28 = vmul.f32 %v5427_v20, %v4961_v4 }
 0x1ed   :  { %4552 = vset.pattern.permute.xlu1 %v12143_v51  ;;  %v427_v35 = vmul.f32 %v412_v36, %v360_v28  ;;  %v4330_v28 = vld [vmem:[%s11421_s3 + $0x4] ss:$8 sm:$0xf]  ;;  %v548_v36 = vsel %vm537_vm2, %v5293_v15, %v5319_v61 }
 0x1ee   :  { %1813 = vperm.xlu1 %4552, %v4803_v16   ;;  %v5447_v59 = vpop.permute.xlu1 %927  ;;  %v5449_v32 = vpop.permute.xlu0 %791  ;;  %v306_v16 = vmul.f32 %v4947_v62, %v5083_v44  ;;  %v5495_v7 = vrot.slane %v4330_v28, %v5413_v43  ;;  %v563_v29 = vmul.f32 %v548_v36, %v498_v21 }
 0x1ef   :  { %12144 = vst [vmem:[#allocation108_spill] sm:$0xff] %v5447_v59  ;;  %12145 = vst [vmem:[#allocation109_spill] sm:$0xff] %v5449_v32  ;;  %1333 = vrot.lane.b32.xlu0 %v5083_v44, %s4691_s29  ;;  %v4329_v59 = vld [vmem:[%s11421_s3 + $0x3] ss:$8 sm:$0xf] }
 0x1f0   :  { %v443_v13 = vadd.f32 %v427_v35, %v306_v16  ;;  %v5492_v61 = vrot.slane %v4329_v59, %v5413_v43  ;;  %12151 = vst [vmem:[#allocation114_spill] sm:$0xff] %v5495_v7  ;;  %v5504_v35 = vld [vmem:[%s11421_s3 + $0x5] ss:$8 sm:$0xf]  ;;  %v5508_v16 = vsub.s32 0, %v5403_v39 }
 0x1f2   :  { %1189 = vrot.lane.b32.xlu1 %v5047_v31, %s4687_s28  ;;  %v5466_v32 = vpop.permute.xlu1 %943  ;;  %v5482_v22 = vpop.permute.xlu0 %807  ;;  %12152 = vst [vmem:[#allocation115_spill] sm:$0xff] %v5508_v16  ;;  %v579_v49 = vadd.f32 %v563_v29, %v443_v13  ;;  %v770_v36 = vmul.f32 %v5492_v61, %v5039_v27  ;;  %v906_v13 = vmul.f32 %v5495_v7, %v5065_v38 }
 0x1f3   :  { %12148 = vst [vmem:[#allocation112_spill] sm:$0xff] %v5466_v32  ;;  %12149 = vst [vmem:[#allocation113_spill] sm:$0xff] %v5482_v22  ;;  %v12150_v32 = vmov 10   ;;  %1349 = vrot.lane.b32.xlu0 %v5091_v48, %s4691_s29  ;;  %v699_v22 = vmul.f32 %v684_v56, %v634_v10  ;;  %v820_v10 = vsel %vm809_vm4, %v5305_v25, %v5330_v41  ;;  %v956_v56 = vsel %vm945_vm5, %v5321_v53, %v5361_v6 }
 0x1f4   :  { %4554 = vset.pattern.permute.xlu1 %v12150_v32  ;;  %v5536_v42 = vrot.slane %v313_v9, %v5508_v16  ;;  %v835_v6 = vmul.f32 %v820_v10, %v770_v36  ;;  %v971_v0 = vmul.f32 %v956_v56, %v906_v13  ;;  %v5556_v56 = vrot.slane %v4327_v2, %v5508_v16 }
 0x1f5   :  { %v715_v29 = vadd.f32 %v699_v22, %v579_v49  ;;  %v416_v22 = vsel %vm401_vm1, %v5339_v1, %v5295_v34  ;;  %v5564_v34 = vrot.slane %v5434_v33, %v5508_v16  ;;  %v552_v33 = vsel %vm537_vm2, %v5324_v55, %v5293_v15 }
 0x1f6   :  { %1191 = vrot.lane.b32.xlu1 %v5115_v58, %s4687_s28  ;;  %v5499_v32 = vpop.permute.xlu1 %1053  ;;  %v5511_v21 = vpop.permute.xlu0 %1055  ;;  %v359_v49 = vmul.f32 %v5536_v42, %v4961_v4  ;;  %12157 = vst [vmem:[#allocation120_spill] sm:$0xff] %v5556_v56  ;;  %v5595_v15 = vrot.slane %v4330_v28, %v5508_v16  ;;  %v960_v28 = vsel %vm945_vm5, %v5367_v12, %v5321_v53 }
 0x1f7   :  { %12153 = vst [vmem:[#allocation116_spill] sm:$0xff] %v5511_v21  ;;  %1593 = vrot.lane.b32.xlu0 %v4890_v40, %s4695_s21  ;;  %v5531_v21 = vrot.slane %v5504_v35, %v5413_v43  ;;  %v851_v7 = vadd.f32 %v835_v6, %v715_v29 }
 0x1f8   :  { %v426_v36 = vmul.f32 %v416_v22, %v359_v49  ;;  %v633_v49 = vmul.f32 %v5564_v34, %v5011_v17 }
 0x1f9   :  { %v1042_v9 = vmul.f32 %v5531_v21, %v5105_v47  ;;  %v987_v29 = vadd.f32 %v971_v0, %v851_v7  ;;  %v688_v0 = vsel %vm673_vm3, %v5354_v50, %v5307_v45  ;;  %v497_v7 = vmul.f32 %v5556_v56, %v4991_v11 }
 0x1fa   :  { %1199 = vrot.lane.b32.xlu1 %v5171_v30, %s4687_s28  ;;  %v5533_v41 = vpop.permute.xlu1 %1057 }
 0x1fb   :  { %12154 = vst [vmem:[#allocation117_spill] sm:$0xff] %v5533_v41  ;;  %1601 = vrot.lane.b32.xlu0 %v4941_v60, %s4695_s21  ;;  %v5547_v41 = vpop.permute.xlu0 %1059 }
 0x1fc   :  { %12155 = vst [vmem:[#allocation118_spill] sm:$0xff] %v5547_v41  ;;  %v305_v41 = vmul.f32 %v4947_v62, %v5047_v31 }
 0x1fe   :  { %1215 = vrot.lane.b32.xlu1 %v5182_v54, %s4687_s28  ;;  %v5553_v10 = vpop.permute.xlu1 %1061  ;;  %v442_v22 = vadd.f32 %v426_v36, %v305_v41  ;;  %v11537_v36 = vmov 13  }
 0x1ff   :  { %12156 = vst [vmem:[#allocation119_spill] sm:$0xff] %v5553_v10  ;;  %v1092_v6 = vsel %vm1081_vm6, %v5499_v32, %v5553_v10  ;;  %1617 = vrot.lane.b32.xlu0 %v4949_v63, %s4695_s21 }
 0x200   :  { %v1107_v13 = vmul.f32 %v1092_v6, %v1042_v9  ;;  %v5588_v9 = vpop.permute.xlu0 %1063  ;;  %v5592_v6 = vrot.slane %v4329_v59, %v5508_v16  ;;  %v824_v59 = vsel %vm809_vm4, %v5337_v57, %v5305_v25  ;;  %v5621_v25 = vrot.slane %v5504_v35, %v5508_v16 }
 0x201   :  { %12159 = vst [vmem:[#allocation122_spill] sm:$0xff] %v5588_v9 }
 0x202   :  { %v5570_v2 = vadd.f32 %v1107_v13, %v987_v29  ;;  %1459 = vrot.lane.b32.xlu1 %v4967_v5, %s4693_s30  ;;  %v5574_v1 = vpop.permute.xlu1 %1065  ;;  %v562_v29 = vmul.f32 %v552_v33, %v497_v7  ;;  %v698_v13 = vmul.f32 %v688_v0, %v633_v49  ;;  %v769_v33 = vmul.f32 %v5592_v6, %v5039_v27 }
 0x203   :  { %12158 = vst [vmem:[#allocation121_spill] sm:$0xff] %v5574_v1  ;;  %1821 = vperm.xlu0 %4553, %v4854_v26   ;;  %v905_v7 = vmul.f32 %v5595_v15, %v5065_v38 }
 0x204   :  { %v578_v41 = vadd.f32 %v562_v29, %v442_v22  ;;  %v5615_v22 = vpop.permute.xlu0 %1067  ;;  %v834_v53 = vmul.f32 %v824_v59, %v769_v33  ;;  %v5646_v33 = vld [vmem:[%s11419_s2] sm:$0xff] }
 0x205   :  { %12161 = vst [vmem:[#allocation124_spill] sm:$0xff] %v5615_v22 }
 0x206   :  { %1467 = vrot.lane.b32.xlu1 %v5004_v14, %s4693_s30  ;;  %v5599_v45 = vpop.permute.xlu1 %1069  ;;  %v714_v0 = vadd.f32 %v698_v13, %v578_v41  ;;  %v1041_v13 = vmul.f32 %v5621_v25, %v5105_v47 }
 0x207   :  { %12160 = vst [vmem:[#allocation123_spill] sm:$0xff] %v5599_v45  ;;  %4556 = vset.pattern.permute.xlu0 %v11537_v36 }
 0x208   :  { %1953 = vperm.xlu0 %4556, %v4839_v23   ;;  %v970_v23 = vmul.f32 %v960_v28, %v905_v7  ;;  %v850_v29 = vadd.f32 %v834_v53, %v714_v0 }
 0x20a   :  { %1483 = vrot.lane.b32.xlu1 %v5013_v19, %s4693_s30  ;;  %v5623_v49 = vpop.permute.xlu1 %1073  ;;  %v986_v36 = vadd.f32 %v970_v23, %v850_v29 }
 0x20b   :  { %12162 = vst [vmem:[#allocation125_spill] sm:$0xff] %v5623_v49  ;;  %v5636_v49 = vpop.permute.xlu0 %1071 }
 0x20c   :  { %1461 = vrot.lane.b32.xlu0 %v5047_v31, %s4693_s30  ;;  %12164 = vst [vmem:[#allocation127_spill] sm:$0xff] %v5636_v49 }
 0x20e   :  { %1689 = vperm.xlu1 %4554, %v4812_v18   ;;  %v5630_v41 = vpop.permute.xlu1 %1077  ;;  %v12165_v18 = vmov 13  }
 0x20f   :  { %12163 = vst [vmem:[#allocation126_spill] sm:$0xff] %v5630_v41  ;;  %v1096_v35 = vsel %vm1081_vm6, %v5630_v41, %v5499_v32  ;;  %v5651_v32 = vpop.permute.xlu0 %1075  ;;  %v12200_v41 = vmov 15  }
 0x210   :  { %v1106_v59 = vmul.f32 %v1096_v35, %v1041_v13  ;;  %1469 = vrot.lane.b32.xlu0 %v5083_v44, %s4693_s30  ;;  %12166 = vst [vmem:[#allocation128_spill] sm:$0xff] %v5651_v32  ;;  %v11540_v13 = vmov 14   ;;  %v5689_v35 = vld [vmem:[%s11419_s2 + $0x8] sm:$0xff]  ;;  %v11582_v32 = vmov 16  }
 0x212   :  { %v5640_v28 = vadd.f32 %v1106_v59, %v986_v36  ;;  %4555 = vset.pattern.permute.xlu1 %v12165_v18 }
 0x213   :  { %1949 = vperm.xlu1 %4555, %v5646_v33   ;;  %v5660_v36 = vpop.permute.xlu0 %1079 }
 0x214   :  { %1485 = vrot.lane.b32.xlu0 %v5091_v48, %s4693_s30  ;;  %12167 = vst [vmem:[#allocation129_spill] sm:$0xff] %v5660_v36 }
 0x217   :  { %1325 = vrot.lane.b32.xlu1 %v5047_v31, %s4691_s29 }
 0x218   :  { %4557 = vset.pattern.permute.xlu1 %v12143_v51  ;;  %1729 = vrot.lane.b32.xlu0 %v4890_v40, %s4697_s23 }
 0x21b   :  { %1327 = vrot.lane.b32.xlu1 %v5115_v58, %s4691_s29 }
 0x21c   :  { %1737 = vrot.lane.b32.xlu0 %v4941_v60, %s4697_s23 }
 0x21f   :  { %1335 = vrot.lane.b32.xlu1 %v5171_v30, %s4691_s29  ;;  %v5666_v0 = vpop.permute.xlu1 %1133  ;;  %v5668_v7 = vpop.permute.xlu0 %1137 }
 0x220   :  { %12168 = vst [vmem:[#allocation130_spill] sm:$0xff] %v5666_v0  ;;  %12169 = vst [vmem:[#allocation131_spill] sm:$0xff] %v5668_v7  ;;  %1753 = vrot.lane.b32.xlu0 %v4949_v63, %s4697_s23 }
 0x223   :  { %1351 = vrot.lane.b32.xlu1 %v5182_v54, %s4691_s29  ;;  %v5674_v51 = vpop.permute.xlu1 %1141  ;;  %v5676_v53 = vpop.permute.xlu0 %1185 }
 0x224   :  { %12170 = vst [vmem:[#allocation132_spill] sm:$0xff] %v5674_v51  ;;  %12171 = vst [vmem:[#allocation133_spill] sm:$0xff] %v5676_v53  ;;  %1957 = vperm.xlu0 %4556, %v4854_v26   ;;  %v5711_v53 = vld [vmem:[%s11419_s2 + $0x18] sm:$0xff] }
 0x227   :  { %1595 = vrot.lane.b32.xlu1 %v4967_v5, %s4695_s21  ;;  %v5681_v23 = vpop.permute.xlu1 %1145  ;;  %v5683_v29 = vpop.permute.xlu0 %1273 }
 0x228   :  { %12172 = vst [vmem:[#allocation134_spill] sm:$0xff] %v5681_v23  ;;  %12173 = vst [vmem:[#allocation135_spill] sm:$0xff] %v5683_v29  ;;  %4559 = vset.pattern.permute.xlu0 %v11540_v13 }
 0x229   :  { %2089 = vperm.xlu0 %4559, %v5689_v35  }
 0x22b   :  { %1603 = vrot.lane.b32.xlu1 %v5004_v14, %s4695_s21  ;;  %v5694_v26 = vpop.permute.xlu0 %1277 }
 0x22c   :  { %12174 = vst [vmem:[#allocation136_spill] sm:$0xff] %v5694_v26  ;;  %v5696_v59 = vpop.permute.xlu1 %1269 }
 0x22d   :  { %12175 = vst [vmem:[#allocation137_spill] sm:$0xff] %v5696_v59  ;;  %1597 = vrot.lane.b32.xlu0 %v5047_v31, %s4695_s21 }
 0x22f   :  { %1619 = vrot.lane.b32.xlu1 %v5013_v19, %s4695_s21  ;;  %v5702_v13 = vpop.permute.xlu0 %1193 }
 0x230   :  { %12176 = vst [vmem:[#allocation138_spill] sm:$0xff] %v5702_v13  ;;  %v12180_v13 = vmov 14  }
 0x231   :  { %v5704_v29 = vpop.permute.xlu1 %1405  ;;  %1605 = vrot.lane.b32.xlu0 %v5083_v44, %s4695_s21 }
 0x232   :  { %12177 = vst [vmem:[#allocation139_spill] sm:$0xff] %v5704_v29 }
 0x233   :  { %1825 = vperm.xlu1 %4557, %v5711_v53   ;;  %v5714_v59 = vpop.permute.xlu0 %1209 }
 0x234   :  { %12178 = vst [vmem:[#allocation140_spill] sm:$0xff] %v5714_v59 }
 0x235   :  { %v5716_v23 = vpop.permute.xlu1 %1409  ;;  %1621 = vrot.lane.b32.xlu0 %v5091_v48, %s4695_s21 }
 0x236   :  { %12179 = vst [vmem:[#allocation141_spill] sm:$0xff] %v5716_v23 }
 0x237   :  { %4558 = vset.pattern.permute.xlu1 %v12180_v13  ;;  %v5722_v29 = vpop.permute.xlu0 %1413 }
 0x238   :  { %2085 = vperm.xlu1 %4558, %v5646_v33   ;;  %12181 = vst [vmem:[#allocation142_spill] sm:$0xff] %v5722_v29 }
 0x239   :  { %1865 = vrot.lane.b32.xlu0 %v4890_v40, %s4699_s9 }
 0x23a   :  { %v5726_v7 = vpop.permute.xlu1 %1281 }
 0x23b   :  { %12182 = vst [vmem:[#allocation143_spill] sm:$0xff] %v5726_v7 }
 0x23c   :  { %1201 = vrot.lane.b32.xlu1 %v4900_v46, %s4687_s28  ;;  %v5730_v59 = vpop.permute.xlu0 %1541 }
 0x23d   :  { %12183 = vst [vmem:[#allocation144_spill] sm:$0xff] %v5730_v59  ;;  %4560 = vset.pattern.permute.xlu1 %v12165_v18  ;;  %1873 = vrot.lane.b32.xlu0 %v4941_v60, %s4699_s9  ;;  %v5752_v18 = vld [vmem:[%s11419_s2 + $0x10] sm:$0xff] }
 0x23f   :  { %v5735_v23 = vpop.permute.xlu1 %1545 }
 0x240   :  { %12184 = vst [vmem:[#allocation145_spill] sm:$0xff] %v5735_v23  ;;  %1203 = vrot.lane.b32.xlu1 %v4975_v8, %s4687_s28  ;;  %v5739_v0 = vpop.permute.xlu0 %1329 }
 0x241   :  { %12185 = vst [vmem:[#allocation146_spill] sm:$0xff] %v5739_v0  ;;  %1889 = vrot.lane.b32.xlu0 %v4949_v63, %s4699_s9 }
 0x243   :  { %v5743_v7 = vpop.permute.xlu1 %1187 }
 0x244   :  { %12186 = vst [vmem:[#allocation147_spill] sm:$0xff] %v5743_v7  ;;  %1463 = vrot.lane.b32.xlu1 %v5115_v58, %s4693_s30  ;;  %v5747_v59 = vpop.permute.xlu0 %1345  ;;  %v11561_v7 = vmov 15  }
 0x245   :  { %12187 = vst [vmem:[#allocation148_spill] sm:$0xff] %v5747_v59  ;;  %2093 = vperm.xlu0 %4559, %v5752_v18  }
 0x247   :  { %v5755_v23 = vpop.permute.xlu1 %1195 }
 0x248   :  { %12188 = vst [vmem:[#allocation149_spill] sm:$0xff] %v5755_v23  ;;  %1471 = vrot.lane.b32.xlu1 %v5171_v30, %s4693_s30  ;;  %v5759_v0 = vpop.permute.xlu0 %1549 }
 0x249   :  { %12189 = vst [vmem:[#allocation150_spill] sm:$0xff] %v5759_v0  ;;  %4562 = vset.pattern.permute.xlu0 %v11561_v7 }
 0x24a   :  { %2225 = vperm.xlu0 %4562, %v5689_v35  }
 0x24b   :  { %v5763_v59 = vpop.permute.xlu1 %1211 }
 0x24c   :  { %12190 = vst [vmem:[#allocation151_spill] sm:$0xff] %v5763_v59  ;;  %1487 = vrot.lane.b32.xlu1 %v5182_v54, %s4693_s30 }
 0x24d   :  { %v5767_v36 = vpop.permute.xlu0 %1681 }
 0x24e   :  { %12191 = vst [vmem:[#allocation152_spill] sm:$0xff] %v5767_v36  ;;  %1473 = vrot.lane.b32.xlu0 %v4900_v46, %s4693_s30 }
 0x24f   :  { %v5771_v23 = vpop.permute.xlu1 %1417 }
 0x250   :  { %12192 = vst [vmem:[#allocation153_spill] sm:$0xff] %v5771_v23  ;;  %1731 = vrot.lane.b32.xlu1 %v4967_v5, %s4697_s23 }
 0x251   :  { %v5775_v49 = vpop.permute.xlu0 %1197 }
 0x252   :  { %12193 = vst [vmem:[#allocation154_spill] sm:$0xff] %v5775_v49  ;;  %1733 = vrot.lane.b32.xlu0 %v5047_v31, %s4697_s23 }
 0x254   :  { %1739 = vrot.lane.b32.xlu1 %v5004_v14, %s4697_s23  ;;  %v5781_v7 = vpop.permute.xlu1 %1677 }
 0x255   :  { %12194 = vst [vmem:[#allocation155_spill] sm:$0xff] %v5781_v7  ;;  %v5783_v59 = vpop.permute.xlu0 %1213 }
 0x256   :  { %12195 = vst [vmem:[#allocation156_spill] sm:$0xff] %v5783_v59  ;;  %1741 = vrot.lane.b32.xlu0 %v5083_v44, %s4697_s23 }
 0x258   :  { %1755 = vrot.lane.b32.xlu1 %v5013_v19, %s4697_s23  ;;  %v5789_v36 = vpop.permute.xlu1 %1321 }
 0x259   :  { %12196 = vst [vmem:[#allocation157_spill] sm:$0xff] %v5789_v36  ;;  %v5791_v23 = vpop.permute.xlu0 %1457 }
 0x25a   :  { %12197 = vst [vmem:[#allocation158_spill] sm:$0xff] %v5791_v23  ;;  %1757 = vrot.lane.b32.xlu0 %v5091_v48, %s4697_s23 }
 0x25c   :  { %1961 = vperm.xlu1 %4560, %v5711_v53   ;;  %v5796_v1 = vpop.permute.xlu1 %1323 }
 0x25d   :  { %12198 = vst [vmem:[#allocation159_spill] sm:$0xff] %v5796_v1  ;;  %v5798_v7 = vpop.permute.xlu0 %1465 }
 0x25e   :  { %12199 = vst [vmem:[#allocation160_spill] sm:$0xff] %v5798_v7  ;;  %2001 = vrot.lane.b32.xlu0 %v4890_v40, %s4701_s12 }
 0x260   :  { %4561 = vset.pattern.permute.xlu1 %v12200_v41  ;;  %v5803_v9 = vpop.permute.xlu1 %1331 }
 0x261   :  { %12201 = vst [vmem:[#allocation161_spill] sm:$0xff] %v5803_v9  ;;  %2221 = vperm.xlu1 %4561, %v5646_v33   ;;  %v5806_v23 = vpop.permute.xlu0 %1481 }
 0x262   :  { %12202 = vst [vmem:[#allocation162_spill] sm:$0xff] %v5806_v23  ;;  %2009 = vrot.lane.b32.xlu0 %v4941_v60, %s4701_s12 }
 0x264   :  { %v5810_v36 = vpop.permute.xlu1 %1347 }
 0x265   :  { %12203 = vst [vmem:[#allocation163_spill] sm:$0xff] %v5810_v36  ;;  %1337 = vrot.lane.b32.xlu1 %v4900_v46, %s4691_s29  ;;  %v5814_v7 = vpop.permute.xlu0 %1685  ;;  %v4332_v36 = vld [vmem:[%s11421_s3 + $0x6] ss:$8 sm:$0xf] }
 0x266   :  { %12204 = vst [vmem:[#allocation164_spill] sm:$0xff] %v5814_v7  ;;  %4563 = vset.pattern.permute.xlu1 %v12180_v13  ;;  %2017 = vrot.lane.b32.xlu0 %v4900_v46, %s4701_s12  ;;  %v5834_v9 = vrot.slane %v4332_v36, %v5413_v43 }
 0x268   :  { %v5819_v1 = vpop.permute.xlu1 %1553  ;;  %12208 = vst [vmem:[#allocation168_spill] sm:$0xff] %v5834_v9 }
 0x269   :  { %12205 = vst [vmem:[#allocation165_spill] sm:$0xff] %v5819_v1  ;;  %1339 = vrot.lane.b32.xlu1 %v4975_v8, %s4691_s29  ;;  %v5837_v1 = vrot.slane %v4332_v36, %v5508_v16 }
 0x26a   :  { %2229 = vperm.xlu0 %4562, %v5752_v18   ;;  %v5824_v23 = vpop.permute.xlu0 %1817 }
 0x26b   :  { %12206 = vst [vmem:[#allocation166_spill] sm:$0xff] %v5824_v23  ;;  %12209 = vst [vmem:[#allocation169_spill] sm:$0xff] %v5837_v1  ;;  %v1177_v23 = vmul.f32 %v5837_v1, %v5674_v51 }
 0x26d   :  { %1599 = vrot.lane.b32.xlu1 %v5115_v58, %s4695_s21  ;;  %v5831_v13 = vpop.permute.xlu1 %1813 }
 0x26e   :  { %12207 = vst [vmem:[#allocation167_spill] sm:$0xff] %v5831_v13  ;;  %4565 = vset.pattern.permute.xlu0 %v11582_v32  ;;  %v5840_v10 = vpop.permute.xlu0 %1333  ;;  %v1178_v13 = vmul.f32 %v5834_v9, %v5674_v51 }
 0x26f   :  { %12210 = vst [vmem:[#allocation170_spill] sm:$0xff] %v5840_v10  ;;  %2361 = vperm.xlu0 %4565, %v5689_v35  }
 0x271   :  { %1607 = vrot.lane.b32.xlu1 %v5171_v30, %s4695_s21  ;;  %v1190_v36 = vpop.permute.xlu1 %1189 }
 0x272   :  { %v1228_v32 = vsel %vm1217_vm7, %v1190_v36, %v5775_v49  ;;  %v1232_v45 = vsel %vm1217_vm7, %v5783_v59, %v1190_v36  ;;  %v5856_v57 = vpop.permute.xlu0 %1349  ;;  %v12222_v36 = vmov 16  }
 0x273   :  { %v1242_v22 = vmul.f32 %v1232_v45, %v1177_v23  ;;  %v1243_v12 = vmul.f32 %v1228_v32, %v1178_v13  ;;  %12211 = vst [vmem:[#allocation171_spill] sm:$0xff] %v5856_v57  ;;  %1609 = vrot.lane.b32.xlu0 %v4900_v46, %s4695_s21 }
 0x275   :  { %v5861_v1 = vadd.f32 %v1242_v22, %v5640_v28  ;;  %v5864_v51 = vadd.f32 %v1243_v12, %v5570_v2  ;;  %1623 = vrot.lane.b32.xlu1 %v5182_v54, %s4695_s21  ;;  %v5868_v49 = vpop.permute.xlu1 %1191 }
 0x276   :  { %12212 = vst [vmem:[#allocation172_spill] sm:$0xff] %v5868_v49  ;;  %v5870_v9 = vpop.permute.xlu0 %1593 }
 0x277   :  { %12213 = vst [vmem:[#allocation173_spill] sm:$0xff] %v5870_v9  ;;  %1869 = vrot.lane.b32.xlu0 %v5047_v31, %s4699_s9 }
 0x279   :  { %1867 = vrot.lane.b32.xlu1 %v4967_v5, %s4699_s9  ;;  %v5876_v45 = vpop.permute.xlu1 %1199 }
 0x27a   :  { %12214 = vst [vmem:[#allocation174_spill] sm:$0xff] %v5876_v45  ;;  %v5878_v22 = vpop.permute.xlu0 %1601  ;;  %v11608_v45 = vmov 17  }
 0x27b   :  { %12215 = vst [vmem:[#allocation175_spill] sm:$0xff] %v5878_v22  ;;  %1877 = vrot.lane.b32.xlu0 %v5083_v44, %s4699_s9 }
 0x27d   :  { %1875 = vrot.lane.b32.xlu1 %v5004_v14, %s4699_s9  ;;  %v5884_v12 = vpop.permute.xlu1 %1215 }
 0x27e   :  { %12216 = vst [vmem:[#allocation176_spill] sm:$0xff] %v5884_v12  ;;  %v5886_v2 = vpop.permute.xlu0 %1617  ;;  %v4333_v12 = vld [vmem:[%s11421_s3 + $0x7] ss:$8 sm:$0xf] }
 0x27f   :  { %12217 = vst [vmem:[#allocation177_spill] sm:$0xff] %v5886_v2  ;;  %1893 = vrot.lane.b32.xlu0 %v5091_v48, %s4699_s9  ;;  %v5926_v9 = vrot.slane %v4333_v12, %v5508_v16 }
 0x281   :  { %1891 = vrot.lane.b32.xlu1 %v5013_v19, %s4699_s9  ;;  %v5892_v28 = vpop.permute.xlu1 %1459  ;;  %12226 = vst [vmem:[#allocation185_spill] sm:$0xff] %v5926_v9 }
 0x282   :  { %12218 = vst [vmem:[#allocation178_spill] sm:$0xff] %v5892_v28  ;;  %v5894_v32 = vpop.permute.xlu0 %1821 }
 0x283   :  { %12219 = vst [vmem:[#allocation179_spill] sm:$0xff] %v5894_v32  ;;  %2137 = vrot.lane.b32.xlu0 %v4890_v40, %s4703_s15 }
 0x285   :  { %2097 = vperm.xlu1 %4563, %v5711_v53   ;;  %v5899_v23 = vpop.permute.xlu1 %1467 }
 0x286   :  { %12220 = vst [vmem:[#allocation180_spill] sm:$0xff] %v5899_v23 }
 0x287   :  { %2145 = vrot.lane.b32.xlu0 %v4941_v60, %s4703_s15  ;;  %v5903_v13 = vpop.permute.xlu0 %1953 }
 0x288   :  { %12221 = vst [vmem:[#allocation181_spill] sm:$0xff] %v5903_v13 }
 0x289   :  { %4564 = vset.pattern.permute.xlu1 %v12222_v36  ;;  %v5906_v59 = vpop.permute.xlu1 %1483 }
 0x28a   :  { %12223 = vst [vmem:[#allocation182_spill] sm:$0xff] %v5906_v59  ;;  %2357 = vperm.xlu1 %4564, %v5646_v33   ;;  %v4334_v59 = vld [vmem:[%s11421_s3 + $0x20] ss:$8 sm:$0xf] }
 0x28b   :  { %2153 = vrot.lane.b32.xlu0 %v4900_v46, %s4703_s15  ;;  %v1462_v32 = vpop.permute.xlu0 %1461  ;;  %v5939_v49 = vrot.slane %v4334_v59, %v5508_v16 }
 0x28d   :  { %v5911_v2 = vpop.permute.xlu1 %1689  ;;  %12230 = vst [vmem:[#allocation189_spill] sm:$0xff] %v5939_v49 }
 0x28e   :  { %12224 = vst [vmem:[#allocation183_spill] sm:$0xff] %v5911_v2  ;;  %1205 = vrot.lane.b32.xlu1 %v5059_v37, %s4687_s28  ;;  %v5929_v2 = vrot.slane %v4333_v12, %v5413_v43  ;;  %v1313_v12 = vmul.f32 %v5926_v9, %v5694_v26 }
 0x28f   :  { %4566 = vset.pattern.permute.xlu1 %v12200_v41  ;;  %2365 = vperm.xlu0 %4565, %v5752_v18   ;;  %v5920_v13 = vpop.permute.xlu0 %1469  ;;  %v5936_v41 = vrot.slane %v4334_v59, %v5413_v43 }
 0x290   :  { %12225 = vst [vmem:[#allocation184_spill] sm:$0xff] %v5920_v13  ;;  %12227 = vst [vmem:[#allocation186_spill] sm:$0xff] %v5929_v2  ;;  %v1314_v23 = vmul.f32 %v5929_v2, %v5694_v26  ;;  %v1500_v26 = vsel %vm1489_vm9, %v1462_v32, %v5920_v13 }
 0x291   :  { %12229 = vst [vmem:[#allocation188_spill] sm:$0xff] %v5936_v41  ;;  %v1450_v59 = vmul.f32 %v5936_v41, %v5722_v29 }
 0x292   :  { %1207 = vrot.lane.b32.xlu1 %v5127_v52, %s4687_s28  ;;  %v5933_v22 = vpop.permute.xlu1 %1949  ;;  %s4705_s28 = smov 114  }
 0x293   :  { %12228 = vst [vmem:[#allocation187_spill] sm:$0xff] %v5933_v22  ;;  %4568 = vset.pattern.permute.xlu0 %v11608_v45  ;;  %v5942_v28 = vpop.permute.xlu0 %1485  ;;  %v1449_v45 = vmul.f32 %v5939_v49, %v5722_v29  ;;  %v1515_v13 = vmul.f32 %v1500_v26, %v1450_v59  ;;  %v4335_v26 = vld [vmem:[%s11421_s3 + $0x21] ss:$8 sm:$0xf] }
 0x294   :  { %12231 = vst [vmem:[#allocation190_spill] sm:$0xff] %v5942_v28  ;;  %2497 = vperm.xlu0 %4568, %v5689_v35   ;;  %v1504_v9 = vsel %vm1489_vm9, %v5942_v28, %v1462_v32 }
 0x295   :  { %v1514_v55 = vmul.f32 %v1504_v9, %v1449_v45 }
 0x296   :  { %1475 = vrot.lane.b32.xlu1 %v4975_v8, %s4693_s30  ;;  %v1326_v22 = vpop.permute.xlu1 %1325 }
 0x297   :  { %v1364_v2 = vsel %vm1353_vm8, %v1326_v22, %v5840_v10  ;;  %v1368_v29 = vsel %vm1353_vm8, %v5856_v57, %v1326_v22  ;;  %v5969_v50 = vpop.permute.xlu0 %1729 }
 0x298   :  { %v1378_v49 = vmul.f32 %v1368_v29, %v1313_v12  ;;  %v1379_v41 = vmul.f32 %v1364_v2, %v1314_v23  ;;  %12232 = vst [vmem:[#allocation191_spill] sm:$0xff] %v5969_v50  ;;  %1745 = vrot.lane.b32.xlu0 %v4900_v46, %s4697_s23  ;;  %v6015_v2 = vrot.slane %v4335_v26, %v5413_v43 }
 0x299   :  { %v6027_v12 = vrot.slane %v4335_v26, %v5508_v16 }
 0x29a   :  { %v1394_v62 = vadd.f32 %v1378_v49, %v5861_v1  ;;  %v1395_v32 = vadd.f32 %v1379_v41, %v5864_v51  ;;  %1735 = vrot.lane.b32.xlu1 %v5115_v58, %s4697_s23  ;;  %v5977_v28 = vpop.permute.xlu1 %1327  ;;  %12242 = vst [vmem:[#allocation201_spill] sm:$0xff] %v6015_v2  ;;  %v1586_v41 = vmul.f32 %v6015_v2, %v5759_v0 }
 0x29b   :  { %12233 = vst [vmem:[#allocation192_spill] sm:$0xff] %v5977_v28  ;;  %v5979_v10 = vpop.permute.xlu0 %1737  ;;  %12244 = vst [vmem:[#allocation203_spill] sm:$0xff] %v6027_v12  ;;  %v12248_v28 = vmov 17  }
 0x29c   :  { %12234 = vst [vmem:[#allocation193_spill] sm:$0xff] %v5979_v10  ;;  %v1531_v29 = vadd.f32 %v1515_v13, %v1395_v32  ;;  %v1530_v22 = vadd.f32 %v1514_v55, %v1394_v62  ;;  %2005 = vrot.lane.b32.xlu0 %v5047_v31, %s4701_s12 }
 0x29e   :  { %1743 = vrot.lane.b32.xlu1 %v5171_v30, %s4697_s23  ;;  %v5985_v9 = vpop.permute.xlu1 %1335 }
 0x29f   :  { %12235 = vst [vmem:[#allocation194_spill] sm:$0xff] %v5985_v9  ;;  %v5987_v1 = vpop.permute.xlu0 %1753 }
 0x2a0   :  { %12236 = vst [vmem:[#allocation195_spill] sm:$0xff] %v5987_v1  ;;  %2013 = vrot.lane.b32.xlu0 %v5083_v44, %s4701_s12 }
 0x2a2   :  { %1759 = vrot.lane.b32.xlu1 %v5182_v54, %s4697_s23  ;;  %v5993_v49 = vpop.permute.xlu1 %1351 }
 0x2a3   :  { %12237 = vst [vmem:[#allocation196_spill] sm:$0xff] %v5993_v49  ;;  %v5995_v51 = vpop.permute.xlu0 %1957 }
 0x2a4   :  { %12238 = vst [vmem:[#allocation197_spill] sm:$0xff] %v5995_v51  ;;  %2021 = vrot.lane.b32.xlu0 %v5059_v37, %s4701_s12  ;;  %v1585_v51 = vmul.f32 %v6027_v12, %v5759_v0  ;;  %v12373_v0 = vld [vmem:[#allocation14_spill] sm:$0xff]  ;;  %v12374_v12 = vld [vmem:[#allocation111_spill] sm:$0xff] }
 0x2a5   :  { %v6565_v2 = vmul.f32 %v12374_v12, %v12373_v0 }
 0x2a6   :  { %2003 = vrot.lane.b32.xlu1 %v4967_v5, %s4701_s12  ;;  %v6001_v62 = vpop.permute.xlu1 %1595 }
 0x2a7   :  { %12239 = vst [vmem:[#allocation198_spill] sm:$0xff] %v6001_v62 }
 0x2a8   :  { %2273 = vrot.lane.b32.xlu0 %v4890_v40, %s4705_s28  ;;  %v6005_v55 = vpop.permute.xlu0 %2089 }
 0x2a9   :  { %12240 = vst [vmem:[#allocation199_spill] sm:$0xff] %v6005_v55 }
 0x2aa   :  { %2011 = vrot.lane.b32.xlu1 %v5004_v14, %s4701_s12  ;;  %v6012_v45 = vpop.permute.xlu1 %1603 }
 0x2ab   :  { %12241 = vst [vmem:[#allocation200_spill] sm:$0xff] %v6012_v45  ;;  %v12369_v45 = vld [vmem:[#allocation12_spill] sm:$0xff] }
 0x2ac   :  { %2281 = vrot.lane.b32.xlu0 %v4941_v60, %s4705_s28  ;;  %v1598_v23 = vpop.permute.xlu0 %1597 }
 0x2ae   :  { %2019 = vrot.lane.b32.xlu1 %v4975_v8, %s4701_s12  ;;  %v6021_v13 = vpop.permute.xlu1 %1619 }
 0x2af   :  { %12243 = vst [vmem:[#allocation202_spill] sm:$0xff] %v6021_v13 }
 0x2b0   :  { %2289 = vrot.lane.b32.xlu0 %v4900_v46, %s4705_s28  ;;  %v6031_v59 = vpop.permute.xlu0 %1605 }
 0x2b1   :  { %12245 = vst [vmem:[#allocation204_spill] sm:$0xff] %v6031_v59  ;;  %v1636_v32 = vsel %vm1625_vm10, %v1598_v23, %v6031_v59 }
 0x2b2   :  { %2233 = vperm.xlu1 %4566, %v5711_v53   ;;  %v6037_v57 = vpop.permute.xlu1 %1825  ;;  %v1651_v55 = vmul.f32 %v1636_v32, %v1586_v41  ;;  %v11638_v32 = vmov 18  }
 0x2b3   :  { %12246 = vst [vmem:[#allocation205_spill] sm:$0xff] %v6037_v57 }
 0x2b4   :  { %v1667_v49 = vadd.f32 %v1651_v55, %v1531_v29  ;;  %2501 = vperm.xlu0 %4568, %v5752_v18   ;;  %v6042_v26 = vpop.permute.xlu0 %1621 }
 0x2b5   :  { %12247 = vst [vmem:[#allocation206_spill] sm:$0xff] %v6042_v26  ;;  %v1640_v1 = vsel %vm1625_vm10, %v6042_v26, %v1598_v23 }
 0x2b6   :  { %4567 = vset.pattern.permute.xlu1 %v12248_v28  ;;  %v1650_v59 = vmul.f32 %v1640_v1, %v1585_v51 }
 0x2b7   :  { %2493 = vperm.xlu1 %4567, %v5646_v33   ;;  %v6049_v9 = vpop.permute.xlu1 %2085 }
 0x2b8   :  { %12249 = vst [vmem:[#allocation207_spill] sm:$0xff] %v6049_v9  ;;  %v1666_v41 = vadd.f32 %v1650_v59, %v1530_v22  ;;  %4571 = vset.pattern.permute.xlu0 %v11638_v32  ;;  %v6052_v29 = vpop.permute.xlu0 %1865 }
 0x2b9   :  { %12250 = vst [vmem:[#allocation208_spill] sm:$0xff] %v6052_v29  ;;  %2633 = vperm.xlu0 %4571, %v5689_v35  }
 0x2bb   :  { %1341 = vrot.lane.b32.xlu1 %v5059_v37, %s4691_s29  ;;  %v6057_v55 = vpop.permute.xlu1 %1201 }
 0x2bc   :  { %12251 = vst [vmem:[#allocation209_spill] sm:$0xff] %v6057_v55  ;;  %4569 = vset.pattern.permute.xlu1 %v12222_v36  ;;  %v6060_v1 = vpop.permute.xlu0 %1873 }
 0x2bd   :  { %12252 = vst [vmem:[#allocation210_spill] sm:$0xff] %v6060_v1  ;;  %1881 = vrot.lane.b32.xlu0 %v4900_v46, %s4699_s9 }
 0x2bf   :  { %1343 = vrot.lane.b32.xlu1 %v5127_v52, %s4691_s29  ;;  %v6066_v22 = vpop.permute.xlu1 %1203  ;;  %s4707_s29 = smov 113  }
 0x2c0   :  { %12253 = vst [vmem:[#allocation211_spill] sm:$0xff] %v6066_v22  ;;  %v6068_v51 = vpop.permute.xlu0 %1889 }
 0x2c1   :  { %12254 = vst [vmem:[#allocation212_spill] sm:$0xff] %v6068_v51  ;;  %2141 = vrot.lane.b32.xlu0 %v5047_v31, %s4703_s15 }
 0x2c3   :  { %1611 = vrot.lane.b32.xlu1 %v4975_v8, %s4695_s21  ;;  %v6074_v23 = vpop.permute.xlu1 %1463 }
 0x2c4   :  { %12255 = vst [vmem:[#allocation213_spill] sm:$0xff] %v6074_v23  ;;  %v6076_v36 = vpop.permute.xlu0 %2093 }
 0x2c5   :  { %12256 = vst [vmem:[#allocation214_spill] sm:$0xff] %v6076_v36  ;;  %2149 = vrot.lane.b32.xlu0 %v5083_v44, %s4703_s15 }
 0x2c7   :  { %1871 = vrot.lane.b32.xlu1 %v5115_v58, %s4699_s9  ;;  %v6082_v59 = vpop.permute.xlu1 %1471 }
 0x2c8   :  { %12257 = vst [vmem:[#allocation215_spill] sm:$0xff] %v6082_v59 }
 0x2c9   :  { %2157 = vrot.lane.b32.xlu0 %v5059_v37, %s4703_s15  ;;  %v6086_v32 = vpop.permute.xlu0 %2225 }
 0x2ca   :  { %12258 = vst [vmem:[#allocation216_spill] sm:$0xff] %v6086_v32  ;;  %v4336_v32 = vld [vmem:[%s11421_s3 + $0x22] ss:$8 sm:$0xf] }
 0x2cb   :  { %1879 = vrot.lane.b32.xlu1 %v5171_v30, %s4699_s9  ;;  %v6090_v26 = vpop.permute.xlu1 %1487  ;;  %v6127_v29 = vrot.slane %v4336_v32, %v5508_v16 }
 0x2cc   :  { %12259 = vst [vmem:[#allocation217_spill] sm:$0xff] %v6090_v26 }
 0x2cd   :  { %2409 = vrot.lane.b32.xlu0 %v4890_v40, %s4707_s29  ;;  %v6094_v36 = vpop.permute.xlu0 %1473  ;;  %12266 = vst [vmem:[#allocation224_spill] sm:$0xff] %v6127_v29  ;;  %v1721_v57 = vmul.f32 %v6127_v29, %v5814_v7 }
 0x2ce   :  { %12260 = vst [vmem:[#allocation218_spill] sm:$0xff] %v6094_v36  ;;  %v6110_v36 = vrot.slane %v4336_v32, %v5413_v43 }
 0x2cf   :  { %1895 = vrot.lane.b32.xlu1 %v5182_v54, %s4699_s9  ;;  %v6098_v23 = vpop.permute.xlu1 %1731 }
 0x2d0   :  { %12261 = vst [vmem:[#allocation219_spill] sm:$0xff] %v6098_v23  ;;  %12263 = vst [vmem:[#allocation221_spill] sm:$0xff] %v6110_v36  ;;  %v1722_v51 = vmul.f32 %v6110_v36, %v5814_v7  ;;  %v6553_v7 = vmul.f32 %v5427_v20, %v12369_v45 }
 0x2d1   :  { %2417 = vrot.lane.b32.xlu0 %v4941_v60, %s4707_s29  ;;  %v1734_v59 = vpop.permute.xlu0 %1733 }
 0x2d2   :  { %12370 = vst [vmem:[#allocation12_spill] sm:$0xff] %v6553_v7 }
 0x2d3   :  { %2139 = vrot.lane.b32.xlu1 %v4967_v5, %s4703_s15  ;;  %v6107_v26 = vpop.permute.xlu1 %1739 }
 0x2d4   :  { %12262 = vst [vmem:[#allocation220_spill] sm:$0xff] %v6107_v26 }
 0x2d5   :  { %2425 = vrot.lane.b32.xlu0 %v4900_v46, %s4707_s29  ;;  %v6117_v23 = vpop.permute.xlu0 %1741 }
 0x2d6   :  { %12264 = vst [vmem:[#allocation222_spill] sm:$0xff] %v6117_v23  ;;  %v1772_v9 = vsel %vm1761_vm11, %v1734_v59, %v6117_v23 }
 0x2d7   :  { %2147 = vrot.lane.b32.xlu1 %v5004_v14, %s4703_s15  ;;  %v6124_v26 = vpop.permute.xlu1 %1755  ;;  %v1787_v1 = vmul.f32 %v1772_v9, %v1722_v51 }
 0x2d8   :  { %12265 = vst [vmem:[#allocation223_spill] sm:$0xff] %v6124_v26 }
 0x2d9   :  { %v6129_v55 = vadd.f32 %v1787_v1, %v1667_v49  ;;  %2637 = vperm.xlu0 %4571, %v5752_v18   ;;  %v6134_v22 = vpop.permute.xlu0 %1757  ;;  %v11659_v49 = vmov 19  }
 0x2da   :  { %12268 = vst [vmem:[#allocation226_spill] sm:$0xff] %v6134_v22  ;;  %v1776_v23 = vsel %vm1761_vm11, %v6134_v22, %v1734_v59  ;;  %v12274_v22 = vmov 18  }
 0x2db   :  { %12267 = vst [vmem:[#allocation225_spill] sm:$0xff] %v6129_v55  ;;  %2155 = vrot.lane.b32.xlu1 %v4975_v8, %s4703_s15  ;;  %v6141_v26 = vpop.permute.xlu1 %1961  ;;  %v1786_v32 = vmul.f32 %v1776_v23, %v1721_v57 }
 0x2dc   :  { %12269 = vst [vmem:[#allocation227_spill] sm:$0xff] %v6141_v26 }
 0x2dd   :  { %v6143_v9 = vadd.f32 %v1786_v32, %v1666_v41  ;;  %4574 = vset.pattern.permute.xlu0 %v11659_v49  ;;  %v6146_v1 = vpop.permute.xlu0 %2001 }
 0x2de   :  { %12271 = vst [vmem:[#allocation229_spill] sm:$0xff] %v6146_v1  ;;  %2769 = vperm.xlu0 %4574, %v5689_v35   ;;  %v4643_v1 = vld [vmem:[%s11421_s3 + $0x1] ss:$8 sm:$0xf] }
 0x2df   :  { %12270 = vst [vmem:[#allocation228_spill] sm:$0xff] %v6143_v9  ;;  %2369 = vperm.xlu1 %4569, %v5711_v53  }
 0x2e0   :  { %v6150_v51 = vpop.permute.xlu1 %2221 }
 0x2e1   :  { %12272 = vst [vmem:[#allocation230_spill] sm:$0xff] %v6150_v51  ;;  %v6152_v59 = vpop.permute.xlu0 %2009 }
 0x2e2   :  { %12273 = vst [vmem:[#allocation231_spill] sm:$0xff] %v6152_v59  ;;  %2025 = vrot.lane.b32.xlu0 %v4949_v63, %s4701_s12 }
 0x2e3   :  { %4570 = vset.pattern.permute.xlu1 %v12274_v22 }
 0x2e4   :  { %2629 = vperm.xlu1 %4570, %v5646_v33   ;;  %v6158_v57 = vpop.permute.xlu1 %1337 }
 0x2e5   :  { %12275 = vst [vmem:[#allocation232_spill] sm:$0xff] %v6158_v57  ;;  %v6160_v41 = vpop.permute.xlu0 %2017 }
 0x2e6   :  { %12276 = vst [vmem:[#allocation233_spill] sm:$0xff] %v6160_v41  ;;  %2277 = vrot.lane.b32.xlu0 %v5047_v31, %s4705_s28 }
 0x2e8   :  { %1477 = vrot.lane.b32.xlu1 %v5059_v37, %s4693_s30  ;;  %v6166_v23 = vpop.permute.xlu1 %1339 }
 0x2e9   :  { %12277 = vst [vmem:[#allocation234_spill] sm:$0xff] %v6166_v23  ;;  %4572 = vset.pattern.permute.xlu1 %v12248_v28  ;;  %v6169_v32 = vpop.permute.xlu0 %2229 }
 0x2ea   :  { %12278 = vst [vmem:[#allocation235_spill] sm:$0xff] %v6169_v32  ;;  %2285 = vrot.lane.b32.xlu0 %v5083_v44, %s4705_s28 }
 0x2ec   :  { %1479 = vrot.lane.b32.xlu1 %v5127_v52, %s4693_s30  ;;  %v6175_v49 = vpop.permute.xlu1 %1599  ;;  %s4711_s30 = smov 111  }
 0x2ed   :  { %12279 = vst [vmem:[#allocation236_spill] sm:$0xff] %v6175_v49 }
 0x2ee   :  { %2293 = vrot.lane.b32.xlu0 %v5059_v37, %s4705_s28  ;;  %v6179_v9 = vpop.permute.xlu0 %2361 }
 0x2ef   :  { %12280 = vst [vmem:[#allocation237_spill] sm:$0xff] %v6179_v9 }
 0x2f0   :  { %1747 = vrot.lane.b32.xlu1 %v4975_v8, %s4697_s23  ;;  %v6183_v55 = vpop.permute.xlu1 %1607 }
 0x2f1   :  { %12281 = vst [vmem:[#allocation238_spill] sm:$0xff] %v6183_v55 }
 0x2f2   :  { %2545 = vrot.lane.b32.xlu0 %v4890_v40, %s4709_s25  ;;  %v6187_v28 = vpop.permute.xlu0 %1609 }
 0x2f3   :  { %12282 = vst [vmem:[#allocation239_spill] sm:$0xff] %v6187_v28 }
 0x2f4   :  { %2007 = vrot.lane.b32.xlu1 %v5115_v58, %s4701_s12  ;;  %v6191_v49 = vpop.permute.xlu1 %1623 }
 0x2f5   :  { %12283 = vst [vmem:[#allocation240_spill] sm:$0xff] %v6191_v49 }
 0x2f6   :  { %2553 = vrot.lane.b32.xlu0 %v4941_v60, %s4709_s25  ;;  %v6195_v9 = vpop.permute.xlu0 %1869 }
 0x2f7   :  { %12284 = vst [vmem:[#allocation241_spill] sm:$0xff] %v6195_v9 }
 0x2f8   :  { %2015 = vrot.lane.b32.xlu1 %v5171_v30, %s4701_s12  ;;  %v6199_v55 = vpop.permute.xlu1 %1867 }
 0x2f9   :  { %12285 = vst [vmem:[#allocation242_spill] sm:$0xff] %v6199_v55  ;;  %v11673_v55 = vmov 20  }
 0x2fa   :  { %2561 = vrot.lane.b32.xlu0 %v4900_v46, %s4709_s25  ;;  %v6203_v32 = vpop.permute.xlu0 %1877 }
 0x2fb   :  { %12286 = vst [vmem:[#allocation243_spill] sm:$0xff] %v6203_v32 }
 0x2fc   :  { %2023 = vrot.lane.b32.xlu1 %v5127_v52, %s4701_s12  ;;  %v6207_v28 = vpop.permute.xlu1 %1875 }
 0x2fd   :  { %12287 = vst [vmem:[#allocation244_spill] sm:$0xff] %v6207_v28 }
 0x2fe   :  { %2773 = vperm.xlu0 %4574, %v5752_v18   ;;  %v6210_v49 = vpop.permute.xlu0 %1893 }
 0x2ff   :  { %12288 = vst [vmem:[#allocation245_spill] sm:$0xff] %v6210_v49 }
 0x300   :  { %2275 = vrot.lane.b32.xlu1 %v4967_v5, %s4705_s28  ;;  %v6214_v9 = vpop.permute.xlu1 %1891 }
 0x301   :  { %12289 = vst [vmem:[#allocation246_spill] sm:$0xff] %v6214_v9 }
 0x302   :  { %4577 = vset.pattern.permute.xlu0 %v11673_v55  ;;  %v6217_v41 = vpop.permute.xlu0 %2137 }
 0x303   :  { %12290 = vst [vmem:[#allocation247_spill] sm:$0xff] %v6217_v41  ;;  %2905 = vperm.xlu0 %4577, %v5689_v35  }
 0x304   :  { %2283 = vrot.lane.b32.xlu1 %v5004_v14, %s4705_s28  ;;  %v6222_v28 = vpop.permute.xlu1 %2097 }
 0x305   :  { %12291 = vst [vmem:[#allocation248_spill] sm:$0xff] %v6222_v28 }
 0x306   :  { %v6224_v32 = vpop.permute.xlu0 %2145 }
 0x307   :  { %12292 = vst [vmem:[#allocation249_spill] sm:$0xff] %v6224_v32  ;;  %2161 = vrot.lane.b32.xlu0 %v4949_v63, %s4703_s15  ;;  %v12297_v32 = vmov 19  }
 0x308   :  { %2291 = vrot.lane.b32.xlu1 %v4975_v8, %s4705_s28 }
 0x309   :  { %v6230_v9 = vpop.permute.xlu1 %2357 }
 0x30a   :  { %12293 = vst [vmem:[#allocation250_spill] sm:$0xff] %v6230_v9  ;;  %v6232_v55 = vpop.permute.xlu0 %2153 }
 0x30b   :  { %12294 = vst [vmem:[#allocation251_spill] sm:$0xff] %v6232_v55  ;;  %2413 = vrot.lane.b32.xlu0 %v5047_v31, %s4707_s29 }
 0x30c   :  { %2505 = vperm.xlu1 %4572, %v5711_v53  }
 0x30d   :  { %v6237_v41 = vpop.permute.xlu1 %1205 }
 0x30e   :  { %12295 = vst [vmem:[#allocation252_spill] sm:$0xff] %v6237_v41  ;;  %v6239_v28 = vpop.permute.xlu0 %2365 }
 0x30f   :  { %12296 = vst [vmem:[#allocation253_spill] sm:$0xff] %v6239_v28  ;;  %2421 = vrot.lane.b32.xlu0 %v5083_v44, %s4707_s29 }
 0x310   :  { %4573 = vset.pattern.permute.xlu1 %v12297_v32 }
 0x311   :  { %2765 = vperm.xlu1 %4573, %v5646_v33   ;;  %v6245_v49 = vpop.permute.xlu1 %1207 }
 0x312   :  { %12298 = vst [vmem:[#allocation254_spill] sm:$0xff] %v6245_v49 }
 0x313   :  { %2429 = vrot.lane.b32.xlu0 %v5059_v37, %s4707_s29  ;;  %v6249_v9 = vpop.permute.xlu0 %2497 }
 0x314   :  { %12299 = vst [vmem:[#allocation255_spill] sm:$0xff] %v6249_v9 }
 0x315   :  { %1613 = vrot.lane.b32.xlu1 %v5059_v37, %s4695_s21  ;;  %v6253_v55 = vpop.permute.xlu1 %1475 }
 0x316   :  { %12300 = vst [vmem:[#allocation256_spill] sm:$0xff] %v6253_v55  ;;  %4575 = vset.pattern.permute.xlu1 %v12274_v22 }
 0x317   :  { %2681 = vrot.lane.b32.xlu0 %v4890_v40, %s4711_s30  ;;  %v6258_v28 = vpop.permute.xlu0 %1745 }
 0x318   :  { %12301 = vst [vmem:[#allocation257_spill] sm:$0xff] %v6258_v28 }
 0x319   :  { %1615 = vrot.lane.b32.xlu1 %v5127_v52, %s4695_s21  ;;  %v6262_v49 = vpop.permute.xlu1 %1735  ;;  %s4713_s21 = smov 110  }
 0x31a   :  { %12302 = vst [vmem:[#allocation258_spill] sm:$0xff] %v6262_v49 }
 0x31b   :  { %2689 = vrot.lane.b32.xlu0 %v4941_v60, %s4711_s30  ;;  %v6266_v9 = vpop.permute.xlu0 %2005 }
 0x31c   :  { %12303 = vst [vmem:[#allocation259_spill] sm:$0xff] %v6266_v9 }
 0x31d   :  { %1883 = vrot.lane.b32.xlu1 %v4975_v8, %s4699_s9  ;;  %v6270_v22 = vpop.permute.xlu1 %1743 }
 0x31e   :  { %12304 = vst [vmem:[#allocation260_spill] sm:$0xff] %v6270_v22  ;;  %v11693_v22 = vmov 21  }
 0x31f   :  { %2697 = vrot.lane.b32.xlu0 %v4900_v46, %s4711_s30  ;;  %v6274_v55 = vpop.permute.xlu0 %2013 }
 0x320   :  { %12305 = vst [vmem:[#allocation261_spill] sm:$0xff] %v6274_v55 }
 0x321   :  { %2143 = vrot.lane.b32.xlu1 %v5115_v58, %s4703_s15  ;;  %v6278_v28 = vpop.permute.xlu1 %1759 }
 0x322   :  { %12306 = vst [vmem:[#allocation262_spill] sm:$0xff] %v6278_v28 }
 0x323   :  { %2909 = vperm.xlu0 %4577, %v5752_v18   ;;  %v6281_v49 = vpop.permute.xlu0 %2021 }
 0x324   :  { %12307 = vst [vmem:[#allocation263_spill] sm:$0xff] %v6281_v49 }
 0x325   :  { %2151 = vrot.lane.b32.xlu1 %v5171_v30, %s4703_s15  ;;  %v6285_v9 = vpop.permute.xlu1 %2003 }
 0x326   :  { %12308 = vst [vmem:[#allocation264_spill] sm:$0xff] %v6285_v9 }
 0x327   :  { %4580 = vset.pattern.permute.xlu0 %v11693_v22  ;;  %v6288_v41 = vpop.permute.xlu0 %2273 }
 0x328   :  { %12309 = vst [vmem:[#allocation265_spill] sm:$0xff] %v6288_v41  ;;  %3041 = vperm.xlu0 %4580, %v5689_v35  }
 0x329   :  { %2159 = vrot.lane.b32.xlu1 %v5127_v52, %s4703_s15  ;;  %v6293_v28 = vpop.permute.xlu1 %2011 }
 0x32a   :  { %12310 = vst [vmem:[#allocation266_spill] sm:$0xff] %v6293_v28 }
 0x32b   :  { %v6295_v55 = vpop.permute.xlu0 %2281 }
 0x32c   :  { %12311 = vst [vmem:[#allocation267_spill] sm:$0xff] %v6295_v55  ;;  %2297 = vrot.lane.b32.xlu0 %v4949_v63, %s4705_s28 }
 0x32d   :  { %2411 = vrot.lane.b32.xlu1 %v4967_v5, %s4707_s29  ;;  %v6301_v9 = vpop.permute.xlu1 %2019 }
 0x32e   :  { %12312 = vst [vmem:[#allocation268_spill] sm:$0xff] %v6301_v9 }
 0x32f   :  { %v6303_v22 = vpop.permute.xlu0 %2289 }
 0x330   :  { %12313 = vst [vmem:[#allocation269_spill] sm:$0xff] %v6303_v22  ;;  %2549 = vrot.lane.b32.xlu0 %v5047_v31, %s4709_s25 }
 0x331   :  { %2419 = vrot.lane.b32.xlu1 %v5004_v14, %s4707_s29  ;;  %v6309_v41 = vpop.permute.xlu1 %2233 }
 0x332   :  { %12314 = vst [vmem:[#allocation270_spill] sm:$0xff] %v6309_v41  ;;  %v12320_v41 = vmov 20  }
 0x333   :  { %v6311_v28 = vpop.permute.xlu0 %2501 }
 0x334   :  { %12315 = vst [vmem:[#allocation271_spill] sm:$0xff] %v6311_v28  ;;  %2557 = vrot.lane.b32.xlu0 %v5083_v44, %s4709_s25 }
 0x335   :  { %2427 = vrot.lane.b32.xlu1 %v4975_v8, %s4707_s29 }
 0x336   :  { %v6317_v55 = vpop.permute.xlu1 %2493 }
 0x337   :  { %12316 = vst [vmem:[#allocation272_spill] sm:$0xff] %v6317_v55 }
 0x338   :  { %2565 = vrot.lane.b32.xlu0 %v5059_v37, %s4709_s25  ;;  %v6321_v22 = vpop.permute.xlu0 %2633 }
 0x339   :  { %12317 = vst [vmem:[#allocation273_spill] sm:$0xff] %v6321_v22  ;;  %2641 = vperm.xlu1 %4575, %v5711_v53  }
 0x33a   :  { %v6324_v9 = vpop.permute.xlu1 %1341 }
 0x33b   :  { %12318 = vst [vmem:[#allocation274_spill] sm:$0xff] %v6324_v9 }
 0x33c   :  { %2817 = vrot.lane.b32.xlu0 %v4890_v40, %s4713_s21  ;;  %v6328_v28 = vpop.permute.xlu0 %1881 }
 0x33d   :  { %12319 = vst [vmem:[#allocation275_spill] sm:$0xff] %v6328_v28  ;;  %4576 = vset.pattern.permute.xlu1 %v12320_v41 }
 0x33e   :  { %2901 = vperm.xlu1 %4576, %v5646_v33   ;;  %v6332_v55 = vpop.permute.xlu1 %1343 }
 0x33f   :  { %12321 = vst [vmem:[#allocation276_spill] sm:$0xff] %v6332_v55 }
 0x340   :  { %2825 = vrot.lane.b32.xlu0 %v4941_v60, %s4713_s21  ;;  %v6336_v22 = vpop.permute.xlu0 %2141 }
 0x341   :  { %12322 = vst [vmem:[#allocation277_spill] sm:$0xff] %v6336_v22 }
 0x342   :  { %1749 = vrot.lane.b32.xlu1 %v5059_v37, %s4697_s23  ;;  %v6340_v9 = vpop.permute.xlu1 %1611 }
 0x343   :  { %12323 = vst [vmem:[#allocation278_spill] sm:$0xff] %v6340_v9  ;;  %4578 = vset.pattern.permute.xlu1 %v12297_v32  ;;  %v11713_v32 = vmov 22  }
 0x344   :  { %2833 = vrot.lane.b32.xlu0 %v4900_v46, %s4713_s21  ;;  %v6345_v28 = vpop.permute.xlu0 %2149 }
 0x345   :  { %12324 = vst [vmem:[#allocation279_spill] sm:$0xff] %v6345_v28 }
 0x346   :  { %1751 = vrot.lane.b32.xlu1 %v5127_v52, %s4697_s23  ;;  %v6349_v55 = vpop.permute.xlu1 %1871  ;;  %s4715_s23 = smov 98  }
 0x347   :  { %12325 = vst [vmem:[#allocation280_spill] sm:$0xff] %v6349_v55 }
 0x348   :  { %3045 = vperm.xlu0 %4580, %v5752_v18   ;;  %v6352_v22 = vpop.permute.xlu0 %2157 }
 0x349   :  { %12326 = vst [vmem:[#allocation281_spill] sm:$0xff] %v6352_v22 }
 0x34a   :  { %2027 = vrot.lane.b32.xlu1 %v5013_v19, %s4701_s12  ;;  %v6356_v9 = vpop.permute.xlu1 %1879 }
 0x34b   :  { %12327 = vst [vmem:[#allocation282_spill] sm:$0xff] %v6356_v9 }
 0x34c   :  { %4583 = vset.pattern.permute.xlu0 %v11713_v32  ;;  %v6359_v49 = vpop.permute.xlu0 %2409 }
 0x34d   :  { %12328 = vst [vmem:[#allocation283_spill] sm:$0xff] %v6359_v49  ;;  %3177 = vperm.xlu0 %4583, %v5689_v35  }
 0x34e   :  { %2279 = vrot.lane.b32.xlu1 %v5115_v58, %s4705_s28  ;;  %v6364_v55 = vpop.permute.xlu1 %1895 }
 0x34f   :  { %12329 = vst [vmem:[#allocation284_spill] sm:$0xff] %v6364_v55 }
 0x350   :  { %v6366_v28 = vpop.permute.xlu0 %2417 }
 0x351   :  { %12330 = vst [vmem:[#allocation285_spill] sm:$0xff] %v6366_v28  ;;  %2433 = vrot.lane.b32.xlu0 %v4949_v63, %s4707_s29 }
 0x352   :  { %2287 = vrot.lane.b32.xlu1 %v5171_v30, %s4705_s28  ;;  %v6372_v9 = vpop.permute.xlu1 %2139 }
 0x353   :  { %12331 = vst [vmem:[#allocation286_spill] sm:$0xff] %v6372_v9 }
 0x354   :  { %v6374_v32 = vpop.permute.xlu0 %2425 }
 0x355   :  { %12332 = vst [vmem:[#allocation287_spill] sm:$0xff] %v6374_v32  ;;  %2685 = vrot.lane.b32.xlu0 %v5047_v31, %s4711_s30 }
 0x356   :  { %2295 = vrot.lane.b32.xlu1 %v5127_v52, %s4705_s28  ;;  %v6380_v49 = vpop.permute.xlu1 %2147 }
 0x357   :  { %12333 = vst [vmem:[#allocation288_spill] sm:$0xff] %v6380_v49 }
 0x358   :  { %v6382_v55 = vpop.permute.xlu0 %2637 }
 0x359   :  { %12334 = vst [vmem:[#allocation289_spill] sm:$0xff] %v6382_v55  ;;  %2693 = vrot.lane.b32.xlu0 %v5083_v44, %s4711_s30 }
 0x35a   :  { %2547 = vrot.lane.b32.xlu1 %v4967_v5, %s4709_s25  ;;  %v6388_v28 = vpop.permute.xlu1 %2155 }
 0x35b   :  { %12335 = vst [vmem:[#allocation290_spill] sm:$0xff] %v6388_v28 }
 0x35d   :  { %2701 = vrot.lane.b32.xlu0 %v5059_v37, %s4711_s30  ;;  %v6392_v32 = vpop.permute.xlu0 %2769 }
 0x35e   :  { %12336 = vst [vmem:[#allocation291_spill] sm:$0xff] %v6392_v32  ;;  %2555 = vrot.lane.b32.xlu1 %v5004_v14, %s4709_s25  ;;  %v6396_v9 = vpop.permute.xlu1 %2369 }
 0x35f   :  { %12337 = vst [vmem:[#allocation292_spill] sm:$0xff] %v6396_v9 }
 0x361   :  { %2953 = vrot.lane.b32.xlu0 %v4890_v40, %s4715_s23  ;;  %v6400_v55 = vpop.permute.xlu0 %2025 }
 0x362   :  { %12338 = vst [vmem:[#allocation293_spill] sm:$0xff] %v6400_v55  ;;  %2563 = vrot.lane.b32.xlu1 %v4975_v8, %s4709_s25  ;;  %v12343_v55 = vmov 21  }
 0x363   :  { %v6404_v28 = vpop.permute.xlu1 %2629 }
 0x364   :  { %12339 = vst [vmem:[#allocation294_spill] sm:$0xff] %v6404_v28 }
 0x365   :  { %2961 = vrot.lane.b32.xlu0 %v4941_v60, %s4715_s23  ;;  %v6408_v32 = vpop.permute.xlu0 %2277 }
 0x366   :  { %12340 = vst [vmem:[#allocation295_spill] sm:$0xff] %v6408_v32  ;;  %2777 = vperm.xlu1 %4578, %v5711_v53  }
 0x367   :  { %v6411_v49 = vpop.permute.xlu1 %1477 }
 0x368   :  { %12341 = vst [vmem:[#allocation296_spill] sm:$0xff] %v6411_v49  ;;  %v11732_v49 = vmov 23  }
 0x369   :  { %2969 = vrot.lane.b32.xlu0 %v4900_v46, %s4715_s23  ;;  %v6415_v9 = vpop.permute.xlu0 %2285 }
 0x36a   :  { %12342 = vst [vmem:[#allocation297_spill] sm:$0xff] %v6415_v9  ;;  %4579 = vset.pattern.permute.xlu1 %v12343_v55 }
 0x36b   :  { %3037 = vperm.xlu1 %4579, %v5646_v33   ;;  %v6419_v22 = vpop.permute.xlu1 %1479 }
 0x36c   :  { %12344 = vst [vmem:[#allocation298_spill] sm:$0xff] %v6419_v22 }
 0x36d   :  { %3181 = vperm.xlu0 %4583, %v5752_v18   ;;  %v6422_v28 = vpop.permute.xlu0 %2293 }
 0x36e   :  { %12345 = vst [vmem:[#allocation299_spill] sm:$0xff] %v6422_v28 }
 0x36f   :  { %1885 = vrot.lane.b32.xlu1 %v5059_v37, %s4699_s9  ;;  %v6426_v32 = vpop.permute.xlu1 %1747 }
 0x370   :  { %12346 = vst [vmem:[#allocation300_spill] sm:$0xff] %v6426_v32  ;;  %4581 = vset.pattern.permute.xlu1 %v12320_v41 }
 0x371   :  { %4586 = vset.pattern.permute.xlu0 %v11732_v49  ;;  %v6430_v9 = vpop.permute.xlu0 %2545 }
 0x372   :  { %12347 = vst [vmem:[#allocation301_spill] sm:$0xff] %v6430_v9  ;;  %3313 = vperm.xlu0 %4586, %v5689_v35  }
 0x373   :  { %1887 = vrot.lane.b32.xlu1 %v5127_v52, %s4699_s9  ;;  %v6435_v33 = vpop.permute.xlu1 %2007 }
 0x374   :  { %12348 = vst [vmem:[#allocation302_spill] sm:$0xff] %v6435_v33 }
 0x375   :  { %v6437_v22 = vpop.permute.xlu0 %2553 }
 0x376   :  { %12349 = vst [vmem:[#allocation303_spill] sm:$0xff] %v6437_v22  ;;  %2569 = vrot.lane.b32.xlu0 %v4949_v63, %s4709_s25 }
 0x377   :  { %2163 = vrot.lane.b32.xlu1 %v5013_v19, %s4703_s15  ;;  %v6443_v41 = vpop.permute.xlu1 %2015 }
 0x378   :  { %12350 = vst [vmem:[#allocation304_spill] sm:$0xff] %v6443_v41 }
 0x379   :  { %v6445_v49 = vpop.permute.xlu0 %2561 }
 0x37a   :  { %12351 = vst [vmem:[#allocation305_spill] sm:$0xff] %v6445_v49  ;;  %2821 = vrot.lane.b32.xlu0 %v5047_v31, %s4713_s21 }
 0x37b   :  { %2415 = vrot.lane.b32.xlu1 %v5115_v58, %s4707_s29  ;;  %v6451_v9 = vpop.permute.xlu1 %2023 }
 0x37c   :  { %12352 = vst [vmem:[#allocation306_spill] sm:$0xff] %v6451_v9  ;;  %v6473_v9 = vsub.s32 3, %v5403_v39 }
 0x37d   :  { %v6453_v33 = vpop.permute.xlu0 %2773 }
 0x37e   :  { %12353 = vst [vmem:[#allocation307_spill] sm:$0xff] %v6453_v33  ;;  %2829 = vrot.lane.b32.xlu0 %v5083_v44, %s4713_s21  ;;  %v6470_v33 = vsub.s32 2, %v5403_v39  ;;  %12358 = vst [vmem:[#allocation312_spill] sm:$0xff] %v6473_v9  ;;  %v6524_v26 = vrot.slane %v4643_v1, %v6473_v9 }
 0x37f   :  { %2423 = vrot.lane.b32.xlu1 %v5171_v30, %s4707_s29  ;;  %v6459_v22 = vpop.permute.xlu1 %2275 }
 0x380   :  { %12354 = vst [vmem:[#allocation308_spill] sm:$0xff] %v6459_v22  ;;  %12357 = vst [vmem:[#allocation311_spill] sm:$0xff] %v6470_v33  ;;  %v6521_v59 = vrot.slane %v4643_v1, %v6470_v33  ;;  %v4644_v1 = vld [vmem:[%s11421_s3 + $0x2] ss:$8 sm:$0xf] }
 0x381   :  { %12365 = vst [vmem:[#allocation317_spill] sm:$0xff] %v6524_v26  ;;  %v6546_v62 = vrot.slane %v4644_v1, %v6470_v33  ;;  %v6561_v36 = vrot.slane %v4644_v1, %v6473_v9  ;;  %v6584_v1 = vmul.f32 %v6524_v26, %v12373_v0 }
 0x382   :  { %2837 = vrot.lane.b32.xlu0 %v5059_v37, %s4713_s21  ;;  %v6463_v49 = vpop.permute.xlu0 %2905  ;;  %v6588_v12 = vmul.f32 %v6521_v59, %v4991_v11 }
 0x383   :  { %12355 = vst [vmem:[#allocation309_spill] sm:$0xff] %v6463_v49  ;;  %2431 = vrot.lane.b32.xlu1 %v5127_v52, %s4707_s29  ;;  %v6467_v41 = vpop.permute.xlu1 %2283 }
 0x384   :  { %12356 = vst [vmem:[#allocation310_spill] sm:$0xff] %v6467_v41  ;;  %v4642_v41 = vld [vmem:[%s11421_s3] ss:$8 sm:$0xf]  ;;  %12377 = vst [vmem:[#allocation324_spill] sm:$0xff] %v6588_v12 }
 0x385   :  { %v342_v32 = vrot.slane %v4642_v41, %v6470_v33  ;;  %v346_v39 = vrot.slane %v4642_v41, %v6473_v9  ;;  %v6505_v41 = vmul.f32 %v5536_v42, %v5031_v24 }
 0x386   :  { %3089 = vrot.lane.b32.xlu0 %v4890_v40, %s4717_s26  ;;  %v6477_v22 = vpop.permute.xlu0 %2161 }
 0x387   :  { %12359 = vst [vmem:[#allocation313_spill] sm:$0xff] %v6477_v22  ;;  %2683 = vrot.lane.b32.xlu1 %v4967_v5, %s4711_s30  ;;  %v6481_v49 = vpop.permute.xlu1 %2291  ;;  %v6501_v51 = vmul.f32 %v342_v32, %v5031_v24  ;;  %v6508_v23 = vmul.f32 %v346_v39, %v5031_v24  ;;  %v6534_v50 = vmul.f32 %v342_v32, %v4961_v4 }
 0x388   :  { %12360 = vst [vmem:[#allocation314_spill] sm:$0xff] %v6481_v49  ;;  %v6498_v49 = vmul.f32 %v5427_v20, %v5031_v24  ;;  %v6556_v29 = vmul.f32 %v342_v32, %v12369_v45  ;;  %v6572_v16 = vmul.f32 %v346_v39, %v12369_v45 }
 0x389   :  { %12366 = vst [vmem:[#allocation318_spill] sm:$0xff] %v6534_v50 }
 0x38a   :  { %3097 = vrot.lane.b32.xlu0 %v4941_v60, %s4717_s26  ;;  %v6490_v28 = vpop.permute.xlu0 %2413  ;;  %12371 = vst [vmem:[#allocation321_spill] sm:$0xff] %v6556_v29  ;;  %12376 = vst [vmem:[#allocation323_spill] sm:$0xff] %v6572_v16  ;;  %v12389_v29 = vld [vmem:[#allocation18_spill] sm:$0xff] }
 0x38b   :  { %12361 = vst [vmem:[#allocation315_spill] sm:$0xff] %v6490_v28  ;;  %2691 = vrot.lane.b32.xlu1 %v5004_v14, %s4711_s30  ;;  %v6494_v22 = vpop.permute.xlu1 %2505  ;;  %v12363_v28 = vld [vmem:[#allocation10_spill] sm:$0xff] }
 0x38c   :  { %12362 = vst [vmem:[#allocation316_spill] sm:$0xff] %v6494_v22  ;;  %v6512_v57 = vmul.f32 %v5427_v20, %v12363_v28  ;;  %v6515_v22 = vmul.f32 %v342_v32, %v12363_v28  ;;  %12364 = vst [vmem:[#allocation10_spill] sm:$0xff] %v6521_v59  ;;  %v6528_v24 = vmul.f32 %v5536_v42, %v12363_v28 }
 0x38d   :  { %v6531_v13 = vmul.f32 %v346_v39, %v12363_v28  ;;  %v6549_v28 = vmul.f32 %v346_v39, %v4961_v4  ;;  %v6569_v4 = vmul.f32 %v5536_v42, %v12369_v45  ;;  %v6576_v20 = vmul.f32 %v6521_v59, %v12373_v0  ;;  %v4645_v42 = vld [vmem:[%s11421_s3 + $0x3] ss:$8 sm:$0xf] }
 0x38e   :  { %3105 = vrot.lane.b32.xlu0 %v4900_v46, %s4717_s26  ;;  %v6538_v10 = vpop.permute.xlu0 %2421  ;;  %v6580_v32 = vmul.f32 %v5556_v56, %v12373_v0  ;;  %v6594_v45 = vrot.slane %v4645_v42, %v6470_v33  ;;  %v12378_v39 = vld [vmem:[#allocation15_spill] sm:$0xff]  ;;  %v6602_v56 = vmul.f32 %v6524_v26, %v4991_v11  ;;  %v6609_v59 = vrot.slane %v4645_v42, %v6473_v9  ;;  %v12385_v42 = vld [vmem:[#allocation17_spill] sm:$0xff] }
 0x38f   :  { %12367 = vst [vmem:[#allocation319_spill] sm:$0xff] %v6538_v10  ;;  %2699 = vrot.lane.b32.xlu1 %v4975_v8, %s4711_s30  ;;  %12368 = vst [vmem:[#allocation320_spill] sm:$0xff] %v6549_v28  ;;  %v6613_v44 = vmul.f32 %v6546_v62, %v12378_v39  ;;  %v6617_v31 = vmul.f32 %v5564_v34, %v12378_v39  ;;  %v6623_v11 = vmul.f32 %v6561_v36, %v12378_v39 }
 0x390   :  { %v6558_v10 = vpop.permute.xlu1 %2765  ;;  %12375 = vst [vmem:[#allocation14_spill] sm:$0xff] %v6569_v4  ;;  %12380 = vst [vmem:[#allocation15_spill] sm:$0xff] %v6602_v56  ;;  %v6648_v4 = vmul.f32 %v6546_v62, %v12385_v42  ;;  %v6660_v7 = vmul.f32 %v6594_v45, %v12389_v29  ;;  %v12394_v56 = vmov 22   ;;  %v6699_v28 = vmul.f32 %v6594_v45, %v5039_v27 }
 0x391   :  { %12372 = vst [vmem:[#allocation322_spill] sm:$0xff] %v6558_v10  ;;  %v12379_v10 = vld [vmem:[#allocation110_spill] sm:$0xff] }
 0x392   :  { %v6598_v43 = vmul.f32 %v12379_v10, %v12378_v39  ;;  %3317 = vperm.xlu0 %4586, %v5752_v18   ;;  %v6605_v0 = vpop.permute.xlu0 %2429  ;;  %v6631_v18 = vmul.f32 %v6561_v36, %v5011_v17  ;;  %12387 = vst [vmem:[#allocation328_spill] sm:$0xff] %v6648_v4  ;;  %12391 = vst [vmem:[#allocation330_spill] sm:$0xff] %v6660_v7 }
 0x393   :  { %12381 = vst [vmem:[#allocation110_spill] sm:$0xff] %v6605_v0  ;;  %2913 = vperm.xlu1 %4581, %v5711_v53   ;;  %v6627_v53 = vmul.f32 %v6546_v62, %v5011_v17  ;;  %v6635_v0 = vmul.f32 %v12379_v10, %v12385_v42  ;;  %v6652_v17 = vmul.f32 %v5564_v34, %v12385_v42 }
 0x394   :  { %v6619_v16 = vpop.permute.xlu1 %1613  ;;  %12384 = vst [vmem:[#allocation327_spill] sm:$0xff] %v6631_v18  ;;  %v11791_v18 = vmov 24  }
 0x395   :  { %12382 = vst [vmem:[#allocation325_spill] sm:$0xff] %v6619_v16  ;;  %12383 = vst [vmem:[#allocation326_spill] sm:$0xff] %v6627_v53  ;;  %v4646_v16 = vld [vmem:[%s11421_s3 + $0x4] ss:$8 sm:$0xf]  ;;  %v6676_v53 = vmul.f32 %v6609_v59, %v12389_v29 }
 0x396   :  { %12386 = vst [vmem:[#allocation17_spill] sm:$0xff] %v6635_v0  ;;  %v6641_v26 = vrot.slane %v4646_v16, %v6470_v33  ;;  %v6644_v39 = vrot.slane %v4646_v16, %v6473_v9  ;;  %12388 = vst [vmem:[#allocation329_spill] sm:$0xff] %v6652_v17  ;;  %v6656_v0 = vmul.f32 %v5492_v61, %v12389_v29  ;;  %4589 = vset.pattern.permute.xlu0 %v11791_v18  ;;  %v6667_v4 = vpop.permute.xlu0 %2681  ;;  %v6688_v18 = vld [vmem:[%s11419_s2] sm:$0xff] }
 0x397   :  { %v6664_v16 = vmul.f32 %v6561_v36, %v12385_v42  ;;  %12393 = vst [vmem:[#allocation332_spill] sm:$0xff] %v6667_v4  ;;  %4582 = vset.pattern.permute.xlu1 %v12394_v56  ;;  %v6672_v17 = vmul.f32 %v5592_v6, %v12389_v29  ;;  %12396 = vst [vmem:[#allocation334_spill] sm:$0xff] %v6676_v53  ;;  %v4647_v42 = vld [vmem:[%s11421_s3 + $0x5] ss:$8 sm:$0xf]  ;;  %3449 = vperm.xlu0 %4589, %v5689_v35  }
 0x398   :  { %12390 = vst [vmem:[#allocation18_spill] sm:$0xff] %v6656_v0  ;;  %12397 = vst [vmem:[#allocation335_spill] sm:$0xff] %v6688_v18  ;;  %3173 = vperm.xlu1 %4582, %v6688_v18   ;;  %v6691_v4 = vpop.permute.xlu1 %1615  ;;  %v12399_v29 = vld [vmem:[#allocation21_spill] sm:$0xff]  ;;  %v12400_v56 = vld [vmem:[#allocation114_spill] sm:$0xff]  ;;  %v6703_v35 = vmul.f32 %v6609_v59, %v5039_v27  ;;  %v6726_v27 = vmul.f32 %v6644_v39, %v5065_v38 }
 0x399   :  { %12392 = vst [vmem:[#allocation331_spill] sm:$0xff] %v6664_v16  ;;  %12395 = vst [vmem:[#allocation333_spill] sm:$0xff] %v6672_v17  ;;  %v6682_v16 = vrot.slane %v4647_v42, %v6470_v33  ;;  %v6695_v12 = vmul.f32 %v12400_v56, %v12399_v29  ;;  %v6706_v33 = vrot.slane %v4647_v42, %v6473_v9  ;;  %v12405_v42 = vld [vmem:[#allocation25_spill] sm:$0xff] }
 0x39a   :  { %12398 = vst [vmem:[#allocation336_spill] sm:$0xff] %v6691_v4  ;;  %12401 = vst [vmem:[#allocation21_spill] sm:$0xff] %v6699_v28  ;;  %v6710_v18 = vmul.f32 %v6641_v26, %v12399_v29  ;;  %v6714_v4 = vmul.f32 %v5595_v15, %v12399_v29  ;;  %v6718_v53 = vmul.f32 %v6644_v39, %v12399_v29  ;;  %v6740_v17 = vpop.permute.xlu0 %2689 }
 0x39b   :  { %12402 = vst [vmem:[#allocation114_spill] sm:$0xff] %v6703_v35  ;;  %v6722_v28 = vmul.f32 %v6641_v26, %v5065_v38  ;;  %12404 = vst [vmem:[#allocation338_spill] sm:$0xff] %v6726_v27  ;;  %v6730_v35 = vmul.f32 %v12400_v56, %v12405_v42  ;;  %v6734_v9 = vmul.f32 %v6641_v26, %v12405_v42  ;;  %v12411_v38 = vld [vmem:[#allocation29_spill] sm:$0xff]  ;;  %2439 = vrot.lane.b32.xlu0 %v5182_v54, %s4707_s29 }
 0x39c   :  { %v6738_v29 = vmul.f32 %v5595_v15, %v12405_v42  ;;  %12409 = vst [vmem:[#allocation341_spill] sm:$0xff] %v6740_v17  ;;  %v6748_v27 = vmul.f32 %v5531_v21, %v12411_v38  ;;  %2029 = vrot.lane.b32.xlu1 %v5091_v48, %s4701_s12  ;;  %v6766_v17 = vmul.f32 %v5621_v25, %v12411_v38 }
 0x39d   :  { %12403 = vst [vmem:[#allocation337_spill] sm:$0xff] %v6722_v28  ;;  %12406 = vst [vmem:[#allocation25_spill] sm:$0xff] %v6730_v35  ;;  %v6744_v28 = vmul.f32 %v6644_v39, %v12405_v42  ;;  %v6752_v35 = vmul.f32 %v6682_v16, %v12411_v38  ;;  %v6762_v42 = vmul.f32 %v6682_v16, %v5105_v47  ;;  %4584 = vset.pattern.permute.xlu1 %v12343_v55 }
 0x39e   :  { %12407 = vst [vmem:[#allocation339_spill] sm:$0xff] %v6734_v9  ;;  %12408 = vst [vmem:[#allocation340_spill] sm:$0xff] %v6738_v29  ;;  %v6758_v29 = vpop.permute.xlu1 %1883 }
 0x39f   :  { %12410 = vst [vmem:[#allocation342_spill] sm:$0xff] %v6744_v28  ;;  %12412 = vst [vmem:[#allocation29_spill] sm:$0xff] %v6748_v27  ;;  %v6770_v27 = vmul.f32 %v6706_v33, %v12411_v38  ;;  %2707 = vrot.lane.b32.xlu0 %v5013_v19, %s4711_s30 }
 0x3a0   :  { %12413 = vst [vmem:[#allocation343_spill] sm:$0xff] %v6752_v35  ;;  %12414 = vst [vmem:[#allocation344_spill] sm:$0xff] %v6758_v29  ;;  %v6774_v35 = vmul.f32 %v6706_v33, %v5105_v47  ;;  %v12419_v29 = vld [vmem:[#allocation2_spill] sm:$0xff]  ;;  %2031 = vrot.lane.b32.xlu1 %v5182_v54, %s4701_s12  ;;  %s4719_s12 = smov 96  }
 0x3a1   :  { %12415 = vst [vmem:[#allocation345_spill] sm:$0xff] %v6762_v42  ;;  %12416 = vst [vmem:[#allocation346_spill] sm:$0xff] %v6766_v17  ;;  %v6779_v28 = vmul.f32 %v12419_v29, %v4941_v60  ;;  %v6783_v42 = vmul.f32 %v12419_v29, %v4900_v46  ;;  %v6787_v17 = vmul.f32 %v12419_v29, %v4949_v63  ;;  %v12420_v47 = vld [vmem:[#allocation6_spill] sm:$0xff]  ;;  %v12425_v63 = vld [vmem:[#allocation3_spill] sm:$0xff] }
 0x3a2   :  { %12417 = vst [vmem:[#allocation347_spill] sm:$0xff] %v6770_v27  ;;  %12418 = vst [vmem:[#allocation348_spill] sm:$0xff] %v6774_v35  ;;  %v6791_v38 = vmul.f32 %v12419_v29, %v4890_v40  ;;  %v6795_v35 = vmul.f32 %v12420_v47, %v5004_v14  ;;  %v6799_v55 = vmul.f32 %v12420_v47, %v4975_v8  ;;  %v6809_v27 = vpop.permute.xlu0 %2697  ;;  %v12422_v29 = vld [vmem:[#allocation8_spill] sm:$0xff] }
 0x3a3   :  { %v6803_v46 = vmul.f32 %v12420_v47, %v4967_v5  ;;  %v6807_v60 = vmul.f32 %v12420_v47, %v5013_v19  ;;  %12421 = vst [vmem:[#allocation2_spill] sm:$0xff] %v6809_v27  ;;  %v6813_v40 = vmul.f32 %v12422_v29, %v5059_v37  ;;  %v6817_v9 = vmul.f32 %v12422_v29, %v5091_v48  ;;  %v6827_v47 = vpop.permute.xlu1 %2143  ;;  %v12428_v27 = vld [vmem:[#allocation22_spill] sm:$0xff] }
 0x3a4   :  { %v6821_v50 = vmul.f32 %v12425_v63, %v5115_v58  ;;  %12427 = vst [vmem:[#allocation349_spill] sm:$0xff] %v6827_v47  ;;  %v762_v37 = vmul.f32 %v5492_v61, %v12428_v27  ;;  %v6835_v29 = vmul.f32 %v12425_v63, %v5171_v30  ;;  %v761_v48 = vmul.f32 %v5592_v6, %v12428_v27 }
 0x3a5   :  { %12423 = vst [vmem:[#allocation6_spill] sm:$0xff] %v6813_v40  ;;  %12424 = vst [vmem:[#allocation8_spill] sm:$0xff] %v6817_v9  ;;  %v763_v40 = vmul.f32 %v6594_v45, %v12428_v27  ;;  %v764_v47 = vmul.f32 %v6609_v59, %v12428_v27  ;;  %v12431_v9 = vld [vmem:[#allocation19_spill] sm:$0xff]  ;;  %v6851_v0 = vmul.f32 %v12425_v63, %v5182_v54  ;;  %v12433_v27 = vld [vmem:[#allocation26_spill] sm:$0xff]  ;;  %2959 = vrot.lane.b32.xlu0 %v5115_v58, %s4715_s23 }
 0x3a6   :  { %12426 = vst [vmem:[#allocation3_spill] sm:$0xff] %v6821_v50  ;;  %12429 = vst [vmem:[#allocation22_spill] sm:$0xff] %v6835_v29  ;;  %v6839_v50 = vmul.f32 %v12425_v63, %v5127_v52  ;;  %v6847_v7 = vmul.f32 %v12379_v10, %v12431_v9  ;;  %v6855_v29 = vmul.f32 %v6546_v62, %v12431_v9  ;;  %2299 = vrot.lane.b32.xlu1 %v5013_v19, %s4705_s28 }
 0x3a7   :  { %v6863_v8 = vmul.f32 %v6561_v36, %v12431_v9  ;;  %v6867_v10 = vmul.f32 %v12400_v56, %v12433_v27  ;;  %v6873_v63 = vmul.f32 %v6641_v26, %v12433_v27  ;;  %v6877_v62 = vmul.f32 %v5595_v15, %v12433_v27  ;;  %v6887_v56 = vpop.permute.xlu1 %2151  ;;  %v12436_v36 = vld [vmem:[#allocation24_spill] sm:$0xff] }
 0x3a8   :  { %12430 = vst [vmem:[#allocation350_spill] sm:$0xff] %v6839_v50  ;;  %12432 = vst [vmem:[#allocation19_spill] sm:$0xff] %v6847_v7  ;;  %v6859_v50 = vmul.f32 %v5564_v34, %v12431_v9  ;;  %v6869_v7 = vpop.permute.xlu0 %2909  ;;  %v6881_v34 = vmul.f32 %v6644_v39, %v12433_v27  ;;  %v6891_v26 = vmul.f32 %v5492_v61, %v12436_v36  ;;  %v12441_v27 = vld [vmem:[#allocation36_spill] sm:$0xff]  ;;  %v12443_v61 = vld [vmem:[#allocation34_spill] sm:$0xff] }
 0x3a9   :  { %12434 = vst [vmem:[#allocation26_spill] sm:$0xff] %v6869_v7  ;;  %12435 = vst [vmem:[#allocation351_spill] sm:$0xff] %v6887_v56  ;;  %v6895_v15 = vmul.f32 %v6594_v45, %v12436_v36  ;;  %v6899_v9 = vmul.f32 %v5592_v6, %v12436_v36  ;;  %v6903_v39 = vmul.f32 %v6609_v59, %v12436_v36  ;;  %v12442_v7 = vld [vmem:[#allocation47_spill] sm:$0xff]  ;;  %v12444_v45 = vld [vmem:[#allocation30_spill] sm:$0xff]  ;;  %2967 = vrot.lane.b32.xlu0 %v5171_v30, %s4715_s23 }
 0x3aa   :  { %12437 = vst [vmem:[#allocation24_spill] sm:$0xff] %v6891_v26  ;;  %v406_v56 = vsel %vm401_vm1, %v12442_v7, %v12441_v27  ;;  %v410_v26 = vsel %vm401_vm1, %v12443_v61, %v12442_v7  ;;  %v12446_v6 = vld [vmem:[#allocation31_spill] sm:$0xff]  ;;  %v12448_v59 = vld [vmem:[#allocation49_spill] sm:$0xff]  ;;  %v6931_v7 = vmul.f32 %v6682_v16, %v12444_v45  ;;  %2551 = vrot.lane.b32.xlu1 %v5115_v58, %s4709_s25 }
 0x3ab   :  { %12438 = vst [vmem:[#allocation352_spill] sm:$0xff] %v6895_v15  ;;  %12439 = vst [vmem:[#allocation353_spill] sm:$0xff] %v6899_v9  ;;  %v6915_v15 = vmul.f32 %v5531_v21, %v12444_v45  ;;  %v6919_v9 = vmul.f32 %v5531_v21, %v12446_v6  ;;  %v402_v36 = vsel %vm401_vm1, %v12441_v27, %v12448_v59 }
 0x3ac   :  { %12440 = vst [vmem:[#allocation354_spill] sm:$0xff] %v6903_v39  ;;  %v414_v39 = vsel %vm401_vm1, %v12448_v59, %v12443_v61  ;;  %12449 = vst [vmem:[#allocation34_spill] sm:$0xff] %v6931_v7  ;;  %v6939_v21 = vmul.f32 %v5621_v25, %v12444_v45  ;;  %v6943_v27 = vmul.f32 %v6706_v33, %v12444_v45  ;;  %v6951_v61 = vpop.permute.xlu0 %3041  ;;  %v12456_v59 = vld [vmem:[#allocation35_spill] sm:$0xff]  ;;  %v12462_v7 = vld [vmem:[#allocation37_spill] sm:$0xff] }
 0x3ad   :  { %12445 = vst [vmem:[#allocation36_spill] sm:$0xff] %v6915_v15  ;;  %12447 = vst [vmem:[#allocation47_spill] sm:$0xff] %v6919_v9  ;;  %v6935_v15 = vmul.f32 %v6682_v16, %v12446_v6  ;;  %v6947_v9 = vmul.f32 %v5621_v25, %v12446_v6  ;;  %v6955_v16 = vpop.permute.xlu1 %2159  ;;  %v420_v25 = vmul.f32 %v406_v56, %v6515_v22  ;;  %v12463_v22 = vld [vmem:[#allocation46_spill] sm:$0xff]  ;;  %2975 = vrot.lane.b32.xlu0 %v5127_v52, %s4715_s23 }
 0x3ae   :  { %12451 = vst [vmem:[#allocation31_spill] sm:$0xff] %v6939_v21  ;;  %12452 = vst [vmem:[#allocation49_spill] sm:$0xff] %v6943_v27  ;;  %v12457_v21 = vld [vmem:[#allocation43_spill] sm:$0xff]  ;;  %v419_v27 = vmul.f32 %v410_v26, %v6512_v57  ;;  %v421_v57 = vmul.f32 %v402_v36, %v6531_v13  ;;  %v12468_v36 = vld [vmem:[#allocation40_spill] sm:$0xff]  ;;  %2559 = vrot.lane.b32.xlu1 %v5171_v30, %s4709_s25 }
 0x3af   :  { %12450 = vst [vmem:[#allocation30_spill] sm:$0xff] %v6935_v15  ;;  %12453 = vst [vmem:[#allocation355_spill] sm:$0xff] %v6947_v9  ;;  %v6961_v45 = vsel %vm537_vm2, %v12457_v21, %v12456_v59  ;;  %v6967_v9 = vmul.f32 %v6706_v33, %v12446_v6  ;;  %v6985_v33 = vsel %vm537_vm2, %v12456_v59, %v12463_v22  ;;  %v12466_v26 = vld [vmem:[#allocation39_spill] sm:$0xff]  ;;  %v12470_v59 = vld [vmem:[#allocation38_spill] sm:$0xff] }
 0x3b0   :  { %12454 = vst [vmem:[#allocation356_spill] sm:$0xff] %v6951_v61  ;;  %12455 = vst [vmem:[#allocation357_spill] sm:$0xff] %v6955_v16  ;;  %v12459_v61 = vld [vmem:[#allocation33_spill] sm:$0xff]  ;;  %v12461_v16 = vld [vmem:[#allocation48_spill] sm:$0xff] }
 0x3b1   :  { %12458 = vst [vmem:[#allocation35_spill] sm:$0xff] %v6961_v45  ;;  %v6973_v15 = vsel %vm537_vm2, %v12459_v61, %v12457_v21  ;;  %v818_v58 = vsel %vm809_vm4, %v12462_v7, %v12461_v16  ;;  %v418_v45 = vmul.f32 %v414_v39, %v6528_v24  ;;  %12464 = vst [vmem:[#allocation33_spill] sm:$0xff] %v6985_v33  ;;  %v12467_v24 = vld [vmem:[#allocation50_spill] sm:$0xff]  ;;  %v12469_v21 = vld [vmem:[#allocation51_spill] sm:$0xff]  ;;  %3227 = vrot.lane.b32.xlu0 %v4967_v5, %s4719_s12 }
 0x3b2   :  { %12460 = vst [vmem:[#allocation43_spill] sm:$0xff] %v6973_v15  ;;  %v6991_v56 = vsel %vm537_vm2, %v12463_v22, %v12459_v61  ;;  %v814_v6 = vsel %vm809_vm4, %v12461_v16, %v12466_v26  ;;  %v810_v13 = vsel %vm809_vm4, %v12466_v26, %v12467_v24  ;;  %v822_v39 = vsel %vm809_vm4, %v12467_v24, %v12462_v7  ;;  %v7015_v22 = vpop.permute.xlu0 %2297  ;;  %v7019_v26 = vpop.permute.xlu1 %2411 }
 0x3b3   :  { %12465 = vst [vmem:[#allocation48_spill] sm:$0xff] %v6991_v56  ;;  %v678_v61 = vsel %vm673_vm3, %v12469_v21, %v12468_v36  ;;  %v682_v16 = vsel %vm673_vm3, %v12470_v59, %v12469_v21  ;;  %12471 = vst [vmem:[#allocation37_spill] sm:$0xff] %v7015_v22  ;;  %v7022_v7 = vadd.f32 %v419_v27, %v6779_v28  ;;  %v12476_v21 = vld [vmem:[#allocation53_spill] sm:$0xff]  ;;  %v12486_v27 = vld [vmem:[#allocation64_spill] sm:$0xff]  ;;  %2567 = vrot.lane.b32.xlu1 %v5127_v52, %s4709_s25 }
 0x3b4   :  { %12472 = vst [vmem:[#allocation46_spill] sm:$0xff] %v7019_v26  ;;  %v7025_v24 = vadd.f32 %v420_v25, %v6783_v42  ;;  %v7027_v15 = vmul.f32 %v818_v58, %v762_v37  ;;  %v686_v56 = vsel %vm673_vm3, %v12476_v21, %v12470_v59  ;;  %v7033_v33 = vmul.f32 %v814_v6, %v763_v40  ;;  %v12487_v25 = vld [vmem:[#allocation52_spill] sm:$0xff]  ;;  %v12493_v6 = vld [vmem:[#allocation66_spill] sm:$0xff] }
 0x3b5   :  { %12473 = vst [vmem:[#allocation39_spill] sm:$0xff] %v7022_v7  ;;  %v7036_v22 = vadd.f32 %v418_v45, %v6791_v38  ;;  %v7039_v26 = vadd.f32 %v421_v57, %v6787_v17  ;;  %v674_v28 = vsel %vm673_vm3, %v12468_v36, %v12476_v21  ;;  %v7045_v37 = vmul.f32 %v822_v39, %v761_v48  ;;  %v12485_v17 = vld [vmem:[#allocation54_spill] sm:$0xff]  ;;  %v12492_v57 = vld [vmem:[#allocation55_spill] sm:$0xff]  ;;  %v12497_v21 = vld [vmem:[#allocation69_spill] sm:$0xff] }
 0x3b6   :  { %12474 = vst [vmem:[#allocation50_spill] sm:$0xff] %v7025_v24  ;;  %12475 = vst [vmem:[#allocation40_spill] sm:$0xff] %v7027_v15  ;;  %v7047_v58 = vmul.f32 %v810_v13, %v764_v47  ;;  %v7050_v42 = vmul.f32 %v682_v16, %v6598_v43  ;;  %v7053_v40 = vmul.f32 %v678_v61, %v6613_v44  ;;  %v7068_v43 = vpop.permute.xlu0 %2549  ;;  %v12491_v47 = vld [vmem:[#allocation44_spill] sm:$0xff]  ;;  %v12494_v36 = vld [vmem:[#allocation42_spill] sm:$0xff]  ;;  %3235 = vrot.lane.b32.xlu0 %v5004_v14, %s4719_s12 }
 0x3b7   :  { %12477 = vst [vmem:[#allocation51_spill] sm:$0xff] %v7033_v33  ;;  %12478 = vst [vmem:[#allocation38_spill] sm:$0xff] %v7036_v22  ;;  %v7056_v38 = vmul.f32 %v686_v56, %v6617_v31  ;;  %v407_v45 = vsel %vm401_vm1, %v12486_v27, %v12485_v17  ;;  %v411_v48 = vsel %vm401_vm1, %v12487_v25, %v12486_v27  ;;  %v7072_v31 = vpop.permute.xlu1 %2419  ;;  %v12495_v61 = vld [vmem:[#allocation57_spill] sm:$0xff]  ;;  %2819 = vrot.lane.b32.xlu1 %v4967_v5, %s4713_s21  ;;  %v12644_v24 = vld [vmem:[#allocation119_spill] sm:$0xff] }
 0x3b8   :  { %12479 = vst [vmem:[#allocation53_spill] sm:$0xff] %v7039_v26  ;;  %12480 = vst [vmem:[#allocation358_spill] sm:$0xff] %v7045_v37  ;;  %v7075_v44 = vmul.f32 %v674_v28, %v6623_v11  ;;  %v950_v56 = vsel %vm945_vm5, %v12492_v57, %v12491_v47  ;;  %v403_v13 = vsel %vm401_vm1, %v12485_v17, %v12493_v6  ;;  %v12496_v16 = vld [vmem:[#allocation61_spill] sm:$0xff]  ;;  %v12498_v17 = vld [vmem:[#allocation59_spill] sm:$0xff] }
 0x3b9   :  { %12481 = vst [vmem:[#allocation359_spill] sm:$0xff] %v7047_v58  ;;  %12482 = vst [vmem:[#allocation360_spill] sm:$0xff] %v7050_v42  ;;  %v415_v39 = vsel %vm401_vm1, %v12493_v6, %v12487_v25  ;;  %v954_v11 = vsel %vm945_vm5, %v12494_v36, %v12492_v57  ;;  %v946_v59 = vsel %vm945_vm5, %v12491_v47, %v12495_v61  ;;  %v12499_v47 = vld [vmem:[#allocation71_spill] sm:$0xff] }
 0x3ba   :  { %12483 = vst [vmem:[#allocation361_spill] sm:$0xff] %v7053_v40  ;;  %12484 = vst [vmem:[#allocation362_spill] sm:$0xff] %v7056_v38  ;;  %v543_v28 = vsel %vm537_vm2, %v12497_v21, %v12496_v16  ;;  %v547_v27 = vsel %vm537_vm2, %v12498_v17, %v12497_v21  ;;  %v958_v25 = vsel %vm945_vm5, %v12495_v61, %v12494_v36  ;;  %v12631_v40 = vld [vmem:[#allocation113_spill] sm:$0xff]  ;;  %v12643_v26 = vld [vmem:[#allocation123_spill] sm:$0xff] }
 0x3bb   :  { %12488 = vst [vmem:[#allocation54_spill] sm:$0xff] %v7068_v43  ;;  %12489 = vst [vmem:[#allocation64_spill] sm:$0xff] %v7072_v31  ;;  %v423_v57 = vmul.f32 %v411_v48, %v6498_v49  ;;  %v424_v6 = vmul.f32 %v407_v45, %v6501_v51  ;;  %v551_v15 = vsel %vm537_vm2, %v12499_v47, %v12498_v17  ;;  %v7123_v49 = vpop.permute.xlu0 %2557  ;;  %v7127_v51 = vpop.permute.xlu1 %2427  ;;  %2827 = vrot.lane.b32.xlu1 %v5004_v14, %s4713_s21 }
 0x3bc   :  { %12490 = vst [vmem:[#allocation52_spill] sm:$0xff] %v7075_v44  ;;  %v422_v42 = vmul.f32 %v415_v39, %v6505_v41  ;;  %v425_v37 = vmul.f32 %v403_v13, %v6508_v23  ;;  %v539_v21 = vsel %vm537_vm2, %v12496_v16, %v12499_v47  ;;  %12500 = vst [vmem:[#allocation44_spill] sm:$0xff] %v7123_v49  ;;  %v12503_v41 = vld [vmem:[#allocation68_spill] sm:$0xff]  ;;  %v12507_v16 = vld [vmem:[#allocation58_spill] sm:$0xff] }
 0x3bd   :  { %12501 = vst [vmem:[#allocation55_spill] sm:$0xff] %v7127_v51  ;;  %v7130_v45 = vmul.f32 %v954_v11, %v6695_v12  ;;  %v12504_v23 = vld [vmem:[#allocation56_spill] sm:$0xff]  ;;  %v559_v13 = vmul.f32 %v547_v27, %v6565_v2  ;;  %v560_v39 = vmul.f32 %v543_v28, %v6576_v20  ;;  %v7139_v36 = vmul.f32 %v950_v56, %v6710_v18  ;;  %v12509_v28 = vld [vmem:[#allocation19_spill] sm:$0xff] }
 0x3be   :  { %v683_v48 = vsel %vm673_vm3, %v12504_v23, %v12503_v41  ;;  %v7142_v61 = vmul.f32 %v958_v25, %v6714_v4  ;;  %v679_v12 = vsel %vm673_vm3, %v12503_v41, %v12507_v16  ;;  %v558_v11 = vmul.f32 %v551_v15, %v6580_v32  ;;  %v12510_v25 = vld [vmem:[#allocation13_spill] sm:$0xff]  ;;  %v12515_v15 = vld [vmem:[#allocation70_spill] sm:$0xff]  ;;  %v12518_v41 = vld [vmem:[#allocation72_spill] sm:$0xff] }
 0x3bf   :  { %12502 = vst [vmem:[#allocation66_spill] sm:$0xff] %v7130_v45  ;;  %12505 = vst [vmem:[#allocation42_spill] sm:$0xff] %v7139_v36  ;;  %v7150_v17 = vmul.f32 %v946_v59, %v6718_v53  ;;  %v439_v2 = vadd.f32 %v423_v57, %v6795_v35  ;;  %v440_v20 = vadd.f32 %v424_v6, %v6799_v55  ;;  %3243 = vrot.lane.b32.xlu0 %v12510_v25, %s4719_s12  ;;  %v7160_v47 = vpop.permute.xlu0 %2565  ;;  %v7164_v32 = vpop.permute.xlu1 %2641  ;;  %v12513_v55 = vld [vmem:[#allocation73_spill] sm:$0xff]  ;;  %v12589_v51 = vld [vmem:[#allocation3_spill] sm:$0xff] }
 0x3c0   :  { %12506 = vst [vmem:[#allocation57_spill] sm:$0xff] %v7142_v61  ;;  %v561_v18 = vmul.f32 %v539_v21, %v6584_v1  ;;  %v438_v56 = vadd.f32 %v422_v42, %v6803_v46  ;;  %v441_v4 = vadd.f32 %v425_v37, %v6807_v60  ;;  %v695_v27 = vmul.f32 %v683_v48, %v12509_v28  ;;  %v12514_v46 = vld [vmem:[#allocation63_spill] sm:$0xff]  ;;  %v12516_v57 = vld [vmem:[#allocation65_spill] sm:$0xff]  ;;  %v12517_v21 = vld [vmem:[#allocation62_spill] sm:$0xff] }
 0x3c1   :  { %12508 = vst [vmem:[#allocation61_spill] sm:$0xff] %v7150_v17  ;;  %12511 = vst [vmem:[#allocation69_spill] sm:$0xff] %v7160_v47  ;;  %v696_v53 = vmul.f32 %v679_v12, %v6855_v29  ;;  %v575_v35 = vadd.f32 %v559_v13, %v439_v2  ;;  %v576_v1 = vadd.f32 %v560_v39, %v440_v20  ;;  %v12519_v13 = vld [vmem:[#allocation60_spill] sm:$0xff]  ;;  %v12523_v20 = vld [vmem:[#allocation75_spill] sm:$0xff]  ;;  %2835 = vrot.lane.b32.xlu1 %v12510_v25, %s4713_s21 }
 0x3c2   :  { %12512 = vst [vmem:[#allocation59_spill] sm:$0xff] %v7164_v32  ;;  %v819_v60 = vsel %vm809_vm4, %v12514_v46, %v12513_v55  ;;  %v675_v37 = vsel %vm673_vm3, %v12507_v16, %v12515_v15  ;;  %v687_v42 = vsel %vm673_vm3, %v12515_v15, %v12504_v23  ;;  %v574_v59 = vadd.f32 %v558_v11, %v438_v56  ;;  %v12520_v16 = vld [vmem:[#allocation77_spill] sm:$0xff]  ;;  %v12521_v12 = vld [vmem:[#allocation84_spill] sm:$0xff]  ;;  %v12522_v11 = vld [vmem:[#allocation18_spill] sm:$0xff] }
 0x3c3   :  { %v815_v29 = vsel %vm809_vm4, %v12513_v55, %v12516_v57  ;;  %v577_v6 = vadd.f32 %v561_v18, %v441_v4  ;;  %v951_v48 = vsel %vm945_vm5, %v12518_v41, %v12517_v21  ;;  %v955_v39 = vsel %vm945_vm5, %v12519_v13, %v12518_v41  ;;  %v7207_v4 = vld [vmem:[%s11419_s2 + $0x18] sm:$0xff]  ;;  %v7210_v28 = vpop.permute.xlu0 %2817  ;;  %v12526_v15 = vld [vmem:[#allocation330_spill] sm:$0xff]  ;;  %v12532_v32 = vld [vmem:[#allocation320_spill] sm:$0xff] }
 0x3c4   :  { %v408_v23 = vsel %vm401_vm1, %v12521_v12, %v12520_v16  ;;  %v831_v2 = vmul.f32 %v819_v60, %v12522_v11  ;;  %v811_v18 = vsel %vm809_vm4, %v12516_v57, %v12523_v20  ;;  %v823_v56 = vsel %vm809_vm4, %v12523_v20, %v12514_v46  ;;  %12524 = vst [vmem:[#allocation71_spill] sm:$0xff] %v7207_v4  ;;  %v12527_v41 = vld [vmem:[#allocation86_spill] sm:$0xff]  ;;  %v7221_v12 = vpop.permute.xlu1 %2901  ;;  %v12624_v17 = vld [vmem:[#allocation25_spill] sm:$0xff]  ;;  %v12626_v36 = vld [vmem:[#allocation339_spill] sm:$0xff] }
 0x3c5   :  { %3457 = vperm.xlu0 %4589, %v7207_v4   ;;  %12525 = vst [vmem:[#allocation68_spill] sm:$0xff] %v7210_v28  ;;  %v694_v55 = vmul.f32 %v687_v42, %v6859_v50  ;;  %v697_v60 = vmul.f32 %v675_v37, %v6863_v8  ;;  %v832_v57 = vmul.f32 %v815_v29, %v12526_v15  ;;  %12528 = vst [vmem:[#allocation56_spill] sm:$0xff] %v7221_v12  ;;  %v12529_v61 = vld [vmem:[#allocation318_spill] sm:$0xff]  ;;  %v12530_v42 = vld [vmem:[#allocation333_spill] sm:$0xff] }
 0x3c6   :  { %v404_v46 = vsel %vm401_vm1, %v12520_v16, %v12527_v41  ;;  %v967_v11 = vmul.f32 %v955_v39, %v6867_v10  ;;  %v711_v20 = vadd.f32 %v695_v27, %v575_v35  ;;  %v712_v45 = vadd.f32 %v696_v53, %v576_v1  ;;  %v12531_v37 = vld [vmem:[#allocation334_spill] sm:$0xff]  ;;  %3049 = vperm.xlu1 %4584, %v7207_v4   ;;  %v12536_v27 = vld [vmem:[#allocation76_spill] sm:$0xff]  ;;  %v12538_v1 = vld [vmem:[#allocation79_spill] sm:$0xff] }
 0x3c7   :  { %v428_v7 = vmul.f32 %v408_v23, %v12529_v61  ;;  %v968_v38 = vmul.f32 %v951_v48, %v6873_v63  ;;  %v710_v50 = vadd.f32 %v694_v55, %v574_v59  ;;  %v830_v8 = vmul.f32 %v823_v56, %v12530_v42  ;;  %v7230_v41 = vpop.permute.xlu0 %2825  ;;  %v12535_v61 = vld [vmem:[#allocation74_spill] sm:$0xff]  ;;  %v12537_v53 = vld [vmem:[#allocation80_spill] sm:$0xff] }
 0x3c8   :  { %v833_v29 = vmul.f32 %v811_v18, %v12531_v37  ;;  %v847_v15 = vadd.f32 %v831_v2, %v711_v20  ;;  %v713_v22 = vadd.f32 %v697_v60, %v577_v6  ;;  %v429_v28 = vmul.f32 %v404_v46, %v12532_v32  ;;  %12534 = vst [vmem:[#allocation58_spill] sm:$0xff] %v7230_v41  ;;  %v12539_v59 = vld [vmem:[#allocation88_spill] sm:$0xff]  ;;  %v12540_v6 = vld [vmem:[#allocation335_spill] sm:$0xff]  ;;  %v7246_v48 = vpop.permute.xlu1 %1749  ;;  %v12545_v46 = vld [vmem:[#allocation81_spill] sm:$0xff] }
 0x3c9   :  { %v12533_v16 = vmov 1   ;;  %v848_v10 = vadd.f32 %v832_v57, %v712_v45  ;;  %v959_v63 = vsel %vm945_vm5, %v12535_v61, %v12519_v13  ;;  %v544_v35 = vsel %vm537_vm2, %v12537_v53, %v12536_v27  ;;  %12541 = vst [vmem:[#allocation19_spill] sm:$0xff] %v7246_v48  ;;  %v12542_v13 = vld [vmem:[#allocation6_spill] sm:$0xff]  ;;  %v12543_v2 = vld [vmem:[#allocation311_spill] sm:$0xff]  ;;  %v12544_v56 = vld [vmem:[#allocation312_spill] sm:$0xff] }
 0x3ca   :  { %4592 = vset.pattern.permute.xlu0 %v12533_v16  ;;  %v680_v32 = vsel %vm673_vm3, %v12539_v59, %v12538_v1  ;;  %v947_v45 = vsel %vm945_vm5, %v12517_v21, %v12535_v61  ;;  %v444_v39 = vadd.f32 %v428_v7, %v12542_v13  ;;  %v4650_v23 = vld [vmem:[%s11421_s3 + $0x6] ss:$8 sm:$0xf]  ;;  %v846_v60 = vadd.f32 %v830_v8, %v710_v50  ;;  %v4653_v47 = vld [vmem:[%s11421_s3 + $0x21] ss:$8 sm:$0xf] }
 0x3cb   :  { %453 = vperm.xlu0 %4592, %v12540_v6   ;;  %v7257_v18 = vrot.slane %v4650_v23, %v12543_v2  ;;  %v7260_v55 = vrot.slane %v4650_v23, %v12544_v56  ;;  %v849_v57 = vadd.f32 %v833_v29, %v713_v22  ;;  %v540_v20 = vsel %vm537_vm2, %v12536_v27, %v12545_v46  ;;  %v12546_v21 = vld [vmem:[#allocation90_spill] sm:$0xff]  ;;  %v12547_v37 = vld [vmem:[#allocation324_spill] sm:$0xff]  ;;  %v7274_v50 = vpop.permute.xlu0 %2833  ;;  %v12553_v27 = vld [vmem:[#allocation83_spill] sm:$0xff] }
 0x3cc   :  { %v676_v7 = vsel %vm673_vm3, %v12538_v1, %v12546_v21  ;;  %v966_v42 = vmul.f32 %v959_v63, %v6877_v62  ;;  %v564_v61 = vmul.f32 %v544_v35, %v12547_v37  ;;  %v12548_v53 = vld [vmem:[#allocation8_spill] sm:$0xff]  ;;  %v12549_v13 = vld [vmem:[#allocation326_spill] sm:$0xff]  ;;  %12550 = vst [vmem:[#allocation73_spill] sm:$0xff] %v7274_v50  ;;  %v12551_v22 = vmov 23   ;;  %v7286_v62 = vpop.permute.xlu1 %1751  ;;  %v12575_v50 = vld [vmem:[#allocation321_spill] sm:$0xff] }
 0x3cd   :  { %v445_v59 = vadd.f32 %v429_v28, %v12548_v53  ;;  %v700_v23 = vmul.f32 %v680_v32, %v12549_v13  ;;  %4585 = vset.pattern.permute.xlu1 %v12551_v22  ;;  %v969_v8 = vmul.f32 %v947_v45, %v6881_v34  ;;  %v12552_v29 = vld [vmem:[#allocation78_spill] sm:$0xff]  ;;  %v7282_v1 = vadd.f32 %v967_v11, %v847_v15  ;;  %v12555_v28 = vld [vmem:[#allocation15_spill] sm:$0xff]  ;;  %v12558_v45 = vld [vmem:[#allocation92_spill] sm:$0xff] }
 0x3ce   :  { %v816_v46 = vsel %vm809_vm4, %v12553_v27, %v12552_v29  ;;  %3309 = vperm.xlu1 %4585, %v12540_v6   ;;  %12554 = vst [vmem:[#allocation63_spill] sm:$0xff] %v7286_v62  ;;  %v565_v63 = vmul.f32 %v540_v20, %v12555_v28  ;;  %v580_v35 = vadd.f32 %v564_v61, %v444_v39  ;;  %v12556_v32 = vld [vmem:[#allocation327_spill] sm:$0xff]  ;;  %v12557_v34 = vld [vmem:[#allocation82_spill] sm:$0xff]  ;;  %v12559_v39 = vld [vmem:[#allocation21_spill] sm:$0xff] }
 0x3cf   :  { %465 = vperm.xlu0 %4592, %v7207_v4   ;;  %v701_v21 = vmul.f32 %v676_v7, %v12556_v32  ;;  %v7290_v37 = vadd.f32 %v968_v38, %v848_v10  ;;  %v952_v53 = vsel %vm945_vm5, %v12558_v45, %v12557_v34  ;;  %v7296_v11 = vadd.f32 %v966_v42, %v846_v60  ;;  %v4651_v13 = vld [vmem:[%s11421_s3 + $0x7] ss:$8 sm:$0xf]  ;;  %v7311_v60 = vpop.permute.xlu0 %3045 }
 0x3d0   :  { %v7298_v15 = vadd.f32 %v969_v8, %v849_v57  ;;  %v7304_v20 = vrot.slane %v4651_v13, %v12543_v2  ;;  %v836_v7 = vmul.f32 %v816_v46, %v12559_v39  ;;  %v12560_v38 = vld [vmem:[#allocation85_spill] sm:$0xff]  ;;  %v716_v61 = vadd.f32 %v700_v23, %v580_v35  ;;  %12561 = vst [vmem:[#allocation70_spill] sm:$0xff] %v7311_v60  ;;  %v12562_v57 = vld [vmem:[#allocation94_spill] sm:$0xff]  ;;  %v12564_v28 = vld [vmem:[#allocation99_spill] sm:$0xff] }
 0x3d1   :  { %v812_v10 = vsel %vm809_vm4, %v12552_v29, %v12560_v38  ;;  %v581_v27 = vadd.f32 %v565_v63, %v445_v59  ;;  %v948_v42 = vsel %vm945_vm5, %v12557_v34, %v12562_v57  ;;  %v12563_v8 = vld [vmem:[#allocation89_spill] sm:$0xff]  ;;  %v12565_v46 = vld [vmem:[#allocation87_spill] sm:$0xff]  ;;  %v12567_v59 = vld [vmem:[#allocation28_spill] sm:$0xff]  ;;  %v7329_v29 = vpop.permute.xlu1 %2027 }
 0x3d2   :  { %v409_v32 = vsel %vm401_vm1, %v12564_v28, %v12563_v8  ;;  %v413_v45 = vsel %vm401_vm1, %v12565_v46, %v12564_v28  ;;  %v12566_v23 = vld [vmem:[#allocation9_spill] sm:$0xff]  ;;  %2165 = vrot.lane.b32.xlu1 %v12567_v59, %s4703_s15  ;;  %12568 = vst [vmem:[#allocation65_spill] sm:$0xff] %v7329_v29  ;;  %v12571_v28 = vmov 22   ;;  %v12572_v60 = vld [vmem:[#allocation114_spill] sm:$0xff]  ;;  %v12577_v41 = vld [vmem:[#allocation323_spill] sm:$0xff] }
 0x3d3   :  { %2841 = vrot.lane.b32.xlu0 %v12566_v23, %s4713_s21  ;;  %v717_v63 = vadd.f32 %v701_v21, %v581_v27  ;;  %v12569_v35 = vld [vmem:[#allocation337_spill] sm:$0xff]  ;;  %4587 = vset.pattern.permute.xlu1 %v12571_v28  ;;  %v837_v12 = vmul.f32 %v812_v10, %v12572_v60  ;;  %v12573_v62 = vld [vmem:[#allocation338_spill] sm:$0xff]  ;;  %v432_v10 = vmul.f32 %v409_v32, %v12575_v50 }
 0x3d4   :  { %v972_v34 = vmul.f32 %v952_v53, %v12569_v35  ;;  %v12570_v39 = vld [vmem:[#allocation101_spill] sm:$0xff]  ;;  %v852_v35 = vadd.f32 %v836_v7, %v716_v61  ;;  %v12576_v60 = vld [vmem:[#allocation14_spill] sm:$0xff]  ;;  %v7367_v7 = vpop.permute.xlu0 %3177  ;;  %v12581_v61 = vld [vmem:[#allocation103_spill] sm:$0xff] }
 0x3d5   :  { %v405_v38 = vsel %vm401_vm1, %v12563_v8, %v12570_v39  ;;  %v417_v57 = vsel %vm401_vm1, %v12570_v39, %v12565_v46  ;;  %v4652_v21 = vld [vmem:[%s11421_s3 + $0x20] ss:$8 sm:$0xf]  ;;  %v7352_v8 = vrot.slane %v4651_v13, %v12544_v56  ;;  %v973_v46 = vmul.f32 %v948_v42, %v12573_v62  ;;  %12579 = vst [vmem:[#allocation62_spill] sm:$0xff] %v7367_v7  ;;  %v7371_v50 = vpop.permute.xlu1 %2279 }
 0x3d6   :  { %v7346_v53 = vrot.slane %v4652_v21, %v12543_v2  ;;  %v7349_v27 = vrot.slane %v4652_v21, %v12544_v56  ;;  %v12574_v39 = vld [vmem:[#allocation12_spill] sm:$0xff]  ;;  %v430_v29 = vmul.f32 %v417_v57, %v12576_v60  ;;  %v433_v48 = vmul.f32 %v405_v38, %v12577_v41  ;;  %2167 = vrot.lane.b32.xlu1 %v5182_v54, %s4703_s15  ;;  %v12582_v42 = vld [vmem:[#allocation91_spill] sm:$0xff]  ;;  %v12583_v38 = vld [vmem:[#allocation93_spill] sm:$0xff] }
 0x3d7   :  { %v431_v28 = vmul.f32 %v413_v45, %v12574_v39  ;;  %v7363_v21 = vrot.slane %v4653_v47, %v12543_v2  ;;  %v12578_v13 = vld [vmem:[#allocation20_spill] sm:$0xff]  ;;  %12580 = vst [vmem:[#allocation72_spill] sm:$0xff] %v7371_v50  ;;  %v7373_v62 = vadd.f32 %v972_v34, %v852_v35  ;;  %v853_v41 = vadd.f32 %v837_v12, %v717_v63  ;;  %v12584_v39 = vld [vmem:[#allocation106_spill] sm:$0xff] }
 0x3d8   :  { %3093 = vrot.lane.b32.xlu0 %v12578_v13, %s4717_s26  ;;  %v685_v32 = vsel %vm673_vm3, %v12582_v42, %v12581_v61  ;;  %v7380_v45 = vrot.slane %v4653_v47, %v12544_v56  ;;  %v681_v57 = vsel %vm673_vm3, %v12581_v61, %v12583_v38  ;;  %v689_v34 = vsel %vm673_vm3, %v12584_v39, %v12582_v42  ;;  %v4654_v12 = vld [vmem:[%s11421_s3 + $0x22] ss:$8 sm:$0xf] }
 0x3d9   :  { %v7394_v63 = vrot.slane %v4654_v12, %v12543_v2  ;;  %v7397_v47 = vrot.slane %v4654_v12, %v12544_v56  ;;  %v7399_v35 = vadd.f32 %v973_v46, %v853_v41  ;;  %v12585_v60 = vld [vmem:[#allocation22_spill] sm:$0xff]  ;;  %v677_v42 = vsel %vm673_vm3, %v12583_v38, %v12584_v39  ;;  %v12592_v12 = vld [vmem:[#allocation17_spill] sm:$0xff]  ;;  %v7425_v41 = vpop.permute.xlu0 %2433  ;;  %v12602_v39 = vld [vmem:[#allocation96_spill] sm:$0xff] }
 0x3da   :  { %v7402_v7 = vadd.f32 %v431_v28, %v12585_v60  ;;  %v12587_v61 = vld [vmem:[#allocation350_spill] sm:$0xff]  ;;  %v7412_v43 = vadd.f32 %v430_v29, %v12589_v51  ;;  %v7415_v49 = vadd.f32 %v433_v48, %v6851_v0  ;;  %v7418_v46 = vmul.f32 %v685_v32, %v12592_v12  ;;  %12595 = vst [vmem:[#allocation330_spill] sm:$0xff] %v7425_v41  ;;  %v7429_v51 = vpop.permute.xlu1 %2287  ;;  %v12597_v29 = vld [vmem:[#allocation328_spill] sm:$0xff] }
 0x3db   :  { %v7405_v50 = vadd.f32 %v432_v10, %v12587_v61  ;;  %v4337_v28 = vld [vmem:[%s11421_s3 + $0x23] ss:$8 sm:$0xf]  ;;  %2435 = vrot.lane.b32.xlu1 %v5013_v19, %s4707_s29  ;;  %12596 = vst [vmem:[#allocation86_spill] sm:$0xff] %v7429_v51  ;;  %v7432_v0 = vmul.f32 %v681_v57, %v12597_v29  ;;  %vm2577_vm1 = vcmp.lt.s32.totalorder %v5419_v3, 112  ;;  %vm2849_vm3 = vcmp.lt.s32.totalorder %v5419_v3, 110 }
 0x3dc   :  { %12586 = vst [vmem:[#allocation60_spill] sm:$0xff] %v7402_v7  ;;  %12590 = vst [vmem:[#allocation84_spill] sm:$0xff] %v7412_v43  ;;  %v12594_v10 = vld [vmem:[#allocation27_spill] sm:$0xff]  ;;  %v12599_v48 = vld [vmem:[#allocation98_spill] sm:$0xff]  ;;  %v7512_v33 = vrot.slane %v4337_v28, %v12544_v56 }
 0x3dd   :  { %12588 = vst [vmem:[#allocation77_spill] sm:$0xff] %v7405_v50  ;;  %12591 = vst [vmem:[#allocation18_spill] sm:$0xff] %v7415_v49  ;;  %3101 = vrot.lane.b32.xlu0 %v12594_v10, %s4717_s26  ;;  %v12600_v32 = vld [vmem:[#allocation104_spill] sm:$0xff]  ;;  %v12604_v61 = vld [vmem:[#allocation329_spill] sm:$0xff]  ;;  %v7495_v51 = vpop.permute.xlu0 %2685 }
 0x3de   :  { %12593 = vst [vmem:[#allocation75_spill] sm:$0xff] %v7418_v46  ;;  %12598 = vst [vmem:[#allocation318_spill] sm:$0xff] %v7432_v0  ;;  %v7438_v38 = vsel %vm537_vm2, %v12600_v32, %v12599_v48  ;;  %v7444_v60 = vsel %vm537_vm2, %v12602_v39, %v12600_v32  ;;  %v7447_v12 = vmul.f32 %v689_v34, %v12604_v61  ;;  %v12606_v46 = vld [vmem:[#allocation331_spill] sm:$0xff]  ;;  %v12610_v0 = vld [vmem:[#allocation97_spill] sm:$0xff]  ;;  %v7499_v31 = vpop.permute.xlu1 %2295 }
 0x3df   :  { %12601 = vst [vmem:[#allocation333_spill] sm:$0xff] %v7438_v38  ;;  %12603 = vst [vmem:[#allocation334_spill] sm:$0xff] %v7444_v60  ;;  %v7450_v49 = vmul.f32 %v677_v42, %v12606_v46  ;;  %v12608_v57 = vld [vmem:[#allocation107_spill] sm:$0xff]  ;;  %v12611_v7 = vld [vmem:[#allocation108_spill] sm:$0xff] }
 0x3e0   :  { %12605 = vst [vmem:[#allocation320_spill] sm:$0xff] %v7447_v12  ;;  %v7456_v29 = vsel %vm537_vm2, %v12599_v48, %v12608_v57  ;;  %v953_v50 = vsel %vm945_vm5, %v12611_v7, %v12610_v0  ;;  %v12612_v32 = vld [vmem:[#allocation95_spill] sm:$0xff]  ;;  %v7470_v42 = vsel %vm537_vm2, %v12608_v57, %v12602_v39  ;;  %v12614_v46 = vld [vmem:[#allocation109_spill] sm:$0xff]  ;;  %v12615_v61 = vld [vmem:[#allocation100_spill] sm:$0xff]  ;;  %v7491_v57 = vrot.slane %v4337_v28, %v12543_v2 }
 0x3e1   :  { %12607 = vst [vmem:[#allocation74_spill] sm:$0xff] %v7450_v49  ;;  %12609 = vst [vmem:[#allocation76_spill] sm:$0xff] %v7456_v29  ;;  %v957_v34 = vsel %vm945_vm5, %v12612_v32, %v12611_v7  ;;  %v821_v48 = vsel %vm809_vm4, %v12615_v61, %v12614_v46  ;;  %v12616_v49 = vld [vmem:[#allocation105_spill] sm:$0xff]  ;;  %v12617_v29 = vld [vmem:[#allocation115_spill] sm:$0xff]  ;;  %v7505_v58 = vmul.f32 %v953_v50, %v12626_v36  ;;  %vm2713_vm2 = vcmp.lt.s32.totalorder %v5419_v3, 111 }
 0x3e2   :  { %12613 = vst [vmem:[#allocation80_spill] sm:$0xff] %v7470_v42  ;;  %v7477_v12 = vrot.slane %v4337_v28, %v12616_v49  ;;  %v7480_v60 = vrot.slane %v4337_v28, %v12617_v29  ;;  %v12618_v43 = vld [vmem:[#allocation102_spill] sm:$0xff]  ;;  %v12619_v38 = vld [vmem:[#allocation112_spill] sm:$0xff]  ;;  %v12620_v42 = vld [vmem:[#allocation23_spill] sm:$0xff]  ;;  %v825_v36 = vsel %vm809_vm4, %v12631_v40, %v12615_v61 }
 0x3e3   :  { %v817_v7 = vsel %vm809_vm4, %v12614_v46, %v12618_v43  ;;  %v961_v39 = vsel %vm945_vm5, %v12619_v38, %v12612_v32  ;;  %3109 = vrot.lane.b32.xlu0 %v12620_v42, %s4717_s26  ;;  %12621 = vst [vmem:[#allocation79_spill] sm:$0xff] %v7495_v51  ;;  %v12622_v41 = vld [vmem:[#allocation32_spill] sm:$0xff]  ;;  %12623 = vst [vmem:[#allocation88_spill] sm:$0xff] %v7499_v31  ;;  %v7502_v46 = vmul.f32 %v957_v34, %v12624_v17  ;;  %v12632_v50 = vld [vmem:[#allocation118_spill] sm:$0xff] }
 0x3e4   :  { %2687 = vrot.lane.b32.xlu1 %v12622_v41, %s4711_s30  ;;  %12627 = vst [vmem:[#allocation6_spill] sm:$0xff] %v7505_v58  ;;  %v949_v32 = vsel %vm945_vm5, %v12610_v0, %v12619_v38  ;;  %12628 = vst [vmem:[#allocation311_spill] sm:$0xff] %v7512_v33  ;;  %v12629_v51 = vld [vmem:[#allocation24_spill] sm:$0xff]  ;;  %v813_v17 = vsel %vm809_vm4, %v12618_v43, %v12631_v40  ;;  %v12633_v34 = vld [vmem:[#allocation67_spill] sm:$0xff]  ;;  %vm2985_vm4 = vcmp.lt.s32.totalorder %v5419_v3, 98  ;;  %vm3121_vm5 = vcmp.lt.s32.totalorder %v5419_v3, 97 }
 0x3e5   :  { %12625 = vst [vmem:[#allocation335_spill] sm:$0xff] %v7502_v46  ;;  %v7515_v44 = vmul.f32 %v821_v48, %v12629_v51  ;;  %v1091_v0 = vsel %vm1081_vm6, %v12633_v34, %v12632_v50  ;;  %v12634_v28 = vld [vmem:[#allocation352_spill] sm:$0xff]  ;;  %v12638_v46 = vld [vmem:[#allocation117_spill] sm:$0xff]  ;;  %v12641_v61 = vld [vmem:[#allocation342_spill] sm:$0xff] }
 0x3e6   :  { %v7530_v38 = vmul.f32 %v817_v7, %v12634_v28  ;;  %v12636_v51 = vld [vmem:[#allocation340_spill] sm:$0xff]  ;;  %v12639_v58 = vld [vmem:[#allocation41_spill] sm:$0xff]  ;;  %v7544_v31 = vmul.f32 %v949_v32, %v12641_v61  ;;  %v1088_v7 = vsel %vm1081_vm6, %v12644_v24, %v12643_v26  ;;  %v7560_v32 = vpop.permute.xlu1 %2547  ;;  %v12651_v24 = vld [vmem:[#allocation354_spill] sm:$0xff] }
 0x3e7   :  { %12630 = vst [vmem:[#allocation312_spill] sm:$0xff] %v7515_v44  ;;  %v7533_v48 = vmul.f32 %v961_v39, %v12636_v51  ;;  %v1090_v43 = vsel %vm1081_vm6, %v12639_v58, %v12638_v46  ;;  %v12640_v44 = vld [vmem:[#allocation124_spill] sm:$0xff]  ;;  %12648 = vst [vmem:[#allocation326_spill] sm:$0xff] %v7560_v32  ;;  %v12656_v42 = vld [vmem:[#allocation122_spill] sm:$0xff] }
 0x3e8   :  { %12635 = vst [vmem:[#allocation81_spill] sm:$0xff] %v7530_v38  ;;  %v1087_v40 = vsel %vm1081_vm6, %v12632_v50, %v12640_v44  ;;  %12642 = vst [vmem:[#allocation324_spill] sm:$0xff] %v7544_v31  ;;  %v12645_v39 = vld [vmem:[#allocation128_spill] sm:$0xff]  ;;  %2695 = vrot.lane.b32.xlu1 %v5171_v30, %s4711_s30  ;;  %v12649_v50 = vld [vmem:[#allocation353_spill] sm:$0xff]  ;;  %v7566_v31 = vmul.f32 %v813_v17, %v12651_v24 }
 0x3e9   :  { %12637 = vst [vmem:[#allocation90_spill] sm:$0xff] %v7533_v48  ;;  %v1095_v28 = vsel %vm1081_vm6, %v12645_v39, %v12633_v34  ;;  %v12646_v51 = vld [vmem:[#allocation4_spill] sm:$0xff]  ;;  %v7556_v48 = vpop.permute.xlu0 %2693  ;;  %v7563_v61 = vmul.f32 %v825_v36, %v12649_v50  ;;  %v12653_v38 = vld [vmem:[#allocation29_spill] sm:$0xff]  ;;  %v1083_v34 = vsel %vm1081_vm6, %v12640_v44, %v12645_v39  ;;  %v12658_v36 = vld [vmem:[#allocation343_spill] sm:$0xff] }
 0x3ea   :  { %3361 = vrot.lane.b32.xlu0 %v12646_v51, %s4720_s27  ;;  %12647 = vst [vmem:[#allocation8_spill] sm:$0xff] %v7556_v48  ;;  %12652 = vst [vmem:[#allocation83_spill] sm:$0xff] %v7566_v31  ;;  %v1103_v16 = vmul.f32 %v1091_v0, %v12653_v38  ;;  %v12654_v51 = vld [vmem:[#allocation36_spill] sm:$0xff]  ;;  %v1104_v50 = vmul.f32 %v1087_v40, %v12658_v36  ;;  %v12660_v0 = vld [vmem:[#allocation121_spill] sm:$0xff] }
 0x3eb   :  { %12650 = vst [vmem:[#allocation78_spill] sm:$0xff] %v7563_v61  ;;  %v7574_v48 = vmul.f32 %v1090_v43, %v12654_v51  ;;  %v12657_v10 = vld [vmem:[#allocation116_spill] sm:$0xff]  ;;  %v12659_v61 = vld [vmem:[#allocation126_spill] sm:$0xff]  ;;  %v1086_v44 = vsel %vm1081_vm6, %v12638_v46, %v12660_v0  ;;  %v12661_v38 = vld [vmem:[#allocation345_spill] sm:$0xff] }
 0x3ec   :  { %v1093_v32 = vsel %vm1081_vm6, %v12657_v10, %v12656_v42  ;;  %v1084_v17 = vsel %vm1081_vm6, %v12643_v26, %v12659_v61  ;;  %v1108_v43 = vmul.f32 %v1088_v7, %v12661_v38  ;;  %v12662_v39 = vld [vmem:[#allocation127_spill] sm:$0xff]  ;;  %v12663_v24 = vld [vmem:[#allocation346_spill] sm:$0xff]  ;;  %v12664_v40 = vld [vmem:[#allocation125_spill] sm:$0xff]  ;;  %2703 = vrot.lane.b32.xlu1 %v5127_v52, %s4711_s30 }
 0x3ed   :  { %12655 = vst [vmem:[#allocation15_spill] sm:$0xff] %v7574_v48  ;;  %v1089_v51 = vsel %vm1081_vm6, %v12656_v42, %v12662_v39  ;;  %v1102_v31 = vmul.f32 %v1095_v28, %v12663_v24  ;;  %v1082_v36 = vsel %vm1081_vm6, %v12660_v0, %v12664_v40  ;;  %v1094_v26 = vsel %vm1081_vm6, %v12664_v40, %v12639_v58  ;;  %v12665_v46 = vld [vmem:[#allocation347_spill] sm:$0xff]  ;;  %v7606_v38 = vpop.permute.xlu0 %2701  ;;  %v7610_v42 = vpop.permute.xlu1 %2555  ;;  %v12669_v0 = vld [vmem:[#allocation348_spill] sm:$0xff]  ;;  %v12670_v48 = vld [vmem:[#allocation129_spill] sm:$0xff] }
 0x3ee   :  { %v1105_v61 = vmul.f32 %v1083_v34, %v12665_v46  ;;  %v12666_v7 = vld [vmem:[#allocation7_spill] sm:$0xff]  ;;  %12667 = vst [vmem:[#allocation327_spill] sm:$0xff] %v7606_v38  ;;  %12668 = vst [vmem:[#allocation82_spill] sm:$0xff] %v7610_v42  ;;  %v7613_v28 = vadd.f32 %v1103_v16, %v7282_v1  ;;  %v1109_v24 = vmul.f32 %v1084_v17, %v12669_v0  ;;  %v12673_v38 = vld [vmem:[#allocation34_spill] sm:$0xff] }
 0x3ef   :  { %3369 = vrot.lane.b32.xlu0 %v12666_v7, %s4720_s27  ;;  %v1085_v58 = vsel %vm1081_vm6, %v12662_v39, %v12670_v48  ;;  %v1097_v34 = vsel %vm1081_vm6, %v12670_v48, %v12657_v10  ;;  %v12671_v40 = vld [vmem:[#allocation47_spill] sm:$0xff]  ;;  %v7628_v42 = vmul.f32 %v1086_v44, %v12673_v38  ;;  %v7631_v16 = vadd.f32 %v1104_v50, %v7290_v37  ;;  %v12676_v1 = vld [vmem:[#allocation30_spill] sm:$0xff] }
 0x3f0   :  { %v7625_v46 = vmul.f32 %v1093_v32, %v12671_v40  ;;  %v7634_v17 = vmul.f32 %v1089_v51, %v12676_v1  ;;  %v4338_v39 = vld [vmem:[%s11421_s3 + $0x25] ss:$8 sm:$0xf]  ;;  %v7640_v0 = vadd.f32 %v1108_v43, %v7373_v62  ;;  %v7649_v44 = vadd.f32 %v1102_v31, %v7296_v11  ;;  %2955 = vrot.lane.b32.xlu1 %v4967_v5, %s4715_s23 }
 0x3f1   :  { %12674 = vst [vmem:[#allocation21_spill] sm:$0xff] %v7628_v42  ;;  %12675 = vst [vmem:[#allocation85_spill] sm:$0xff] %v7631_v16  ;;  %v12679_v10 = vld [vmem:[#allocation31_spill] sm:$0xff]  ;;  %v12681_v32 = vld [vmem:[#allocation49_spill] sm:$0xff]  ;;  %v7652_v37 = vadd.f32 %v1105_v61, %v7298_v15  ;;  %v7658_v38 = vmul.f32 %v1085_v58, %v6967_v9  ;;  %v7662_v43 = vpop.permute.xlu0 %2953  ;;  %v7669_v31 = vadd.f32 %v1109_v24, %v7399_v35  ;;  %vm3257_vm6 = vcmp.lt.s32.totalorder %v5419_v3, 96 }
 0x3f2   :  { %12672 = vst [vmem:[#allocation92_spill] sm:$0xff] %v7625_v46  ;;  %12677 = vst [vmem:[#allocation94_spill] sm:$0xff] %v7634_v17  ;;  %v7643_v48 = vmul.f32 %v1094_v26, %v12679_v10  ;;  %v7646_v40 = vmul.f32 %v1082_v36, %v12681_v32  ;;  %v12684_v50 = vld [vmem:[#allocation355_spill] sm:$0xff]  ;;  %v12687_v62 = vld [vmem:[#allocation5_spill] sm:$0xff]  ;;  %v7666_v36 = vpop.permute.xlu1 %2563  ;;  %v7672_v11 = vrot.slane %v4338_v39, %v12617_v29 }
 0x3f3   :  { %12678 = vst [vmem:[#allocation89_spill] sm:$0xff] %v7640_v0  ;;  %12683 = vst [vmem:[#allocation28_spill] sm:$0xff] %v7652_v37  ;;  %v7655_v51 = vmul.f32 %v1097_v34, %v12684_v50  ;;  %3377 = vrot.lane.b32.xlu0 %v12687_v62, %s4720_s27  ;;  %v7675_v15 = vrot.slane %v4338_v39, %v12616_v49  ;;  %v7678_v9 = vrot.slane %v4338_v39, %v12543_v2  ;;  %v12691_v26 = vld [vmem:[#allocation130_spill] sm:$0xff]  ;;  %v12692_v61 = vld [vmem:[#allocation168_spill] sm:$0xff] }
 0x3f4   :  { %12680 = vst [vmem:[#allocation99_spill] sm:$0xff] %v7643_v48  ;;  %12682 = vst [vmem:[#allocation87_spill] sm:$0xff] %v7646_v40  ;;  %v1170_v58 = vmul.f32 %v12692_v61, %v12691_v26  ;;  %v12693_v34 = vld [vmem:[#allocation169_spill] sm:$0xff]  ;;  %v7686_v10 = vmul.f32 %v7257_v18, %v12691_v26  ;;  %v7689_v35 = vrot.slane %v4338_v39, %v12544_v56  ;;  %v12696_v24 = vld [vmem:[#allocation131_spill] sm:$0xff]  ;;  %2963 = vrot.lane.b32.xlu1 %v5004_v14, %s4715_s23 }
 0x3f5   :  { %12685 = vst [vmem:[#allocation337_spill] sm:$0xff] %v7655_v51  ;;  %12686 = vst [vmem:[#allocation101_spill] sm:$0xff] %v7658_v38  ;;  %v1169_v1 = vmul.f32 %v12693_v34, %v12691_v26  ;;  %v1174_v32 = vmul.f32 %v12692_v61, %v12696_v24  ;;  %v1173_v50 = vmul.f32 %v12693_v34, %v12696_v24  ;;  %v12700_v39 = vld [vmem:[#allocation132_spill] sm:$0xff]  ;;  %v12709_v62 = vld [vmem:[#allocation133_spill] sm:$0xff] }
 0x3f6   :  { %12688 = vst [vmem:[#allocation114_spill] sm:$0xff] %v7662_v43  ;;  %12689 = vst [vmem:[#allocation338_spill] sm:$0xff] %v7666_v36  ;;  %v7697_v38 = vmul.f32 %v7260_v55, %v12691_v26  ;;  %v7701_v46 = vmul.f32 %v7257_v18, %v12696_v24  ;;  %v7705_v17 = vmul.f32 %v7260_v55, %v12696_v24  ;;  %v4655_v26 = vld [vmem:[%s11420_s7] sm:$0xff]  ;;  %v7718_v43 = vpop.permute.xlu0 %2961  ;;  %v7722_v24 = vpop.permute.xlu1 %2777  ;;  %v12710_v7 = vld [vmem:[#allocation135_spill] sm:$0xff] }
 0x3f7   :  { %12690 = vst [vmem:[#allocation12_spill] sm:$0xff] %v7669_v31  ;;  %12694 = vst [vmem:[#allocation321_spill] sm:$0xff] %v7686_v10  ;;  %v7709_v51 = vmul.f32 %v7257_v18, %v12700_v39  ;;  %v7713_v48 = vmul.f32 %v7260_v55, %v12700_v39  ;;  %3579 = vperm.xlu0 %4592, %v4655_v26   ;;  %v12705_v36 = vld [vmem:[#allocation134_spill] sm:$0xff] }
 0x3f8   :  { %12695 = vst [vmem:[#allocation14_spill] sm:$0xff] %v7689_v35  ;;  %12697 = vst [vmem:[#allocation323_spill] sm:$0xff] %v7697_v38  ;;  %v7726_v40 = vmul.f32 %v12692_v61, %v12705_v36  ;;  %v7730_v39 = vmul.f32 %v12693_v34, %v12705_v36  ;;  %v7734_v42 = vmul.f32 %v7257_v18, %v12705_v36  ;;  %v12711_v61 = vld [vmem:[#allocation186_spill] sm:$0xff]  ;;  %v12712_v34 = vld [vmem:[#allocation185_spill] sm:$0xff]  ;;  %2971 = vrot.lane.b32.xlu1 %v12510_v25, %s4715_s23 }
 0x3f9   :  { %12698 = vst [vmem:[#allocation103_spill] sm:$0xff] %v7701_v46  ;;  %12699 = vst [vmem:[#allocation91_spill] sm:$0xff] %v7705_v17  ;;  %v7738_v26 = vmul.f32 %v7260_v55, %v12705_v36  ;;  %v7746_v31 = vmul.f32 %v12711_v61, %v12710_v7  ;;  %v7750_v0 = vmul.f32 %v12712_v34, %v12710_v7  ;;  %v12714_v55 = vld [vmem:[#allocation140_spill] sm:$0xff]  ;;  %v12732_v46 = vld [vmem:[#allocation149_spill] sm:$0xff] }
 0x3fa   :  { %12701 = vst [vmem:[#allocation93_spill] sm:$0xff] %v7709_v51  ;;  %12702 = vst [vmem:[#allocation106_spill] sm:$0xff] %v7713_v48  ;;  %v7754_v18 = vmul.f32 %v7304_v20, %v12710_v7  ;;  %v1230_v36 = vsel %vm1217_vm7, %v12714_v55, %v12709_v62  ;;  %v7770_v48 = vmul.f32 %v7352_v8, %v12710_v7  ;;  %v7786_v37 = vpop.permute.xlu0 %2969  ;;  %v7807_v38 = vpop.permute.xlu1 %3037 }
 0x3fb   :  { %12703 = vst [vmem:[#allocation22_spill] sm:$0xff] %v7718_v43  ;;  %12704 = vst [vmem:[#allocation350_spill] sm:$0xff] %v7722_v24  ;;  %v12708_v43 = vld [vmem:[#allocation138_spill] sm:$0xff]  ;;  %2711 = vrot.lane.b32.xlu0 %v5182_v54, %s4711_s30 }
 0x3fc   :  { %12706 = vst [vmem:[#allocation3_spill] sm:$0xff] %v7734_v42  ;;  %12707 = vst [vmem:[#allocation17_spill] sm:$0xff] %v7738_v26  ;;  %v1226_v24 = vsel %vm1217_vm7, %v12709_v62, %v12708_v43  ;;  %v12715_v26 = vld [vmem:[#allocation137_spill] sm:$0xff]  ;;  %v12719_v62 = vld [vmem:[#allocation136_spill] sm:$0xff]  ;;  %3185 = vperm.xlu1 %4587, %v7207_v4  }
 0x3fd   :  { %12713 = vst [vmem:[#allocation328_spill] sm:$0xff] %v7754_v18  ;;  %v7762_v42 = vmul.f32 %v12712_v34, %v12715_v26  ;;  %v7766_v13 = vmul.f32 %v12711_v61, %v12715_v26  ;;  %12716 = vst [vmem:[#allocation98_spill] sm:$0xff] %v7770_v48  ;;  %v7774_v51 = vmul.f32 %v7304_v20, %v12715_v26  ;;  %v12723_v48 = vld [vmem:[#allocation139_spill] sm:$0xff] }
 0x3fe   :  { %v7778_v23 = vmul.f32 %v7352_v8, %v12715_v26  ;;  %v7782_v18 = vmul.f32 %v7304_v20, %v12719_v62  ;;  %12721 = vst [vmem:[#allocation331_spill] sm:$0xff] %v7786_v37  ;;  %v7790_v7 = vmul.f32 %v1226_v24, %v1170_v58  ;;  %v12725_v26 = vld [vmem:[#allocation189_spill] sm:$0xff]  ;;  %v7805_v37 = vmul.f32 %v7352_v8, %v12719_v62  ;;  %v12733_v43 = vld [vmem:[#allocation147_spill] sm:$0xff] }
 0x3ff   :  { %12717 = vst [vmem:[#allocation104_spill] sm:$0xff] %v7774_v51  ;;  %v12724_v51 = vld [vmem:[#allocation188_spill] sm:$0xff]  ;;  %12727 = vst [vmem:[#allocation108_spill] sm:$0xff] %v7807_v38  ;;  %v7809_v58 = vmul.f32 %v1230_v36, %v1169_v1  ;;  %v12729_v24 = vld [vmem:[#allocation141_spill] sm:$0xff]  ;;  %v7817_v10 = vmul.f32 %v7346_v53, %v12723_v48  ;;  %v7821_v17 = vmul.f32 %v7349_v27, %v12723_v48  ;;  %2979 = vrot.lane.b32.xlu0 %v5013_v19, %s4715_s23 }
 0x400   :  { %12718 = vst [vmem:[#allocation96_spill] sm:$0xff] %v7778_v23  ;;  %12720 = vst [vmem:[#allocation329_spill] sm:$0xff] %v7782_v18  ;;  %v7794_v16 = vmul.f32 %v12724_v51, %v12723_v48  ;;  %v7798_v23 = vmul.f32 %v12725_v26, %v12723_v48  ;;  %v4339_v18 = vld [vmem:[%s11421_s3 + $0x26] ss:$8 sm:$0xf]  ;;  %v1227_v62 = vsel %vm1217_vm7, %v12733_v43, %v12732_v46 }
 0x401   :  { %12722 = vst [vmem:[#allocation107_spill] sm:$0xff] %v7790_v7  ;;  %12726 = vst [vmem:[#allocation97_spill] sm:$0xff] %v7805_v37  ;;  %v7813_v7 = vmul.f32 %v12724_v51, %v12729_v24  ;;  %v12734_v1 = vld [vmem:[#allocation151_spill] sm:$0xff]  ;;  %v7837_v38 = vmul.f32 %v7346_v53, %v12729_v24  ;;  %v7840_v48 = vrot.slane %v4339_v18, %v12617_v29  ;;  %v12747_v46 = vld [vmem:[#allocation201_spill] sm:$0xff] }
 0x402   :  { %12728 = vst [vmem:[#allocation95_spill] sm:$0xff] %v7809_v58  ;;  %12730 = vst [vmem:[#allocation109_spill] sm:$0xff] %v7817_v10  ;;  %v1231_v36 = vsel %vm1217_vm7, %v12734_v1, %v12733_v43  ;;  %v7833_v58 = vmul.f32 %v12725_v26, %v12729_v24  ;;  %v7843_v37 = vrot.slane %v4339_v18, %v12616_v49  ;;  %v7852_v43 = vpop.permute.xlu0 %3181  ;;  %v12740_v10 = vld [vmem:[#allocation143_spill] sm:$0xff] }
 0x403   :  { %12731 = vst [vmem:[#allocation100_spill] sm:$0xff] %v7821_v17  ;;  %12735 = vst [vmem:[#allocation105_spill] sm:$0xff] %v7837_v38  ;;  %v7847_v17 = vmul.f32 %v7349_v27, %v12729_v24  ;;  %v7856_v38 = vmul.f32 %v12711_v61, %v12740_v10  ;;  %v7860_v55 = vmul.f32 %v12712_v34, %v12740_v10  ;;  %v12746_v34 = vld [vmem:[#allocation144_spill] sm:$0xff]  ;;  %3231 = vrot.lane.b32.xlu0 %v12622_v41, %s4719_s12 }
 0x404   :  { %12736 = vst [vmem:[#allocation115_spill] sm:$0xff] %v7840_v48  ;;  %12737 = vst [vmem:[#allocation102_spill] sm:$0xff] %v7843_v37  ;;  %v7863_v1 = vrot.slane %v4339_v18, %v12543_v2  ;;  %v7866_v24 = vrot.slane %v4339_v18, %v12544_v56  ;;  %v1239_v37 = vmul.f32 %v1227_v62, %v1174_v32 }
 0x405   :  { %12738 = vst [vmem:[#allocation112_spill] sm:$0xff] %v7847_v17  ;;  %12739 = vst [vmem:[#allocation25_spill] sm:$0xff] %v7852_v43  ;;  %v7868_v17 = vpop.permute.xlu1 %1885  ;;  %v1238_v4 = vmul.f32 %v1231_v36, %v1173_v50  ;;  %v7872_v43 = vmul.f32 %v7304_v20, %v12740_v10  ;;  %v7876_v61 = vmul.f32 %v7352_v8, %v12740_v10  ;;  %v12752_v50 = vld [vmem:[#allocation145_spill] sm:$0xff]  ;;  %v12754_v36 = vmov 24  }
 0x406   :  { %12741 = vst [vmem:[#allocation339_spill] sm:$0xff] %v7863_v1  ;;  %12742 = vst [vmem:[#allocation24_spill] sm:$0xff] %v7866_v24  ;;  %v7880_v48 = vmul.f32 %v12747_v46, %v12746_v34  ;;  %v12748_v1 = vld [vmem:[#allocation203_spill] sm:$0xff]  ;;  %v12749_v24 = vld [vmem:[#allocation142_spill] sm:$0xff]  ;;  %v7896_v8 = vmul.f32 %v12747_v46, %v12752_v50  ;;  %v7904_v62 = vmul.f32 %v7363_v21, %v12746_v34  ;;  %4588 = vset.pattern.permute.xlu1 %v12754_v36 }
 0x407   :  { %12743 = vst [vmem:[#allocation113_spill] sm:$0xff] %v7868_v17  ;;  %12744 = vst [vmem:[#allocation118_spill] sm:$0xff] %v7872_v43  ;;  %v7884_v18 = vmul.f32 %v12748_v1, %v12746_v34  ;;  %v7888_v32 = vmul.f32 %v7346_v53, %v12749_v24  ;;  %v7892_v20 = vmul.f32 %v7349_v27, %v12749_v24  ;;  %v7925_v43 = vpop.permute.xlu0 %3313  ;;  %3445 = vperm.xlu1 %4588, %v12540_v6   ;;  %v12762_v36 = vld [vmem:[#allocation161_spill] sm:$0xff] }
 0x408   :  { %12745 = vst [vmem:[#allocation67_spill] sm:$0xff] %v7876_v61  ;;  %v7900_v10 = vmul.f32 %v12748_v1, %v12752_v50  ;;  %12753 = vst [vmem:[#allocation117_spill] sm:$0xff] %v7904_v62  ;;  %v7911_v24 = vmul.f32 %v7380_v45, %v12746_v34  ;;  %v7915_v17 = vmul.f32 %v7363_v21, %v12752_v50  ;;  %3239 = vrot.lane.b32.xlu0 %v5171_v30, %s4719_s12 }
 0x409   :  { %12750 = vst [vmem:[#allocation352_spill] sm:$0xff] %v7888_v32  ;;  %12751 = vst [vmem:[#allocation340_spill] sm:$0xff] %v7892_v20  ;;  %v7919_v20 = vmul.f32 %v7380_v45, %v12752_v50  ;;  %v12758_v32 = vld [vmem:[#allocation150_spill] sm:$0xff]  ;;  %v7928_v62 = vpop.permute.xlu1 %1887  ;;  %v1255_v34 = vadd.f32 %v1239_v37, %v7613_v28  ;;  %v12771_v37 = vld [vmem:[#allocation148_spill] sm:$0xff] }
 0x40a   :  { %12755 = vst [vmem:[#allocation41_spill] sm:$0xff] %v7911_v24  ;;  %12756 = vst [vmem:[#allocation124_spill] sm:$0xff] %v7915_v17  ;;  %v7923_v61 = vmul.f32 %v7363_v21, %v12758_v32  ;;  %v1254_v24 = vadd.f32 %v1238_v4, %v7649_v44  ;;  %v12763_v17 = vld [vmem:[#allocation159_spill] sm:$0xff]  ;;  %v12770_v44 = vld [vmem:[#allocation157_spill] sm:$0xff] }
 0x40b   :  { %12757 = vst [vmem:[#allocation342_spill] sm:$0xff] %v7919_v20  ;;  %12760 = vst [vmem:[#allocation119_spill] sm:$0xff] %v7925_v43  ;;  %v1363_v50 = vsel %vm1353_vm8, %v12763_v17, %v12762_v36  ;;  %v7938_v20 = vmul.f32 %v7380_v45, %v12758_v32  ;;  %v12766_v43 = vld [vmem:[#allocation153_spill] sm:$0xff]  ;;  %v1366_v32 = vsel %vm1353_vm8, %v12771_v37, %v12770_v44  ;;  %v12779_v37 = vld [vmem:[#allocation160_spill] sm:$0xff]  ;;  %2301 = vrot.lane.b32.xlu1 %v12567_v59, %s4705_s28 }
 0x40c   :  { %12759 = vst [vmem:[#allocation123_spill] sm:$0xff] %v7923_v61  ;;  %12761 = vst [vmem:[#allocation128_spill] sm:$0xff] %v7928_v62  ;;  %v12765_v61 = vld [vmem:[#allocation163_spill] sm:$0xff]  ;;  %v7946_v62 = vmul.f32 %v12724_v51, %v12766_v43  ;;  %v7950_v4 = vmul.f32 %v12725_v26, %v12766_v43  ;;  %v7954_v28 = vmul.f32 %v7346_v53, %v12766_v43  ;;  %v12773_v36 = vld [vmem:[#allocation221_spill] sm:$0xff]  ;;  %4590 = vset.pattern.permute.xlu1 %v12551_v22 }
 0x40d   :  { %12764 = vst [vmem:[#allocation353_spill] sm:$0xff] %v7938_v20  ;;  %v1367_v6 = vsel %vm1353_vm8, %v12765_v61, %v12763_v17  ;;  %v12772_v20 = vld [vmem:[#allocation152_spill] sm:$0xff]  ;;  %v7970_v26 = vmul.f32 %v7349_v27, %v12766_v43  ;;  %v12778_v53 = vld [vmem:[#allocation146_spill] sm:$0xff]  ;;  %3247 = vrot.lane.b32.xlu0 %v5127_v52, %s4719_s12 }
 0x40e   :  { %12767 = vst [vmem:[#allocation354_spill] sm:$0xff] %v7946_v62  ;;  %12768 = vst [vmem:[#allocation29_spill] sm:$0xff] %v7950_v4  ;;  %v7962_v17 = vmul.f32 %v12773_v36, %v12772_v20  ;;  %v12775_v51 = vld [vmem:[#allocation224_spill] sm:$0xff]  ;;  %v12780_v4 = vld [vmem:[#allocation158_spill] sm:$0xff]  ;;  %v7988_v43 = vmul.f32 %v7394_v63, %v12772_v20 }
 0x40f   :  { %12769 = vst [vmem:[#allocation36_spill] sm:$0xff] %v7954_v28  ;;  %v7966_v61 = vmul.f32 %v12775_v51, %v12772_v20  ;;  %12777 = vst [vmem:[#allocation343_spill] sm:$0xff] %v7970_v26  ;;  %v1362_v28 = vsel %vm1353_vm8, %v12770_v44, %v12778_v53  ;;  %v1498_v62 = vsel %vm1489_vm9, %v12780_v4, %v12779_v37  ;;  %v4340_v27 = vld [vmem:[%s11421_s3 + $0x27] ss:$8 sm:$0xf]  ;;  %v7990_v26 = vpop.permute.xlu0 %2569  ;;  %v7994_v44 = vpop.permute.xlu1 %2163  ;;  %2303 = vrot.lane.b32.xlu1 %v5182_v54, %s4705_s28  ;;  %s4721_s28 = smov 94  }
 0x410   :  { %12774 = vst [vmem:[#allocation122_spill] sm:$0xff] %v7962_v17  ;;  %v1375_v17 = vmul.f32 %v1363_v50, %v7746_v31  ;;  %12781 = vst [vmem:[#allocation126_spill] sm:$0xff] %v7988_v43  ;;  %v12784_v53 = vld [vmem:[#allocation162_spill] sm:$0xff]  ;;  %v1374_v50 = vmul.f32 %v1367_v6, %v7750_v0  ;;  %v8007_v43 = vmul.f32 %v7397_v47, %v12772_v20 }
 0x411   :  { %12776 = vst [vmem:[#allocation116_spill] sm:$0xff] %v7966_v61  ;;  %12782 = vst [vmem:[#allocation121_spill] sm:$0xff] %v7990_v26  ;;  %v1502_v31 = vsel %vm1489_vm9, %v12784_v53, %v12780_v4  ;;  %v12785_v61 = vld [vmem:[#allocation155_spill] sm:$0xff]  ;;  %v8011_v26 = vmul.f32 %v1366_v32, %v7762_v42  ;;  %v8026_v20 = vmul.f32 %v1362_v28, %v7766_v13  ;;  %3499 = vrot.lane.b32.xlu0 %v4967_v5, %s4721_s28 }
 0x412   :  { %12783 = vst [vmem:[#allocation345_spill] sm:$0xff] %v7994_v44  ;;  %v8003_v37 = vmul.f32 %v12773_v36, %v12785_v61  ;;  %12786 = vst [vmem:[#allocation127_spill] sm:$0xff] %v8007_v43  ;;  %v8015_v44 = vmul.f32 %v12775_v51, %v12785_v61  ;;  %v8019_v0 = vmul.f32 %v7394_v63, %v12785_v61 }
 0x413   :  { %12787 = vst [vmem:[#allocation346_spill] sm:$0xff] %v8011_v26  ;;  %v8023_v6 = vmul.f32 %v7397_v47, %v12785_v61  ;;  %12790 = vst [vmem:[#allocation348_spill] sm:$0xff] %v8026_v20  ;;  %v8029_v22 = vmul.f32 %v1498_v62, %v7794_v16  ;;  %v8032_v42 = vrot.slane %v4340_v27, %v12617_v29  ;;  %v8048_v16 = vpop.permute.xlu0 %2821  ;;  %v8052_v62 = vpop.permute.xlu1 %2415  ;;  %v12797_v20 = vld [vmem:[#allocation178_spill] sm:$0xff]  ;;  %2571 = vrot.lane.b32.xlu1 %v5013_v19, %s4709_s25 }
 0x414   :  { %12788 = vst [vmem:[#allocation125_spill] sm:$0xff] %v8019_v0  ;;  %v8035_v4 = vrot.slane %v4340_v27, %v12616_v49  ;;  %v1391_v32 = vadd.f32 %v1375_v17, %v1255_v34  ;;  %v8040_v43 = vmul.f32 %v1502_v31, %v7798_v23  ;;  %v8043_v61 = vrot.slane %v4340_v27, %v12543_v2  ;;  %v12798_v34 = vld [vmem:[#allocation164_spill] sm:$0xff]  ;;  %v12801_v31 = vld [vmem:[#allocation165_spill] sm:$0xff] }
 0x415   :  { %12789 = vst [vmem:[#allocation347_spill] sm:$0xff] %v8023_v6  ;;  %12791 = vst [vmem:[#allocation129_spill] sm:$0xff] %v8029_v22  ;;  %v8046_v13 = vrot.slane %v4340_v27, %v12544_v56  ;;  %v1390_v28 = vadd.f32 %v1374_v50, %v1254_v24  ;;  %v12796_v22 = vld [vmem:[#allocation180_spill] sm:$0xff]  ;;  %v8060_v17 = vmul.f32 %v7394_v63, %v12798_v34  ;;  %3507 = vrot.lane.b32.xlu0 %v5004_v14, %s4721_s28 }
 0x416   :  { %12792 = vst [vmem:[#allocation47_spill] sm:$0xff] %v8040_v43  ;;  %12794 = vst [vmem:[#allocation30_spill] sm:$0xff] %v8048_v16  ;;  %v1499_v23 = vsel %vm1489_vm9, %v12797_v20, %v12796_v22  ;;  %v8064_v27 = vmul.f32 %v7397_v47, %v12798_v34  ;;  %v8068_v43 = vmul.f32 %v12747_v46, %v12801_v31  ;;  %v12807_v16 = vld [vmem:[#allocation172_spill] sm:$0xff]  ;;  %v12809_v46 = vld [vmem:[#allocation173_spill] sm:$0xff] }
 0x417   :  { %12793 = vst [vmem:[#allocation34_spill] sm:$0xff] %v8046_v13  ;;  %12795 = vst [vmem:[#allocation31_spill] sm:$0xff] %v8052_v62  ;;  %v8072_v24 = vmul.f32 %v12748_v1, %v12801_v31  ;;  %v8076_v50 = vmul.f32 %v7363_v21, %v12801_v31  ;;  %v8080_v26 = vmul.f32 %v7380_v45, %v12801_v31  ;;  %v12806_v62 = vld [vmem:[#allocation174_spill] sm:$0xff]  ;;  %v12812_v45 = vld [vmem:[#allocation176_spill] sm:$0xff]  ;;  %v8113_v22 = vpop.permute.xlu0 %2829  ;;  %2823 = vrot.lane.b32.xlu1 %v12622_v41, %s4713_s21 }
 0x418   :  { %12799 = vst [vmem:[#allocation49_spill] sm:$0xff] %v8060_v17  ;;  %12800 = vst [vmem:[#allocation355_spill] sm:$0xff] %v8064_v27  ;;  %v1229_v34 = vsel %vm1217_vm7, %v12807_v16, %v12806_v62  ;;  %v12808_v27 = vld [vmem:[#allocation175_spill] sm:$0xff]  ;;  %v12810_v1 = vld [vmem:[#allocation182_spill] sm:$0xff]  ;;  %v1233_v31 = vsel %vm1217_vm7, %v12812_v45, %v12807_v16  ;;  %v8117_v62 = vpop.permute.xlu1 %2423 }
 0x419   :  { %12802 = vst [vmem:[#allocation130_spill] sm:$0xff] %v8068_v43  ;;  %12803 = vst [vmem:[#allocation168_spill] sm:$0xff] %v8072_v24  ;;  %v1634_v17 = vsel %vm1625_vm10, %v12809_v46, %v12808_v27  ;;  %v1503_v21 = vsel %vm1489_vm9, %v12810_v1, %v12797_v20  ;;  %v1511_v20 = vmul.f32 %v1499_v23, %v7813_v7  ;;  %v12816_v24 = vld [vmem:[#allocation166_spill] sm:$0xff]  ;;  %3515 = vrot.lane.b32.xlu0 %v12510_v25, %s4721_s28 }
 0x41a   :  { %12804 = vst [vmem:[#allocation169_spill] sm:$0xff] %v8076_v50  ;;  %12805 = vst [vmem:[#allocation131_spill] sm:$0xff] %v8080_v26  ;;  %v12811_v50 = vld [vmem:[#allocation167_spill] sm:$0xff]  ;;  %v12813_v26 = vld [vmem:[#allocation177_spill] sm:$0xff]  ;;  %v8121_v16 = vmul.f32 %v7477_v12, %v12816_v24  ;;  %v8142_v45 = vmul.f32 %v1634_v17, %v7880_v48  ;;  %v1510_v43 = vmul.f32 %v1503_v21, %v7833_v58 }
 0x41b   :  { %v8096_v6 = vmul.f32 %v7477_v12, %v12811_v50  ;;  %v1638_v0 = vsel %vm1625_vm10, %v12813_v26, %v12809_v46  ;;  %v8111_v1 = vmul.f32 %v7480_v60, %v12811_v50  ;;  %12814 = vst [vmem:[#allocation132_spill] sm:$0xff] %v8113_v22  ;;  %12815 = vst [vmem:[#allocation134_spill] sm:$0xff] %v8117_v62  ;;  %v4341_v62 = vld [vmem:[%s11421_s3 + $0x40] ss:$8 sm:$0xf]  ;;  %2831 = vrot.lane.b32.xlu1 %v5171_v30, %s4713_s21 }
 0x41c   :  { %12817 = vst [vmem:[#allocation133_spill] sm:$0xff] %v8121_v16  ;;  %v8125_v46 = vmul.f32 %v7480_v60, %v12816_v24  ;;  %v8129_v7 = vmul.f32 %v7491_v57, %v12811_v50  ;;  %v8133_v23 = vmul.f32 %v7512_v33, %v12811_v50  ;;  %v8139_v22 = vmul.f32 %v1229_v34, %v7726_v40  ;;  %v8180_v17 = vpop.permute.xlu1 %2431  ;;  %v12831_v34 = vld [vmem:[#allocation181_spill] sm:$0xff] }
 0x41d   :  { %12822 = vst [vmem:[#allocation136_spill] sm:$0xff] %v8142_v45  ;;  %v8153_v50 = vmul.f32 %v1638_v0, %v7884_v18  ;;  %v1527_v58 = vadd.f32 %v1511_v20, %v1391_v32  ;;  %v8166_v48 = vrot.slane %v4341_v62, %v12617_v29  ;;  %v8176_v0 = vpop.permute.xlu0 %2837  ;;  %12830 = vst [vmem:[#allocation144_spill] sm:$0xff] %v8180_v17  ;;  %v12838_v17 = vld [vmem:[#allocation193_spill] sm:$0xff]  ;;  %2847 = vrot.lane.b32.xlu0 %v5182_v54, %s4713_s21 }
 0x41e   :  { %12818 = vst [vmem:[#allocation135_spill] sm:$0xff] %v8125_v46  ;;  %12819 = vst [vmem:[#allocation186_spill] sm:$0xff] %v8129_v7  ;;  %v8147_v46 = vmul.f32 %v7491_v57, %v12816_v24  ;;  %v8150_v7 = vmul.f32 %v1233_v31, %v7730_v39  ;;  %v8184_v32 = vmul.f32 %v7672_v11, %v12831_v34  ;;  %v12834_v24 = vld [vmem:[#allocation200_spill] sm:$0xff] }
 0x41f   :  { %12820 = vst [vmem:[#allocation185_spill] sm:$0xff] %v8133_v23  ;;  %12821 = vst [vmem:[#allocation137_spill] sm:$0xff] %v8139_v22  ;;  %v12826_v23 = vld [vmem:[#allocation179_spill] sm:$0xff]  ;;  %v8187_v21 = vrot.slane %v4341_v62, %v12616_v49  ;;  %v8190_v31 = vrot.slane %v4341_v62, %v12543_v2  ;;  %v8193_v20 = vrot.slane %v4341_v62, %v12544_v56  ;;  %v12835_v22 = vld [vmem:[#allocation198_spill] sm:$0xff]  ;;  %2839 = vrot.lane.b32.xlu1 %v5127_v52, %s4713_s21 }
 0x420   :  { %12823 = vst [vmem:[#allocation139_spill] sm:$0xff] %v8147_v46  ;;  %12824 = vst [vmem:[#allocation188_spill] sm:$0xff] %v8150_v7  ;;  %v8157_v16 = vmul.f32 %v7477_v12, %v12826_v23  ;;  %v8161_v40 = vmul.f32 %v7480_v60, %v12826_v23  ;;  %v8170_v39 = vmul.f32 %v7491_v57, %v12826_v23  ;;  %v12840_v62 = vld [vmem:[#allocation202_spill] sm:$0xff] }
 0x421   :  { %12825 = vst [vmem:[#allocation189_spill] sm:$0xff] %v8153_v50  ;;  %v8174_v18 = vmul.f32 %v7512_v33, %v12826_v23  ;;  %12829 = vst [vmem:[#allocation143_spill] sm:$0xff] %v8176_v0  ;;  %v1526_v23 = vadd.f32 %v1510_v43, %v1390_v28  ;;  %v1635_v7 = vsel %vm1625_vm10, %v12835_v22, %v12834_v24  ;;  %v12839_v0 = vld [vmem:[#allocation191_spill] sm:$0xff]  ;;  %3115 = vrot.lane.b32.xlu0 %v5013_v19, %s4717_s26 }
 0x422   :  { %12827 = vst [vmem:[#allocation141_spill] sm:$0xff] %v8170_v39  ;;  %12832 = vst [vmem:[#allocation201_spill] sm:$0xff] %v8184_v32  ;;  %v8202_v45 = vmul.f32 %v7675_v15, %v12831_v34  ;;  %v8206_v50 = vmul.f32 %v7678_v9, %v12831_v34  ;;  %v1770_v43 = vsel %vm1761_vm11, %v12839_v0, %v12838_v17  ;;  %v12844_v34 = vld [vmem:[#allocation194_spill] sm:$0xff]  ;;  %v12851_v32 = vld [vmem:[#allocation187_spill] sm:$0xff] }
 0x423   :  { %12828 = vst [vmem:[#allocation147_spill] sm:$0xff] %v8174_v18  ;;  %12833 = vst [vmem:[#allocation203_spill] sm:$0xff] %v8193_v20  ;;  %v1639_v28 = vsel %vm1625_vm10, %v12840_v62, %v12835_v22  ;;  %v12841_v18 = vld [vmem:[#allocation183_spill] sm:$0xff]  ;;  %3091 = vrot.lane.b32.xlu1 %v4967_v5, %s4717_s26 }
 0x424   :  { %12836 = vst [vmem:[#allocation142_spill] sm:$0xff] %v8202_v45  ;;  %12837 = vst [vmem:[#allocation145_spill] sm:$0xff] %v8206_v50  ;;  %v8218_v39 = vmul.f32 %v12773_v36, %v12841_v18  ;;  %v8222_v46 = vmul.f32 %v12775_v51, %v12841_v18  ;;  %v12845_v50 = vld [vmem:[#allocation192_spill] sm:$0xff]  ;;  %v12846_v45 = vld [vmem:[#allocation195_spill] sm:$0xff]  ;;  %v8240_v51 = vmul.f32 %v7394_v63, %v12841_v18 }
 0x425   :  { %v1365_v24 = vsel %vm1353_vm8, %v12845_v50, %v12844_v34  ;;  %v1774_v22 = vsel %vm1761_vm11, %v12846_v45, %v12839_v0  ;;  %v12847_v36 = vld [vmem:[#allocation196_spill] sm:$0xff]  ;;  %v8246_v34 = vpop.permute.xlu1 %2683  ;;  %v8251_v0 = vmul.f32 %v7672_v11, %v12851_v32  ;;  %v8259_v63 = vmul.f32 %v7397_v47, %v12841_v18  ;;  %3367 = vrot.lane.b32.xlu0 %v12622_v41, %s4720_s27 }
 0x426   :  { %12842 = vst [vmem:[#allocation150_spill] sm:$0xff] %v8218_v39  ;;  %12843 = vst [vmem:[#allocation159_spill] sm:$0xff] %v8222_v46  ;;  %v1369_v62 = vsel %vm1353_vm8, %v12847_v36, %v12845_v50  ;;  %v8242_v46 = vpop.permute.xlu0 %3089  ;;  %v1647_v39 = vmul.f32 %v1635_v7, %v7896_v8  ;;  %v8255_v50 = vmul.f32 %v7675_v15, %v12851_v32 }
 0x427   :  { %12848 = vst [vmem:[#allocation153_spill] sm:$0xff] %v8240_v51  ;;  %12849 = vst [vmem:[#allocation157_spill] sm:$0xff] %v8242_v46  ;;  %v8262_v46 = vmul.f32 %v1770_v43, %v8003_v37  ;;  %v1646_v51 = vmul.f32 %v1639_v28, %v7900_v10  ;;  %v8267_v8 = vmul.f32 %v7678_v9, %v12851_v32  ;;  %v12859_v37 = vld [vmem:[#allocation197_spill] sm:$0xff]  ;;  %3099 = vrot.lane.b32.xlu1 %v5004_v14, %s4717_s26  ;;  %v12951_v14 = vld [vmem:[#allocation71_spill] sm:$0xff] }
 0x428   :  { %12850 = vst [vmem:[#allocation152_spill] sm:$0xff] %v8246_v34  ;;  %12852 = vst [vmem:[#allocation221_spill] sm:$0xff] %v8259_v63  ;;  %v8271_v7 = vmul.f32 %v7689_v35, %v12851_v32  ;;  %v8274_v34 = vmul.f32 %v1365_v24, %v7856_v38  ;;  %v8277_v36 = vmul.f32 %v1774_v22, %v8015_v44  ;;  %v12861_v32 = vld [vmem:[#allocation199_spill] sm:$0xff] }
 0x429   :  { %12853 = vst [vmem:[#allocation224_spill] sm:$0xff] %v8262_v46  ;;  %12854 = vst [vmem:[#allocation158_spill] sm:$0xff] %v8267_v8  ;;  %v8280_v47 = vmul.f32 %v1369_v62, %v7860_v55  ;;  %v8284_v10 = vmul.f32 %v7672_v11, %v12859_v37  ;;  %v8290_v18 = vmul.f32 %v7675_v15, %v12859_v37  ;;  %v12862_v38 = vld [vmem:[#allocation115_spill] sm:$0xff]  ;;  %v8303_v43 = vpop.permute.xlu1 %2691  ;;  %3375 = vrot.lane.b32.xlu0 %v5171_v30, %s4720_s27 }
 0x42a   :  { %12855 = vst [vmem:[#allocation162_spill] sm:$0xff] %v8271_v7  ;;  %12856 = vst [vmem:[#allocation155_spill] sm:$0xff] %v8274_v34  ;;  %v8294_v24 = vmul.f32 %v12862_v38, %v12861_v32  ;;  %v4342_v55 = vld [vmem:[%s11421_s3 + $0x41] ss:$8 sm:$0xf]  ;;  %v8299_v44 = vpop.permute.xlu0 %3097  ;;  %v8307_v62 = vmul.f32 %v7678_v9, %v12859_v37  ;;  %v8311_v28 = vmul.f32 %v7689_v35, %v12859_v37 }
 0x42b   :  { %12857 = vst [vmem:[#allocation178_spill] sm:$0xff] %v8277_v36  ;;  %12858 = vst [vmem:[#allocation164_spill] sm:$0xff] %v8280_v47  ;;  %v1663_v22 = vadd.f32 %v1647_v39, %v1527_v58  ;;  %v12868_v34 = vld [vmem:[#allocation211_spill] sm:$0xff]  ;;  %v12869_v47 = vld [vmem:[#allocation149_spill] sm:$0xff]  ;;  %v1662_v7 = vadd.f32 %v1646_v51, %v1526_v23  ;;  %v8342_v23 = vrot.slane %v4342_v55, %v12616_v49  ;;  %3107 = vrot.lane.b32.xlu1 %v12510_v25, %s4717_s26 }
 0x42c   :  { %12860 = vst [vmem:[#allocation165_spill] sm:$0xff] %v8290_v18  ;;  %12863 = vst [vmem:[#allocation172_spill] sm:$0xff] %v8294_v24  ;;  %v1223_v46 = vsel %vm1217_vm7, %v12869_v47, %v12868_v34  ;;  %v12870_v36 = vld [vmem:[#allocation102_spill] sm:$0xff]  ;;  %v12875_v58 = vld [vmem:[#allocation205_spill] sm:$0xff] }
 0x42d   :  { %12864 = vst [vmem:[#allocation175_spill] sm:$0xff] %v8299_v44  ;;  %12865 = vst [vmem:[#allocation173_spill] sm:$0xff] %v8303_v43  ;;  %v8319_v44 = vmul.f32 %v12870_v36, %v12861_v32  ;;  %v12872_v43 = vld [vmem:[#allocation339_spill] sm:$0xff]  ;;  %v8331_v39 = vmul.f32 %v7477_v12, %v12875_v58  ;;  %v8335_v47 = vmul.f32 %v7480_v60, %v12875_v58  ;;  %v12882_v60 = vld [vmem:[#allocation140_spill] sm:$0xff]  ;;  %3383 = vrot.lane.b32.xlu0 %v5127_v52, %s4720_s27 }
 0x42e   :  { %12866 = vst [vmem:[#allocation167_spill] sm:$0xff] %v8307_v62  ;;  %12867 = vst [vmem:[#allocation177_spill] sm:$0xff] %v8311_v28  ;;  %v8323_v63 = vmul.f32 %v12872_v43, %v12861_v32  ;;  %v12874_v62 = vld [vmem:[#allocation151_spill] sm:$0xff]  ;;  %v8339_v28 = vrot.slane %v4342_v55, %v12617_v29  ;;  %v8346_v51 = vmul.f32 %v7491_v57, %v12875_v58  ;;  %v12884_v32 = vld [vmem:[#allocation138_spill] sm:$0xff] }
 0x42f   :  { %12871 = vst [vmem:[#allocation179_spill] sm:$0xff] %v8319_v44  ;;  %v1219_v37 = vsel %vm1217_vm7, %v12868_v34, %v12874_v62  ;;  %12876 = vst [vmem:[#allocation193_spill] sm:$0xff] %v8331_v39  ;;  %v8350_v12 = vmul.f32 %v7512_v33, %v12875_v58  ;;  %v12883_v34 = vld [vmem:[#allocation209_spill] sm:$0xff]  ;;  %v12885_v8 = vld [vmem:[#allocation103_spill] sm:$0xff]  ;;  %v8366_v58 = vpop.permute.xlu0 %3105  ;;  %v8370_v33 = vpop.permute.xlu1 %2699  ;;  %3321 = vperm.xlu1 %4590, %v12951_v14  }
 0x430   :  { %12873 = vst [vmem:[#allocation198_spill] sm:$0xff] %v8323_v63  ;;  %12877 = vst [vmem:[#allocation191_spill] sm:$0xff] %v8335_v47  ;;  %v1218_v62 = vsel %vm1217_vm7, %v12883_v34, %v12882_v60  ;;  %v1222_v63 = vsel %vm1217_vm7, %v12884_v32, %v12883_v34  ;;  %v1240_v57 = vmul.f32 %v1223_v46, %v12885_v8  ;;  %v12890_v47 = vld [vmem:[#allocation208_spill] sm:$0xff]  ;;  %v12891_v39 = vld [vmem:[#allocation91_spill] sm:$0xff] }
 0x431   :  { %12878 = vst [vmem:[#allocation183_spill] sm:$0xff] %v8339_v28  ;;  %12879 = vst [vmem:[#allocation192_spill] sm:$0xff] %v8342_v23  ;;  %v1241_v44 = vmul.f32 %v1219_v37, %v12891_v39  ;;  %v12892_v32 = vld [vmem:[#allocation207_spill] sm:$0xff]  ;;  %v8382_v8 = vrot.slane %v4342_v55, %v12544_v56  ;;  %v12894_v34 = vld [vmem:[#allocation220_spill] sm:$0xff] }
 0x432   :  { %12880 = vst [vmem:[#allocation195_spill] sm:$0xff] %v8346_v51  ;;  %12881 = vst [vmem:[#allocation187_spill] sm:$0xff] %v8350_v12  ;;  %v8364_v51 = vrot.slane %v4342_v55, %v12543_v2  ;;  %v12889_v12 = vld [vmem:[#allocation210_spill] sm:$0xff]  ;;  %v8379_v46 = vmul.f32 %v12862_v38, %v12892_v32  ;;  %v8394_v37 = vmul.f32 %v12870_v36, %v12892_v32  ;;  %v12898_v55 = vld [vmem:[#allocation321_spill] sm:$0xff] }
 0x433   :  { %12887 = vst [vmem:[#allocation115_spill] sm:$0xff] %v8366_v58  ;;  %12888 = vst [vmem:[#allocation211_spill] sm:$0xff] %v8370_v33  ;;  %v1906_v60 = vsel %vm1897_vm12, %v12890_v47, %v12889_v12  ;;  %v12895_v58 = vld [vmem:[#allocation219_spill] sm:$0xff]  ;;  %v8398_v39 = vmul.f32 %v12872_v43, %v12892_v32  ;;  %v8401_v12 = vmul.f32 %v1222_v63, %v12898_v55  ;;  %v12906_v63 = vld [vmem:[#allocation85_spill] sm:$0xff]  ;;  %2437 = vrot.lane.b32.xlu1 %v12567_v59, %s4707_s29 }
 0x434   :  { %12886 = vst [vmem:[#allocation197_spill] sm:$0xff] %v8364_v51  ;;  %12893 = vst [vmem:[#allocation149_spill] sm:$0xff] %v8382_v8  ;;  %v1771_v5 = vsel %vm1761_vm11, %v12895_v58, %v12894_v34  ;;  %v12896_v33 = vld [vmem:[#allocation223_spill] sm:$0xff]  ;;  %v12902_v34 = vld [vmem:[#allocation212_spill] sm:$0xff]  ;;  %v8420_v55 = vadd.f32 %v1240_v57, %v12906_v63 }
 0x435   :  { %v1775_v24 = vsel %vm1761_vm11, %v12896_v33, %v12895_v58  ;;  %12897 = vst [vmem:[#allocation102_spill] sm:$0xff] %v8398_v39  ;;  %12899 = vst [vmem:[#allocation339_spill] sm:$0xff] %v8401_v12  ;;  %v12900_v8 = vld [vmem:[#allocation323_spill] sm:$0xff]  ;;  %v1910_v23 = vsel %vm1897_vm12, %v12902_v34, %v12890_v47  ;;  %v12903_v58 = vld [vmem:[#allocation24_spill] sm:$0xff]  ;;  %v8417_v39 = vmul.f32 %v1906_v60, %v8096_v6  ;;  %v8432_v12 = vpop.permute.xlu1 %2913  ;;  %v8434_v6 = vpop.permute.xlu0 %3317 }
 0x436   :  { %v8404_v51 = vmul.f32 %v1218_v62, %v12900_v8  ;;  %v8412_v33 = vmul.f32 %v12903_v58, %v12892_v32  ;;  %v12907_v62 = vld [vmem:[#allocation215_spill] sm:$0xff]  ;;  %v12908_v8 = vld [vmem:[#allocation213_spill] sm:$0xff]  ;;  %12910 = vst [vmem:[#allocation209_spill] sm:$0xff] %v8432_v12  ;;  %12911 = vst [vmem:[#allocation138_spill] sm:$0xff] %v8434_v6 }
 0x437   :  { %12905 = vst [vmem:[#allocation140_spill] sm:$0xff] %v8417_v39  ;;  %v12909_v47 = vld [vmem:[#allocation217_spill] sm:$0xff]  ;;  %v12912_v60 = vld [vmem:[#allocation28_spill] sm:$0xff]  ;;  %v12913_v63 = vld [vmem:[#allocation218_spill] sm:$0xff] }
 0x438   :  { %12901 = vst [vmem:[#allocation151_spill] sm:$0xff] %v8404_v51  ;;  %12904 = vst [vmem:[#allocation205_spill] sm:$0xff] %v8412_v33  ;;  %v1501_v51 = vsel %vm1489_vm9, %v12908_v8, %v12907_v62  ;;  %v1505_v32 = vsel %vm1489_vm9, %v12909_v47, %v12908_v8  ;;  %v8437_v57 = vadd.f32 %v1241_v44, %v12912_v60  ;;  %v12914_v39 = vld [vmem:[#allocation160_spill] sm:$0xff]  ;;  %v12915_v62 = vld [vmem:[#allocation122_spill] sm:$0xff] }
 0x439   :  { %v1494_v33 = vsel %vm1489_vm9, %v12914_v39, %v12913_v63  ;;  %v1783_v34 = vmul.f32 %v1771_v5, %v12915_v62  ;;  %v12916_v28 = vld [vmem:[#allocation116_spill] sm:$0xff]  ;;  %v8446_v8 = vmul.f32 %v1910_v23, %v8111_v1  ;;  %v1490_v6 = vsel %vm1489_vm9, %v12913_v63, %v12784_v53  ;;  %v12918_v12 = vld [vmem:[#allocation214_spill] sm:$0xff]  ;;  %v12925_v23 = vld [vmem:[#allocation109_spill] sm:$0xff] }
 0x43a   :  { %v1782_v18 = vmul.f32 %v1775_v24, %v12916_v28  ;;  %v8454_v44 = vmul.f32 %v12862_v38, %v12918_v12  ;;  %v8458_v60 = vmul.f32 %v12870_v36, %v12918_v12  ;;  %v12919_v39 = vld [vmem:[#allocation354_spill] sm:$0xff]  ;;  %v12921_v24 = vld [vmem:[#allocation29_spill] sm:$0xff]  ;;  %v8470_v53 = vmul.f32 %v12872_v43, %v12918_v12  ;;  %v12927_v63 = vld [vmem:[#allocation216_spill] sm:$0xff] }
 0x43b   :  { %12917 = vst [vmem:[#allocation103_spill] sm:$0xff] %v8446_v8  ;;  %v8461_v5 = vmul.f32 %v1501_v51, %v12919_v39  ;;  %v8464_v28 = vmul.f32 %v1505_v32, %v12921_v24  ;;  %v8474_v1 = vmul.f32 %v12903_v58, %v12918_v12  ;;  %v8477_v62 = vmul.f32 %v1494_v33, %v12925_v23  ;;  %v12931_v12 = vld [vmem:[#allocation100_spill] sm:$0xff]  ;;  %v12937_v8 = vld [vmem:[#allocation231_spill] sm:$0xff]  ;;  %v12966_v47 = vld [vmem:[#allocation241_spill] sm:$0xff] }
 0x43c   :  { %12923 = vst [vmem:[#allocation207_spill] sm:$0xff] %v8470_v53  ;;  %v8481_v51 = vmul.f32 %v8032_v42, %v12927_v63  ;;  %v8485_v32 = vmul.f32 %v8035_v4, %v12927_v63  ;;  %v8491_v39 = vmul.f32 %v8043_v61, %v12927_v63  ;;  %v8494_v24 = vmul.f32 %v1490_v6, %v12931_v12  ;;  %v12958_v14 = vld [vmem:[#allocation328_spill] sm:$0xff] }
 0x43d   :  { %12920 = vst [vmem:[#allocation208_spill] sm:$0xff] %v8461_v5  ;;  %12922 = vst [vmem:[#allocation91_spill] sm:$0xff] %v8464_v28  ;;  %v8496_v33 = vadd.f32 %v1783_v34, %v1663_v22  ;;  %v8498_v23 = vadd.f32 %v1782_v18, %v1662_v7  ;;  %v8504_v5 = vpop.permute.xlu0 %3449  ;;  %v8506_v28 = vpop.permute.xlu1 %3173  ;;  %v4343_v7 = vld [vmem:[%s11421_s3 + $0x42] ss:$8 sm:$0xf] }
 0x43e   :  { %12924 = vst [vmem:[#allocation219_spill] sm:$0xff] %v8474_v1  ;;  %12926 = vst [vmem:[#allocation321_spill] sm:$0xff] %v8477_v62  ;;  %v12933_v1 = vld [vmem:[#allocation227_spill] sm:$0xff]  ;;  %v12938_v62 = vld [vmem:[#allocation229_spill] sm:$0xff] }
 0x43f   :  { %12928 = vst [vmem:[#allocation323_spill] sm:$0xff] %v8481_v51  ;;  %12929 = vst [vmem:[#allocation85_spill] sm:$0xff] %v8485_v32  ;;  %v8502_v53 = vmul.f32 %v7672_v11, %v12933_v1  ;;  %v2042_v63 = vsel %vm2033_vm13, %v12938_v62, %v12937_v8  ;;  %v8514_v6 = vmul.f32 %v7675_v15, %v12933_v1  ;;  %v12942_v22 = vld [vmem:[#allocation232_spill] sm:$0xff]  ;;  %v12943_v34 = vld [vmem:[#allocation146_spill] sm:$0xff] }
 0x440   :  { %12930 = vst [vmem:[#allocation213_spill] sm:$0xff] %v8491_v39  ;;  %12932 = vst [vmem:[#allocation28_spill] sm:$0xff] %v8494_v24  ;;  %v8521_v11 = vmul.f32 %v7678_v9, %v12933_v1  ;;  %v8525_v18 = vmul.f32 %v7689_v35, %v12933_v1  ;;  %v1358_v12 = vsel %vm1353_vm8, %v12943_v34, %v12942_v22  ;;  %v12944_v39 = vld [vmem:[#allocation234_spill] sm:$0xff]  ;;  %v12945_v15 = vld [vmem:[#allocation161_spill] sm:$0xff] }
 0x441   :  { %12934 = vst [vmem:[#allocation218_spill] sm:$0xff] %v8502_v53  ;;  %12935 = vst [vmem:[#allocation160_spill] sm:$0xff] %v8504_v5  ;;  %v12946_v5 = vld [vmem:[#allocation230_spill] sm:$0xff]  ;;  %v12947_v35 = vld [vmem:[#allocation148_spill] sm:$0xff] }
 0x442   :  { %12936 = vst [vmem:[#allocation122_spill] sm:$0xff] %v8506_v28  ;;  %12939 = vst [vmem:[#allocation116_spill] sm:$0xff] %v8514_v6  ;;  %v1359_v28 = vsel %vm1353_vm8, %v12945_v15, %v12944_v39  ;;  %v8538_v9 = vmul.f32 %v8032_v42, %v12946_v5  ;;  %v8542_v1 = vmul.f32 %v8035_v4, %v12946_v5  ;;  %v12961_v51 = vld [vmem:[#allocation96_spill] sm:$0xff] }
 0x443   :  { %12940 = vst [vmem:[#allocation214_spill] sm:$0xff] %v8521_v11  ;;  %12941 = vst [vmem:[#allocation354_spill] sm:$0xff] %v8525_v18  ;;  %v1354_v34 = vsel %vm1353_vm8, %v12942_v22, %v12947_v35  ;;  %v12948_v18 = vld [vmem:[#allocation233_spill] sm:$0xff]  ;;  %v12949_v11 = vld [vmem:[#allocation163_spill] sm:$0xff]  ;;  %v8560_v25 = vmul.f32 %v8043_v61, %v12946_v5  ;;  %v8564_v6 = vmul.f32 %v2042_v63, %v8251_v0 }
 0x444   :  { %v2038_v15 = vsel %vm2033_vm13, %v12937_v8, %v12948_v18  ;;  %v1355_v24 = vsel %vm1353_vm8, %v12944_v39, %v12949_v11  ;;  %v8567_v35 = vrot.slane %v4343_v7, %v12617_v29  ;;  %v8570_v22 = vrot.slane %v4343_v7, %v12616_v49  ;;  %v8576_v39 = vpop.permute.xlu0 %2439  ;;  %v8578_v11 = vpop.permute.xlu1 %2029 }
 0x445   :  { %12950 = vst [vmem:[#allocation29_spill] sm:$0xff] %v8560_v25  ;;  %12952 = vst [vmem:[#allocation109_spill] sm:$0xff] %v8564_v6  ;;  %v8574_v8 = vmul.f32 %v8046_v13, %v12946_v5  ;;  %v12956_v25 = vld [vmem:[#allocation104_spill] sm:$0xff]  ;;  %v1376_v0 = vmul.f32 %v1359_v28, %v12958_v14  ;;  %v8585_v63 = vrot.slane %v4343_v7, %v12543_v2  ;;  %v4656_v28 = vld [vmem:[%s11420_s7 + $0x18] sm:$0xff] }
 0x446   :  { %12954 = vst [vmem:[#allocation227_spill] sm:$0xff] %v8576_v39  ;;  %12955 = vst [vmem:[#allocation231_spill] sm:$0xff] %v8578_v11  ;;  %v8581_v32 = vmul.f32 %v1358_v12, %v12956_v25  ;;  %v8588_v6 = vrot.slane %v4343_v7, %v12544_v56  ;;  %v8591_v53 = vmul.f32 %v1354_v34, %v12961_v51  ;;  %v12964_v39 = vld [vmem:[#allocation98_spill] sm:$0xff]  ;;  %v12965_v11 = vld [vmem:[#allocation243_spill] sm:$0xff]  ;;  %3591 = vperm.xlu0 %4592, %v4656_v28  }
 0x447   :  { %12953 = vst [vmem:[#allocation100_spill] sm:$0xff] %v8574_v8  ;;  %12959 = vst [vmem:[#allocation232_spill] sm:$0xff] %v8585_v63  ;;  %v8594_v5 = vmul.f32 %v2038_v15, %v8255_v50  ;;  %v1377_v8 = vmul.f32 %v1355_v24, %v12964_v39  ;;  %v1908_v25 = vsel %vm1897_vm12, %v12966_v47, %v12965_v11  ;;  %v12967_v7 = vld [vmem:[#allocation244_spill] sm:$0xff]  ;;  %v12968_v12 = vld [vmem:[#allocation242_spill] sm:$0xff] }
 0x448   :  { %12957 = vst [vmem:[#allocation229_spill] sm:$0xff] %v8581_v32  ;;  %12960 = vst [vmem:[#allocation146_spill] sm:$0xff] %v8588_v6  ;;  %v1907_v51 = vsel %vm1897_vm12, %v12968_v12, %v12967_v7  ;;  %v12969_v50 = vld [vmem:[#allocation245_spill] sm:$0xff]  ;;  %v12970_v34 = vld [vmem:[#allocation246_spill] sm:$0xff]  ;;  %v8630_v32 = vpop.permute.xlu0 %2707 }
 0x449   :  { %12962 = vst [vmem:[#allocation234_spill] sm:$0xff] %v8591_v53  ;;  %12963 = vst [vmem:[#allocation161_spill] sm:$0xff] %v8594_v5  ;;  %v1912_v24 = vsel %vm1897_vm12, %v12969_v50, %v12966_v47  ;;  %v1911_v15 = vsel %vm1897_vm12, %v12970_v34, %v12968_v12  ;;  %v12971_v39 = vld [vmem:[#allocation235_spill] sm:$0xff]  ;;  %v12973_v28 = vld [vmem:[#allocation238_spill] sm:$0xff]  ;;  %v8632_v50 = vpop.permute.xlu1 %2031  ;;  %v12978_v12 = vmov 24  }
 0x44a   :  { %v8618_v14 = vmul.f32 %v8032_v42, %v12971_v39  ;;  %v12974_v5 = vld [vmem:[#allocation236_spill] sm:$0xff]  ;;  %v8628_v47 = vmul.f32 %v8035_v4, %v12971_v39  ;;  %12976 = vst [vmem:[#allocation233_spill] sm:$0xff] %v8630_v32  ;;  %12977 = vst [vmem:[#allocation163_spill] sm:$0xff] %v8632_v50  ;;  %4591 = vset.pattern.permute.xlu1 %v12978_v12  ;;  %v8637_v34 = vmul.f32 %v8043_v61, %v12971_v39  ;;  %v12981_v7 = vld [vmem:[#allocation239_spill] sm:$0xff] }
 0x44b   :  { %v1637_v53 = vsel %vm1625_vm10, %v12974_v5, %v12973_v28  ;;  %v8641_v11 = vmul.f32 %v8046_v13, %v12971_v39  ;;  %v8644_v28 = vadd.f32 %v1376_v0, %v8420_v55  ;;  %v1626_v32 = vsel %vm1625_vm10, %v12981_v7, %v12813_v26  ;;  %2983 = vrot.lane.b32.xlu0 %v5182_v54, %s4715_s23 }
 0x44c   :  { %12972 = vst [vmem:[#allocation230_spill] sm:$0xff] %v8618_v14  ;;  %12975 = vst [vmem:[#allocation148_spill] sm:$0xff] %v8628_v47  ;;  %v1630_v12 = vsel %vm1625_vm10, %v12808_v27, %v12981_v7  ;;  %v1923_v50 = vmul.f32 %v1908_v25, %v8157_v16  ;;  %v1922_v0 = vmul.f32 %v1912_v24, %v8161_v40  ;;  %v12984_v47 = vld [vmem:[#allocation135_spill] sm:$0xff]  ;;  %v12986_v27 = vld [vmem:[#allocation130_spill] sm:$0xff] }
 0x44d   :  { %12979 = vst [vmem:[#allocation71_spill] sm:$0xff] %v8637_v34  ;;  %12980 = vst [vmem:[#allocation104_spill] sm:$0xff] %v8641_v11  ;;  %v12982_v34 = vld [vmem:[#allocation240_spill] sm:$0xff]  ;;  %v12983_v11 = vld [vmem:[#allocation133_spill] sm:$0xff]  ;;  %v1918_v14 = vmul.f32 %v1911_v15, %v12984_v47  ;;  %v8665_v26 = vadd.f32 %v1377_v8, %v8437_v57  ;;  %v8668_v7 = vmul.f32 %v1637_v53, %v12986_v27  ;;  %v8692_v27 = vpop.permute.xlu0 %2959 }
 0x44e   :  { %v1641_v39 = vsel %vm1625_vm10, %v12982_v34, %v12974_v5  ;;  %v1919_v55 = vmul.f32 %v1907_v51, %v12983_v11  ;;  %v12988_v16 = vld [vmem:[#allocation237_spill] sm:$0xff]  ;;  %v12991_v11 = vmov 0   ;;  %v12994_v24 = vld [vmem:[#allocation156_spill] sm:$0xff]  ;;  %v12996_v53 = vld [vmem:[#allocation154_spill] sm:$0xff]  ;;  %12998 = vst [vmem:[#allocation235_spill] sm:$0xff] %v8692_v27 }
 0x44f   :  { %12985 = vst [vmem:[#allocation328_spill] sm:$0xff] %v8665_v26  ;;  %12987 = vst [vmem:[#allocation96_spill] sm:$0xff] %v8668_v7  ;;  %v8672_v25 = vmul.f32 %v8166_v48, %v12988_v16  ;;  %v12990_v5 = vld [vmem:[#allocation9_spill] sm:$0xff]  ;;  %4594 = vset.pattern.permute.xlu0 %v12991_v11  ;;  %v12995_v15 = vld [vmem:[#allocation252_spill] sm:$0xff]  ;;  %v8690_v47 = vmul.f32 %v8187_v21, %v12988_v16  ;;  %v8694_v26 = vpop.permute.xlu1 %2299 }
 0x450   :  { %2705 = vrot.lane.b32.xlu1 %v12990_v5, %s4711_s30  ;;  %v12992_v40 = vld [vmem:[#allocation117_spill] sm:$0xff]  ;;  %v1220_v57 = vsel %vm1217_vm7, %v12995_v15, %v12994_v24  ;;  %v1224_v8 = vsel %vm1217_vm7, %v12996_v53, %v12995_v15  ;;  %12999 = vst [vmem:[#allocation236_spill] sm:$0xff] %v8694_v26  ;;  %v13002_v7 = vld [vmem:[#allocation168_spill] sm:$0xff]  ;;  %v8710_v53 = vadd.f32 %v1919_v55, %v8496_v33 }
 0x451   :  { %12989 = vst [vmem:[#allocation98_spill] sm:$0xff] %v8672_v25  ;;  %v8678_v51 = vmul.f32 %v1630_v12, %v12992_v40  ;;  %12997 = vst [vmem:[#allocation242_spill] sm:$0xff] %v8690_v47  ;;  %v13000_v12 = vld [vmem:[#allocation41_spill] sm:$0xff]  ;;  %v8700_v11 = vmul.f32 %v1641_v39, %v13002_v7  ;;  %v13006_v25 = vld [vmem:[#allocation247_spill] sm:$0xff]  ;;  %3251 = vrot.lane.b32.xlu0 %v5013_v19, %s4719_s12 }
 0x452   :  { %v8697_v40 = vmul.f32 %v1626_v32, %v13000_v12  ;;  %v13004_v24 = vld [vmem:[#allocation225_spill] sm:$0xff]  ;;  %v13007_v27 = vld [vmem:[#allocation228_spill] sm:$0xff]  ;;  %v8716_v32 = vadd.f32 %v1918_v14, %v8498_v23  ;;  %v13009_v39 = vld [vmem:[#allocation251_spill] sm:$0xff] }
 0x453   :  { %12993 = vst [vmem:[#allocation241_spill] sm:$0xff] %v8678_v51  ;;  %13003 = vst [vmem:[#allocation133_spill] sm:$0xff] %v8700_v11  ;;  %v8703_v51 = vadd.f32 %v1923_v50, %v13004_v24  ;;  %v13005_v5 = vld [vmem:[#allocation249_spill] sm:$0xff]  ;;  %v8713_v47 = vadd.f32 %v1922_v0, %v13007_v27  ;;  %v8723_v50 = vmul.f32 %v8190_v31, %v12988_v16  ;;  %v13011_v7 = vld [vmem:[#allocation106_spill] sm:$0xff] }
 0x454   :  { %13001 = vst [vmem:[#allocation239_spill] sm:$0xff] %v8697_v40  ;;  %v2178_v15 = vsel %vm2169_vm14, %v13006_v25, %v13005_v5  ;;  %v2174_v33 = vsel %vm2169_vm14, %v13005_v5, %v13009_v39  ;;  %v13010_v55 = vld [vmem:[#allocation93_spill] sm:$0xff]  ;;  %v1245_v27 = vmul.f32 %v1220_v57, %v13011_v7  ;;  %v13012_v23 = vld [vmem:[#allocation248_spill] sm:$0xff]  ;;  %v8749_v57 = vpop.permute.xlu1 %2551  ;;  %v13021_v7 = vld [vmem:[#allocation250_spill] sm:$0xff] }
 0x455   :  { %13008 = vst [vmem:[#allocation135_spill] sm:$0xff] %v8723_v50  ;;  %v1244_v0 = vmul.f32 %v1224_v8, %v13010_v55  ;;  %v8733_v14 = vmul.f32 %v12862_v38, %v13012_v23  ;;  %v4344_v12 = vld [vmem:[%s11421_s3 + $0x43] ss:$8 sm:$0xf]  ;;  %v8741_v16 = vmul.f32 %v2178_v15, %v8379_v46  ;;  %v8745_v5 = vmul.f32 %v12870_v36, %v13012_v23  ;;  %v8747_v8 = vpop.permute.xlu0 %2967 }
 0x456   :  { %v13014_v24 = vld [vmem:[#allocation20_spill] sm:$0xff]  ;;  %13017 = vst [vmem:[#allocation252_spill] sm:$0xff] %v8747_v8  ;;  %13018 = vst [vmem:[#allocation154_spill] sm:$0xff] %v8749_v57  ;;  %v8753_v38 = vmul.f32 %v12872_v43, %v13012_v23  ;;  %v8757_v55 = vmul.f32 %v12903_v58, %v13012_v23  ;;  %v8761_v46 = vmul.f32 %v8166_v48, %v13021_v7  ;;  %v13025_v23 = vld [vmem:[#allocation253_spill] sm:$0xff]  ;;  %3503 = vrot.lane.b32.xlu0 %v12622_v41, %s4721_s28 }
 0x457   :  { %13013 = vst [vmem:[#allocation130_spill] sm:$0xff] %v8733_v14  ;;  %2957 = vrot.lane.b32.xlu1 %v13014_v24, %s4715_s23  ;;  %13015 = vst [vmem:[#allocation117_spill] sm:$0xff] %v8741_v16  ;;  %v8765_v36 = vmul.f32 %v8187_v21, %v13021_v7  ;;  %v8769_v15 = vmul.f32 %v8190_v31, %v13021_v7  ;;  %v8773_v43 = vmul.f32 %v8193_v20, %v13021_v7  ;;  %v13028_v11 = vld [vmem:[#allocation89_spill] sm:$0xff]  ;;  %v13029_v16 = vld [vmem:[#allocation12_spill] sm:$0xff] }
 0x458   :  { %13016 = vst [vmem:[#allocation156_spill] sm:$0xff] %v8745_v5  ;;  %13019 = vst [vmem:[#allocation41_spill] sm:$0xff] %v8753_v38  ;;  %v8776_v50 = vmul.f32 %v2174_v33, %v8394_v37  ;;  %v8780_v58 = vmul.f32 %v8166_v48, %v13025_v23  ;;  %v8787_v38 = vrot.slane %v4344_v12, %v12617_v29  ;;  %v13030_v33 = vld [vmem:[#allocation254_spill] sm:$0xff]  ;;  %v13032_v8 = vld [vmem:[#allocation256_spill] sm:$0xff] }
 0x459   :  { %13020 = vst [vmem:[#allocation168_spill] sm:$0xff] %v8757_v55  ;;  %13022 = vst [vmem:[#allocation225_spill] sm:$0xff] %v8769_v15  ;;  %v8784_v55 = vmul.f32 %v8187_v21, %v13025_v23  ;;  %v8792_v7 = vadd.f32 %v1244_v0, %v13028_v11  ;;  %v8795_v37 = vadd.f32 %v1245_v27, %v13029_v16  ;;  %v13033_v26 = vld [vmem:[#allocation180_spill] sm:$0xff]  ;;  %v13034_v24 = vld [vmem:[#allocation27_spill] sm:$0xff]  ;;  %v8814_v0 = vpop.permute.xlu0 %2975  ;;  %v8816_v27 = vpop.permute.xlu1 %2559 }
 0x45a   :  { %13023 = vst [vmem:[#allocation249_spill] sm:$0xff] %v8773_v43  ;;  %13024 = vst [vmem:[#allocation228_spill] sm:$0xff] %v8776_v50  ;;  %v13031_v50 = vld [vmem:[#allocation174_spill] sm:$0xff]  ;;  %v1495_v40 = vsel %vm1489_vm9, %v13033_v26, %v13032_v8  ;;  %v13035_v43 = vld [vmem:[#allocation176_spill] sm:$0xff]  ;;  %v8812_v16 = vrot.slane %v4344_v12, %v12616_v49  ;;  %v8822_v26 = vrot.slane %v4344_v12, %v12544_v56  ;;  %3511 = vrot.lane.b32.xlu0 %v5171_v30, %s4721_s28 }
 0x45b   :  { %13026 = vst [vmem:[#allocation93_spill] sm:$0xff] %v8780_v58  ;;  %13027 = vst [vmem:[#allocation106_spill] sm:$0xff] %v8784_v55  ;;  %v1225_v57 = vsel %vm1217_vm7, %v13031_v50, %v13030_v33  ;;  %2965 = vrot.lane.b32.xlu1 %v13034_v24, %s4715_s23  ;;  %v1221_v11 = vsel %vm1217_vm7, %v13030_v33, %v13035_v43  ;;  %v8819_v50 = vrot.slane %v4344_v12, %v12543_v2  ;;  %v13040_v15 = vld [vmem:[#allocation261_spill] sm:$0xff]  ;;  %v13041_v24 = vld [vmem:[#allocation259_spill] sm:$0xff] }
 0x45c   :  { %13036 = vst [vmem:[#allocation248_spill] sm:$0xff] %v8814_v0  ;;  %13037 = vst [vmem:[#allocation250_spill] sm:$0xff] %v8816_v27  ;;  %v2044_v5 = vsel %vm2033_vm13, %v13041_v24, %v13040_v15  ;;  %v13042_v14 = vld [vmem:[#allocation263_spill] sm:$0xff]  ;;  %v13043_v33 = vld [vmem:[#allocation266_spill] sm:$0xff]  ;;  %v8838_v34 = vmul.f32 %v8190_v31, %v13025_v23  ;;  %vm3393_vm7 = vcmp.lt.s32.totalorder %v5419_v3, 95 }
 0x45d   :  { %13038 = vst [vmem:[#allocation253_spill] sm:$0xff] %v8819_v50  ;;  %13039 = vst [vmem:[#allocation89_spill] sm:$0xff] %v8822_v26  ;;  %v2040_v43 = vsel %vm2033_vm13, %v13040_v15, %v13042_v14  ;;  %v13044_v0 = vld [vmem:[#allocation264_spill] sm:$0xff]  ;;  %v13046_v12 = vld [vmem:[#allocation3_spill] sm:$0xff] }
 0x45e   :  { %v2043_v27 = vsel %vm2033_vm13, %v13044_v0, %v13043_v33  ;;  %13045 = vst [vmem:[#allocation12_spill] sm:$0xff] %v8838_v34  ;;  %v8841_v26 = vmul.f32 %v1225_v57, %v13046_v12  ;;  %v13048_v55 = vld [vmem:[#allocation182_spill] sm:$0xff]  ;;  %v13049_v58 = vld [vmem:[#allocation105_spill] sm:$0xff]  ;;  %v13050_v15 = vld [vmem:[#allocation268_spill] sm:$0xff]  ;;  %3519 = vrot.lane.b32.xlu0 %v5127_v52, %s4721_s28 }
 0x45f   :  { %v1491_v24 = vsel %vm1489_vm9, %v13032_v8, %v13048_v55  ;;  %v1512_v50 = vmul.f32 %v1495_v40, %v13049_v58  ;;  %v2039_v14 = vsel %vm2033_vm13, %v13043_v33, %v13050_v15  ;;  %v13051_v0 = vld [vmem:[#allocation17_spill] sm:$0xff]  ;;  %v13054_v40 = vld [vmem:[#allocation260_spill] sm:$0xff]  ;;  %v13055_v8 = vld [vmem:[#allocation258_spill] sm:$0xff] }
 0x460   :  { %13047 = vst [vmem:[#allocation254_spill] sm:$0xff] %v8841_v26  ;;  %v8855_v34 = vmul.f32 %v1221_v11, %v13051_v0  ;;  %v13053_v57 = vld [vmem:[#allocation257_spill] sm:$0xff]  ;;  %v1773_v55 = vsel %vm1761_vm11, %v13055_v8, %v13054_v40  ;;  %v13056_v33 = vld [vmem:[#allocation23_spill] sm:$0xff]  ;;  %v2058_v11 = vmul.f32 %v2044_v5, %v8284_v10  ;;  %v13057_v0 = vld [vmem:[#allocation262_spill] sm:$0xff] }
 0x461   :  { %v1762_v12 = vsel %vm1761_vm11, %v13053_v57, %v12846_v45  ;;  %v1766_v58 = vsel %vm1761_vm11, %v12838_v17, %v13053_v57  ;;  %2973 = vrot.lane.b32.xlu1 %v13056_v33, %s4715_s23  ;;  %v1777_v45 = vsel %vm1761_vm11, %v13057_v0, %v13055_v8  ;;  %v13059_v15 = vld [vmem:[#allocation201_spill] sm:$0xff]  ;;  %v8878_v17 = vpop.permute.xlu0 %3227  ;;  %v8880_v57 = vpop.permute.xlu1 %2567  ;;  %v13062_v39 = vld [vmem:[#allocation112_spill] sm:$0xff]  ;;  %v13064_v30 = vld [vmem:[#allocation267_spill] sm:$0xff]  ;;  %v8892_v8 = vmul.f32 %v8193_v20, %v13025_v23 }
 0x462   :  { %13052 = vst [vmem:[#allocation174_spill] sm:$0xff] %v8855_v34  ;;  %v13058_v34 = vld [vmem:[#allocation165_spill] sm:$0xff]  ;;  %v2054_v25 = vmul.f32 %v2043_v27, %v13059_v15  ;;  %13060 = vst [vmem:[#allocation256_spill] sm:$0xff] %v8878_v17  ;;  %v8883_v40 = vmul.f32 %v1491_v24, %v13062_v39  ;;  %v13066_v5 = vld [vmem:[#allocation142_spill] sm:$0xff]  ;;  %3119 = vrot.lane.b32.xlu0 %v5182_v54, %s4717_s26 }
 0x463   :  { %v2059_v26 = vmul.f32 %v2040_v43, %v13058_v34  ;;  %13061 = vst [vmem:[#allocation180_spill] sm:$0xff] %v8880_v57  ;;  %v13065_v33 = vld [vmem:[#allocation265_spill] sm:$0xff]  ;;  %v2055_v41 = vmul.f32 %v2039_v14, %v13066_v5  ;;  %13067 = vst [vmem:[#allocation261_spill] sm:$0xff] %v8892_v8  ;;  %v8895_v34 = vadd.f32 %v1512_v50, %v8644_v28  ;;  %v13069_v24 = vld [vmem:[#allocation255_spill] sm:$0xff] }
 0x464   :  { %13063 = vst [vmem:[#allocation176_spill] sm:$0xff] %v8883_v40  ;;  %v2314_v10 = vsel %vm2305_vm15, %v13065_v33, %v13064_v30  ;;  %v13068_v27 = vld [vmem:[#allocation269_spill] sm:$0xff]  ;;  %v13070_v43 = vld [vmem:[#allocation183_spill] sm:$0xff]  ;;  %v13072_v40 = vld [vmem:[#allocation192_spill] sm:$0xff] }
 0x465   :  { %v2310_v39 = vsel %vm2305_vm15, %v13064_v30, %v13068_v27  ;;  %v8903_v15 = vmul.f32 %v13070_v43, %v13069_v24  ;;  %v8907_v17 = vmul.f32 %v13072_v40, %v13069_v24  ;;  %v13074_v14 = vld [vmem:[#allocation125_spill] sm:$0xff]  ;;  %v13076_v28 = vld [vmem:[#allocation347_spill] sm:$0xff]  ;;  %v13078_v5 = vld [vmem:[#allocation150_spill] sm:$0xff]  ;;  %v8929_v0 = vadd.f32 %v2059_v26, %v8703_v51 }
 0x466   :  { %v8912_v23 = vmul.f32 %v1766_v58, %v13074_v14  ;;  %v8915_v50 = vmul.f32 %v1762_v12, %v13076_v28  ;;  %v8918_v8 = vmul.f32 %v1773_v55, %v13078_v5  ;;  %v13080_v30 = vld [vmem:[#allocation159_spill] sm:$0xff]  ;;  %v8932_v58 = vadd.f32 %v2054_v25, %v8716_v32  ;;  %v8937_v55 = vpop.permute.xlu0 %3235  ;;  %v8939_v14 = vpop.permute.xlu1 %2819  ;;  %v13089_v25 = vld [vmem:[#allocation270_spill] sm:$0xff]  ;;  %v13099_v5 = vld [vmem:[#allocation197_spill] sm:$0xff]  ;;  %3387 = vrot.lane.b32.xlu0 %v5013_v19, %s4720_s27 }
 0x467   :  { %13071 = vst [vmem:[#allocation266_spill] sm:$0xff] %v8903_v15  ;;  %13073 = vst [vmem:[#allocation3_spill] sm:$0xff] %v8907_v17  ;;  %v8921_v57 = vmul.f32 %v1777_v45, %v13080_v30  ;;  %v13082_v15 = vld [vmem:[#allocation4_spill] sm:$0xff]  ;;  %v8926_v17 = vadd.f32 %v2058_v11, %v8713_v47  ;;  %v8935_v12 = vmul.f32 %v2314_v10, %v8538_v9  ;;  %v13087_v47 = vld [vmem:[#allocation274_spill] sm:$0xff] }
 0x468   :  { %13075 = vst [vmem:[#allocation182_spill] sm:$0xff] %v8912_v23  ;;  %13077 = vst [vmem:[#allocation105_spill] sm:$0xff] %v8915_v50  ;;  %3225 = vrot.lane.b32.xlu1 %v13082_v15, %s4719_s12  ;;  %v8942_v45 = vadd.f32 %v2055_v41, %v8710_v53  ;;  %v8945_v28 = vmul.f32 %v2310_v39, %v8542_v1  ;;  %v13088_v11 = vld [vmem:[#allocation170_spill] sm:$0xff]  ;;  %v8954_v9 = vmul.f32 %v8032_v42, %v13089_v25  ;;  %v13091_v32 = vld [vmem:[#allocation171_spill] sm:$0xff] }
 0x469   :  { %13079 = vst [vmem:[#allocation17_spill] sm:$0xff] %v8918_v8  ;;  %13081 = vst [vmem:[#allocation257_spill] sm:$0xff] %v8921_v57  ;;  %v1360_v51 = vsel %vm1353_vm8, %v13088_v11, %v13087_v47  ;;  %v1356_v41 = vsel %vm1353_vm8, %v13087_v47, %v13091_v32  ;;  %v8962_v1 = vmul.f32 %v8035_v4, %v13089_v25  ;;  %v13095_v26 = vld [vmem:[#allocation271_spill] sm:$0xff]  ;;  %v13102_v11 = vld [vmem:[#allocation329_spill] sm:$0xff] }
 0x46a   :  { %13083 = vst [vmem:[#allocation258_spill] sm:$0xff] %v8935_v12  ;;  %13084 = vst [vmem:[#allocation165_spill] sm:$0xff] %v8937_v55  ;;  %v8968_v53 = vmul.f32 %v8043_v61, %v13089_v25  ;;  %v8972_v42 = vmul.f32 %v8046_v13, %v13089_v25  ;;  %v8976_v10 = vmul.f32 %v13070_v43, %v13095_v26  ;;  %v8985_v4 = vld [vmem:[%s11421_s3 + $0x44] ss:$8 sm:$0xf]  ;;  %v9008_v8 = vpop.permute.xlu1 %2827  ;;  %3255 = vrot.lane.b32.xlu0 %v5182_v54, %s4719_s12 }
 0x46b   :  { %13085 = vst [vmem:[#allocation201_spill] sm:$0xff] %v8939_v14  ;;  %13086 = vst [vmem:[#allocation112_spill] sm:$0xff] %v8945_v28  ;;  %v8980_v39 = vmul.f32 %v13072_v40, %v13095_v26  ;;  %v13098_v61 = vld [vmem:[#allocation7_spill] sm:$0xff]  ;;  %v8991_v30 = vmul.f32 %v13099_v5, %v13069_v24  ;;  %v8995_v47 = vmul.f32 %v13099_v5, %v13095_v26  ;;  %v13103_v32 = vld [vmem:[#allocation272_spill] sm:$0xff] }
 0x46c   :  { %13090 = vst [vmem:[#allocation267_spill] sm:$0xff] %v8954_v9  ;;  %13092 = vst [vmem:[#allocation142_spill] sm:$0xff] %v8962_v1  ;;  %3233 = vrot.lane.b32.xlu1 %v13098_v61, %s4719_s12  ;;  %v1380_v25 = vmul.f32 %v1360_v51, %v13102_v11  ;;  %v9000_v13 = vmul.f32 %v13070_v43, %v13103_v32  ;;  %v13106_v24 = vld [vmem:[#allocation149_spill] sm:$0xff]  ;;  %v9017_v51 = vmul.f32 %v13099_v5, %v13103_v32  ;;  %v13114_v55 = vld [vmem:[#allocation200_spill] sm:$0xff] }
 0x46d   :  { %13093 = vst [vmem:[#allocation269_spill] sm:$0xff] %v8968_v53  ;;  %13094 = vst [vmem:[#allocation183_spill] sm:$0xff] %v8972_v42  ;;  %v9004_v42 = vmul.f32 %v13072_v40, %v13103_v32  ;;  %v9006_v53 = vpop.permute.xlu0 %3243  ;;  %v13108_v57 = vld [vmem:[#allocation97_spill] sm:$0xff]  ;;  %v9021_v11 = vmul.f32 %v13106_v24, %v13103_v32  ;;  %v13119_v50 = vld [vmem:[#allocation210_spill] sm:$0xff] }
 0x46e   :  { %13096 = vst [vmem:[#allocation192_spill] sm:$0xff] %v8976_v10  ;;  %13097 = vst [vmem:[#allocation125_spill] sm:$0xff] %v8980_v39  ;;  %v13111_v28 = vld [vmem:[#allocation273_spill] sm:$0xff]  ;;  %v13126_v1 = vld [vmem:[#allocation194_spill] sm:$0xff]  ;;  %3523 = vrot.lane.b32.xlu0 %v5013_v19, %s4721_s28 }
 0x46f   :  { %13100 = vst [vmem:[#allocation347_spill] sm:$0xff] %v8991_v30  ;;  %13101 = vst [vmem:[#allocation150_spill] sm:$0xff] %v8995_v47  ;;  %v9012_v30 = vmul.f32 %v13106_v24, %v13095_v26  ;;  %v1381_v47 = vmul.f32 %v1356_v41, %v13108_v57  ;;  %v9025_v12 = vmul.f32 %v8567_v35, %v13111_v28  ;;  %v13116_v14 = vld [vmem:[#allocation277_spill] sm:$0xff]  ;;  %v13131_v39 = vld [vmem:[#allocation286_spill] sm:$0xff] }
 0x470   :  { %13104 = vst [vmem:[#allocation159_spill] sm:$0xff] %v9006_v53  ;;  %13105 = vst [vmem:[#allocation274_spill] sm:$0xff] %v9008_v8  ;;  %v13113_v53 = vld [vmem:[#allocation278_spill] sm:$0xff]  ;;  %v9037_v41 = vrot.slane %v8985_v4, %v12617_v29  ;;  %v9041_v32 = vmul.f32 %v8570_v22, %v13111_v28  ;;  %v13118_v8 = vld [vmem:[#allocation275_spill] sm:$0xff] }
 0x471   :  { %13107 = vst [vmem:[#allocation170_spill] sm:$0xff] %v9012_v30  ;;  %13109 = vst [vmem:[#allocation270_spill] sm:$0xff] %v9017_v51  ;;  %v1631_v26 = vsel %vm1625_vm10, %v13114_v55, %v13113_v53  ;;  %v13115_v30 = vld [vmem:[#allocation279_spill] sm:$0xff]  ;;  %v1902_v55 = vsel %vm1897_vm12, %v13119_v50, %v13118_v8  ;;  %v13120_v23 = vld [vmem:[#allocation281_spill] sm:$0xff] }
 0x472   :  { %13110 = vst [vmem:[#allocation171_spill] sm:$0xff] %v9021_v11  ;;  %13112 = vst [vmem:[#allocation271_spill] sm:$0xff] %v9025_v12  ;;  %v2180_v57 = vsel %vm2169_vm14, %v13116_v14, %v13115_v30  ;;  %v2176_v14 = vsel %vm2169_vm14, %v13115_v30, %v13120_v23  ;;  %v9055_v12 = vrot.slane %v8985_v4, %v12616_v49  ;;  %v13122_v61 = vld [vmem:[#allocation5_spill] sm:$0xff]  ;;  %v13123_v50 = vld [vmem:[#allocation212_spill] sm:$0xff]  ;;  %3391 = vrot.lane.b32.xlu0 %v5182_v54, %s4720_s27 }
 0x473   :  { %13117 = vst [vmem:[#allocation197_spill] sm:$0xff] %v9041_v32  ;;  %v9059_v32 = vmul.f32 %v8585_v63, %v13111_v28  ;;  %3241 = vrot.lane.b32.xlu1 %v13122_v61, %s4719_s12  ;;  %v9064_v11 = vadd.f32 %v1380_v25, %v8792_v7  ;;  %v1898_v15 = vsel %vm1897_vm12, %v13118_v8, %v13123_v50  ;;  %v13124_v30 = vld [vmem:[#allocation196_spill] sm:$0xff]  ;;  %v9080_v61 = vpop.permute.xlu0 %3457  ;;  %v13132_v10 = vld [vmem:[#allocation186_spill] sm:$0xff] }
 0x474   :  { %v13125_v23 = vld [vmem:[#allocation276_spill] sm:$0xff]  ;;  %13128 = vst [vmem:[#allocation97_spill] sm:$0xff] %v9080_v61  ;;  %v9083_v7 = vadd.f32 %v1381_v47, %v8795_v37  ;;  %v2194_v8 = vmul.f32 %v2180_v57, %v8454_v44  ;;  %v9092_v33 = vmul.f32 %v1902_v55, %v13132_v10  ;;  %v2195_v37 = vmul.f32 %v2176_v14, %v8458_v60  ;;  %v13135_v47 = vld [vmem:[#allocation290_spill] sm:$0xff] }
 0x475   :  { %13121 = vst [vmem:[#allocation329_spill] sm:$0xff] %v9059_v32  ;;  %v1357_v51 = vsel %vm1353_vm8, %v13125_v23, %v13124_v30  ;;  %v1361_v28 = vsel %vm1353_vm8, %v13126_v1, %v13125_v23  ;;  %v9078_v32 = vpop.permute.xlu1 %2835  ;;  %v13129_v25 = vld [vmem:[#allocation124_spill] sm:$0xff]  ;;  %v13134_v23 = vld [vmem:[#allocation202_spill] sm:$0xff]  ;;  %vm3529_vm8 = vcmp.lt.s32.totalorder %v5419_v3, 94  ;;  %v13892_v3 = vmov 0.0  }
 0x476   :  { %13127 = vst [vmem:[#allocation272_spill] sm:$0xff] %v9078_v32  ;;  %v1648_v9 = vmul.f32 %v1631_v26, %v13129_v25  ;;  %v13130_v50 = vld [vmem:[#allocation288_spill] sm:$0xff]  ;;  %13133 = vst [vmem:[#allocation278_spill] sm:$0xff] %v9092_v33  ;;  %v1627_v1 = vsel %vm1625_vm10, %v13113_v53, %v13134_v23  ;;  %v13136_v26 = vld [vmem:[#allocation185_spill] sm:$0xff]  ;;  %3527 = vrot.lane.b32.xlu0 %v5182_v54, %s4721_s28 }
 0x477   :  { %v2179_v30 = vsel %vm2169_vm14, %v13131_v39, %v13130_v50  ;;  %v2175_v44 = vsel %vm2169_vm14, %v13130_v50, %v13135_v47  ;;  %v9106_v57 = vmul.f32 %v1898_v15, %v13136_v26  ;;  %v13138_v10 = vld [vmem:[#allocation118_spill] sm:$0xff]  ;;  %v13140_v25 = vld [vmem:[#allocation67_spill] sm:$0xff]  ;;  %v13143_v23 = vld [vmem:[#allocation280_spill] sm:$0xff]  ;;  %v9149_v47 = vadd.f32 %v2195_v37, %v8929_v0 }
 0x478   :  { %v9109_v55 = vmul.f32 %v1361_v28, %v13138_v10  ;;  %v9112_v39 = vmul.f32 %v1357_v51, %v13140_v25  ;;  %v13142_v53 = vld [vmem:[#allocation282_spill] sm:$0xff]  ;;  %v4657_v14 = vld [vmem:[%s11419_s2 + $0x10] sm:$0xff]  ;;  %v13145_v28 = vld [vmem:[#allocation285_spill] sm:$0xff] }
 0x479   :  { %13137 = vst [vmem:[#allocation200_spill] sm:$0xff] %v9106_v57  ;;  %v1909_v60 = vsel %vm1897_vm12, %v13143_v23, %v13142_v53  ;;  %3453 = vperm.xlu1 %4591, %v4657_v14   ;;  %v13144_v50 = vld [vmem:[#allocation284_spill] sm:$0xff]  ;;  %v13146_v26 = vld [vmem:[#allocation283_spill] sm:$0xff]  ;;  %v13150_v14 = vld [vmem:[#allocation342_spill] sm:$0xff]  ;;  %v9140_v57 = vadd.f32 %v1648_v9, %v8895_v34  ;;  %v9146_v53 = vpop.permute.xlu0 %453 }
 0x47a   :  { %13139 = vst [vmem:[#allocation279_spill] sm:$0xff] %v9109_v55  ;;  %13141 = vst [vmem:[#allocation275_spill] sm:$0xff] %v9112_v39  ;;  %v1913_v15 = vsel %vm1897_vm12, %v13144_v50, %v13143_v23  ;;  %v2450_v51 = vsel %vm2441_vm0, %v13146_v26, %v13145_v28  ;;  %v13147_v10 = vld [vmem:[#allocation287_spill] sm:$0xff]  ;;  %v13148_v39 = vld [vmem:[#allocation172_spill] sm:$0xff]  ;;  %v9134_v55 = vpop.permute.xlu1 %3049  ;;  %v9137_v32 = vmul.f32 %v1627_v1, %v13150_v14 }
 0x47b   :  { %v2446_v25 = vsel %vm2441_vm0, %v13145_v28, %v13147_v10  ;;  %v2190_v61 = vmul.f32 %v2179_v30, %v13148_v39  ;;  %13149 = vst [vmem:[#allocation210_spill] sm:$0xff] %v9134_v55  ;;  %v9143_v23 = vadd.f32 %v2194_v8, %v8926_v17  ;;  %v13152_v33 = vld [vmem:[#allocation179_spill] sm:$0xff]  ;;  %v13153_v28 = vld [vmem:[#allocation193_spill] sm:$0xff]  ;;  %v13155_v30 = vld [vmem:[#allocation10_spill] sm:$0xff]  ;;  %v9173_v8 = vrot.slane %v8985_v4, %v12543_v2 }
 0x47c   :  { %13151 = vst [vmem:[#allocation212_spill] sm:$0xff] %v9137_v32  ;;  %v2191_v50 = vmul.f32 %v2175_v44, %v13152_v33  ;;  %v9152_v39 = vmul.f32 %v1909_v60, %v13153_v28  ;;  %v491_v1 = vmul.f32 %v13155_v30, %v9146_v53  ;;  %v13156_v14 = vld [vmem:[#allocation317_spill] sm:$0xff]  ;;  %v13157_v17 = vld [vmem:[#allocation191_spill] sm:$0xff]  ;;  %v9164_v33 = vmul.f32 %v2450_v51, %v8761_v46 }
 0x47d   :  { %v492_v34 = vmul.f32 %v13156_v14, %v9146_v53  ;;  %v9161_v9 = vmul.f32 %v1913_v15, %v13157_v17  ;;  %v9167_v0 = vmul.f32 %v2446_v25, %v8765_v36  ;;  %2573 = vrot.lane.b32.xlu1 %v12567_v59, %s4709_s25  ;;  %13161 = vst [vmem:[#allocation288_spill] sm:$0xff] %v9173_v8  ;;  %v13162_v44 = vld [vmem:[#allocation35_spill] sm:$0xff]  ;;  %v13163_v15 = vld [vmem:[#allocation33_spill] sm:$0xff]  ;;  %v13164_v51 = vmov 1  }
 0x47e   :  { %13154 = vst [vmem:[#allocation196_spill] sm:$0xff] %v9152_v39  ;;  %13159 = vst [vmem:[#allocation194_spill] sm:$0xff] %v9164_v33  ;;  %v9176_v37 = vadd.f32 %v2190_v61, %v8932_v58  ;;  %v556_v60 = vmul.f32 %v13162_v44, %v491_v1  ;;  %4593 = vset.pattern.permute.xlu1 %v13164_v51  ;;  %v9184_v36 = vrot.slane %v8985_v4, %v12544_v56  ;;  %v13166_v28 = vld [vmem:[#allocation289_spill] sm:$0xff]  ;;  %v13167_v61 = vld [vmem:[#allocation292_spill] sm:$0xff]  ;;  %v9203_v44 = vpop.permute.xlu1 %3309 }
 0x47f   :  { %13158 = vst [vmem:[#allocation276_spill] sm:$0xff] %v9161_v9  ;;  %13160 = vst [vmem:[#allocation124_spill] sm:$0xff] %v9167_v0  ;;  %v557_v46 = vmul.f32 %v13163_v15, %v492_v34  ;;  %v9187_v25 = vadd.f32 %v2191_v50, %v8942_v45  ;;  %v9191_v17 = vmul.f32 %v8567_v35, %v13166_v28  ;;  %v9201_v34 = vpop.permute.xlu0 %465  ;;  %v13171_v4 = vld [vmem:[#allocation293_spill] sm:$0xff]  ;;  %v13172_v15 = vld [vmem:[#allocation50_spill] sm:$0xff] }
 0x480   :  { %13165 = vst [vmem:[#allocation186_spill] sm:$0xff] %v9184_v36  ;;  %v9195_v58 = vmul.f32 %v8570_v22, %v13166_v28  ;;  %v9199_v1 = vmul.f32 %v8166_v48, %v13167_v61  ;;  %13169 = vst [vmem:[#allocation185_spill] sm:$0xff] %v9201_v34  ;;  %v2034_v45 = vsel %vm2033_vm13, %v12948_v18, %v13171_v4  ;;  %v13173_v28 = vld [vmem:[#allocation53_spill] sm:$0xff]  ;;  %v13184_v9 = vld [vmem:[#allocation158_spill] sm:$0xff] }
 0x481   :  { %13170 = vst [vmem:[#allocation118_spill] sm:$0xff] %v9203_v44  ;;  %v2046_v50 = vsel %vm2033_vm13, %v13171_v4, %v12938_v62  ;;  %v572_v51 = vadd.f32 %v556_v60, %v13172_v15  ;;  %v573_v32 = vadd.f32 %v557_v46, %v13173_v28  ;;  %v9219_v48 = vmul.f32 %v8187_v21, %v13167_v61  ;;  %v13177_v62 = vld [vmem:[#allocation291_spill] sm:$0xff]  ;;  %v13179_v46 = vld [vmem:[#allocation190_spill] sm:$0xff]  ;;  %v13180_v28 = vld [vmem:[#allocation296_spill] sm:$0xff] }
 0x482   :  { %13168 = vst [vmem:[#allocation202_spill] sm:$0xff] %v9199_v1  ;;  %v9223_v44 = vmul.f32 %v8190_v31, %v13167_v61  ;;  %v9227_v18 = vmul.f32 %v8193_v20, %v13167_v61  ;;  %v9231_v60 = vmul.f32 %v8787_v38, %v13177_v62  ;;  %2575 = vrot.lane.b32.xlu1 %v5182_v54, %s4709_s25  ;;  %v13181_v4 = vld [vmem:[#allocation184_spill] sm:$0xff]  ;;  %v13182_v15 = vld [vmem:[#allocation361_spill] sm:$0xff]  ;;  %v13186_v0 = vld [vmem:[#allocation162_spill] sm:$0xff] }
 0x483   :  { %13174 = vst [vmem:[#allocation67_spill] sm:$0xff] %v9219_v48  ;;  %v1492_v21 = vsel %vm1489_vm9, %v13180_v28, %v13179_v46  ;;  %v1496_v31 = vsel %vm1489_vm9, %v13181_v4, %v13180_v28  ;;  %v708_v61 = vadd.f32 %v13182_v15, %v572_v51  ;;  %v13183_v20 = vld [vmem:[#allocation52_spill] sm:$0xff]  ;;  %v9246_v55 = vmul.f32 %v2034_v45, %v13184_v9  ;;  %v9261_v28 = vpop.permute.xlu1 %2165  ;;  %v13192_v51 = vld [vmem:[#allocation297_spill] sm:$0xff]  ;;  %v13194_v45 = vld [vmem:[#allocation51_spill] sm:$0xff] }
 0x484   :  { %13175 = vst [vmem:[#allocation280_spill] sm:$0xff] %v9223_v44  ;;  %13176 = vst [vmem:[#allocation285_spill] sm:$0xff] %v9227_v18  ;;  %v709_v39 = vadd.f32 %v13183_v20, %v573_v32  ;;  %v9249_v33 = vmul.f32 %v2046_v50, %v13186_v0  ;;  %v9257_v46 = vmul.f32 %v8812_v16, %v13177_v62  ;;  %v9259_v44 = vpop.permute.xlu0 %2841  ;;  %v13193_v20 = vld [vmem:[#allocation295_spill] sm:$0xff]  ;;  %v13199_v36 = vld [vmem:[#allocation300_spill] sm:$0xff] }
 0x485   :  { %13178 = vst [vmem:[#allocation283_spill] sm:$0xff] %v9231_v60  ;;  %13185 = vst [vmem:[#allocation287_spill] sm:$0xff] %v9246_v55  ;;  %v13188_v60 = vld [vmem:[#allocation294_spill] sm:$0xff]  ;;  %v2316_v32 = vsel %vm2305_vm15, %v13193_v20, %v13192_v51  ;;  %v844_v50 = vadd.f32 %v13194_v45, %v708_v61  ;;  %v13195_v4 = vld [vmem:[#allocation359_spill] sm:$0xff] }
 0x486   :  { %13187 = vst [vmem:[#allocation172_spill] sm:$0xff] %v9249_v33  ;;  %v9253_v18 = vmul.f32 %v8567_v35, %v13188_v60  ;;  %13189 = vst [vmem:[#allocation342_spill] sm:$0xff] %v9257_v46  ;;  %v9269_v9 = vmul.f32 %v8570_v22, %v13188_v60  ;;  %v4346_v0 = vld [vmem:[%s11421_s3 + $0x45] ss:$8 sm:$0xf]  ;;  %v845_v15 = vadd.f32 %v13195_v4, %v709_v39  ;;  %2843 = vrot.lane.b32.xlu1 %v5013_v19, %s4713_s21 }
 0x487   :  { %13190 = vst [vmem:[#allocation179_spill] sm:$0xff] %v9259_v44  ;;  %13191 = vst [vmem:[#allocation193_spill] sm:$0xff] %v9261_v28  ;;  %v13196_v28 = vld [vmem:[#allocation352_spill] sm:$0xff]  ;;  %v13198_v20 = vld [vmem:[#allocation299_spill] sm:$0xff] }
 0x488   :  { %v1516_v44 = vmul.f32 %v1496_v31, %v13196_v28  ;;  %v13197_v46 = vld [vmem:[#allocation340_spill] sm:$0xff]  ;;  %v2312_v55 = vsel %vm2305_vm15, %v13192_v51, %v13198_v20  ;;  %v13201_v39 = vld [vmem:[#allocation42_spill] sm:$0xff]  ;;  %v13202_v54 = vld [vmem:[#allocation61_spill] sm:$0xff]  ;;  %v9298_v31 = vmul.f32 %v8588_v6, %v13188_v60 }
 0x489   :  { %v1517_v33 = vmul.f32 %v1492_v21, %v13197_v46  ;;  %v13200_v48 = vld [vmem:[#allocation220_spill] sm:$0xff]  ;;  %v980_v61 = vadd.f32 %v13201_v39, %v844_v50  ;;  %v981_v45 = vadd.f32 %v13202_v54, %v845_v15  ;;  %v9294_v21 = vmul.f32 %v8585_v63, %v13188_v60  ;;  %v13205_v46 = vld [vmem:[#allocation230_spill] sm:$0xff]  ;;  %v13206_v51 = vld [vmem:[#allocation217_spill] sm:$0xff]  ;;  %v9312_v39 = vpop.permute.xlu0 %3093  ;;  %v9314_v54 = vpop.permute.xlu1 %2167 }
 0x48a   :  { %v1767_v14 = vsel %vm1761_vm11, %v13200_v48, %v13199_v36  ;;  %13204 = vst [vmem:[#allocation35_spill] sm:$0xff] %v9298_v31  ;;  %v2330_v28 = vmul.f32 %v2316_v32, %v13205_v46  ;;  %v13207_v4 = vld [vmem:[#allocation298_spill] sm:$0xff]  ;;  %v13208_v19 = vld [vmem:[#allocation215_spill] sm:$0xff]  ;;  %v9310_v15 = vrot.slane %v4346_v0, %v12617_v29  ;;  %13210 = vst [vmem:[#allocation292_spill] sm:$0xff] %v9312_v39 }
 0x48b   :  { %13203 = vst [vmem:[#allocation191_spill] sm:$0xff] %v9294_v21  ;;  %v1493_v48 = vsel %vm1489_vm9, %v13207_v4, %v13206_v51  ;;  %v1497_v50 = vsel %vm1489_vm9, %v13208_v19, %v13207_v4  ;;  %13211 = vst [vmem:[#allocation293_spill] sm:$0xff] %v9314_v54  ;;  %v13212_v60 = vld [vmem:[#allocation148_spill] sm:$0xff]  ;;  %v13213_v32 = vld [vmem:[#allocation126_spill] sm:$0xff]  ;;  %v9325_v30 = vadd.f32 %v1516_v44, %v9064_v11  ;;  %vm4723_vm9 = vmmov 0  }
 0x48c   :  { %13209 = vst [vmem:[#allocation33_spill] sm:$0xff] %v9310_v15  ;;  %v2331_v20 = vmul.f32 %v2312_v55, %v13212_v60  ;;  %v1784_v46 = vmul.f32 %v1767_v14, %v13213_v32  ;;  %v13214_v31 = vld [vmem:[#allocation21_spill] sm:$0xff]  ;;  %v13216_v51 = vld [vmem:[#allocation87_spill] sm:$0xff]  ;;  %v9328_v4 = vadd.f32 %v1517_v33, %v9083_v7  ;;  %v9335_v55 = vrot.slane %v4346_v0, %v12616_v49  ;;  %v13221_v14 = vld [vmem:[#allocation32_spill] sm:$0xff] }
 0x48d   :  { %v9319_v21 = vadd.f32 %v13214_v31, %v980_v61  ;;  %v9322_v1 = vadd.f32 %v13216_v51, %v981_v45  ;;  %v13218_v19 = vld [vmem:[#allocation303_spill] sm:$0xff]  ;;  %v13219_v39 = vld [vmem:[#allocation301_spill] sm:$0xff]  ;;  %3095 = vrot.lane.b32.xlu1 %v13221_v14, %s4717_s26  ;;  %v13222_v61 = vld [vmem:[#allocation304_spill] sm:$0xff]  ;;  %v2346_v14 = vadd.f32 %v2330_v28, %v9143_v23  ;;  %v9369_v34 = vpop.permute.xlu1 %2435  ;;  %4406 = vmatprep.mubr.msk.f32.mxu0 %vm4723_vm9, %v13892_v3 }
 0x48e   :  { %v2586_v54 = vsel %vm2577_vm1, %v13219_v39, %v13218_v19  ;;  %13220 = vst [vmem:[#allocation190_spill] sm:$0xff] %v9335_v55  ;;  %v13223_v45 = vld [vmem:[#allocation302_spill] sm:$0xff]  ;;  %v13224_v44 = vld [vmem:[#allocation305_spill] sm:$0xff]  ;;  %v13226_v31 = vld [vmem:[#allocation308_spill] sm:$0xff] }
 0x48f   :  { %13215 = vst [vmem:[#allocation50_spill] sm:$0xff] %v9319_v21  ;;  %13217 = vst [vmem:[#allocation53_spill] sm:$0xff] %v9322_v1  ;;  %v2045_v11 = vsel %vm2033_vm13, %v13223_v45, %v13222_v61  ;;  %v2582_v7 = vsel %vm2577_vm1, %v13218_v19, %v13224_v44  ;;  %v13225_v33 = vld [vmem:[#allocation310_spill] sm:$0xff]  ;;  %v13228_v45 = vld [vmem:[#allocation36_spill] sm:$0xff]  ;;  %v9367_v44 = vpop.permute.xlu0 %3101  ;;  %v9380_v28 = vmul.f32 %v2586_v54, %v9000_v13 }
 0x490   :  { %v2315_v60 = vsel %vm2305_vm15, %v13226_v31, %v13225_v33  ;;  %v13227_v32 = vld [vmem:[#allocation314_spill] sm:$0xff]  ;;  %v9358_v39 = vmul.f32 %v1497_v50, %v13228_v45  ;;  %v13230_v1 = vld [vmem:[#allocation343_spill] sm:$0xff]  ;;  %13233 = vst [vmem:[#allocation361_spill] sm:$0xff] %v9367_v44  ;;  %13234 = vst [vmem:[#allocation52_spill] sm:$0xff] %v9369_v34 }
 0x491   :  { %v2311_v51 = vsel %vm2305_vm15, %v13225_v33, %v13227_v32  ;;  %v9361_v21 = vmul.f32 %v1493_v48, %v13230_v1  ;;  %v13232_v19 = vld [vmem:[#allocation306_spill] sm:$0xff]  ;;  %v2347_v33 = vadd.f32 %v2331_v20, %v9149_v47  ;;  %v13235_v32 = vld [vmem:[#allocation223_spill] sm:$0xff]  ;;  %v1800_v1 = vadd.f32 %v1784_v46, %v9140_v57  ;;  %13237 = vst [vmem:[#allocation162_spill] sm:$0xff] %v9380_v28  ;;  %v13242_v47 = vld [vmem:[#allocation85_spill] sm:$0xff] }
 0x492   :  { %13229 = vst [vmem:[#allocation296_spill] sm:$0xff] %v9358_v39  ;;  %v2041_v31 = vsel %vm2033_vm13, %v13222_v61, %v13232_v19  ;;  %v9376_v23 = vsel %vm1761_vm11, %v13199_v36, %v13235_v32  ;;  %v13238_v48 = vld [vmem:[#allocation218_spill] sm:$0xff]  ;;  %v9386_v61 = vmul.f32 %v2582_v7, %v9004_v42  ;;  %v13241_v45 = vld [vmem:[#allocation323_spill] sm:$0xff]  ;;  %v2327_v20 = vmul.f32 %v2311_v51, %v13242_v47  ;;  %v13243_v44 = vld [vmem:[#allocation45_spill] sm:$0xff] }
 0x493   :  { %13231 = vst [vmem:[#allocation184_spill] sm:$0xff] %v9361_v21  ;;  %13236 = vst [vmem:[#allocation158_spill] sm:$0xff] %v9376_v23  ;;  %v9383_v50 = vmul.f32 %v2045_v11, %v13238_v48  ;;  %v2326_v34 = vmul.f32 %v2315_v60, %v13241_v45  ;;  %3103 = vrot.lane.b32.xlu1 %v13243_v44, %s4717_s26  ;;  %v13244_v36 = vld [vmem:[#allocation116_spill] sm:$0xff]  ;;  %v13246_v57 = vld [vmem:[#allocation313_spill] sm:$0xff] }
 0x494   :  { %13240 = vst [vmem:[#allocation297_spill] sm:$0xff] %v9386_v61  ;;  %v9393_v32 = vmul.f32 %v2041_v31, %v13244_v36  ;;  %v13247_v46 = vld [vmem:[#allocation251_spill] sm:$0xff]  ;;  %v13249_v11 = vld [vmem:[#allocation253_spill] sm:$0xff]  ;;  %v13253_v31 = vld [vmem:[#allocation110_spill] sm:$0xff] }
 0x495   :  { %13239 = vst [vmem:[#allocation294_spill] sm:$0xff] %v9383_v50  ;;  %v2170_v13 = vsel %vm2169_vm14, %v13247_v46, %v13246_v57  ;;  %v13248_v54 = vld [vmem:[#allocation247_spill] sm:$0xff]  ;;  %v9405_v7 = vmul.f32 %v13249_v11, %v13177_v62  ;;  %v9425_v46 = vpop.permute.xlu1 %2687  ;;  %v13258_v62 = vld [vmem:[#allocation325_spill] sm:$0xff]  ;;  %v13265_v61 = vld [vmem:[#allocation106_spill] sm:$0xff] }
 0x496   :  { %13245 = vst [vmem:[#allocation51_spill] sm:$0xff] %v9393_v32  ;;  %v2182_v42 = vsel %vm2169_vm14, %v13246_v57, %v13248_v54  ;;  %v13251_v60 = vld [vmem:[#allocation319_spill] sm:$0xff]  ;;  %v9423_v57 = vpop.permute.xlu0 %3109  ;;  %13256 = vst [vmem:[#allocation340_spill] sm:$0xff] %v9425_v46  ;;  %v13257_v54 = vld [vmem:[#allocation206_spill] sm:$0xff] }
 0x497   :  { %13250 = vst [vmem:[#allocation359_spill] sm:$0xff] %v9405_v7  ;;  %v13252_v51 = vld [vmem:[#allocation315_spill] sm:$0xff]  ;;  %v2448_v48 = vsel %vm2441_vm0, %v13251_v60, %v13253_v31  ;;  %13255 = vst [vmem:[#allocation352_spill] sm:$0xff] %v9423_v57  ;;  %v1628_v23 = vsel %vm1625_vm10, %v13258_v62, %v13257_v54  ;;  %v13259_v7 = vld [vmem:[#allocation204_spill] sm:$0xff]  ;;  %v9442_v31 = vadd.f32 %v2326_v34, %v9176_v37  ;;  %3111 = vrot.lane.b32.xlu1 %v5127_v52, %s4717_s26 }
 0x498   :  { %v2452_v44 = vsel %vm2441_vm0, %v13252_v51, %v13251_v60  ;;  %v13254_v45 = vld [vmem:[#allocation307_spill] sm:$0xff]  ;;  %v1632_v60 = vsel %vm1625_vm10, %v13259_v7, %v13258_v62  ;;  %v9436_v51 = vrot.slane %v4346_v0, %v12544_v56  ;;  %v13262_v32 = vld [vmem:[#allocation102_spill] sm:$0xff]  ;;  %v13263_v50 = vld [vmem:[#allocation205_spill] sm:$0xff]  ;;  %v9451_v54 = vadd.f32 %v2327_v20, %v9187_v25 }
 0x499   :  { %v9417_v47 = vmul.f32 %v8787_v38, %v13254_v45  ;;  %v9421_v36 = vmul.f32 %v8812_v16, %v13254_v45  ;;  %v9439_v45 = vrot.slane %v4346_v0, %v12543_v2  ;;  %v9445_v46 = vmul.f32 %v2170_v13, %v13262_v32  ;;  %v13264_v62 = vld [vmem:[#allocation93_spill] sm:$0xff]  ;;  %v13267_v28 = vld [vmem:[#allocation244_spill] sm:$0xff]  ;;  %v13284_v21 = vld [vmem:[#allocation139_spill] sm:$0xff] }
 0x49a   :  { %13260 = vst [vmem:[#allocation300_spill] sm:$0xff] %v9436_v51  ;;  %v9448_v57 = vmul.f32 %v2182_v42, %v13263_v50  ;;  %v2466_v7 = vmul.f32 %v2452_v44, %v13264_v62  ;;  %v2467_v0 = vmul.f32 %v2448_v48, %v13265_v61  ;;  %v13266_v51 = vld [vmem:[#allocation344_spill] sm:$0xff]  ;;  %v13270_v50 = vld [vmem:[#allocation123_spill] sm:$0xff]  ;;  %v13271_v25 = vld [vmem:[#allocation353_spill] sm:$0xff]  ;;  %v9471_v42 = vpop.permute.xlu0 %3361  ;;  %v9473_v61 = vpop.permute.xlu1 %2695 }
 0x49b   :  { %13261 = vst [vmem:[#allocation220_spill] sm:$0xff] %v9439_v45  ;;  %v1903_v37 = vsel %vm1897_vm12, %v13267_v28, %v13266_v51  ;;  %v13268_v34 = vld [vmem:[#allocation316_spill] sm:$0xff]  ;;  %v1652_v13 = vmul.f32 %v1632_v60, %v13270_v50  ;;  %v1653_v20 = vmul.f32 %v1628_v23, %v13271_v25  ;;  %13273 = vst [vmem:[#allocation230_spill] sm:$0xff] %v9471_v42  ;;  %v13276_v28 = vld [vmem:[#allocation322_spill] sm:$0xff] }
 0x49c   :  { %v9463_v32 = vmul.f32 %v13070_v43, %v13268_v34  ;;  %v9469_v52 = vmul.f32 %v13072_v40, %v13268_v34  ;;  %13274 = vst [vmem:[#allocation217_spill] sm:$0xff] %v9473_v61  ;;  %v9477_v44 = vmul.f32 %v13099_v5, %v13268_v34  ;;  %v9481_v43 = vmul.f32 %v8787_v38, %v13276_v28  ;;  %v4347_v40 = vld [vmem:[%s11421_s3 + $0x46] ss:$8 sm:$0xf] }
 0x49d   :  { %v9485_v48 = vmul.f32 %v8812_v16, %v13276_v28  ;;  %v9492_v23 = vmul.f32 %v13249_v11, %v13276_v28  ;;  %v9496_v5 = vmul.f32 %v13106_v24, %v13268_v34  ;;  %v13279_v60 = vld [vmem:[#allocation240_spill] sm:$0xff]  ;;  %v13281_v25 = vld [vmem:[#allocation238_spill] sm:$0xff]  ;;  %v13285_v34 = vld [vmem:[#allocation11_spill] sm:$0xff]  ;;  %v2482_v24 = vadd.f32 %v2466_v7, %v2346_v14 }
 0x49e   :  { %13269 = vst [vmem:[#allocation42_spill] sm:$0xff] %v9463_v32  ;;  %13272 = vst [vmem:[#allocation61_spill] sm:$0xff] %v9469_v52  ;;  %v13280_v62 = vld [vmem:[#allocation336_spill] sm:$0xff]  ;;  %3363 = vrot.lane.b32.xlu1 %v13285_v34, %s4720_s27  ;;  %v9532_v14 = vrot.slane %v4347_v40, %v12616_v49  ;;  %v9536_v7 = vpop.permute.xlu1 %2703 }
 0x49f   :  { %13275 = vst [vmem:[#allocation298_spill] sm:$0xff] %v9477_v44  ;;  %13277 = vst [vmem:[#allocation215_spill] sm:$0xff] %v9492_v23  ;;  %v1629_v50 = vsel %vm1625_vm10, %v13280_v62, %v13279_v60  ;;  %v1633_v51 = vsel %vm1625_vm10, %v13281_v25, %v13280_v62  ;;  %v13282_v44 = vld [vmem:[#allocation341_spill] sm:$0xff]  ;;  %v13283_v42 = vld [vmem:[#allocation332_spill] sm:$0xff]  ;;  %v1920_v23 = vmul.f32 %v1903_v37, %v13284_v21  ;;  %vm3647_vm10 = vcmask 261120  }
 0x4a0   :  { %13278 = vst [vmem:[#allocation148_spill] sm:$0xff] %v9496_v5  ;;  %v2722_v61 = vsel %vm2713_vm2, %v13283_v42, %v13282_v44  ;;  %v2483_v5 = vadd.f32 %v2467_v0, %v2347_v33  ;;  %v13286_v60 = vld [vmem:[#allocation2_spill] sm:$0xff]  ;;  %v13287_v62 = vld [vmem:[#allocation89_spill] sm:$0xff]  ;;  %v9523_v42 = vadd.f32 %v1652_v13, %v9325_v30  ;;  %v9526_v21 = vadd.f32 %v1653_v20, %v9328_v4  ;;  %v9534_v33 = vpop.permute.xlu0 %3369  ;;  %v13297_v4 = vld [vmem:[#allocation64_spill] sm:$0xff] }
 0x4a1   :  { %v2718_v39 = vsel %vm2713_vm2, %v13282_v44, %v13286_v60  ;;  %v9520_v25 = vmul.f32 %v13287_v62, %v13276_v28  ;;  %v9529_v37 = vrot.slane %v4347_v40, %v12617_v29  ;;  %13289 = vst [vmem:[#allocation21_spill] sm:$0xff] %v9532_v14  ;;  %13290 = vst [vmem:[#allocation87_spill] sm:$0xff] %v9534_v33  ;;  %v13292_v0 = vld [vmem:[#allocation169_spill] sm:$0xff]  ;;  %v13294_v28 = vld [vmem:[#allocation131_spill] sm:$0xff] }
 0x4a2   :  { %13291 = vst [vmem:[#allocation303_spill] sm:$0xff] %v9536_v7  ;;  %v9539_v44 = vmul.f32 %v1633_v51, %v13292_v0  ;;  %v9542_v34 = vmul.f32 %v1629_v50, %v13294_v28  ;;  %v9545_v30 = vmul.f32 %v2722_v61, %v9253_v18  ;;  %v13298_v13 = vld [vmem:[#allocation46_spill] sm:$0xff]  ;;  %v9554_v33 = vmul.f32 %v2718_v39, %v9269_v9  ;;  %v13300_v7 = vld [vmem:[#allocation44_spill] sm:$0xff]  ;;  %v13302_v50 = vld [vmem:[#allocation55_spill] sm:$0xff] }
 0x4a3   :  { %13288 = vst [vmem:[#allocation126_spill] sm:$0xff] %v9520_v25  ;;  %v2451_v20 = vsel %vm2441_vm0, %v13298_v13, %v13297_v4  ;;  %v9551_v25 = vadd.f32 %v1920_v23, %v1800_v1  ;;  %v13301_v60 = vld [vmem:[#allocation54_spill] sm:$0xff]  ;;  %v2447_v18 = vsel %vm2441_vm0, %v13297_v4, %v13302_v50  ;;  %v13303_v61 = vld [vmem:[#allocation16_spill] sm:$0xff]  ;;  %v13304_v0 = vld [vmem:[#allocation351_spill] sm:$0xff] }
 0x4a4   :  { %13293 = vst [vmem:[#allocation32_spill] sm:$0xff] %v9539_v44  ;;  %13295 = vst [vmem:[#allocation304_spill] sm:$0xff] %v9542_v34  ;;  %v2588_v51 = vsel %vm2577_vm1, %v13301_v60, %v13300_v7  ;;  %3371 = vrot.lane.b32.xlu1 %v13303_v61, %s4720_s27  ;;  %v13305_v28 = vld [vmem:[#allocation349_spill] sm:$0xff]  ;;  %v13317_v44 = vld [vmem:[#allocation242_spill] sm:$0xff] }
 0x4a5   :  { %13296 = vst [vmem:[#allocation310_spill] sm:$0xff] %v9545_v30  ;;  %13299 = vst [vmem:[#allocation36_spill] sm:$0xff] %v9554_v33  ;;  %v2181_v1 = vsel %vm2169_vm14, %v13305_v28, %v13304_v0  ;;  %v13306_v9 = vld [vmem:[#allocation357_spill] sm:$0xff]  ;;  %v13312_v28 = vld [vmem:[#allocation98_spill] sm:$0xff]  ;;  %v9591_v30 = vpop.permute.xlu0 %3377  ;;  %v2463_v52 = vmul.f32 %v2447_v18, %v13317_v44 }
 0x4a6   :  { %v2177_v39 = vsel %vm2169_vm14, %v13304_v0, %v13306_v9  ;;  %v13307_v23 = vld [vmem:[#allocation309_spill] sm:$0xff]  ;;  %v2462_v0 = vmul.f32 %v2451_v20, %v13312_v28  ;;  %13313 = vst [vmem:[#allocation223_spill] sm:$0xff] %v9591_v30  ;;  %v9593_v9 = vpop.permute.xlu1 %2955  ;;  %v13321_v20 = vld [vmem:[#allocation130_spill] sm:$0xff] }
 0x4a7   :  { %v9576_v13 = vmul.f32 %v9037_v41, %v13307_v23  ;;  %v9580_v4 = vmul.f32 %v9055_v12, %v13307_v23  ;;  %v13310_v60 = vld [vmem:[#allocation37_spill] sm:$0xff]  ;;  %13314 = vst [vmem:[#allocation218_spill] sm:$0xff] %v9593_v9  ;;  %v9610_v28 = vmul.f32 %v2181_v1, %v13321_v20  ;;  %v13323_v9 = vld [vmem:[#allocation156_spill] sm:$0xff]  ;;  %v13331_v1 = vld [vmem:[#allocation226_spill] sm:$0xff] }
 0x4a8   :  { %v2306_v61 = vsel %vm2305_vm15, %v13068_v27, %v13310_v60  ;;  %v13311_v33 = vld [vmem:[#allocation265_spill] sm:$0xff]  ;;  %v9613_v30 = vmul.f32 %v2177_v39, %v13323_v9  ;;  %v13332_v20 = vld [vmem:[#allocation19_spill] sm:$0xff]  ;;  %v13333_v39 = vld [vmem:[#allocation222_spill] sm:$0xff] }
 0x4a9   :  { %13308 = vst [vmem:[#allocation343_spill] sm:$0xff] %v9576_v13  ;;  %13309 = vst [vmem:[#allocation306_spill] sm:$0xff] %v9580_v4  ;;  %v2318_v50 = vsel %vm2305_vm15, %v13310_v60, %v13311_v33  ;;  %v9597_v13 = vmul.f32 %v9173_v8, %v13307_v23  ;;  %v13316_v4 = vld [vmem:[#allocation192_spill] sm:$0xff]  ;;  %v13318_v27 = vld [vmem:[#allocation69_spill] sm:$0xff]  ;;  %v1764_v9 = vsel %vm1761_vm11, %v13332_v20, %v13331_v1 }
 0x4aa   :  { %v2602_v34 = vmul.f32 %v2588_v51, %v13316_v4  ;;  %v2584_v32 = vsel %vm2577_vm1, %v13300_v7, %v13318_v27  ;;  %v13319_v60 = vld [vmem:[#allocation26_spill] sm:$0xff]  ;;  %13322 = vst [vmem:[#allocation45_spill] sm:$0xff] %v9610_v28  ;;  %13324 = vst [vmem:[#allocation116_spill] sm:$0xff] %v9613_v30  ;;  %v13325_v23 = vld [vmem:[#allocation120_spill] sm:$0xff]  ;;  %v9638_v30 = vadd.f32 %v2462_v0, %v9442_v31 }
 0x4ab   :  { %13315 = vst [vmem:[#allocation323_spill] sm:$0xff] %v9597_v13  ;;  %v9607_v33 = vmul.f32 %v9037_v41, %v13319_v60  ;;  %v489_v51 = vmul.f32 %v13325_v23, %v9146_v53  ;;  %v13326_v44 = vld [vmem:[#allocation13_spill] sm:$0xff]  ;;  %v9621_v18 = vmul.f32 %v9055_v12, %v13319_v60  ;;  %v13329_v13 = vld [vmem:[#allocation100_spill] sm:$0xff]  ;;  %v13341_v0 = vld [vmem:[#allocation59_spill] sm:$0xff] }
 0x4ac   :  { %3379 = vrot.lane.b32.xlu1 %v13326_v44, %s4720_s27  ;;  %v13328_v7 = vld [vmem:[#allocation29_spill] sm:$0xff]  ;;  %v9627_v27 = vmul.f32 %v2318_v50, %v13329_v13  ;;  %v1768_v44 = vsel %vm1761_vm11, %v13333_v39, %v13332_v20  ;;  %v9646_v13 = vrot.slane %v4347_v40, %v12543_v2  ;;  %v9649_v50 = vrot.slane %v4347_v40, %v12544_v56  ;;  %v13339_v20 = vld [vmem:[#allocation58_spill] sm:$0xff]  ;;  %v13340_v31 = vld [vmem:[#allocation68_spill] sm:$0xff] }
 0x4ad   :  { %13320 = vst [vmem:[#allocation85_spill] sm:$0xff] %v9607_v33  ;;  %13327 = vst [vmem:[#allocation313_spill] sm:$0xff] %v9621_v18  ;;  %v9624_v4 = vmul.f32 %v2306_v61, %v13328_v7  ;;  %v13334_v60 = vld [vmem:[#allocation125_spill] sm:$0xff]  ;;  %v9641_v61 = vpop.permute.xlu0 %3579  ;;  %v9643_v7 = vpop.permute.xlu1 %2963  ;;  %v9651_v1 = vadd.f32 %v2602_v34, %v2482_v24  ;;  %v9654_v18 = vadd.f32 %v2463_v52, %v9451_v54  ;;  %v13347_v54 = vld [vmem:[#allocation48_spill] sm:$0xff] }
 0x4ae   :  { %13330 = vst [vmem:[#allocation251_spill] sm:$0xff] %v9627_v27  ;;  %v2603_v28 = vmul.f32 %v2584_v32, %v13334_v60  ;;  %13335 = vst [vmem:[#allocation247_spill] sm:$0xff] %v9641_v61  ;;  %v2858_v32 = vsel %vm2849_vm3, %v13340_v31, %v13339_v20  ;;  %v9662_v60 = vmul.f32 %v8567_v35, %v13341_v0  ;;  %v13343_v39 = vld [vmem:[#allocation49_spill] sm:$0xff]  ;;  %v4658_v34 = vld [vmem:[%s11420_s7 + $0x8] sm:$0xff] }
 0x4af   :  { %13336 = vst [vmem:[#allocation319_spill] sm:$0xff] %v9643_v7  ;;  %13337 = vst [vmem:[#allocation206_spill] sm:$0xff] %v9646_v13  ;;  %v1788_v61 = vmul.f32 %v1768_v44, %v13343_v39  ;;  %v13344_v7 = vld [vmem:[#allocation355_spill] sm:$0xff]  ;;  %v13345_v40 = vld [vmem:[#allocation65_spill] sm:$0xff]  ;;  %v554_v52 = vmul.f32 %v13347_v54, %v489_v51  ;;  %v9686_v51 = vmul.f32 %v8585_v63, %v13341_v0 }
 0x4b0   :  { %13338 = vst [vmem:[#allocation325_spill] sm:$0xff] %v9649_v50  ;;  %13342 = vst [vmem:[#allocation204_spill] sm:$0xff] %v9662_v60  ;;  %v1789_v33 = vmul.f32 %v1764_v9, %v13344_v7  ;;  %v13346_v50 = vld [vmem:[#allocation268_spill] sm:$0xff]  ;;  %3583 = vperm.xlu1 %4593, %v4658_v34   ;;  %v13348_v31 = vld [vmem:[#allocation73_spill] sm:$0xff]  ;;  %v9682_v7 = vmul.f32 %v8570_v22, %v13341_v0 }
 0x4b1   :  { %v2035_v24 = vsel %vm2033_vm13, %v13346_v50, %v13345_v40  ;;  %v2854_v35 = vsel %vm2849_vm3, %v13339_v20, %v13348_v31  ;;  %v13349_v44 = vld [vmem:[#allocation111_spill] sm:$0xff]  ;;  %13351 = vst [vmem:[#allocation205_spill] sm:$0xff] %v9686_v51  ;;  %v2619_v50 = vadd.f32 %v2603_v28, %v2483_v5  ;;  %v13352_v39 = vld [vmem:[#allocation262_spill] sm:$0xff]  ;;  %v13354_v40 = vld [vmem:[#allocation260_spill] sm:$0xff]  ;;  %v9700_v22 = vpop.permute.xlu0 %2711  ;;  %v9705_v5 = vmul.f32 %v2858_v32, %v9481_v43 }
 0x4b2   :  { %v490_v9 = vmul.f32 %v13349_v44, %v9146_v53  ;;  %13350 = vst [vmem:[#allocation102_spill] sm:$0xff] %v9682_v7  ;;  %v13353_v54 = vld [vmem:[#allocation63_spill] sm:$0xff]  ;;  %v9698_v53 = vmul.f32 %v8588_v6, %v13341_v0  ;;  %13356 = vst [vmem:[#allocation106_spill] sm:$0xff] %v9700_v22  ;;  %v9702_v7 = vpop.permute.xlu1 %2971  ;;  %v13359_v28 = vld [vmem:[#allocation145_spill] sm:$0xff]  ;;  %v9718_v0 = vadd.f32 %v1788_v61, %v9523_v42 }
 0x4b3   :  { %v1765_v34 = vsel %vm1761_vm11, %v13353_v54, %v13352_v39  ;;  %v1769_v20 = vsel %vm1761_vm11, %v13354_v40, %v13353_v54  ;;  %13357 = vst [vmem:[#allocation244_spill] sm:$0xff] %v9702_v7  ;;  %13358 = vst [vmem:[#allocation316_spill] sm:$0xff] %v9705_v5  ;;  %v2056_v63 = vmul.f32 %v2035_v24, %v13359_v28  ;;  %v13360_v51 = vld [vmem:[#allocation56_spill] sm:$0xff]  ;;  %v13362_v32 = vld [vmem:[#allocation38_spill] sm:$0xff]  ;;  %vm3744_vm11 = vcmask 64512  }
 0x4b4   :  { %13355 = vst [vmem:[#allocation93_spill] sm:$0xff] %v9698_v53  ;;  %v9710_v39 = vmul.f32 %v9037_v41, %v13360_v51  ;;  %v9715_v40 = vmul.f32 %v9055_v12, %v13360_v51  ;;  %v9721_v54 = vadd.f32 %v1789_v33, %v9526_v21  ;;  %v9724_v43 = vmul.f32 %v2854_v35, %v9485_v48  ;;  %v13363_v28 = vld [vmem:[#allocation153_spill] sm:$0xff]  ;;  %v13367_v7 = vld [vmem:[#allocation43_spill] sm:$0xff]  ;;  %v13368_v61 = vld [vmem:[#allocation356_spill] sm:$0xff] }
 0x4b5   :  { %v570_v24 = vadd.f32 %v554_v52, %v13362_v32  ;;  %2709 = vrot.lane.b32.xlu1 %v12567_v59, %s4711_s30  ;;  %v9730_v6 = vmul.f32 %v1769_v20, %v13363_v28  ;;  %v13365_v53 = vld [vmem:[#allocation221_spill] sm:$0xff]  ;;  %v555_v42 = vmul.f32 %v13367_v7, %v490_v9  ;;  %v9738_v21 = vmul.f32 %v9310_v15, %v13368_v61  ;;  %v13370_v33 = vld [vmem:[#allocation8_spill] sm:$0xff]  ;;  %v13371_v48 = vld [vmem:[#allocation79_spill] sm:$0xff]  ;;  %v9748_v20 = vpop.permute.xlu0 %2979 }
 0x4b6   :  { %13361 = vst [vmem:[#allocation123_spill] sm:$0xff] %v9724_v43  ;;  %v9733_v51 = vmul.f32 %v1765_v34, %v13365_v53  ;;  %v2724_v52 = vsel %vm2713_vm2, %v13371_v48, %v13370_v33  ;;  %v13372_v35 = vld [vmem:[#allocation70_spill] sm:$0xff]  ;;  %13374 = vst [vmem:[#allocation238_spill] sm:$0xff] %v9748_v20  ;;  %v9750_v28 = vpop.permute.xlu1 %3185  ;;  %v9754_v9 = vmul.f32 %v9335_v55, %v13368_v61  ;;  %v13385_v22 = vld [vmem:[#allocation9_spill] sm:$0xff] }
 0x4b7   :  { %13364 = vst [vmem:[#allocation353_spill] sm:$0xff] %v9730_v6  ;;  %13369 = vst [vmem:[#allocation240_spill] sm:$0xff] %v9738_v21  ;;  %v9746_v32 = vmul.f32 %v9310_v15, %v13372_v35  ;;  %v9758_v7 = vmul.f32 %v9439_v45, %v13368_v61  ;;  %v9761_v34 = vadd.f32 %v2056_v63, %v9551_v25  ;;  %v13378_v53 = vld [vmem:[#allocation330_spill] sm:$0xff]  ;;  %v13379_v21 = vld [vmem:[#allocation327_spill] sm:$0xff] }
 0x4b8   :  { %13366 = vst [vmem:[#allocation322_spill] sm:$0xff] %v9733_v51  ;;  %13375 = vst [vmem:[#allocation341_spill] sm:$0xff] %v9750_v28  ;;  %v2442_v48 = vsel %vm2441_vm0, %v13147_v10, %v13378_v53  ;;  %v2720_v28 = vsel %vm2713_vm2, %v13370_v33, %v13379_v21  ;;  %v4348_v61 = vld [vmem:[%s11421_s3 + $0x47] ss:$8 sm:$0xf]  ;;  %v2454_v63 = vsel %vm2441_vm0, %v13378_v53, %v13146_v26 }
 0x4b9   :  { %13373 = vst [vmem:[#allocation336_spill] sm:$0xff] %v9746_v32  ;;  %13376 = vst [vmem:[#allocation139_spill] sm:$0xff] %v9754_v9  ;;  %v9773_v9 = vmul.f32 %v9335_v55, %v13372_v35  ;;  %v13381_v25 = vld [vmem:[#allocation82_spill] sm:$0xff]  ;;  %2977 = vrot.lane.b32.xlu1 %v13385_v22, %s4715_s23  ;;  %v13387_v43 = vld [vmem:[#allocation72_spill] sm:$0xff]  ;;  %v9815_v51 = vpop.permute.xlu0 %3231 }
 0x4ba   :  { %13377 = vst [vmem:[#allocation11_spill] sm:$0xff] %v9758_v7  ;;  %v13382_v10 = vld [vmem:[#allocation326_spill] sm:$0xff]  ;;  %v13388_v53 = vld [vmem:[#allocation88_spill] sm:$0xff]  ;;  %v13389_v5 = vld [vmem:[#allocation39_spill] sm:$0xff]  ;;  %v9825_v6 = vpop.permute.xlu1 %3445 }
 0x4bb   :  { %13380 = vst [vmem:[#allocation169_spill] sm:$0xff] %v9773_v9  ;;  %v2587_v7 = vsel %vm2577_vm1, %v13382_v10, %v13381_v25  ;;  %v13383_v20 = vld [vmem:[#allocation338_spill] sm:$0xff]  ;;  %v2738_v9 = vmul.f32 %v2724_v52, %v9191_v17  ;;  %v571_v32 = vadd.f32 %v555_v42, %v13389_v5  ;;  %13393 = vst [vmem:[#allocation44_spill] sm:$0xff] %v9815_v51  ;;  %v13395_v17 = vld [vmem:[#allocation249_spill] sm:$0xff] }
 0x4bc   :  { %v2583_v33 = vsel %vm2577_vm1, %v13381_v25, %v13383_v20  ;;  %v13384_v35 = vld [vmem:[#allocation362_spill] sm:$0xff]  ;;  %v2739_v25 = vmul.f32 %v2720_v28, %v9195_v58  ;;  %v9821_v5 = vmul.f32 %v2454_v63, %v13395_v17  ;;  %v13397_v52 = vld [vmem:[#allocation3_spill] sm:$0xff]  ;;  %13398 = vst [vmem:[#allocation16_spill] sm:$0xff] %v9825_v6  ;;  %v13404_v63 = vld [vmem:[#allocation20_spill] sm:$0xff] }
 0x4bd   :  { %v706_v21 = vadd.f32 %v13384_v35, %v570_v24  ;;  %v13386_v60 = vld [vmem:[#allocation86_spill] sm:$0xff]  ;;  %v2599_v28 = vmul.f32 %v2583_v33, %v13397_v52  ;;  %v13399_v45 = vld [vmem:[#allocation267_spill] sm:$0xff]  ;;  %3229 = vrot.lane.b32.xlu1 %v13404_v63, %s4719_s12  ;;  %v13405_v33 = vld [vmem:[#allocation113_spill] sm:$0xff] }
 0x4be   :  { %v2317_v26 = vsel %vm2305_vm15, %v13387_v43, %v13386_v60  ;;  %v2313_v10 = vsel %vm2305_vm15, %v13386_v60, %v13388_v53  ;;  %v13390_v24 = vld [vmem:[#allocation62_spill] sm:$0xff]  ;;  %v9813_v43 = vrot.slane %v4348_v61, %v12617_v29  ;;  %v13394_v60 = vld [vmem:[#allocation225_spill] sm:$0xff]  ;;  %v13411_v52 = vld [vmem:[#allocation331_spill] sm:$0xff]  ;;  %v9875_v6 = vpop.permute.xlu1 %2301 }
 0x4bf   :  { %v9806_v35 = vmul.f32 %v9529_v37, %v13390_v24  ;;  %v9810_v20 = vmul.f32 %v9532_v14, %v13390_v24  ;;  %v9818_v53 = vmul.f32 %v2442_v48, %v13394_v60  ;;  %v13396_v58 = vld [vmem:[#allocation266_spill] sm:$0xff]  ;;  %v9828_v31 = vmul.f32 %v2317_v26, %v13399_v45  ;;  %v13406_v60 = vld [vmem:[#allocation243_spill] sm:$0xff]  ;;  %v13407_v26 = vld [vmem:[#allocation360_spill] sm:$0xff]  ;;  %13415 = vst [vmem:[#allocation242_spill] sm:$0xff] %v9875_v6 }
 0x4c0   :  { %v2598_v42 = vmul.f32 %v2587_v7, %v13396_v58  ;;  %v13403_v27 = vld [vmem:[#allocation358_spill] sm:$0xff]  ;;  %v9835_v48 = vrot.slane %v4348_v61, %v12616_v49  ;;  %v9840_v7 = vadd.f32 %v2738_v9, %v9651_v1  ;;  %v1904_v45 = vsel %vm1897_vm12, %v13406_v60, %v13405_v33  ;;  %v9860_v9 = vpop.permute.xlu0 %3239 }
 0x4c1   :  { %13391 = vst [vmem:[#allocation131_spill] sm:$0xff] %v9806_v35  ;;  %13392 = vst [vmem:[#allocation64_spill] sm:$0xff] %v9810_v20  ;;  %v13401_v20 = vld [vmem:[#allocation142_spill] sm:$0xff]  ;;  %v842_v51 = vadd.f32 %v13403_v27, %v706_v21  ;;  %v707_v17 = vadd.f32 %v13407_v26, %v571_v32  ;;  %v9850_v27 = vadd.f32 %v2739_v25, %v2619_v50  ;;  %v13414_v25 = vld [vmem:[#allocation245_spill] sm:$0xff] }
 0x4c2   :  { %13400 = vst [vmem:[#allocation351_spill] sm:$0xff] %v9828_v31  ;;  %v9831_v35 = vmul.f32 %v2313_v10, %v13401_v20  ;;  %v9848_v20 = vrot.slane %v4348_v61, %v12543_v2  ;;  %v13409_v21 = vld [vmem:[#allocation22_spill] sm:$0xff]  ;;  %13412 = vst [vmem:[#allocation98_spill] sm:$0xff] %v9860_v9  ;;  %v9863_v60 = vrot.slane %v4348_v61, %v12544_v56  ;;  %v13448_v31 = vld [vmem:[#allocation53_spill] sm:$0xff] }
 0x4c3   :  { %v13410_v10 = vld [vmem:[#allocation114_spill] sm:$0xff]  ;;  %v2990_v1 = vsel %vm2985_vm4, %v13409_v21, %v13411_v52  ;;  %v9866_v32 = vadd.f32 %v2598_v42, %v9638_v30  ;;  %v9869_v50 = vadd.f32 %v2599_v28, %v9654_v18  ;;  %v1900_v26 = vsel %vm1897_vm12, %v13405_v33, %v13414_v25  ;;  %v13418_v52 = vld [vmem:[#allocation141_spill] sm:$0xff]  ;;  %v13420_v30 = vld [vmem:[#allocation27_spill] sm:$0xff] }
 0x4c4   :  { %13402 = vst [vmem:[#allocation37_spill] sm:$0xff] %v9831_v35  ;;  %13408 = vst [vmem:[#allocation265_spill] sm:$0xff] %v9848_v20  ;;  %v2994_v58 = vsel %vm2985_vm4, %v13410_v10, %v13409_v21  ;;  %v13416_v10 = vld [vmem:[#allocation350_spill] sm:$0xff]  ;;  %v1924_v61 = vmul.f32 %v1904_v45, %v13418_v52  ;;  %3237 = vrot.lane.b32.xlu1 %v13420_v30, %s4719_s12  ;;  %v13425_v33 = vld [vmem:[#allocation40_spill] sm:$0xff] }
 0x4c5   :  { %13413 = vst [vmem:[#allocation192_spill] sm:$0xff] %v9863_v60  ;;  %v9879_v21 = vmul.f32 %v8787_v38, %v13416_v10  ;;  %v13419_v60 = vld [vmem:[#allocation57_spill] sm:$0xff]  ;;  %v9887_v18 = vmul.f32 %v13287_v62, %v13416_v10  ;;  %v9891_v42 = vmul.f32 %v8812_v16, %v13416_v10  ;;  %v9894_v28 = vmul.f32 %v2994_v58, %v9710_v39  ;;  %v13427_v52 = vld [vmem:[#allocation147_spill] sm:$0xff]  ;;  %v13429_v62 = vld [vmem:[#allocation290_spill] sm:$0xff] }
 0x4c6   :  { %v978_v9 = vadd.f32 %v13419_v60, %v842_v51  ;;  %v9897_v38 = vmul.f32 %v2990_v1, %v9715_v40  ;;  %v843_v45 = vadd.f32 %v13425_v33, %v707_v17  ;;  %v9902_v51 = vmul.f32 %v13249_v11, %v13416_v10  ;;  %v13428_v25 = vld [vmem:[#allocation345_spill] sm:$0xff]  ;;  %v9918_v17 = vpop.permute.xlu0 %3247  ;;  %v13432_v10 = vld [vmem:[#allocation128_spill] sm:$0xff]  ;;  %v13433_v58 = vld [vmem:[#allocation282_spill] sm:$0xff] }
 0x4c7   :  { %13417 = vst [vmem:[#allocation130_spill] sm:$0xff] %v9879_v21  ;;  %13421 = vst [vmem:[#allocation156_spill] sm:$0xff] %v9887_v18  ;;  %v1925_v60 = vmul.f32 %v1900_v26, %v13427_v52  ;;  %v2171_v16 = vsel %vm2169_vm14, %v13429_v62, %v13428_v25  ;;  %v13430_v18 = vld [vmem:[#allocation108_spill] sm:$0xff]  ;;  %v1905_v1 = vsel %vm1897_vm12, %v13433_v58, %v13432_v10  ;;  %v13435_v33 = vld [vmem:[#allocation30_spill] sm:$0xff]  ;;  %v9930_v25 = vpop.permute.xlu1 %2303 }
 0x4c8   :  { %13422 = vst [vmem:[#allocation120_spill] sm:$0xff] %v9891_v42  ;;  %13423 = vst [vmem:[#allocation13_spill] sm:$0xff] %v9894_v28  ;;  %v9911_v39 = vmul.f32 %v9310_v15, %v13430_v18  ;;  %v9916_v40 = vmul.f32 %v9335_v55, %v13430_v18  ;;  %v13434_v26 = vld [vmem:[#allocation132_spill] sm:$0xff]  ;;  %v13436_v52 = vld [vmem:[#allocation185_spill] sm:$0xff]  ;;  %v9934_v18 = vmul.f32 %v9646_v13, %v13390_v24 }
 0x4c9   :  { %13424 = vst [vmem:[#allocation29_spill] sm:$0xff] %v9897_v38  ;;  %13426 = vst [vmem:[#allocation100_spill] sm:$0xff] %v9902_v51  ;;  %v2860_v62 = vsel %vm2849_vm3, %v13435_v33, %v13434_v26  ;;  %v501_v11 = vmul.f32 %v13325_v23, %v13436_v52  ;;  %v9937_v51 = vadd.f32 %v1924_v61, %v9718_v0  ;;  %v13440_v42 = vld [vmem:[#allocation99_spill] sm:$0xff]  ;;  %v13441_v33 = vld [vmem:[#allocation50_spill] sm:$0xff] }
 0x4ca   :  { %13431 = vst [vmem:[#allocation226_spill] sm:$0xff] %v9918_v17  ;;  %13437 = vst [vmem:[#allocation19_spill] sm:$0xff] %v9930_v25  ;;  %v13439_v17 = vld [vmem:[#allocation284_spill] sm:$0xff]  ;;  %v1114_v21 = vadd.f32 %v13440_v42, %v978_v9  ;;  %v13442_v35 = vld [vmem:[#allocation339_spill] sm:$0xff]  ;;  %v9957_v9 = vadd.f32 %v1925_v60, %v9721_v54  ;;  %v9967_v55 = vpop.permute.xlu0 %3499 }
 0x4cb   :  { %13438 = vst [vmem:[#allocation222_spill] sm:$0xff] %v9934_v18  ;;  %v1901_v58 = vsel %vm1897_vm12, %v13432_v10, %v13439_v17  ;;  %v1252_v6 = vadd.f32 %v13442_v35, %v13441_v33  ;;  %v13443_v23 = vld [vmem:[#allocation23_spill] sm:$0xff]  ;;  %v13444_v25 = vld [vmem:[#allocation121_spill] sm:$0xff]  ;;  %v13446_v0 = vld [vmem:[#allocation198_spill] sm:$0xff] }
 0x4cc   :  { %3245 = vrot.lane.b32.xlu1 %v13443_v23, %s4719_s12  ;;  %v13445_v38 = vld [vmem:[#allocation305_spill] sm:$0xff]  ;;  %v2192_v61 = vmul.f32 %v2171_v16, %v13446_v0  ;;  %v13447_v18 = vld [vmem:[#allocation66_spill] sm:$0xff]  ;;  %v13449_v28 = vld [vmem:[#allocation151_spill] sm:$0xff]  ;;  %13453 = vst [vmem:[#allocation58_spill] sm:$0xff] %v9967_v55 }
 0x4cd   :  { %v2578_v24 = vsel %vm2577_vm1, %v13445_v38, %v13444_v25  ;;  %v979_v13 = vadd.f32 %v13447_v18, %v843_v45  ;;  %v1253_v17 = vadd.f32 %v13449_v28, %v13448_v31  ;;  %v13450_v42 = vld [vmem:[#allocation195_spill] sm:$0xff]  ;;  %v13452_v10 = vld [vmem:[#allocation301_spill] sm:$0xff]  ;;  %v2874_v38 = vmul.f32 %v2860_v62, %v9417_v47  ;;  %v13456_v45 = vld [vmem:[#allocation134_spill] sm:$0xff] }
 0x4ce   :  { %v9960_v35 = vmul.f32 %v1905_v1, %v13450_v42  ;;  %v2590_v33 = vsel %vm2577_vm1, %v13444_v25, %v13452_v10  ;;  %v13454_v16 = vld [vmem:[#allocation187_spill] sm:$0xff]  ;;  %v13458_v28 = vld [vmem:[#allocation10_spill] sm:$0xff]  ;;  %v13459_v1 = vld [vmem:[#allocation80_spill] sm:$0xff]  ;;  %v9979_v42 = vpop.permute.xlu1 %2571 }
 0x4cf   :  { %v9970_v18 = vmul.f32 %v1901_v58, %v13454_v16  ;;  %v13457_v31 = vld [vmem:[#allocation31_spill] sm:$0xff]  ;;  %v503_v60 = vmul.f32 %v13458_v28, %v13436_v52  ;;  %v566_v0 = vmul.f32 %v13459_v1, %v501_v11  ;;  %13460 = vst [vmem:[#allocation49_spill] sm:$0xff] %v9979_v42  ;;  %v13461_v25 = vld [vmem:[#allocation270_spill] sm:$0xff]  ;;  %v13465_v55 = vld [vmem:[#allocation229_spill] sm:$0xff]  ;;  %v9996_v11 = vadd.f32 %v2192_v61, %v9761_v34 }
 0x4d0   :  { %13451 = vst [vmem:[#allocation125_spill] sm:$0xff] %v9960_v35  ;;  %v2453_v54 = vsel %vm2441_vm0, %v13457_v31, %v13456_v45  ;;  %v9982_v10 = vmul.f32 %v2578_v24, %v13461_v25  ;;  %v13463_v47 = vld [vmem:[#allocation143_spill] sm:$0xff]  ;;  %v13466_v35 = vld [vmem:[#allocation4_spill] sm:$0xff]  ;;  %v13470_v25 = vld [vmem:[#allocation234_spill] sm:$0xff] }
 0x4d1   :  { %13455 = vst [vmem:[#allocation59_spill] sm:$0xff] %v9970_v18  ;;  %v2856_v62 = vsel %vm2849_vm3, %v13434_v26, %v13463_v47  ;;  %v13464_v58 = vld [vmem:[#allocation95_spill] sm:$0xff]  ;;  %v1388_v18 = vadd.f32 %v13465_v55, %v1252_v6  ;;  %3497 = vrot.lane.b32.xlu1 %v13466_v35, %s4721_s28  ;;  %v1389_v42 = vadd.f32 %v13470_v25, %v1253_v17  ;;  %v13472_v6 = vld [vmem:[#allocation202_spill] sm:$0xff]  ;;  %v13474_v34 = vld [vmem:[#allocation317_spill] sm:$0xff] }
 0x4d2   :  { %13462 = vst [vmem:[#allocation355_spill] sm:$0xff] %v9982_v10  ;;  %v1250_v16 = vadd.f32 %v13464_v58, %v1114_v21  ;;  %v13467_v28 = vld [vmem:[#allocation171_spill] sm:$0xff]  ;;  %v10004_v21 = vadd.f32 %v2874_v38, %v9840_v7  ;;  %v10007_v55 = vmul.f32 %v2453_v54, %v13472_v6  ;;  %v502_v35 = vmul.f32 %v13349_v44, %v13436_v52  ;;  %v13476_v17 = vld [vmem:[#allocation173_spill] sm:$0xff]  ;;  %v13477_v58 = vld [vmem:[#allocation152_spill] sm:$0xff]  ;;  %v10022_v25 = vpop.permute.xlu1 %2823 }
 0x4d3   :  { %v9993_v15 = vmul.f32 %v2590_v33, %v13467_v28  ;;  %v13469_v24 = vld [vmem:[#allocation15_spill] sm:$0xff]  ;;  %v504_v61 = vmul.f32 %v13474_v34, %v13436_v52  ;;  %v10013_v33 = vpop.permute.xlu0 %3507  ;;  %v2723_v28 = vsel %vm2713_vm2, %v13477_v58, %v13476_v17  ;;  %v13478_v7 = vld [vmem:[#allocation333_spill] sm:$0xff]  ;;  %13480 = vst [vmem:[#allocation63_spill] sm:$0xff] %v10022_v25  ;;  %v13481_v6 = vld [vmem:[#allocation144_spill] sm:$0xff] }
 0x4d4   :  { %v1115_v1 = vadd.f32 %v13469_v24, %v979_v13  ;;  %v4349_v26 = vld [vmem:[%s11421_s3 + $0x60] ss:$8 sm:$0xf]  ;;  %13471 = vst [vmem:[#allocation48_spill] sm:$0xff] %v10004_v21  ;;  %13473 = vst [vmem:[#allocation111_spill] sm:$0xff] %v10007_v55  ;;  %v2875_v13 = vmul.f32 %v2856_v62, %v9421_v36  ;;  %v568_v38 = vmul.f32 %v13478_v7, %v503_v60 }
 0x4d5   :  { %13468 = vst [vmem:[#allocation268_spill] sm:$0xff] %v9993_v15  ;;  %13475 = vst [vmem:[#allocation262_spill] sm:$0xff] %v10013_v33  ;;  %v13479_v24 = vld [vmem:[#allocation84_spill] sm:$0xff]  ;;  %v2449_v44 = vsel %vm2441_vm0, %v13456_v45, %v13481_v6  ;;  %v13482_v52 = vld [vmem:[#allocation346_spill] sm:$0xff]  ;;  %v10031_v62 = vrot.slane %v4349_v26, %v12617_v29  ;;  %v10042_v45 = vrot.slane %v4349_v26, %v12616_v49 }
 0x4d6   :  { %v582_v54 = vadd.f32 %v566_v0, %v13479_v24  ;;  %v1386_v34 = vadd.f32 %v13482_v52, %v1250_v16  ;;  %v13483_v47 = vld [vmem:[#allocation321_spill] sm:$0xff]  ;;  %v13485_v58 = vld [vmem:[#allocation7_spill] sm:$0xff]  ;;  %v13489_v25 = vld [vmem:[#allocation28_spill] sm:$0xff] }
 0x4d7   :  { %v1524_v36 = vadd.f32 %v13483_v47, %v1388_v18  ;;  %13484 = vst [vmem:[#allocation260_spill] sm:$0xff] %v10031_v62  ;;  %3505 = vrot.lane.b32.xlu1 %v13485_v58, %s4721_s28  ;;  %v13486_v60 = vld [vmem:[#allocation175_spill] sm:$0xff]  ;;  %v13487_v7 = vld [vmem:[#allocation157_spill] sm:$0xff]  ;;  %v1525_v55 = vadd.f32 %v13489_v25, %v1389_v42  ;;  %13490 = vst [vmem:[#allocation145_spill] sm:$0xff] %v10042_v45  ;;  %v10051_v10 = vpop.permute.xlu0 %3515 }
 0x4d8   :  { %v3130_v0 = vsel %vm3121_vm5, %v13487_v7, %v13486_v60  ;;  %v13488_v24 = vld [vmem:[#allocation107_spill] sm:$0xff]  ;;  %v13493_v58 = vld [vmem:[#allocation334_spill] sm:$0xff]  ;;  %v13494_v21 = vld [vmem:[#allocation76_spill] sm:$0xff]  ;;  %13495 = vst [vmem:[#allocation38_spill] sm:$0xff] %v10051_v10  ;;  %v10061_v7 = vpop.permute.xlu1 %2831 }
 0x4d9   :  { %v1251_v33 = vadd.f32 %v13488_v24, %v1115_v1  ;;  %v13491_v16 = vld [vmem:[#allocation271_spill] sm:$0xff]  ;;  %v567_v52 = vmul.f32 %v13493_v58, %v502_v35  ;;  %v569_v15 = vmul.f32 %v13494_v21, %v504_v61  ;;  %v10054_v1 = vadd.f32 %v2875_v13, %v9850_v27  ;;  %v13497_v49 = vld [vmem:[#allocation77_spill] sm:$0xff]  ;;  %13499 = vst [vmem:[#allocation153_spill] sm:$0xff] %v10061_v7 }
 0x4da   :  { %v2734_v18 = vmul.f32 %v2723_v28, %v13491_v16  ;;  %v13492_v47 = vld [vmem:[#allocation211_spill] sm:$0xff]  ;;  %v584_v24 = vadd.f32 %v568_v38, %v13497_v49  ;;  %v13498_v28 = vld [vmem:[#allocation320_spill] sm:$0xff]  ;;  %v13502_v13 = vld [vmem:[#allocation5_spill] sm:$0xff] }
 0x4db   :  { %v2719_v29 = vsel %vm2713_vm2, %v13476_v17, %v13492_v47  ;;  %v13496_v42 = vld [vmem:[#allocation67_spill] sm:$0xff]  ;;  %v718_v16 = vadd.f32 %v13498_v28, %v582_v54  ;;  %v10064_v17 = vmul.f32 %v3130_v0, %v9911_v39  ;;  %3513 = vrot.lane.b32.xlu1 %v13502_v13, %s4721_s28  ;;  %v13504_v38 = vld [vmem:[#allocation197_spill] sm:$0xff]  ;;  %v13505_v54 = vld [vmem:[#allocation348_spill] sm:$0xff]  ;;  %v10078_v39 = vrot.slane %v4349_v26, %v12543_v2  ;;  %v10085_v7 = vpop.permute.xlu0 %2847 }
 0x4dc   :  { %v10057_v25 = vmul.f32 %v2449_v44, %v13496_v42  ;;  %v13500_v35 = vld [vmem:[#allocation115_spill] sm:$0xff]  ;;  %v13503_v44 = vld [vmem:[#allocation241_spill] sm:$0xff]  ;;  %v2735_v42 = vmul.f32 %v2719_v29, %v13504_v38  ;;  %v1387_v49 = vadd.f32 %v13505_v54, %v1251_v33  ;;  %v10081_v0 = vadd.f32 %v2734_v18, %v9866_v32  ;;  %13510 = vst [vmem:[#allocation43_spill] sm:$0xff] %v10085_v7  ;;  %v13512_v33 = vld [vmem:[#allocation318_spill] sm:$0xff] }
 0x4dd   :  { %v3126_v21 = vsel %vm3121_vm5, %v13486_v60, %v13500_v35  ;;  %v13501_v61 = vld [vmem:[#allocation47_spill] sm:$0xff]  ;;  %v1660_v58 = vadd.f32 %v13503_v44, %v1524_v36  ;;  %13507 = vst [vmem:[#allocation221_spill] sm:$0xff] %v10078_v39  ;;  %v13508_v60 = vld [vmem:[#allocation60_spill] sm:$0xff]  ;;  %v10088_v36 = vrot.slane %v4349_v26, %v12544_v56  ;;  %v13513_v13 = vld [vmem:[#allocation78_spill] sm:$0xff]  ;;  %v10095_v44 = vpop.permute.xlu1 %2839 }
 0x4de   :  { %v1522_v27 = vadd.f32 %v13501_v61, %v1386_v34  ;;  %v13506_v28 = vld [vmem:[#allocation239_spill] sm:$0xff]  ;;  %v583_v35 = vadd.f32 %v567_v52, %v13508_v60  ;;  %v13509_v34 = vld [vmem:[#allocation18_spill] sm:$0xff]  ;;  %v10091_v29 = vmul.f32 %v3126_v21, %v9916_v40  ;;  %v854_v2 = vadd.f32 %v13513_v13, %v718_v16  ;;  %v13516_v52 = vld [vmem:[#allocation189_spill] sm:$0xff] }
 0x4df   :  { %v1661_v10 = vadd.f32 %v13506_v28, %v1525_v55  ;;  %v585_v61 = vadd.f32 %v569_v15, %v13509_v34  ;;  %13511 = vst [vmem:[#allocation8_spill] sm:$0xff] %v10088_v36  ;;  %v720_v55 = vadd.f32 %v13512_v33, %v584_v24  ;;  %v13514_v32 = vld [vmem:[#allocation119_spill] sm:$0xff]  ;;  %2845 = vrot.lane.b32.xlu1 %v12567_v59, %s4713_s21  ;;  %v13517_v56 = vld [vmem:[#allocation182_spill] sm:$0xff]  ;;  %v13520_v21 = vld [vmem:[#allocation209_spill] sm:$0xff] }
 0x4e0   :  { %v10099_v18 = vmul.f32 %v9813_v43, %v13514_v32  ;;  %v1658_v15 = vadd.f32 %v13516_v52, %v1522_v27  ;;  %v1796_v26 = vadd.f32 %v13517_v56, %v1660_v58  ;;  %v10107_v40 = vmul.f32 %v9835_v48, %v13514_v32  ;;  %v13521_v27 = vld [vmem:[#allocation129_spill] sm:$0xff]  ;;  %v13523_v34 = vld [vmem:[#allocation75_spill] sm:$0xff]  ;;  %v13524_v13 = vld [vmem:[#allocation74_spill] sm:$0xff]  ;;  %v10128_v56 = vpop.permute.xlu0 %3115 }
 0x4e1   :  { %v10111_v24 = vmul.f32 %v9848_v20, %v13514_v32  ;;  %v10114_v16 = vadd.f32 %v2735_v42, %v9869_v50  ;;  %v10118_v38 = vmul.f32 %v9037_v41, %v13520_v21  ;;  %v1523_v54 = vadd.f32 %v13521_v27, %v1387_v49  ;;  %v13522_v28 = vld [vmem:[#allocation105_spill] sm:$0xff]  ;;  %13525 = vst [vmem:[#allocation9_spill] sm:$0xff] %v10128_v56  ;;  %v13528_v32 = vld [vmem:[#allocation90_spill] sm:$0xff]  ;;  %v13529_v27 = vld [vmem:[#allocation160_spill] sm:$0xff] }
 0x4e2   :  { %13515 = vst [vmem:[#allocation330_spill] sm:$0xff] %v10099_v18  ;;  %13518 = vst [vmem:[#allocation82_spill] sm:$0xff] %v10107_v40  ;;  %v1797_v60 = vadd.f32 %v13522_v28, %v1661_v10  ;;  %v10124_v58 = vmul.f32 %v9055_v12, %v13520_v21  ;;  %v719_v33 = vadd.f32 %v13523_v34, %v583_v35  ;;  %v13527_v41 = vld [vmem:[#allocation81_spill] sm:$0xff]  ;;  %v10140_v12 = vpop.permute.xlu1 %3091  ;;  %v13532_v35 = vld [vmem:[#allocation186_spill] sm:$0xff] }
 0x4e3   :  { %13519 = vst [vmem:[#allocation362_spill] sm:$0xff] %v10111_v24  ;;  %v721_v52 = vadd.f32 %v13524_v13, %v585_v61  ;;  %v10132_v50 = vmul.f32 %v9173_v8, %v13520_v21  ;;  %v856_v42 = vadd.f32 %v13527_v41, %v720_v55  ;;  %v990_v49 = vadd.f32 %v13528_v32, %v854_v2  ;;  %v13534_v61 = vld [vmem:[#allocation231_spill] sm:$0xff]  ;;  %v13536_v8 = vld [vmem:[#allocation178_spill] sm:$0xff]  ;;  %v13557_v7 = vld [vmem:[#allocation233_spill] sm:$0xff] }
 0x4e4   :  { %v10138_v10 = vmul.f32 %v10031_v62, %v13529_v27  ;;  %13531 = vst [vmem:[#allocation225_spill] sm:$0xff] %v10140_v12  ;;  %v10144_v28 = vmul.f32 %v13532_v35, %v13520_v21  ;;  %v13535_v34 = vld [vmem:[#allocation263_spill] sm:$0xff]  ;;  %v1794_v24 = vadd.f32 %v13536_v8, %v1658_v15  ;;  %3113 = vrot.lane.b32.xlu1 %v13385_v22, %s4717_s26  ;;  %v13537_v55 = vld [vmem:[#allocation278_spill] sm:$0xff]  ;;  %v13541_v8 = vld [vmem:[#allocation136_spill] sm:$0xff]  ;;  %v10175_v20 = vpop.permute.xlu0 %3367 }
 0x4e5   :  { %13526 = vst [vmem:[#allocation86_spill] sm:$0xff] %v10132_v50  ;;  %v2036_v13 = vsel %vm2033_vm13, %v13535_v34, %v13534_v61  ;;  %v1932_v2 = vadd.f32 %v13537_v55, %v1796_v26  ;;  %v13538_v32 = vld [vmem:[#allocation122_spill] sm:$0xff]  ;;  %v13539_v40 = vld [vmem:[#allocation227_spill] sm:$0xff]  ;;  %v1659_v15 = vadd.f32 %v13541_v8, %v1523_v54  ;;  %v13543_v55 = vld [vmem:[#allocation312_spill] sm:$0xff] }
 0x4e6   :  { %13530 = vst [vmem:[#allocation39_spill] sm:$0xff] %v10138_v10  ;;  %13533 = vst [vmem:[#allocation249_spill] sm:$0xff] %v10144_v28  ;;  %v10156_v41 = vmul.f32 %v9529_v37, %v13538_v32  ;;  %v2445_v21 = vsel %vm2441_vm0, %v13481_v6, %v13539_v40  ;;  %v13540_v35 = vld [vmem:[#allocation259_spill] sm:$0xff]  ;;  %v13542_v10 = vld [vmem:[#allocation200_spill] sm:$0xff]  ;;  %v2457_v26 = vsel %vm2441_vm0, %v13539_v40, %v13457_v31 }
 0x4e7   :  { %v2048_v34 = vsel %vm2033_vm13, %v13534_v61, %v13540_v35  ;;  %v1933_v27 = vadd.f32 %v13542_v10, %v1797_v60  ;;  %v855_v18 = vadd.f32 %v13543_v55, %v719_v33  ;;  %v13544_v39 = vld [vmem:[#allocation83_spill] sm:$0xff]  ;;  %13545 = vst [vmem:[#allocation266_spill] sm:$0xff] %v10175_v20  ;;  %v10179_v35 = vmul.f32 %v9532_v14, %v13538_v32  ;;  %v13547_v60 = vld [vmem:[#allocation236_spill] sm:$0xff]  ;;  %v13548_v10 = vld [vmem:[#allocation314_spill] sm:$0xff]  ;;  %v10188_v33 = vpop.permute.xlu1 %3099 }
 0x4e8   :  { %v857_v6 = vadd.f32 %v13544_v39, %v721_v52  ;;  %v13546_v54 = vld [vmem:[#allocation167_spill] sm:$0xff]  ;;  %v2307_v8 = vsel %vm2305_vm15, %v13548_v10, %v13547_v60  ;;  %v13549_v31 = vld [vmem:[#allocation6_spill] sm:$0xff]  ;;  %v13550_v50 = vld [vmem:[#allocation337_spill] sm:$0xff]  ;;  %13551 = vst [vmem:[#allocation3_spill] sm:$0xff] %v10188_v33  ;;  %3365 = vrot.lane.b32.xlu1 %v13404_v63, %s4720_s27 }
 0x4e9   :  { %v2060_v61 = vmul.f32 %v2036_v13, %v13546_v54  ;;  %v992_v40 = vadd.f32 %v13549_v31, %v856_v42  ;;  %v1126_v56 = vadd.f32 %v13550_v50, %v990_v49  ;;  %v13552_v39 = vld [vmem:[#allocation280_spill] sm:$0xff]  ;;  %v13554_v55 = vld [vmem:[#allocation177_spill] sm:$0xff]  ;;  %v13555_v13 = vld [vmem:[#allocation287_spill] sm:$0xff]  ;;  %v2715_v42 = vsel %vm2713_vm2, %v13492_v47, %v13557_v7  ;;  %v10215_v7 = vpop.permute.xlu0 %3375 }
 0x4ea   :  { %v10191_v52 = vmul.f32 %v2445_v21, %v13552_v39  ;;  %v2061_v20 = vmul.f32 %v2048_v34, %v13554_v55  ;;  %v2068_v54 = vadd.f32 %v13555_v13, %v1932_v2  ;;  %v13556_v32 = vld [vmem:[#allocation103_spill] sm:$0xff]  ;;  %v13559_v21 = vld [vmem:[#allocation172_spill] sm:$0xff]  ;;  %v13561_v39 = vld [vmem:[#allocation302_spill] sm:$0xff]  ;;  %13565 = vst [vmem:[#allocation142_spill] sm:$0xff] %v10215_v7 }
 0x4eb   :  { %v1930_v28 = vadd.f32 %v13556_v32, %v1794_v24  ;;  %v13558_v50 = vld [vmem:[#allocation163_spill] sm:$0xff]  ;;  %v2069_v10 = vadd.f32 %v13559_v21, %v1933_v27  ;;  %v13560_v34 = vld [vmem:[#allocation224_spill] sm:$0xff]  ;;  %v13562_v24 = vld [vmem:[#allocation213_spill] sm:$0xff] }
 0x4ec   :  { %13553 = vst [vmem:[#allocation267_spill] sm:$0xff] %v10191_v52  ;;  %v2037_v49 = vsel %vm2033_vm13, %v13232_v19, %v13558_v50  ;;  %v1795_v31 = vadd.f32 %v13560_v34, %v1659_v15  ;;  %v2049_v2 = vsel %vm2033_vm13, %v13558_v50, %v13561_v39  ;;  %v2328_v32 = vmul.f32 %v2307_v8, %v13562_v24  ;;  %v13563_v55 = vld [vmem:[#allocation335_spill] sm:$0xff]  ;;  %v13564_v60 = vld [vmem:[#allocation324_spill] sm:$0xff]  ;;  %v13566_v12 = vld [vmem:[#allocation285_spill] sm:$0xff]  ;;  %v10225_v52 = vpop.permute.xlu1 %3107 }
 0x4ed   :  { %v991_v13 = vadd.f32 %v13563_v55, %v855_v18  ;;  %v993_v47 = vadd.f32 %v13564_v60, %v857_v6  ;;  %v10218_v33 = vmul.f32 %v2457_v26, %v13566_v12  ;;  %v10221_v19 = vadd.f32 %v2060_v61, %v9937_v51  ;;  %v13568_v27 = vld [vmem:[#allocation94_spill] sm:$0xff]  ;;  %v13569_v21 = vld [vmem:[#allocation188_spill] sm:$0xff]  ;;  %13570 = vst [vmem:[#allocation20_spill] sm:$0xff] %v10225_v52  ;;  %v13571_v18 = vld [vmem:[#allocation329_spill] sm:$0xff] }
 0x4ee   :  { %v1128_v15 = vadd.f32 %v13568_v27, %v992_v40  ;;  %v1262_v34 = vadd.f32 %v13569_v21, %v1126_v56  ;;  %v10228_v8 = vadd.f32 %v2061_v20, %v9957_v9  ;;  %v10231_v50 = vmul.f32 %v2715_v42, %v13571_v18  ;;  %3373 = vrot.lane.b32.xlu1 %v13420_v30, %s4720_s27  ;;  %v13573_v26 = vld [vmem:[#allocation109_spill] sm:$0xff]  ;;  %v13574_v6 = vld [vmem:[#allocation214_spill] sm:$0xff]  ;;  %v13576_v20 = vld [vmem:[#allocation140_spill] sm:$0xff]  ;;  %v10254_v27 = vpop.permute.xlu0 %3383 }
 0x4ef   :  { %13567 = vst [vmem:[#allocation358_spill] sm:$0xff] %v10218_v33  ;;  %v2204_v12 = vadd.f32 %v9445_v46, %v2068_v54  ;;  %v2066_v51 = vadd.f32 %v13573_v26, %v1930_v28  ;;  %v10238_v61 = vmul.f32 %v2037_v49, %v13574_v6  ;;  %v13575_v60 = vld [vmem:[#allocation354_spill] sm:$0xff]  ;;  %v2205_v40 = vadd.f32 %v9448_v57, %v2069_v10  ;;  %v13578_v24 = vld [vmem:[#allocation201_spill] sm:$0xff]  ;;  %v13579_v54 = vld [vmem:[#allocation92_spill] sm:$0xff] }
 0x4f0   :  { %13572 = vst [vmem:[#allocation113_spill] sm:$0xff] %v10231_v50  ;;  %v10241_v56 = vmul.f32 %v2049_v2, %v13575_v60  ;;  %v1931_v9 = vadd.f32 %v13576_v20, %v1795_v31  ;;  %v10246_v42 = vadd.f32 %v2328_v32, %v9996_v11  ;;  %v13577_v39 = vld [vmem:[#allocation274_spill] sm:$0xff]  ;;  %v1127_v28 = vadd.f32 %v13579_v54, %v991_v13  ;;  %v13580_v55 = vld [vmem:[#allocation101_spill] sm:$0xff]  ;;  %v13582_v2 = vld [vmem:[#allocation252_spill] sm:$0xff]  ;;  %v10266_v6 = vpop.permute.xlu1 %3321 }
 0x4f1   :  { %v2859_v46 = vsel %vm2849_vm3, %v13578_v24, %v13577_v39  ;;  %v1129_v49 = vadd.f32 %v13580_v55, %v993_v47  ;;  %13581 = vst [vmem:[#allocation243_spill] sm:$0xff] %v10254_v27  ;;  %v13583_v21 = vld [vmem:[#allocation235_spill] sm:$0xff]  ;;  %v13584_v10 = vld [vmem:[#allocation248_spill] sm:$0xff]  ;;  %v13585_v31 = vld [vmem:[#allocation254_spill] sm:$0xff]  ;;  %v2340_v55 = vadd.f32 %v9624_v4, %v2204_v12 }
 0x4f2   :  { %v2997_v57 = vsel %vm2985_vm4, %v13583_v21, %v13582_v2  ;;  %v2993_v11 = vsel %vm2985_vm4, %v13582_v2, %v13584_v10  ;;  %v1264_v32 = vadd.f32 %v13585_v31, %v1128_v15  ;;  %v13586_v18 = vld [vmem:[#allocation164_spill] sm:$0xff]  ;;  %13587 = vst [vmem:[#allocation360_spill] sm:$0xff] %v10266_v6  ;;  %v13588_v13 = vld [vmem:[#allocation250_spill] sm:$0xff]  ;;  %3381 = vrot.lane.b32.xlu1 %v13443_v23, %s4720_s27  ;;  %v13591_v15 = vld [vmem:[#allocation117_spill] sm:$0xff]  ;;  %v10295_v21 = vpop.permute.xlu0 %3591 }
 0x4f3   :  { %v1398_v26 = vadd.f32 %v13586_v18, %v1262_v34  ;;  %v13589_v47 = vld [vmem:[#allocation154_spill] sm:$0xff]  ;;  %v13590_v20 = vld [vmem:[#allocation180_spill] sm:$0xff]  ;;  %v2202_v2 = vadd.f32 %v13591_v15, %v2066_v51  ;;  %v13592_v34 = vld [vmem:[#allocation165_spill] sm:$0xff]  ;;  %v10291_v50 = vmul.f32 %v2993_v11, %v10124_v58  ;;  %13600 = vst [vmem:[#allocation245_spill] sm:$0xff] %v10295_v21  ;;  %v2476_v11 = vadd.f32 %v9818_v53, %v2340_v55 }
 0x4f4   :  { %v2589_v60 = vsel %vm2577_vm1, %v13589_v47, %v13588_v13  ;;  %v2585_v54 = vsel %vm2577_vm1, %v13588_v13, %v13590_v20  ;;  %v13593_v31 = vld [vmem:[#allocation256_spill] sm:$0xff]  ;;  %v13594_v24 = vld [vmem:[#allocation283_spill] sm:$0xff]  ;;  %v13596_v52 = vld [vmem:[#allocation161_spill] sm:$0xff]  ;;  %v10288_v13 = vmul.f32 %v2997_v57, %v10118_v38  ;;  %v10306_v58 = vpop.permute.xlu1 %2437 }
 0x4f5   :  { %v3267_v18 = vsel %vm3257_vm6, %v13593_v31, %v13592_v34  ;;  %v2870_v27 = vmul.f32 %v2859_v46, %v13594_v24  ;;  %v13595_v10 = vld [vmem:[#allocation251_spill] sm:$0xff]  ;;  %v2067_v7 = vadd.f32 %v13596_v52, %v1931_v9  ;;  %13597 = vst [vmem:[#allocation22_spill] sm:$0xff] %v10291_v50  ;;  %v13598_v4 = vld [vmem:[#allocation137_spill] sm:$0xff]  ;;  %v13599_v51 = vld [vmem:[#allocation174_spill] sm:$0xff] }
 0x4f6   :  { %v2341_v6 = vadd.f32 %v13595_v10, %v2205_v40  ;;  %v1263_v12 = vadd.f32 %v13598_v4, %v1127_v28  ;;  %v1265_v15 = vadd.f32 %v13599_v51, %v1129_v49  ;;  %v13601_v33 = vld [vmem:[#allocation42_spill] sm:$0xff]  ;;  %v13602_v24 = vld [vmem:[#allocation272_spill] sm:$0xff]  ;;  %v13603_v40 = vld [vmem:[#allocation91_spill] sm:$0xff]  ;;  %v10331_v53 = vpop.permute.xlu0 %2983 }
 0x4f7   :  { %v10298_v31 = vmul.f32 %v2589_v60, %v13601_v33  ;;  %v2855_v52 = vsel %vm2849_vm3, %v13577_v39, %v13602_v24  ;;  %v1534_v38 = vadd.f32 %v13603_v40, %v1398_v26  ;;  %v13604_v9 = vld [vmem:[#allocation279_spill] sm:$0xff]  ;;  %v13605_v57 = vld [vmem:[#allocation61_spill] sm:$0xff]  ;;  %v4659_v33 = vld [vmem:[%s11420_s7 + $0x10] sm:$0xff]  ;;  %v10320_v26 = vadd.f32 %v2870_v27, %v10081_v0 }
 0x4f8   :  { %v1400_v46 = vadd.f32 %v13604_v9, %v1264_v32  ;;  %v10309_v28 = vmul.f32 %v2585_v54, %v13605_v57  ;;  %v13606_v49 = vld [vmem:[#allocation131_spill] sm:$0xff]  ;;  %3587 = vperm.xlu1 %4593, %v4659_v33   ;;  %v13608_v39 = vld [vmem:[#allocation258_spill] sm:$0xff]  ;;  %v2477_v32 = vadd.f32 %v9821_v5, %v2341_v6  ;;  %v13609_v4 = vld [vmem:[#allocation97_spill] sm:$0xff] }
 0x4f9   :  { %v10312_v10 = vmul.f32 %v3267_v18, %v13606_v49  ;;  %v2338_v60 = vadd.f32 %v13608_v39, %v2202_v2  ;;  %v10325_v54 = vmul.f32 %v10031_v62, %v13609_v4  ;;  %v13611_v18 = vld [vmem:[#allocation228_spill] sm:$0xff]  ;;  %v13612_v40 = vld [vmem:[#allocation342_spill] sm:$0xff]  ;;  %v13613_v57 = vld [vmem:[#allocation155_spill] sm:$0xff]  ;;  %v10335_v0 = vmul.f32 %v10042_v45, %v13609_v4  ;;  %v2706_v39 = vpop.permute.xlu1 %2705 }
 0x4fa   :  { %v2203_v51 = vadd.f32 %v13611_v18, %v2067_v7  ;;  %v2871_v9 = vmul.f32 %v2855_v52, %v13612_v40  ;;  %v1399_v49 = vadd.f32 %v13613_v57, %v1263_v12  ;;  %v13614_v33 = vld [vmem:[#allocation275_spill] sm:$0xff]  ;;  %v13617_v5 = vld [vmem:[#allocation73_spill] sm:$0xff]  ;;  %v13618_v55 = vld [vmem:[#allocation68_spill] sm:$0xff]  ;;  %v10365_v50 = vpop.permute.xlu0 %3251 }
 0x4fb   :  { %13607 = vst [vmem:[#allocation350_spill] sm:$0xff] %v10312_v10  ;;  %13610 = vst [vmem:[#allocation141_spill] sm:$0xff] %v10325_v54  ;;  %v1401_v21 = vadd.f32 %v13614_v33, %v1265_v15  ;;  %v13616_v27 = vld [vmem:[#allocation179_spill] sm:$0xff]  ;;  %v13619_v2 = vld [vmem:[#allocation296_spill] sm:$0xff] }
 0x4fc   :  { %13615 = vst [vmem:[#allocation57_spill] sm:$0xff] %v10335_v0  ;;  %v2850_v6 = vsel %vm2849_vm3, %v13617_v5, %v13616_v27  ;;  %v2862_v7 = vsel %vm2849_vm3, %v13616_v27, %v13618_v55  ;;  %v1536_v12 = vadd.f32 %v13619_v2, %v1400_v46  ;;  %v13620_v52 = vld [vmem:[#allocation133_spill] sm:$0xff]  ;;  %v13621_v18 = vld [vmem:[#allocation355_spill] sm:$0xff]  ;;  %v13622_v57 = vld [vmem:[#allocation2_spill] sm:$0xff]  ;;  %2981 = vrot.lane.b32.xlu1 %v12567_v59, %s4715_s23  ;;  %v13629_v0 = vmov 0  }
 0x4fd   :  { %v1670_v15 = vadd.f32 %v13620_v52, %v1534_v38  ;;  %v2612_v40 = vadd.f32 %v13621_v18, %v2476_v11  ;;  %v2714_v33 = vsel %vm2713_vm2, %v13622_v57, %v2706_v39  ;;  %v13623_v62 = vld [vmem:[#allocation332_spill] sm:$0xff]  ;;  %v13624_v45 = vld [vmem:[#allocation194_spill] sm:$0xff]  ;;  %v13626_v2 = vld [vmem:[#allocation191_spill] sm:$0xff]  ;;  %4595 = vset.pattern.permute.xlu1 %v13629_v0  ;;  %13633 = vst [vmem:[#allocation27_spill] sm:$0xff] %v10365_v50 }
 0x4fe   :  { %v2726_v5 = vsel %vm2713_vm2, %v2706_v39, %v13623_v62  ;;  %v2474_v27 = vadd.f32 %v13624_v45, %v2338_v60  ;;  %v13625_v55 = vld [vmem:[#allocation268_spill] sm:$0xff]  ;;  %v2732_v38 = vmul.f32 %v2714_v33, %v13626_v2  ;;  %v13627_v52 = vld [vmem:[#allocation35_spill] sm:$0xff]  ;;  %v10369_v45 = vmul.f32 %v10088_v36, %v13609_v4  ;;  %v13635_v60 = vld [vmem:[#allocation126_spill] sm:$0xff] }
 0x4ff   :  { %v2613_v46 = vadd.f32 %v13625_v55, %v2477_v32  ;;  %v2733_v10 = vmul.f32 %v2726_v5, %v13627_v52  ;;  %v13628_v11 = vld [vmem:[#allocation112_spill] sm:$0xff]  ;;  %v13631_v54 = vld [vmem:[#allocation215_spill] sm:$0xff]  ;;  %v2869_v32 = vmul.f32 %v2862_v7, %v13635_v60  ;;  %v13636_v33 = vld [vmem:[#allocation193_spill] sm:$0xff] }
 0x500   :  { %v2339_v18 = vadd.f32 %v13628_v11, %v2203_v51  ;;  %v13630_v57 = vld [vmem:[#allocation208_spill] sm:$0xff]  ;;  %v2868_v24 = vmul.f32 %v2850_v6, %v13631_v54  ;;  %13634 = vst [vmem:[#allocation40_spill] sm:$0xff] %v10369_v45  ;;  %v13637_v5 = vld [vmem:[#allocation281_spill] sm:$0xff]  ;;  %v2748_v0 = vadd.f32 %v2732_v38, %v2612_v40  ;;  %v10379_v54 = vadd.f32 %v2871_v9, %v10114_v16  ;;  %v13652_v36 = vld [vmem:[#allocation219_spill] sm:$0xff] }
 0x501   :  { %v1535_v34 = vadd.f32 %v13630_v57, %v1399_v49  ;;  %v13632_v62 = vld [vmem:[#allocation184_spill] sm:$0xff]  ;;  %v2172_v51 = vsel %vm2169_vm14, %v13637_v5, %v13636_v33  ;;  %v2749_v55 = vadd.f32 %v2733_v10, %v2613_v46  ;;  %v10376_v49 = vpop.permute.xlu1 %2957  ;;  %v13642_v7 = vld [vmem:[#allocation257_spill] sm:$0xff]  ;;  %3249 = vrot.lane.b32.xlu1 %v13385_v22, %s4719_s12  ;;  %v13643_v10 = vld [vmem:[#allocation162_spill] sm:$0xff] }
 0x502   :  { %v1537_v39 = vadd.f32 %v13632_v62, %v1401_v21  ;;  %13638 = vst [vmem:[#allocation147_spill] sm:$0xff] %v10376_v49  ;;  %13639 = vst [vmem:[#allocation290_spill] sm:$0xff] %v10379_v54  ;;  %v13640_v21 = vld [vmem:[#allocation277_spill] sm:$0xff]  ;;  %v13641_v2 = vld [vmem:[#allocation32_spill] sm:$0xff]  ;;  %v1806_v11 = vadd.f32 %v13642_v7, %v1670_v15  ;;  %v2610_v40 = vadd.f32 %v13643_v10, %v2474_v27  ;;  %v10399_v15 = vpop.permute.xlu0 %3503 }
 0x503   :  { %v2184_v6 = vsel %vm2169_vm14, %v13636_v33, %v13640_v21  ;;  %v1672_v52 = vadd.f32 %v13641_v2, %v1536_v12  ;;  %v13644_v46 = vld [vmem:[#allocation124_spill] sm:$0xff]  ;;  %v10392_v16 = vadd.f32 %v2868_v24, %v2748_v0  ;;  %v10394_v9 = vadd.f32 %v2869_v32, %v2749_v55  ;;  %v13647_v57 = vld [vmem:[#allocation207_spill] sm:$0xff]  ;;  %v13650_v21 = vld [vmem:[#allocation210_spill] sm:$0xff] }
 0x504   :  { %v2475_v38 = vadd.f32 %v13644_v46, %v2339_v18  ;;  %v2196_v62 = vmul.f32 %v2172_v51, %v13647_v57  ;;  %v13648_v60 = vld [vmem:[#allocation304_spill] sm:$0xff]  ;;  %v2197_v27 = vmul.f32 %v2184_v6, %v13652_v36  ;;  %v13653_v24 = vld [vmem:[#allocation33_spill] sm:$0xff]  ;;  %v13654_v32 = vld [vmem:[#allocation190_spill] sm:$0xff] }
 0x505   :  { %13645 = vst [vmem:[#allocation128_spill] sm:$0xff] %v10392_v16  ;;  %13646 = vst [vmem:[#allocation282_spill] sm:$0xff] %v10394_v9  ;;  %v1673_v33 = vadd.f32 %v13648_v60, %v1537_v39  ;;  %v13649_v12 = vld [vmem:[#allocation96_spill] sm:$0xff]  ;;  %v2966_v10 = vpop.permute.xlu1 %2965  ;;  %v10408_v18 = vmul.f32 %v13653_v24, %v13650_v21  ;;  %v10412_v51 = vmul.f32 %v13654_v32, %v13650_v21  ;;  %v13658_v0 = vld [vmem:[#allocation353_spill] sm:$0xff]  ;;  %3501 = vrot.lane.b32.xlu1 %v13404_v63, %s4721_s28 }
 0x506   :  { %v1671_v5 = vadd.f32 %v13649_v12, %v1535_v34  ;;  %v13651_v2 = vld [vmem:[#allocation300_spill] sm:$0xff]  ;;  %v1808_v55 = vadd.f32 %v13658_v0, %v1672_v52  ;;  %v13659_v46 = vld [vmem:[#allocation361_spill] sm:$0xff]  ;;  %v2996_v12 = vsel %vm2985_vm4, %v10376_v49, %v2966_v10  ;;  %v10445_v54 = vpop.permute.xlu0 %3511 }
 0x507   :  { %v10403_v7 = vmul.f32 %v13651_v2, %v13650_v21  ;;  %13655 = vst [vmem:[#allocation132_spill] sm:$0xff] %v10412_v51  ;;  %v13656_v39 = vld [vmem:[#allocation220_spill] sm:$0xff]  ;;  %v13662_v24 = vld [vmem:[#allocation293_spill] sm:$0xff] }
 0x508   :  { %v10416_v34 = vmul.f32 %v13656_v39, %v13650_v21  ;;  %v13660_v57 = vld [vmem:[#allocation292_spill] sm:$0xff]  ;;  %v13663_v32 = vld [vmem:[#allocation357_spill] sm:$0xff]  ;;  %v13665_v39 = vld [vmem:[#allocation310_spill] sm:$0xff] }
 0x509   :  { %v3132_v36 = vsel %vm3121_vm5, %v13660_v57, %v13659_v46  ;;  %v13661_v6 = vld [vmem:[#allocation276_spill] sm:$0xff]  ;;  %v2173_v21 = vsel %vm2169_vm14, %v13663_v32, %v13662_v24  ;;  %v13664_v52 = vld [vmem:[#allocation85_spill] sm:$0xff]  ;;  %v2746_v2 = vadd.f32 %v13665_v39, %v2610_v40  ;;  %v10456_v32 = vpop.permute.xlu1 %2973  ;;  %3509 = vrot.lane.b32.xlu1 %v13420_v30, %s4721_s28 }
 0x50a   :  { %13657 = vst [vmem:[#allocation185_spill] sm:$0xff] %v10416_v34  ;;  %v1942_v60 = vadd.f32 %v13661_v6, %v1806_v11  ;;  %v3010_v0 = vmul.f32 %v2996_v12, %v13664_v52  ;;  %v13666_v9 = vld [vmem:[#allocation297_spill] sm:$0xff]  ;;  %v10437_v11 = vadd.f32 %v2196_v62, %v10221_v19  ;;  %v13667_v6 = vld [vmem:[#allocation322_spill] sm:$0xff]  ;;  %v10448_v12 = vadd.f32 %v2197_v27, %v10228_v8  ;;  %v13670_v40 = vld [vmem:[#allocation336_spill] sm:$0xff] }
 0x50b   :  { %v2611_v57 = vadd.f32 %v13666_v9, %v2475_v38  ;;  %v1809_v16 = vadd.f32 %v13667_v6, %v1673_v33  ;;  %v13668_v49 = vld [vmem:[#allocation349_spill] sm:$0xff]  ;;  %v3146_v39 = vmul.f32 %v3132_v36, %v13670_v40  ;;  %v13671_v38 = vld [vmem:[#allocation52_spill] sm:$0xff]  ;;  %v13672_v9 = vld [vmem:[#allocation55_spill] sm:$0xff]  ;;  %13674 = vst [vmem:[#allocation284_spill] sm:$0xff] %v10456_v32  ;;  %v2992_v27 = vsel %vm2985_vm4, %v2966_v10, %v10456_v32  ;;  %v10478_v10 = vpop.permute.xlu0 %3519 }
 0x50c   :  { %v2185_v63 = vsel %vm2169_vm14, %v13662_v24, %v13668_v49  ;;  %v13669_v50 = vld [vmem:[#allocation17_spill] sm:$0xff]  ;;  %v2443_v19 = vsel %vm2441_vm0, %v13672_v9, %v13671_v38  ;;  %v13673_v62 = vld [vmem:[#allocation48_spill] sm:$0xff]  ;;  %v13677_v8 = vld [vmem:[#allocation294_spill] sm:$0xff]  ;;  %13686 = vst [vmem:[#allocation50_spill] sm:$0xff] %v10478_v10 }
 0x50d   :  { %v1807_v4 = vadd.f32 %v13669_v50, %v1671_v5  ;;  %v3026_v33 = vadd.f32 %v3010_v0, %v13673_v62  ;;  %v13675_v52 = vld [vmem:[#allocation125_spill] sm:$0xff]  ;;  %v13676_v24 = vld [vmem:[#allocation352_spill] sm:$0xff]  ;;  %v2078_v5 = vadd.f32 %v13677_v8, %v1942_v60  ;;  %v13684_v60 = vld [vmem:[#allocation135_spill] sm:$0xff]  ;;  %3517 = vrot.lane.b32.xlu1 %v13443_v23, %s4721_s28 }
 0x50e   :  { %v1944_v49 = vadd.f32 %v13675_v52, %v1808_v55  ;;  %v3128_v50 = vsel %vm3121_vm5, %v13659_v46, %v13676_v24  ;;  %v13678_v36 = vld [vmem:[#allocation313_spill] sm:$0xff]  ;;  %v13679_v6 = vld [vmem:[#allocation316_spill] sm:$0xff]  ;;  %v13682_v52 = vld [vmem:[#allocation59_spill] sm:$0xff]  ;;  %v2464_v8 = vmul.f32 %v2443_v19, %v13684_v60 }
 0x50f   :  { %v3011_v0 = vmul.f32 %v2992_v27, %v13678_v36  ;;  %v2882_v40 = vadd.f32 %v13679_v6, %v2746_v2  ;;  %v13680_v9 = vld [vmem:[#allocation36_spill] sm:$0xff]  ;;  %v10472_v62 = vadd.f32 %v3146_v39, %v3026_v33  ;;  %v1945_v38 = vadd.f32 %v13682_v52, %v1809_v16  ;;  %v13683_v46 = vld [vmem:[#allocation41_spill] sm:$0xff]  ;;  %v10488_v33 = vpop.permute.xlu1 %3225  ;;  %v13692_v19 = vld [vmem:[#allocation87_spill] sm:$0xff] }
 0x510   :  { %v2747_v55 = vadd.f32 %v13680_v9, %v2611_v57  ;;  %v2200_v24 = vmul.f32 %v2173_v21, %v13683_v46  ;;  %v13685_v34 = vld [vmem:[#allocation196_spill] sm:$0xff]  ;;  %v13687_v32 = vld [vmem:[#allocation169_spill] sm:$0xff]  ;;  %v13690_v57 = vld [vmem:[#allocation118_spill] sm:$0xff]  ;;  %13691 = vst [vmem:[#allocation339_spill] sm:$0xff] %v10488_v33  ;;  %v2080_v21 = vadd.f32 %v10238_v61, %v1944_v49  ;;  %v10518_v23 = vadd.f32 %v2464_v8, %v10246_v42 }
 0x511   :  { %13681 = vst [vmem:[#allocation99_spill] sm:$0xff] %v10472_v62  ;;  %v1943_v51 = vadd.f32 %v13685_v34, %v1807_v4  ;;  %v3147_v30 = vmul.f32 %v3128_v50, %v13687_v32  ;;  %v13688_v45 = vld [vmem:[#allocation217_spill] sm:$0xff]  ;;  %v13689_v27 = vld [vmem:[#allocation340_spill] sm:$0xff]  ;;  %v3345_v39 = vmul.f32 %v9813_v43, %v13690_v57  ;;  %v3027_v16 = vadd.f32 %v3011_v0, %v10054_v1  ;;  %v13693_v4 = vld [vmem:[#allocation230_spill] sm:$0xff] }
 0x512   :  { %v2725_v2 = vsel %vm2713_vm2, %v13689_v27, %v13688_v45  ;;  %v3402_v34 = vsel %vm3393_vm7, %v13693_v4, %v13692_v19  ;;  %v13694_v32 = vld [vmem:[#allocation303_spill] sm:$0xff]  ;;  %v13696_v1 = vld [vmem:[#allocation45_spill] sm:$0xff]  ;;  %v2081_v60 = vadd.f32 %v10241_v56, %v1945_v38  ;;  %v13700_v4 = vld [vmem:[#allocation168_spill] sm:$0xff]  ;;  %v2216_v38 = vadd.f32 %v2200_v24, %v2080_v21  ;;  %3117 = vrot.lane.b32.xlu1 %v12567_v59, %s4717_s26 }
 0x513   :  { %v2721_v50 = vsel %vm2713_vm2, %v13688_v45, %v13694_v32  ;;  %v13695_v36 = vld [vmem:[#allocation223_spill] sm:$0xff]  ;;  %v2214_v61 = vadd.f32 %v13696_v1, %v2078_v5  ;;  %v13697_v49 = vld [vmem:[#allocation13_spill] sm:$0xff]  ;;  %v10508_v46 = vadd.f32 %v3147_v30, %v3027_v16  ;;  %v2201_v45 = vmul.f32 %v2185_v63, %v13700_v4  ;;  %v13702_v5 = vld [vmem:[#allocation204_spill] sm:$0xff]  ;;  %v3234_v63 = vpop.permute.xlu1 %3233 }
 0x514   :  { %v3398_v6 = vsel %vm3393_vm7, %v13692_v19, %v13695_v36  ;;  %v3018_v0 = vadd.f32 %v13697_v49, %v2882_v40  ;;  %v13698_v9 = vld [vmem:[#allocation123_spill] sm:$0xff]  ;;  %v3346_v19 = vmul.f32 %v9835_v48, %v13690_v57  ;;  %v10515_v36 = vpop.permute.xlu0 %3119  ;;  %v10521_v40 = vmul.f32 %v2725_v2, %v13702_v5  ;;  %v13704_v16 = vld [vmem:[#allocation218_spill] sm:$0xff]  ;;  %v13707_v1 = vld [vmem:[#allocation29_spill] sm:$0xff] }
 0x515   :  { %v2883_v52 = vadd.f32 %v13698_v9, %v2747_v55  ;;  %13699 = vst [vmem:[#allocation23_spill] sm:$0xff] %v10508_v46  ;;  %v13701_v62 = vld [vmem:[#allocation51_spill] sm:$0xff]  ;;  %v3410_v55 = vmul.f32 %v3402_v34, %v3345_v39  ;;  %v3266_v42 = vsel %vm3257_vm6, %v10488_v33, %v3234_v63  ;;  %v2217_v24 = vadd.f32 %v2201_v45, %v2081_v60  ;;  %v13708_v21 = vld [vmem:[#allocation116_spill] sm:$0xff]  ;;  %v13729_v33 = vld [vmem:[#allocation93_spill] sm:$0xff] }
 0x516   :  { %v2079_v10 = vadd.f32 %v13701_v62, %v1943_v51  ;;  %v13703_v30 = vld [vmem:[#allocation319_spill] sm:$0xff]  ;;  %v13705_v51 = vld [vmem:[#allocation102_spill] sm:$0xff]  ;;  %v3411_v4 = vmul.f32 %v3398_v6, %v3346_v19  ;;  %v3154_v39 = vadd.f32 %v10064_v17, %v3018_v0  ;;  %v3274_v34 = vmul.f32 %v3266_v42, %v10156_v41  ;;  %v13711_v41 = vld [vmem:[#allocation244_spill] sm:$0xff]  ;;  %3385 = vrot.lane.b32.xlu1 %v13385_v22, %s4720_s27 }
 0x517   :  { %v2995_v56 = vsel %vm2985_vm4, %v13704_v16, %v13703_v30  ;;  %v10528_v62 = vmul.f32 %v2721_v50, %v13705_v51  ;;  %v13706_v8 = vld [vmem:[#allocation351_spill] sm:$0xff]  ;;  %v3019_v49 = vadd.f32 %v13707_v1, %v2883_v52  ;;  %v13710_v19 = vld [vmem:[#allocation106_spill] sm:$0xff]  ;;  %v10559_v45 = vpop.permute.xlu1 %3241  ;;  %v13718_v1 = vld [vmem:[#allocation72_spill] sm:$0xff] }
 0x518   :  { %v2350_v2 = vadd.f32 %v13706_v8, %v2214_v61  ;;  %v2215_v50 = vadd.f32 %v13708_v21, %v2079_v10  ;;  %v13709_v9 = vld [vmem:[#allocation343_spill] sm:$0xff]  ;;  %v2717_v5 = vsel %vm2713_vm2, %v13694_v32, %v13710_v19  ;;  %v10545_v51 = vpop.permute.xlu0 %3387  ;;  %v2729_v17 = vsel %vm2713_vm2, %v13710_v19, %v13689_v27  ;;  %v13712_v10 = vld [vmem:[#allocation242_spill] sm:$0xff]  ;;  %13714 = vst [vmem:[#allocation121_spill] sm:$0xff] %v10559_v45  ;;  %v13717_v27 = vld [vmem:[#allocation88_spill] sm:$0xff] }
 0x519   :  { %v3006_v6 = vmul.f32 %v2995_v56, %v13709_v9  ;;  %v2991_v61 = vsel %vm2985_vm4, %v13703_v30, %v13711_v41  ;;  %v13713_v0 = vld [vmem:[#allocation299_spill] sm:$0xff]  ;;  %v3290_v60 = vadd.f32 %v3274_v34, %v3154_v39  ;;  %v3262_v39 = vsel %vm3257_vm6, %v3234_v63, %v10559_v45 }
 0x51a   :  { %v2308_v52 = vsel %vm2305_vm15, %v13713_v0, %v13712_v10  ;;  %v13715_v32 = vld [vmem:[#allocation295_spill] sm:$0xff]  ;;  %v3155_v9 = vadd.f32 %v10091_v29, %v3019_v49  ;;  %v3275_v19 = vmul.f32 %v3262_v39, %v10179_v35  ;;  %v13720_v0 = vld [vmem:[#allocation37_spill] sm:$0xff]  ;;  %v10607_v45 = vmul.f32 %v2729_v17, %v13729_v33  ;;  %3253 = vrot.lane.b32.xlu1 %v12567_v59, %s4719_s12 }
 0x51b   :  { %v2320_v56 = vsel %vm2305_vm15, %v13712_v10, %v13715_v32  ;;  %v13716_v42 = vld [vmem:[#allocation19_spill] sm:$0xff]  ;;  %v10581_v10 = vadd.f32 %v3410_v55, %v3290_v60  ;;  %v2351_v32 = vadd.f32 %v13720_v0, %v2215_v50  ;;  %v13725_v49 = vld [vmem:[#allocation269_spill] sm:$0xff]  ;;  %v10601_v0 = vadd.f32 %v3006_v6, %v10320_v26 }
 0x51c   :  { %v2309_v8 = vsel %vm2305_vm15, %v13717_v27, %v13716_v42  ;;  %v2321_v30 = vsel %vm2305_vm15, %v13716_v42, %v13718_v1  ;;  %v13719_v34 = vld [vmem:[#allocation111_spill] sm:$0xff]  ;;  %v13722_v42 = vld [vmem:[#allocation110_spill] sm:$0xff]  ;;  %v3291_v39 = vadd.f32 %v3275_v19, %v3155_v9  ;;  %v10596_v50 = vpop.permute.xlu0 %3255  ;;  %v13732_v19 = vld [vmem:[#allocation261_spill] sm:$0xff] }
 0x51d   :  { %v2486_v21 = vadd.f32 %v13719_v34, %v2350_v2  ;;  %v13721_v27 = vld [vmem:[#allocation71_spill] sm:$0xff]  ;;  %v2444_v63 = vsel %vm2441_vm0, %v13722_v42, %v10306_v58  ;;  %v13724_v34 = vld [vmem:[#allocation104_spill] sm:$0xff]  ;;  %v2336_v35 = vmul.f32 %v2309_v8, %v13725_v49  ;;  %v2487_v6 = vadd.f32 %v10057_v25, %v2351_v32  ;;  %v13734_v17 = vld [vmem:[#allocation341_spill] sm:$0xff] }
 0x51e   :  { %v2332_v57 = vmul.f32 %v2308_v52, %v13721_v27  ;;  %v13723_v1 = vld [vmem:[#allocation315_spill] sm:$0xff]  ;;  %v2333_v29 = vmul.f32 %v2320_v56, %v13724_v34  ;;  %v10598_v52 = vpop.permute.xlu1 %3453  ;;  %v13728_v27 = vld [vmem:[#allocation205_spill] sm:$0xff]  ;;  %v10617_v26 = vadd.f32 %v3411_v4, %v3291_v39  ;;  %3521 = vrot.lane.b32.xlu1 %v13385_v22, %s4721_s28  ;;  %v13741_v39 = vld [vmem:[#allocation150_spill] sm:$0xff]  ;;  %v3222_v22 = vmul.f32 %v9532_v14, %v13734_v17 }
 0x51f   :  { %v2456_v2 = vsel %vm2441_vm0, %v10306_v58, %v13723_v1  ;;  %v13726_v55 = vld [vmem:[#allocation183_spill] sm:$0xff]  ;;  %13727 = vst [vmem:[#allocation305_spill] sm:$0xff] %v10598_v52  ;;  %v10604_v42 = vmul.f32 %v2717_v5, %v13728_v27  ;;  %v13730_v58 = vld [vmem:[#allocation306_spill] sm:$0xff]  ;;  %v2622_v8 = vadd.f32 %v10298_v31, %v2486_v21  ;;  %v2352_v21 = vadd.f32 %v2336_v35, %v2216_v38  ;;  %v13735_v49 = vld [vmem:[#allocation49_spill] sm:$0xff] }
 0x520   :  { %v2337_v60 = vmul.f32 %v2321_v30, %v13726_v55  ;;  %v10610_v56 = vmul.f32 %v2991_v61, %v13730_v58  ;;  %v13731_v30 = vld [vmem:[#allocation12_spill] sm:$0xff]  ;;  %v2469_v1 = vmul.f32 %v2456_v2, %v13732_v19  ;;  %v13733_v5 = vld [vmem:[#allocation238_spill] sm:$0xff]  ;;  %v3221_v61 = vmul.f32 %v9529_v37, %v13734_v17  ;;  %v13737_v32 = vld [vmem:[#allocation153_spill] sm:$0xff] }
 0x521   :  { %v2468_v9 = vmul.f32 %v2444_v63, %v13731_v30  ;;  %v2987_v33 = vsel %vm2985_vm4, %v13711_v41, %v13733_v5  ;;  %v2348_v34 = vadd.f32 %v2332_v57, %v10437_v11  ;;  %v2349_v31 = vadd.f32 %v2333_v29, %v10448_v12  ;;  %v13736_v2 = vld [vmem:[#allocation338_spill] sm:$0xff]  ;;  %v13738_v55 = vld [vmem:[#allocation63_spill] sm:$0xff]  ;;  %v13739_v57 = vld [vmem:[#allocation69_spill] sm:$0xff] }
 0x522   :  { %v2353_v63 = vadd.f32 %v2337_v60, %v2217_v24  ;;  %v2579_v4 = vsel %vm2577_vm1, %v13736_v2, %v13735_v49  ;;  %v2574_v25 = vpop.permute.xlu1 %2573  ;;  %v2861_v41 = vsel %vm2849_vm3, %v13738_v55, %v13737_v32  ;;  %v2857_v11 = vsel %vm2849_vm3, %v13737_v32, %v10095_v44  ;;  %v13740_v38 = vld [vmem:[#allocation54_spill] sm:$0xff]  ;;  %v10648_v60 = vpop.permute.xlu0 %3523  ;;  %v13743_v32 = vld [vmem:[#allocation323_spill] sm:$0xff]  ;;  %3389 = vrot.lane.b32.xlu1 %v12567_v59, %s4720_s27 }
 0x523   :  { %v2580_v12 = vsel %vm2577_vm1, %v13739_v57, %v2574_v25  ;;  %v2592_v24 = vsel %vm2577_vm1, %v2574_v25, %v13740_v38  ;;  %v2484_v29 = vadd.f32 %v2468_v9, %v2348_v34  ;;  %v2485_v35 = vadd.f32 %v2469_v1, %v2349_v31  ;;  %v13742_v58 = vld [vmem:[#allocation170_spill] sm:$0xff]  ;;  %v13744_v46 = vld [vmem:[#allocation347_spill] sm:$0xff]  ;;  %v13746_v38 = vld [vmem:[#allocation120_spill] sm:$0xff] }
 0x524   :  { %v2604_v27 = vmul.f32 %v2580_v12, %v13741_v39  ;;  %v2605_v30 = vmul.f32 %v2592_v24, %v13742_v58  ;;  %v2758_v19 = vadd.f32 %v10521_v40, %v2622_v8  ;;  %v2623_v2 = vadd.f32 %v10309_v28, %v2487_v6  ;;  %v13745_v9 = vld [vmem:[#allocation130_spill] sm:$0xff]  ;;  %v13747_v40 = vld [vmem:[#allocation267_spill] sm:$0xff]  ;;  %v13754_v58 = vld [vmem:[#allocation44_spill] sm:$0xff] }
 0x525   :  { %v10655_v57 = vmul.f32 %v2987_v33, %v13743_v32  ;;  %v2600_v25 = vmul.f32 %v2579_v4, %v13744_v46  ;;  %v2878_v1 = vmul.f32 %v2861_v41, %v13745_v9  ;;  %v2879_v24 = vmul.f32 %v2857_v11, %v13746_v38  ;;  %v13748_v6 = vld [vmem:[#allocation3_spill] sm:$0xff]  ;;  %v13749_v33 = vld [vmem:[#allocation225_spill] sm:$0xff]  ;;  %v13750_v41 = vld [vmem:[#allocation358_spill] sm:$0xff] }
 0x526   :  { %v10661_v34 = vadd.f32 %v2604_v27, %v2484_v29  ;;  %v10663_v31 = vadd.f32 %v2605_v30, %v2485_v35  ;;  %v2576_v12 = vpop.permute.xlu1 %2575  ;;  %v2488_v8 = vadd.f32 %v13747_v40, %v2352_v21  ;;  %v3131_v4 = vsel %vm3121_vm5, %v13749_v33, %v13748_v6  ;;  %v13751_v29 = vld [vmem:[#allocation298_spill] sm:$0xff]  ;;  %v13752_v35 = vld [vmem:[#allocation148_spill] sm:$0xff]  ;;  %v13755_v32 = vld [vmem:[#allocation43_spill] sm:$0xff]  ;;  %3525 = vrot.lane.b32.xlu1 %v12567_v59, %s4721_s28  ;;  %s4724_s28 = smov 125  }
 0x527   :  { %v2581_v28 = vsel %vm2577_vm1, %v13590_v20, %v2576_v12  ;;  %v2593_v46 = vsel %vm2577_vm1, %v2576_v12, %v13589_v47  ;;  %v2489_v11 = vadd.f32 %v13750_v41, %v2353_v63  ;;  %v2759_v20 = vadd.f32 %v10528_v62, %v2623_v2  ;;  %v13753_v27 = vld [vmem:[#allocation98_spill] sm:$0xff]  ;;  %v3392_v2 = vpop.permute.xlu0 %3391  ;;  %v13758_v41 = vld [vmem:[#allocation235_spill] sm:$0xff]  ;;  %v13764_v59 = vld [vmem:[#allocation249_spill] sm:$0xff] }
 0x528   :  { %v2608_v21 = vmul.f32 %v2581_v28, %v13751_v29  ;;  %v2609_v39 = vmul.f32 %v2593_v46, %v13752_v35  ;;  %v3269_v47 = vsel %vm3257_vm6, %v13754_v58, %v13753_v27  ;;  %v2616_v30 = vadd.f32 %v2600_v25, %v10518_v23  ;;  %v13756_v12 = vld [vmem:[#allocation226_spill] sm:$0xff] }
 0x529   :  { %v2865_v9 = vsel %vm2849_vm3, %v13755_v32, %v13738_v55  ;;  %v3265_v63 = vsel %vm3257_vm6, %v13753_v27, %v13756_v12  ;;  %v2894_v62 = vadd.f32 %v2878_v1, %v2758_v19  ;;  %v2853_v23 = vsel %vm2849_vm3, %v10095_v44, %v13755_v32  ;;  %v13757_v55 = vld [vmem:[#allocation240_spill] sm:$0xff] }
 0x52a   :  { %v2624_v38 = vadd.f32 %v2608_v21, %v2488_v8  ;;  %v2625_v40 = vadd.f32 %v2609_v39, %v2489_v11  ;;  %v10697_v28 = vpop.permute.xlu1 %2843  ;;  %v2895_v25 = vadd.f32 %v2879_v24, %v2759_v20  ;;  %v3142_v46 = vmul.f32 %v3131_v4, %v13757_v55  ;;  %v13759_v19 = vld [vmem:[#allocation156_spill] sm:$0xff]  ;;  %v13760_v8 = vld [vmem:[#allocation206_spill] sm:$0xff]  ;;  %v13761_v4 = vld [vmem:[#allocation325_spill] sm:$0xff] }
 0x52b   :  { %v3001_v29 = vsel %vm2985_vm4, %v10331_v53, %v13758_v41  ;;  %v2881_v1 = vmul.f32 %v2865_v9, %v13759_v19  ;;  %v3223_v11 = vmul.f32 %v13760_v8, %v13734_v17  ;;  %v3286_v24 = vmul.f32 %v3269_v47, %v3221_v61  ;;  %v13762_v20 = vld [vmem:[#allocation113_spill] sm:$0xff]  ;;  %v13763_v32 = vld [vmem:[#allocation100_spill] sm:$0xff]  ;;  %v13765_v61 = vld [vmem:[#allocation22_spill] sm:$0xff] }
 0x52c   :  { %v2760_v21 = vadd.f32 %v10604_v42, %v2624_v38  ;;  %v2761_v44 = vadd.f32 %v10607_v45, %v2625_v40  ;;  %v10715_v35 = vmul.f32 %v3265_v63, %v3222_v22  ;;  %v3224_v39 = vmul.f32 %v13761_v4, %v13734_v17  ;;  %v13766_v47 = vld [vmem:[#allocation142_spill] sm:$0xff]  ;;  %v13769_v40 = vld [vmem:[#allocation9_spill] sm:$0xff] }
 0x52d   :  { %v2752_v27 = vadd.f32 %v13762_v20, %v2616_v30  ;;  %v2880_v55 = vmul.f32 %v2853_v23, %v13763_v32  ;;  %v3017_v41 = vmul.f32 %v3001_v29, %v13764_v59  ;;  %v3030_v8 = vadd.f32 %v10288_v13, %v2894_v62  ;;  %v13767_v30 = vld [vmem:[#allocation266_spill] sm:$0xff]  ;;  %v3528_v13 = vpop.permute.xlu0 %3527  ;;  %v13770_v23 = vld [vmem:[#allocation20_spill] sm:$0xff] }
 0x52e   :  { %v3096_v9 = vpop.permute.xlu1 %3095  ;;  %v2897_v19 = vadd.f32 %v2881_v1, %v2761_v44  ;;  %v10724_v42 = vadd.f32 %v3142_v46, %v10601_v0  ;;  %v3273_v45 = vsel %vm3257_vm6, %v10596_v50, %v13754_v58  ;;  %v3031_v22 = vadd.f32 %v13765_v61, %v2895_v25  ;;  %v13768_v0 = vld [vmem:[#allocation272_spill] sm:$0xff]  ;;  %v13774_v61 = vld [vmem:[#allocation359_spill] sm:$0xff] }
 0x52f   :  { %v3137_v17 = vsel %vm3121_vm5, %v10515_v36, %v3096_v9  ;;  %v3405_v63 = vsel %vm3393_vm7, %v13767_v30, %v13766_v47  ;;  %v2851_v62 = vsel %vm2849_vm3, %v13768_v0, %v10697_v28  ;;  %v3123_v46 = vsel %vm3121_vm5, %v13770_v23, %v13769_v40  ;;  %v13771_v29 = vld [vmem:[#allocation360_spill] sm:$0xff] }
 0x530   :  { %v3033_v38 = vadd.f32 %v3017_v41, %v2897_v19  ;;  %v3153_v58 = vmul.f32 %v3137_v17, %v10403_v7  ;;  %v3127_v25 = vsel %vm3121_vm5, %v13748_v6, %v13770_v23  ;;  %v3357_v1 = vmul.f32 %v9813_v43, %v13771_v29  ;;  %v13772_v20 = vld [vmem:[#allocation248_spill] sm:$0xff] }
 0x531   :  { %v3409_v44 = vsel %vm3393_vm7, %v3392_v2, %v13767_v30  ;;  %v2989_v7 = vsel %vm2985_vm4, %v13772_v20, %v10331_v53  ;;  %v3289_v32 = vmul.f32 %v3273_v45, %v3224_v39  ;;  %v13773_v59 = vld [vmem:[#allocation192_spill] sm:$0xff]  ;;  %v3545_v6 = vsel %vm3529_vm8, %v3528_v13, %v10399_v15 }
 0x532   :  { %v3360_v41 = vmul.f32 %v13773_v59, %v13771_v29  ;;  %v3169_v19 = vadd.f32 %v3153_v58, %v3033_v38  ;;  %v3104_v17 = vpop.permute.xlu1 %3103  ;;  %v2872_v0 = vmul.f32 %v2851_v62, %v13774_v61  ;;  %v2896_v23 = vadd.f32 %v2880_v55, %v2760_v21  ;;  %v13775_v38 = vld [vmem:[#allocation86_spill] sm:$0xff]  ;;  %v13776_v55 = vld [vmem:[#allocation243_spill] sm:$0xff]  ;;  %v13777_v62 = vld [vmem:[#allocation40_spill] sm:$0xff] }
 0x533   :  { %v3133_v30 = vsel %vm3121_vm5, %v3096_v9, %v3104_v17  ;;  %v3358_v52 = vmul.f32 %v9835_v48, %v13771_v29  ;;  %v3422_v20 = vmul.f32 %v3405_v63, %v3357_v1  ;;  %v3016_v58 = vmul.f32 %v2989_v7, %v13775_v38  ;;  %v13779_v61 = vld [vmem:[#allocation185_spill] sm:$0xff] }
 0x534   :  { %v3425_v53 = vmul.f32 %v3409_v44, %v3360_v41  ;;  %v3305_v39 = vadd.f32 %v3289_v32, %v3169_v19  ;;  %v3150_v45 = vmul.f32 %v3133_v30, %v10408_v18  ;;  %v3541_v14 = vsel %vm3529_vm8, %v10399_v15, %v10445_v54 }
 0x535   :  { %v3261_v21 = vsel %vm3257_vm6, %v13756_v12, %v10596_v50  ;;  %v3397_v9 = vsel %vm3393_vm7, %v13776_v55, %v3392_v2  ;;  %v3561_v44 = vmul.f32 %v3545_v6, %v13777_v62  ;;  %v2888_v7 = vadd.f32 %v2872_v0, %v2752_v27  ;;  %v13778_v50 = vld [vmem:[#allocation132_spill] sm:$0xff]  ;;  %v13780_v6 = vld [vmem:[#allocation139_spill] sm:$0xff]  ;;  %v13781_v27 = vld [vmem:[#allocation141_spill] sm:$0xff] }
 0x536   :  { %v3441_v18 = vadd.f32 %v3425_v53, %v3305_v39  ;;  %v3166_v63 = vadd.f32 %v3150_v45, %v3030_v8  ;;  %v3112_v1 = vpop.permute.xlu1 %3111  ;;  %v3032_v32 = vadd.f32 %v3016_v58, %v2896_v23  ;;  %v3143_v53 = vmul.f32 %v3127_v25, %v13780_v6  ;;  %v13783_v62 = vld [vmem:[#allocation50_spill] sm:$0xff] }
 0x537   :  { %v3125_v15 = vsel %vm3121_vm5, %v3112_v1, %v10515_v36  ;;  %v3129_v41 = vsel %vm3121_vm5, %v3104_v17, %v3112_v1  ;;  %v3401_v8 = vsel %vm3393_vm7, %v13766_v47, %v13776_v55  ;;  %v3558_v0 = vmul.f32 %v3541_v14, %v13781_v27  ;;  %v13782_v36 = vld [vmem:[#allocation265_spill] sm:$0xff]  ;;  %v13786_v55 = vld [vmem:[#allocation290_spill] sm:$0xff] }
 0x538   :  { %v3302_v19 = vadd.f32 %v3286_v24, %v3166_v63  ;;  %v3151_v12 = vmul.f32 %v3129_v41, %v13778_v50  ;;  %v3152_v30 = vmul.f32 %v3125_v15, %v13779_v61  ;;  %v10791_v2 = vadd.f32 %v3561_v44, %v3441_v18  ;;  %v13788_v18 = vld [vmem:[#allocation58_spill] sm:$0xff]  ;;  %v13789_v63 = vld [vmem:[#allocation97_spill] sm:$0xff]  ;;  %v13793_v61 = vld [vmem:[#allocation27_spill] sm:$0xff] }
 0x539   :  { %v3359_v23 = vmul.f32 %v13782_v36, %v13771_v29  ;;  %v3288_v17 = vmul.f32 %v3261_v21, %v3223_v11  ;;  %v3423_v58 = vmul.f32 %v3401_v8, %v3358_v52  ;;  %v3537_v25 = vsel %vm3529_vm8, %v10445_v54, %v13783_v62  ;;  %v13785_v21 = vld [vmem:[#allocation165_spill] sm:$0xff]  ;;  %v13794_v8 = vld [vmem:[#allocation350_spill] sm:$0xff] }
 0x53a   :  { %v3438_v24 = vadd.f32 %v3422_v20, %v3302_v19  ;;  %v3167_v39 = vadd.f32 %v3151_v12, %v3031_v22  ;;  %v3168_v45 = vadd.f32 %v3152_v30, %v3032_v32  ;;  %v10801_v38 = vpop.permute.xlu1 %3363  ;;  %v3533_v14 = vsel %vm3529_vm8, %v13783_v62, %v3528_v13  ;;  %v13784_v20 = vld [vmem:[#allocation159_spill] sm:$0xff]  ;;  %v13792_v32 = vld [vmem:[#allocation57_spill] sm:$0xff] }
 0x53b   :  { %v3424_v44 = vmul.f32 %v3397_v9, %v3359_v23  ;;  %v3024_v47 = vadd.f32 %v10655_v57, %v2888_v7  ;;  %v3263_v52 = vsel %vm3257_vm6, %v13785_v21, %v13784_v20  ;;  %v3023_v54 = vadd.f32 %v10610_v56, %v13786_v55  ;;  %v13787_v9 = vld [vmem:[#allocation262_spill] sm:$0xff]  ;;  %v13790_v57 = vld [vmem:[#allocation221_spill] sm:$0xff] }
 0x53c   :  { %v3303_v11 = vadd.f32 %v10715_v35, %v3167_v39  ;;  %v3304_v29 = vadd.f32 %v3288_v17, %v3168_v45  ;;  %v10812_v22 = vadd.f32 %v3558_v0, %v3438_v24  ;;  %v3539_v13 = vsel %vm3529_vm8, %v13788_v18, %v13787_v9  ;;  %v13791_v35 = vld [vmem:[#allocation11_spill] sm:$0xff]  ;;  %v13796_v24 = vld [vmem:[#allocation64_spill] sm:$0xff]  ;;  %v13798_v45 = vld [vmem:[#allocation145_spill] sm:$0xff] }
 0x53d   :  { %v3495_v1 = vmul.f32 %v13790_v57, %v13789_v63  ;;  %v3144_v7 = vmul.f32 %v3123_v46, %v13791_v35  ;;  %v3559_v15 = vmul.f32 %v3537_v25, %v13792_v32  ;;  %v3159_v12 = vadd.f32 %v3143_v53, %v3023_v54  ;;  %v13795_v46 = vld [vmem:[#allocation330_spill] sm:$0xff]  ;;  %v13797_v39 = vld [vmem:[#allocation160_spill] sm:$0xff] }
 0x53e   :  { %v3439_v41 = vadd.f32 %v3423_v58, %v3303_v11  ;;  %v3440_v19 = vadd.f32 %v3424_v44, %v3304_v29  ;;  %v3372_v50 = vpop.permute.xlu1 %3371  ;;  %v3259_v56 = vsel %vm3257_vm6, %v13784_v20, %v13793_v61  ;;  %v3294_v27 = vadd.f32 %v13794_v8, %v10724_v42  ;;  %v13799_v44 = vld [vmem:[#allocation39_spill] sm:$0xff]  ;;  %v13800_v11 = vld [vmem:[#allocation38_spill] sm:$0xff]  ;;  %v13809_v8 = vld [vmem:[#allocation344_spill] sm:$0xff] }
 0x53f   :  { %v3560_v30 = vmul.f32 %v3533_v14, %v3495_v1  ;;  %v3403_v6 = vsel %vm3393_vm7, %v10801_v38, %v3372_v50  ;;  %v3160_v23 = vadd.f32 %v3144_v7, %v3024_v47  ;;  %v3279_v53 = vmul.f32 %v3263_v52, %v13796_v24  ;;  %v13801_v47 = vld [vmem:[#allocation222_spill] sm:$0xff] }
 0x540   :  { %v3414_v0 = vmul.f32 %v3403_v6, %v13795_v46  ;;  %v10838_v17 = vadd.f32 %v3559_v15, %v3439_v41  ;;  %v3486_v58 = vmul.f32 %v13798_v45, %v13797_v39  ;;  %v3487_v62 = vmul.f32 %v13790_v57, %v13797_v39  ;;  %v13803_v7 = vld [vmem:[#allocation362_spill] sm:$0xff]  ;;  %v13804_v15 = vld [vmem:[#allocation328_spill] sm:$0xff] }
 0x541   :  { %v10845_v25 = vadd.f32 %v3560_v30, %v3440_v19  ;;  %v3550_v14 = vmul.f32 %v3539_v13, %v13799_v44  ;;  %v3535_v42 = vsel %vm3529_vm8, %v13787_v9, %v13800_v11  ;;  %v3280_v29 = vmul.f32 %v3259_v56, %v13801_v47  ;;  %v13802_v9 = vld [vmem:[#allocation82_spill] sm:$0xff]  ;;  %v13805_v41 = vld [vmem:[#allocation176_spill] sm:$0xff]  ;;  %v13806_v56 = vld [vmem:[#allocation127_spill] sm:$0xff] }
 0x542   :  { %v3430_v20 = vadd.f32 %v3414_v0, %v3294_v27  ;;  %v3380_v21 = vpop.permute.xlu1 %3379  ;;  %v3531_v52 = vsel %vm3529_vm8, %v13800_v11, %v10648_v60  ;;  %v3295_v55 = vadd.f32 %v3279_v53, %v3159_v12  ;;  %v1529_v19 = vadd.f32 %v13805_v41, %v13804_v15  ;;  %v13807_v30 = vld [vmem:[#allocation158_spill] sm:$0xff]  ;;  %v13810_v53 = vld [vmem:[#allocation212_spill] sm:$0xff]  ;;  %v13812_v11 = vld [vmem:[#allocation311_spill] sm:$0xff] }
 0x543   :  { %v3395_v54 = vsel %vm3393_vm7, %v3380_v21, %v10545_v51  ;;  %v3399_v13 = vsel %vm3393_vm7, %v3372_v50, %v3380_v21  ;;  %v3296_v1 = vadd.f32 %v3280_v29, %v3160_v23  ;;  %v1785_v6 = vmul.f32 %v13807_v30, %v13806_v56  ;;  %v13808_v12 = vld [vmem:[#allocation246_spill] sm:$0xff]  ;;  %v13813_v29 = vld [vmem:[#allocation264_spill] sm:$0xff]  ;;  %v13821_v30 = vld [vmem:[#allocation289_spill] sm:$0xff] }
 0x544   :  { %v3566_v63 = vadd.f32 %v3550_v14, %v3430_v20  ;;  %v3415_v35 = vmul.f32 %v3399_v13, %v13802_v9  ;;  %v3416_v32 = vmul.f32 %v3395_v54, %v13803_v7  ;;  %v1899_v27 = vsel %vm1897_vm12, %v13809_v8, %v13808_v12  ;;  %v13811_v14 = vld [vmem:[#allocation166_spill] sm:$0xff]  ;;  %v13814_v20 = vld [vmem:[#allocation65_spill] sm:$0xff]  ;;  %v13818_v9 = vld [vmem:[#allocation24_spill] sm:$0xff] }
 0x545   :  { %v3551_v46 = vmul.f32 %v3535_v42, %v3486_v58  ;;  %v3552_v0 = vmul.f32 %v3531_v52, %v3487_v62  ;;  %v1665_v44 = vadd.f32 %v13810_v53, %v1529_v19  ;;  %v1856_v47 = vmul.f32 %v13812_v11, %v13811_v14  ;;  %v13815_v42 = vld [vmem:[#allocation181_spill] sm:$0xff]  ;;  %v13816_v52 = vld [vmem:[#allocation14_spill] sm:$0xff]  ;;  %v13819_v7 = vld [vmem:[#allocation216_spill] sm:$0xff] }
 0x546   :  { %v3431_v50 = vadd.f32 %v3415_v35, %v3295_v55  ;;  %v3432_v24 = vadd.f32 %v3416_v32, %v3296_v1  ;;  %v10872_v23 = vpop.permute.xlu1 %3583  ;;  %v2047_v21 = vsel %vm2033_vm13, %v13814_v20, %v13813_v29  ;;  %v1992_v55 = vmul.f32 %v13816_v52, %v13815_v42  ;;  %v13817_v1 = vld [vmem:[#allocation199_spill] sm:$0xff]  ;;  %v13820_v32 = vld [vmem:[#allocation34_spill] sm:$0xff]  ;;  %v13822_v12 = vld [vmem:[#allocation232_spill] sm:$0xff] }
 0x547   :  { %v10884_v58 = vadd.f32 %v10872_v23, %v3566_v63  ;;  %v1921_v62 = vmul.f32 %v1899_v27, %v1856_v47  ;;  %v2128_v35 = vmul.f32 %v13818_v9, %v13817_v1  ;;  %v2264_v15 = vmul.f32 %v13820_v32, %v13819_v7  ;;  %v13823_v63 = vld [vmem:[#allocation146_spill] sm:$0xff]  ;;  %v13826_v53 = vld [vmem:[#allocation327_spill] sm:$0xff]  ;;  %v13829_v42 = vld [vmem:[#allocation236_spill] sm:$0xff] }
 0x548   :  { %v3567_v54 = vadd.f32 %v3551_v46, %v3431_v50  ;;  %v10881_v13 = vadd.f32 %v3552_v0, %v3432_v24  ;;  %v1801_v41 = vadd.f32 %v1785_v6, %v1665_v44  ;;  %v2675_v8 = vmul.f32 %v13822_v12, %v13821_v30  ;;  %v13824_v0 = vld [vmem:[#allocation286_spill] sm:$0xff]  ;;  %v13825_v50 = vld [vmem:[#allocation345_spill] sm:$0xff]  ;;  %v13827_v44 = vld [vmem:[#allocation79_spill] sm:$0xff] }
 0x549   :  { %v2676_v27 = vmul.f32 %v13823_v63, %v13821_v30  ;;  %v2057_v46 = vmul.f32 %v2047_v21, %v1992_v55  ;;  %v2183_v24 = vsel %vm2169_vm14, %v13825_v50, %v13824_v0  ;;  %v12020_v29 = vmax.f32 %v10884_v58, 0.0  ;;  %v13830_v55 = vld [vmem:[#allocation56_spill] sm:$0xff]  ;;  %v13832_v7 = vld [vmem:[#allocation186_spill] sm:$0xff] }
 0x54a   :  { %v10893_v19 = vadd.f32 %v10872_v23, %v3567_v54  ;;  %v2710_v56 = vpop.permute.xlu1 %2709  ;;  %v1937_v21 = vadd.f32 %v1921_v62, %v1801_v41  ;;  %v13828_v54 = vld [vmem:[#allocation308_spill] sm:$0xff]  ;;  %v2940_v32 = vmul.f32 %v13832_v7, %v13830_v55  ;;  %v2193_v30 = vmul.f32 %v2183_v24, %v2128_v35  ;;  %v13833_v41 = vld [vmem:[#allocation237_spill] sm:$0xff]  ;;  %v13835_v50 = vld [vmem:[#allocation46_spill] sm:$0xff] }
 0x54b   :  { %v2716_v6 = vsel %vm2713_vm2, %v13826_v53, %v2710_v56  ;;  %v2728_v14 = vsel %vm2713_vm2, %v2710_v56, %v13827_v44  ;;  %v2319_v52 = vsel %vm2305_vm15, %v13829_v42, %v13828_v54  ;;  %v13831_v1 = vld [vmem:[#allocation288_spill] sm:$0xff]  ;;  %v13837_v24 = vld [vmem:[#allocation331_spill] sm:$0xff]  ;;  %v13840_v42 = vld [vmem:[#allocation149_spill] sm:$0xff] }
 0x54c   :  { %v2740_v11 = vmul.f32 %v2716_v6, %v2675_v8  ;;  %v2741_v47 = vmul.f32 %v2728_v14, %v2676_v27  ;;  %v12019_v20 = vmax.f32 %v10893_v19, 0.0  ;;  %v2939_v9 = vmul.f32 %v13831_v1, %v13830_v55  ;;  %v13834_v27 = vld [vmem:[#allocation203_spill] sm:$0xff]  ;;  %v13836_v53 = vld [vmem:[#allocation52_spill] sm:$0xff] }
 0x54d   :  { %v2400_v0 = vmul.f32 %v13834_v27, %v13833_v41  ;;  %v2455_v35 = vsel %vm2441_vm0, %v13836_v53, %v13835_v50  ;;  %v2073_v44 = vadd.f32 %v2057_v46, %v1937_v21  ;;  %v2329_v14 = vmul.f32 %v2319_v52, %v2264_v15  ;;  %v13839_v54 = vld [vmem:[#allocation255_spill] sm:$0xff]  ;;  %v13841_v41 = vld [vmem:[#allocation326_spill] sm:$0xff] }
 0x54e   :  { %v10920_v56 = vadd.f32 %v2740_v11, %v10661_v34  ;;  %v10923_v12 = vadd.f32 %v2741_v47, %v10663_v31  ;;  %v2978_v8 = vpop.permute.xlu1 %2977  ;;  %v3629_v62 = vadd.f32 %v12019_v20, %v12020_v29  ;;  %v13838_v31 = vld [vmem:[#allocation114_spill] sm:$0xff]  ;;  %v2536_v55 = vmul.f32 %v13840_v42, %v13839_v54 }
 0x54f   :  { %v2986_v34 = vsel %vm2985_vm4, %v13837_v24, %v2978_v8  ;;  %v2998_v6 = vsel %vm2985_vm4, %v2978_v8, %v13838_v31  ;;  %v2591_v27 = vsel %vm2577_vm1, %v13735_v49, %v13841_v41  ;;  %v2209_v50 = vadd.f32 %v2193_v30, %v2073_v44  ;;  %v13842_v24 = vld [vmem:[#allocation128_spill] sm:$0xff]  ;;  %v13843_v29 = vld [vmem:[#allocation282_spill] sm:$0xff]  ;;  %v13846_v30 = vld [vmem:[#allocation201_spill] sm:$0xff] }
 0x550   :  { %v3004_v11 = vmul.f32 %v2986_v34, %v2939_v9  ;;  %v3005_v47 = vmul.f32 %v2998_v6, %v2940_v32  ;;  %3630 = vadd.xlane.f32.xlu0 %v3629_v62  ;;  %v2465_v53 = vmul.f32 %v2455_v35, %v2400_v0  ;;  %v2601_v21 = vmul.f32 %v2591_v27, %v2536_v55  ;;  %v13844_v32 = vld [vmem:[#allocation152_spill] sm:$0xff]  ;;  %v13845_v62 = vld [vmem:[#allocation233_spill] sm:$0xff]  ;;  %v13848_v31 = vld [vmem:[#allocation291_spill] sm:$0xff] }
 0x551   :  { %v2345_v46 = vadd.f32 %v2329_v14, %v2209_v50  ;;  %v2727_v49 = vsel %vm2713_vm2, %v13845_v62, %v13844_v32  ;;  %v2863_v0 = vsel %vm2849_vm3, %v10697_v28, %v13846_v30  ;;  %v13847_v35 = vld [vmem:[#allocation273_spill] sm:$0xff]  ;;  %v2999_v42 = vsel %vm2985_vm4, %v13733_v5, %v13704_v16  ;;  %v13854_v32 = vld [vmem:[#allocation260_spill] sm:$0xff] }
 0x552   :  { %v10948_v20 = vadd.f32 %v3004_v11, %v13842_v24  ;;  %v10951_v8 = vadd.f32 %v3005_v47, %v13843_v29  ;;  %v10953_v15 = vpop.permute.xlu1 %3229  ;;  %v2672_v29 = vmul.f32 %v13823_v63, %v13847_v35  ;;  %v13849_v6 = vld [vmem:[#allocation89_spill] sm:$0xff]  ;;  %v3135_v50 = vsel %vm3121_vm5, %v13769_v40, %v13749_v33  ;;  %v13852_v24 = vld [vmem:[#allocation300_spill] sm:$0xff] }
 0x553   :  { %v2481_v52 = vadd.f32 %v2465_v53, %v2345_v46  ;;  %v2808_v44 = vmul.f32 %v13849_v6, %v13848_v31  ;;  %v13850_v55 = vld [vmem:[#allocation309_spill] sm:$0xff]  ;;  %v13851_v53 = vld [vmem:[#allocation356_spill] sm:$0xff]  ;;  %v3407_v40 = vsel %vm3393_vm7, %v10545_v51, %v10801_v38  ;;  %v13857_v31 = vld [vmem:[#allocation119_spill] sm:$0xff] }
 0x554   :  { %v2737_v14 = vmul.f32 %v2727_v49, %v2672_v29  ;;  %v2944_v28 = vmul.f32 %v13832_v7, %v13850_v55  ;;  %v3080_v46 = vmul.f32 %v13852_v24, %v13851_v53  ;;  %v13856_v29 = vld [vmem:[#allocation256_spill] sm:$0xff] }
 0x555   :  { %v2617_v34 = vadd.f32 %v2601_v21, %v2481_v52  ;;  %v2873_v11 = vmul.f32 %v2863_v0, %v2808_v44  ;;  %v13853_v52 = vld [vmem:[#allocation16_spill] sm:$0xff]  ;;  %v13855_v0 = vld [vmem:[#allocation62_spill] sm:$0xff]  ;;  %v3271_v33 = vsel %vm3257_vm6, %v13793_v61, %v13856_v29  ;;  %v3352_v44 = vmul.f32 %v13773_v59, %v13857_v31 }
 0x556   :  { %v10955_v9 = vpop.permute.xlu1 %3237  ;;  %v3009_v63 = vmul.f32 %v2999_v42, %v2944_v28  ;;  %v3481_v62 = vmul.f32 %v13854_v32, %v13853_v52  ;;  %v3145_v49 = vmul.f32 %v3135_v50, %v3080_v46  ;;  %v3216_v35 = vmul.f32 %v13761_v4, %v13855_v0  ;;  %v13859_v53 = vld [vmem:[#allocation8_spill] sm:$0xff] }
 0x557   :  { %v2753_v54 = vadd.f32 %v2737_v14, %v2617_v34  ;;  %v3417_v55 = vmul.f32 %v3407_v40, %v3352_v44  ;;  %v3488_v46 = vmul.f32 %v13859_v53, %v13797_v39  ;;  %v11039_v39 = vadd.f32 %v10872_v23, %v10881_v13 }
 0x558   :  { %v3281_v42 = vmul.f32 %v3271_v33, %v3216_v35 }
 0x559   :  { %v2889_v41 = vadd.f32 %v2873_v11, %v2753_v54  ;;  %v3482_v11 = vmul.f32 %v13798_v45, %v13853_v52  ;;  %v12026_v40 = vmax.f32 %v11039_v39, 0.0 }
 0x55a   :  { %v10969_v47 = vpop.permute.xlu1 %3245 }
 0x55b   :  { %v3025_v21 = vadd.f32 %v3009_v63, %v2889_v41  ;;  %v13858_v63 = vld [vmem:[#allocation247_spill] sm:$0xff] }
 0x55d   :  { %v3161_v34 = vadd.f32 %v3145_v49, %v3025_v21 }
 0x55e   :  { %v10977_v27 = vpop.permute.xlu1 %3497 }
 0x55f   :  { %v3297_v41 = vadd.f32 %v3281_v42, %v3161_v34 }
 0x561   :  { %v3433_v21 = vadd.f32 %v3417_v55, %v3297_v41 }
 0x562   :  { %v3506_v16 = vpop.permute.xlu1 %3505 }
 0x563   :  { %v3538_v5 = vsel %vm3529_vm8, %v10977_v27, %v3506_v16 }
 0x564   :  { %v3546_v30 = vmul.f32 %v3538_v5, %v3481_v62 }
 0x566   :  { %v3562_v14 = vadd.f32 %v3546_v30, %v10581_v10  ;;  %v11005_v54 = vpop.permute.xlu1 %3513  ;;  %v3543_v10 = vsel %vm3529_vm8, %v10648_v60, %v13788_v18 }
 0x567   :  { %v3534_v61 = vsel %vm3529_vm8, %v3506_v16, %v11005_v54  ;;  %v13860_v16 = vld [vmem:[#allocation245_spill] sm:$0xff]  ;;  %v3553_v5 = vmul.f32 %v3543_v10, %v3488_v46 }
 0x568   :  { %v3547_v28 = vmul.f32 %v3534_v61, %v3482_v11  ;;  %v11014_v50 = vadd.f32 %v13858_v63, %v3562_v14  ;;  %v11035_v60 = vadd.f32 %v13860_v16, %v10812_v22  ;;  %v11059_v34 = vadd.f32 %v13860_v16, %v10845_v25  ;;  %v13865_v10 = vld [vmem:[#allocation25_spill] sm:$0xff] }
 0x569   :  { %v3569_v18 = vadd.f32 %v3553_v5, %v3433_v21  ;;  %v11064_v44 = vadd.f32 %v13860_v16, %v10791_v2  ;;  %v3217_v46 = vmul.f32 %v9529_v37, %v13865_v10  ;;  %v13866_v5 = vld [vmem:[#allocation138_spill] sm:$0xff] }
 0x56a   :  { %v3563_v51 = vadd.f32 %v3547_v28, %v10617_v26  ;;  %v11011_v38 = vpop.permute.xlu1 %2845  ;;  %v11027_v26 = vadd.f32 %v13860_v16, %v10838_v17  ;;  %v12028_v30 = vmax.f32 %v11014_v50, 0.0  ;;  %13862 = vst [vmem:[#allocation66_spill] sm:$0xff] %v11035_v60  ;;  %v12024_v22 = vmax.f32 %v11035_v60, 0.0  ;;  %13863 = vst [vmem:[#allocation53_spill] sm:$0xff] %v11059_v34  ;;  %v13887_v60 = vld [vmem:[#allocation230_spill] sm:$0xff] }
 0x56b   :  { %v11047_v29 = vadd.f32 %v10872_v23, %v3569_v18  ;;  %13864 = vst [vmem:[#allocation151_spill] sm:$0xff] %v11064_v44  ;;  %v12022_v11 = vmax.f32 %v11059_v34, 0.0  ;;  %v12021_v25 = vmax.f32 %v11064_v44, 0.0  ;;  %v12029_v28 = vmov 0.0|0.0   ;;  %v13884_v44 = vld [vmem:[#allocation339_spill] sm:$0xff] }
 0x56c   :  { %v11023_v62 = vadd.f32 %v13858_v63, %v3563_v51  ;;  %13861 = vst [vmem:[#allocation198_spill] sm:$0xff] %v11027_v26  ;;  %v12023_v35 = vmax.f32 %v11027_v26, 0.0  ;;  %4444 = vmatprep.subr.bf16.mxu0 %v12029_v28  ;;  %v3268_v51 = vsel %vm3257_vm6, %v10953_v15, %v10955_v9  ;;  %v3353_v18 = vmul.f32 %v9813_v43, %v13866_v5  ;;  %v13885_v26 = vld [vmem:[#allocation118_spill] sm:$0xff] }
 0x56d   :  { %v12025_v23 = vmax.f32 %v11047_v29, 0.0  ;;  %v3895_v42 = vadd.f32 %v12021_v25, %v12022_v11  ;;  %v3282_v16 = vmul.f32 %v3268_v51, %v3217_v46  ;;  %v13868_v11 = vld [vmem:[#allocation99_spill] sm:$0xff]  ;;  %v3354_v43 = vmul.f32 %v9835_v48, %v13866_v5 }
 0x56e   :  { %v11029_v49 = vpop.permute.xlu1 %3113  ;;  %v12027_v0 = vmax.f32 %v11023_v62, 0.0  ;;  %v3635_v13 = vadd.f32 %v12023_v35, %v12024_v22  ;;  %v13869_v35 = vld [vmem:[#allocation305_spill] sm:$0xff] }
 0x56f   :  { %v3889_v14 = vadd.f32 %v12025_v23, %v12026_v40  ;;  %v3298_v51 = vadd.f32 %v3282_v16, %v13868_v11  ;;  %v3489_v22 = vmul.f32 %v13854_v32, %v13869_v35  ;;  %v13870_v40 = vld [vmem:[#allocation23_spill] sm:$0xff]  ;;  %v3490_v11 = vmul.f32 %v13798_v45, %v13869_v35  ;;  %v13873_v45 = vld [vmem:[#allocation26_spill] sm:$0xff] }
 0x570   :  { %v3626_v17 = vadd.f32 %v12027_v0, %v12028_v30  ;;  %v13872_v30 = vld [vmem:[#allocation253_spill] sm:$0xff] }
 0x572   :  { %v11049_v33 = vpop.permute.xlu1 %3365  ;;  %3627 = vadd.xlane.f32.xlu1 %v3626_v17 }
 0x576   :  { %v3374_v31 = vpop.permute.xlu1 %3373  ;;  %3636 = vadd.xlane.f32.xlu1 %v3635_v13  ;;  %v3264_v13 = vsel %vm3257_vm6, %v10955_v9, %v10969_v47 }
 0x577   :  { %v3404_v21 = vsel %vm3393_vm7, %v11049_v33, %v3374_v31 }
 0x578   :  { %v3418_v25 = vmul.f32 %v3404_v21, %v3353_v18 }
 0x57a   :  { %v11071_v61 = vpop.permute.xlu1 %3381  ;;  %3890 = vadd.xlane.f32.xlu1 %v3889_v14  ;;  %v13867_v14 = vld [vmem:[#allocation21_spill] sm:$0xff] }
 0x57b   :  { %v3400_v37 = vsel %vm3393_vm7, %v3374_v31, %v11071_v61 }
 0x57c   :  { %v3419_v21 = vmul.f32 %v3400_v37, %v3354_v43 }
 0x57e   :  { %v11078_v55 = vpop.permute.xlu1 %3587  ;;  %3896 = vadd.xlane.f32.xlu1 %v3895_v42  ;;  %v3218_v42 = vmul.f32 %v13867_v14, %v13865_v10  ;;  %v3434_v14 = vadd.f32 %v3418_v25, %v3298_v51  ;;  %v2947_v51 = vmul.f32 %v13831_v1, %v13873_v45 }
 0x580   :  { %v3283_v46 = vmul.f32 %v3264_v13, %v3218_v42  ;;  %v13871_v42 = vld [vmem:[#allocation307_spill] sm:$0xff] }
 0x581   :  { %v2811_v28 = vmul.f32 %v13872_v30, %v13871_v42 }
 0x582   :  { %v11080_v2 = vpop.permute.xlu1 %2981  ;;  %v3299_v0 = vadd.f32 %v3283_v46, %v13870_v40  ;;  %v2948_v46 = vmul.f32 %v13832_v7, %v13873_v45  ;;  %v13878_v7 = vld [vmem:[#allocation157_spill] sm:$0xff]  ;;  %v13882_v45 = vld [vmem:[#allocation30_spill] sm:$0xff] }
 0x584   :  { %v3435_v32 = vadd.f32 %v3419_v21, %v3299_v0  ;;  %v13875_v0 = vld [vmem:[#allocation220_spill] sm:$0xff]  ;;  %v13877_v21 = vld [vmem:[#allocation115_spill] sm:$0xff] }
 0x585   :  { %v3122_v1 = vsel %vm3121_vm5, %v13877_v21, %v11029_v49 }
 0x586   :  { %v3250_v41 = vpop.permute.xlu1 %3249 }
 0x58a   :  { %v11094_v17 = vpop.permute.xlu1 %3501 }
 0x58e   :  { %v3510_v23 = vpop.permute.xlu1 %3509 }
 0x58f   :  { %v3540_v9 = vsel %vm3529_vm8, %v11094_v17, %v3510_v23 }
 0x590   :  { %v3554_v18 = vmul.f32 %v3540_v9, %v3489_v22  ;;  %v2812_v22 = vmul.f32 %v13849_v6, %v13871_v42  ;;  %v13876_v9 = vld [vmem:[#allocation108_spill] sm:$0xff]  ;;  %v13881_v42 = vld [vmem:[#allocation143_spill] sm:$0xff] }
 0x591   :  { %v3075_v6 = vmul.f32 %v13875_v0, %v13876_v9 }
 0x592   :  { %v3570_v31 = vadd.f32 %v3554_v18, %v3434_v14  ;;  %v11116_v16 = vpop.permute.xlu1 %3517  ;;  %v3076_v14 = vmul.f32 %v13852_v24, %v13876_v9 }
 0x593   :  { %v3536_v48 = vsel %vm3529_vm8, %v3510_v23, %v11116_v16  ;;  %v13874_v23 = vld [vmem:[#allocation70_spill] sm:$0xff]  ;;  %v3140_v21 = vmul.f32 %v3122_v1, %v3075_v6 }
 0x594   :  { %v3555_v13 = vmul.f32 %v3536_v48, %v3490_v11  ;;  %v11126_v37 = vadd.f32 %v11078_v55, %v3570_v31  ;;  %v3083_v43 = vmul.f32 %v13875_v0, %v13874_v23  ;;  %v3084_v30 = vmul.f32 %v13852_v24, %v13874_v23  ;;  %v13879_v11 = vld [vmem:[#allocation122_spill] sm:$0xff] }
 0x595   :  { %v3134_v31 = vsel %vm3121_vm5, %v11029_v49, %v13878_v7  ;;  %v13880_v48 = vld [vmem:[#allocation206_spill] sm:$0xff]  ;;  %v3220_v24 = vmul.f32 %v13761_v4, %v13865_v10  ;;  %v2864_v23 = vsel %vm2849_vm3, %v11011_v38, %v13882_v45  ;;  %v3212_v7 = vmul.f32 %v13761_v4, %v13879_v11 }
 0x596   :  { %v3571_v25 = vadd.f32 %v3555_v13, %v3435_v32  ;;  %v3118_v40 = vpop.permute.xlu1 %3117  ;;  %v3211_v32 = vmul.f32 %v13880_v48, %v13879_v11  ;;  %v3219_v13 = vmul.f32 %v13880_v48, %v13865_v10  ;;  %v12036_v0 = vmax.f32 %v11126_v37, 0.0  ;;  %v13883_v10 = vld [vmem:[#allocation121_spill] sm:$0xff]  ;;  %v13886_v11 = vld [vmem:[#allocation223_spill] sm:$0xff] }
 0x597   :  { %v3258_v48 = vsel %vm3257_vm6, %v13883_v10, %v3250_v41  ;;  %v3141_v34 = vmul.f32 %v3134_v31, %v3076_v14  ;;  %v3348_v45 = vmul.f32 %v13773_v59, %v13885_v26  ;;  %v2877_v1 = vmul.f32 %v2864_v23, %v2812_v22  ;;  %v13889_v14 = vld [vmem:[#allocation147_spill] sm:$0xff] }
 0x598   :  { %v11145_v18 = vadd.f32 %v11078_v55, %v3571_v25  ;;  %v2852_v25 = vsel %vm2849_vm3, %v13881_v42, %v11011_v38  ;;  %v3270_v42 = vsel %vm3257_vm6, %v3250_v41, %v13884_v44  ;;  %v3347_v38 = vmul.f32 %v13782_v36, %v13885_v26  ;;  %v13888_v41 = vld [vmem:[#allocation284_spill] sm:$0xff] }
 0x599   :  { %v2876_v6 = vmul.f32 %v2852_v25, %v2811_v28  ;;  %v2988_v26 = vsel %vm2985_vm4, %v13888_v41, %v11080_v2  ;;  %v3000_v31 = vsel %vm2985_vm4, %v11080_v2, %v13889_v14  ;;  %v3276_v28 = vmul.f32 %v3258_v48, %v3211_v32 }
 0x59a   :  { %v3386_v49 = vpop.permute.xlu1 %3385  ;;  %v12035_v9 = vmax.f32 %v11145_v18, 0.0  ;;  %v3277_v22 = vmul.f32 %v3270_v42, %v3212_v7  ;;  %v3156_v23 = vadd.f32 %v3140_v21, %v10948_v20  ;;  %v3484_v41 = vmul.f32 %v13859_v53, %v13853_v52 }
 0x59b   :  { %v3394_v10 = vsel %vm3393_vm7, %v13886_v11, %v3386_v49  ;;  %v3406_v44 = vsel %vm3393_vm7, %v3386_v49, %v13887_v60  ;;  %v13890_v11 = vld [vmem:[#allocation352_spill] sm:$0xff]  ;;  %v3483_v49 = vmul.f32 %v13790_v57, %v13853_v52  ;;  %v2892_v20 = vadd.f32 %v2876_v6, %v10920_v56 }
 0x59c   :  { %v3632_v4 = vadd.f32 %v12035_v9, %v12036_v0  ;;  %v3124_v60 = vsel %vm3121_vm5, %v13890_v11, %v3118_v40  ;;  %v3157_v9 = vadd.f32 %v3141_v34, %v10951_v8  ;;  %v13891_v0 = vld [vmem:[#allocation292_spill] sm:$0xff]  ;;  %v3412_v32 = vmul.f32 %v3394_v10, %v3347_v38 }
 0x59d   :  { %v3136_v2 = vsel %vm3121_vm5, %v3118_v40, %v13891_v0  ;;  %v3413_v7 = vmul.f32 %v3406_v44, %v3348_v45  ;;  %v2893_v21 = vadd.f32 %v2877_v1, %v10923_v12  ;;  %v3012_v48 = vmul.f32 %v2988_v26, %v2947_v51 }
 0x59e   :  { %v3254_v25 = vpop.permute.xlu1 %3253  ;;  %3633 = vadd.xlane.f32.xlu0 %v3632_v4  ;;  %v3013_v42 = vmul.f32 %v3000_v31, %v2948_v46  ;;  %v3292_v4 = vadd.f32 %v3276_v28, %v3156_v23  ;;  %v3293_v14 = vadd.f32 %v3277_v22, %v3157_v9  ;;  %v3148_v11 = vmul.f32 %v3124_v60, %v3083_v43 }
 0x59f   :  { %v3260_v52 = vsel %vm3257_vm6, %v10969_v47, %v3254_v25  ;;  %v3149_v34 = vmul.f32 %v3136_v2, %v3084_v30  ;;  %v3272_v40 = vsel %vm3257_vm6, %v3254_v25, %v10953_v15  ;;  %v3028_v9 = vadd.f32 %v3012_v48, %v2892_v20 }
 0x5a0   :  { %v3428_v51 = vadd.f32 %v3412_v32, %v3292_v4  ;;  %v3429_v46 = vadd.f32 %v3413_v7, %v3293_v14  ;;  %v3029_v47 = vadd.f32 %v3013_v42, %v2893_v21  ;;  %v3284_v38 = vmul.f32 %v3260_v52, %v3219_v13  ;;  %v11272_v21 = vld [vmem:[%s11420_s7] sm:$0xff] }
 0x5a1   :  { %v3355_v30 = vmul.f32 %v13782_v36, %v13866_v5  ;;  %v3285_v45 = vmul.f32 %v3272_v40, %v3220_v24  ;;  %v3164_v10 = vadd.f32 %v3148_v11, %v3028_v9  ;;  %v13893_v11 = vmov 0.0|0.0   ;;  %3732 = vrot.lane.b32.xlu1 %v11272_v21, %s4724_s28 }
 0x5a2   :  { %v3522_v8 = vpop.permute.xlu1 %3521  ;;  %v3165_v44 = vadd.f32 %v3149_v34, %v3029_v47 }
 0x5a3   :  { %v3530_v56 = vsel %vm3529_vm8, %v11005_v54, %v3522_v8  ;;  %v3542_v12 = vsel %vm3529_vm8, %v3522_v8, %v10977_v27  ;;  %v3356_v54 = vmul.f32 %v13773_v59, %v13866_v5  ;;  %v3300_v28 = vadd.f32 %v3284_v38, %v3164_v10  ;;  %v4663_v10 = vld [vmem:[%s11420_s7 + $0x18] sm:$0xff] }
 0x5a4   :  { %v3548_v43 = vmul.f32 %v3530_v56, %v3483_v49  ;;  %v3549_v0 = vmul.f32 %v3542_v12, %v3484_v41  ;;  %v3491_v59 = vmul.f32 %v13790_v57, %v13869_v35  ;;  %v3301_v5 = vadd.f32 %v3285_v45, %v3165_v44  ;;  %v3643_v12 = vld [vmem:[%s11422_s4] sm:$0xff] }
 0x5a6   :  { %v3564_v15 = vadd.f32 %v3548_v43, %v3428_v51  ;;  %v3565_v6 = vadd.f32 %v3549_v0, %v3429_v46  ;;  %v3390_v1 = vpop.permute.xlu1 %3389 }
 0x5a7   :  { %v3396_v27 = vsel %vm3393_vm7, %v11071_v61, %v3390_v1  ;;  %v3408_v13 = vsel %vm3393_vm7, %v3390_v1, %v11049_v33  ;;  %v3492_v61 = vmul.f32 %v13859_v53, %v13869_v35  ;;  %v4661_v1 = vld [vmem:[%s11420_s7 + $0x10] sm:$0xff] }
 0x5a8   :  { %v3420_v26 = vmul.f32 %v3396_v27, %v3355_v30  ;;  %v3421_v31 = vmul.f32 %v3408_v13, %v3356_v54  ;;  %v11234_v36 = vadd.f32 %v13858_v63, %v3564_v15  ;;  %v11237_v24 = vadd.f32 %v13858_v63, %v3565_v6  ;;  %v3728_v6 = vld [vmem:[%s11423_s5] sm:$0xff]  ;;  %v11298_v54 = vld [vmem:[%s11420_s7 + $0x8] sm:$0xff] }
 0x5a9   :  { %4411 = vmatprep.mubr.msk.f32.mxu1 %vm3744_vm11, %v3728_v6  ;;  %3734 = vrot.lane.b32.xlu1 %v11298_v54, %s4724_s28 }
 0x5aa   :  { %v3526_v22 = vpop.permute.xlu1 %3525  ;;  %v3612_v25 = vmax.f32 %v11234_v36, 0.0  ;;  %v3613_v33 = vmax.f32 %v11237_v24, 0.0  ;;  %v3436_v23 = vadd.f32 %v3420_v26, %v3300_v28  ;;  %v3437_v49 = vadd.f32 %v3421_v31, %v3301_v5 }
 0x5ab   :  { %v3532_v60 = vsel %vm3529_vm8, %v11116_v16, %v3526_v22  ;;  %v3544_v63 = vsel %vm3529_vm8, %v3526_v22, %v11094_v17 }
 0x5ac   :  { %v3556_v57 = vmul.f32 %v3532_v60, %v3491_v59  ;;  %v3557_v41 = vmul.f32 %v3544_v63, %v3492_v61  ;;  %v3886_v53 = vadd.f32 %v3613_v33, %v3612_v25 }
 0x5ad   :  { %3738 = vrot.lane.b32.xlu1 %v4663_v10, %s4724_s28 }
 0x5ae   :  { %v3572_v35 = vadd.f32 %v3556_v57, %v3436_v23  ;;  %v3573_v2 = vadd.f32 %v3557_v41, %v3437_v49  ;;  %3887 = vadd.xlane.f32.xlu0 %v3886_v53  ;;  %v3729_v49 = vld [vmem:[%s11423_s5 + $0x8] sm:$0xff]  ;;  %v3730_v57 = vld [vmem:[%s11423_s5 + $0x10] sm:$0xff]  ;;  %v3731_v41 = vld [vmem:[%s11423_s5 + $0x18] sm:$0xff] }
 0x5b0   :  { %v11256_v32 = vadd.f32 %v11078_v55, %v3572_v35  ;;  %v11259_v16 = vadd.f32 %v11078_v55, %v3573_v2 }
 0x5b2   :  { %v3620_v17 = vmax.f32 %v11256_v32, 0.0  ;;  %v3621_v7 = vmax.f32 %v11259_v16, 0.0  ;;  %v4125_v32 = vld [vmem:[%s11424_s6 + $0x8] sm:$0xff] }
 0x5b4   :  { %v3892_v20 = vadd.f32 %v3621_v7, %v3620_v17 }
 0x5b6   :  { %3893 = vadd.xlane.f32.xlu0 %v3892_v20 }
 0x5cc   :  { %3644 = vrot.lane.b32.xlu0 %v11272_v21, %s4703_s15 }
 0x5d0   :  { %3736 = vrot.lane.b32.xlu0 %v4661_v1, %s4724_s28 }
 0x5dd   :  { %v3631_v55 = vpop.xlane.xlu0 %3630 }
 0x5de   :  { %v3640_v42 = vmul.f32 0.00390625, %v3631_v55 }
 0x5ff   :  { %v3628_v48 = vpop.xlane.xlu1 %3627 }
 0x600   :  { %v3639_v4 = vmul.f32 0.00390625, %v3628_v48 }
 0x602   :  { %v4445_v14 = vpack.c.bf16 %v3640_v42, %v3639_v4 }
 0x603   :  { %v3637_v52 = vpop.xlane.xlu1 %3636 }
 0x604   :  { %4446 = vmatpush3.bf16.msra.mxu0 %v4445_v14  ;;  %v3642_v34 = vmul.f32 0.00390625, %v3637_v52 }
 0x605   :  { %4447 = vmatprep.subr.bf16.mxu0 %v13893_v11 }
 0x607   :  { %v3891_v51 = vpop.xlane.xlu1 %3890 }
 0x608   :  { %v3899_v43 = vmul.f32 0.00390625, %v3891_v51 }
 0x60b   :  { %v3897_v47 = vpop.xlane.xlu1 %3896 }
 0x60c   :  { %v3901_v30 = vmul.f32 0.00390625, %v3897_v47 }
 0x613   :  { %v3733_v55 = vpop.permute.xlu1 %3732 }
 0x61b   :  { %v3735_v48 = vpop.permute.xlu1 %3734 }
 0x62b   :  { %v3634_v8 = vpop.xlane.xlu0 %3633 }
 0x62c   :  { %v3641_v40 = vmul.f32 0.00390625, %v3634_v8 }
 0x62e   :  { %v4448_v56 = vpack.c.bf16 %v3642_v34, %v3641_v40 }
 0x630   :  { %4449 = vmatpush3.bf16.msra.mxu0 %v4448_v56 }
 0x631   :  { %4450 = vmatprep.subr.bf16.mxu0 %v13893_v11 }
 0x633   :  { %4407 = vmatmul.mubr.msk.f32.vlgmr.msra.gmra.mrb[8].mxu0 %vm3647_vm10, %v3643_v12 }
 0x634   :  { %4425 = vmatprep.mubr.msk.f32.mxu0 %vm4723_vm9, %v13892_v3 }
 0x63b   :  { %v3888_v46 = vpop.xlane.xlu0 %3887 }
 0x63c   :  { %v3898_v0 = vmul.f32 0.00390625, %v3888_v46  ;;  %v3739_v46 = vpop.permute.xlu1 %3738 }
 0x63e   :  { %v4451_v9 = vpack.c.bf16 %v3899_v43, %v3898_v0 }
 0x640   :  { %4452 = vmatpush3.bf16.msra.mxu0 %v4451_v9 }
 0x641   :  { %4453 = vmatprep.subr.bf16.mxu0 %v13893_v11 }
 0x643   :  { %v3894_v38 = vpop.xlane.xlu0 %3893 }
 0x644   :  { %v3900_v45 = vmul.f32 0.00390625, %v3894_v38 }
 0x646   :  { %v4454_v15 = vpack.c.bf16 %v3901_v30, %v3900_v45 }
 0x647   :  { %v3645_v44 = vpop.permute.xlu0 %3644 }
 0x648   :  { %4455 = vmatpush3.bf16.msra.mxu0 %v4454_v15 }
 0x64b   :  { %4426 = vmatmul.mubr.msk.f32.vlgmr.msra.gmra.mrb[10].mxu0 %vm3647_vm10, %v3643_v12  ;;  %v3737_v0 = vpop.permute.xlu0 %3736 }
 0x64c   :  { %4204 = vmatprep.mubr.f32.mxu0 %v13892_v3 }
 0x706   :  { %v3717_v27 = vpop.f32.mrb[8].mxu0 }
 0x707   :  { %v3718_v13 = vadd.f32 %v3717_v27, %v3645_v44  ;;  %v4408_v26 = vpop.f32.mrb[9].mxu0 }
 0x709   :  { %v4351_v31 = vmul.f32 -1.442695, %v3718_v13 }
 0x70b   :  { %4598 = vpow2.f32 %v4351_v31 }
 0x715   :  { %v4599_v28 = vpop.eup %4598 }
 0x716   :  { %v3724_v59 = vadd.f32 1.0, %v4599_v28 }
 0x718   :  { %4600 = vrcp.f32 %v3724_v59 }
 0x71e   :  { %v3968_v5 = vpop.f32.mrb[10].mxu0 }
 0x71f   :  { %v3969_v61 = vadd.f32 %v3968_v5, %v3645_v44  ;;  %v4427_v22 = vpop.f32.mrb[11].mxu0 }
 0x721   :  { %v4361_v23 = vmul.f32 -1.442695, %v3969_v61 }
 0x722   :  { %v4601_v60 = vpop.eup %4600 }
 0x723   :  { %v3727_v63 = vmul.f32 %v4601_v60, %v3718_v13  ;;  %4602 = vpow2.f32 %v4361_v23 }
 0x725   :  { %4409 = vmatprep.subr.mxu1 %v3727_v63 }
 0x726   :  { %4410 = vmatpush3.msra.mxu1 %v3727_v63 }
 0x727   :  { %4412 = vmatmul.mubr.msk.f32.vlgmr.msra.gmra.mrb[8].mxu1 %vm3744_vm11, %v3729_v49 }
 0x728   :  { %4414 = vmatprep.mubr.msk.f32.mxu1 %vm3744_vm11, %v3730_v57 }
 0x72b   :  { %4415 = vmatmul.mubr.msk.f32.gmra.mrb[10].mxu1 %vm3744_vm11, %v3731_v41 }
 0x72c   :  { %4430 = vmatprep.mubr.msk.f32.mxu1 %vm3744_vm11, %v3728_v6 }
 0x72d   :  { %v4603_v53 = vpop.eup %4602 }
 0x72e   :  { %v3975_v35 = vadd.f32 1.0, %v4603_v53 }
 0x730   :  { %4604 = vrcp.f32 %v3975_v35 }
 0x73a   :  { %v4605_v2 = vpop.eup %4604 }
 0x73b   :  { %v3978_v20 = vmul.f32 %v4605_v2, %v3969_v61 }
 0x73d   :  { %4428 = vmatprep.subr.mxu1 %v3978_v20 }
 0x73e   :  { %4429 = vmatpush3.msra.mxu1 %v3978_v20 }
 0x73f   :  { %4431 = vmatmul.mubr.msk.f32.vlgmr.msra.gmra.mrb[12].mxu1 %vm3744_vm11, %v3729_v49 }
 0x740   :  { %4433 = vmatprep.mubr.msk.f32.mxu1 %vm3744_vm11, %v3730_v57 }
 0x743   :  { %4434 = vmatmul.mubr.msk.f32.gmra.mrb[14].mxu1 %vm3744_vm11, %v3731_v41 }
 0x744   :  { %4281 = vmatprep.mubr.f32.mxu1 %v13892_v3 }
 0x7fa   :  { %v4413_v42 = vpop.f32.mrb[8].mxu1 }
 0x7fb   :  { %v3829_v4 = vadd.f32 %v4413_v42, %v3735_v48  ;;  %v3823_v14 = vpop.f32.mrb[9].mxu1 }
 0x7fc   :  { %v3824_v11 = vadd.f32 %v3823_v14, %v3733_v55 }
 0x7fd   :  { %v4357_v52 = vmul.f32 -1.442695, %v3829_v4 }
 0x7fe   :  { %v4356_v8 = vmul.f32 -1.442695, %v3824_v11  ;;  %v4416_v34 = vpop.f32.mrb[10].mxu1 }
 0x7ff   :  { %4606 = vpow2.f32 %v4357_v52  ;;  %v3833_v40 = vpop.f32.mrb[11].mxu1  ;;  %v3839_v9 = vadd.f32 %v4416_v34, %v3739_v46 }
 0x800   :  { %4608 = vpow2.f32 %v4356_v8  ;;  %v3834_v47 = vadd.f32 %v3833_v40, %v3737_v0  ;;  %v13894_v8 = vmov 4   ;;  %v13895_v40 = vmax.f32 %v10884_v58, 0.0 }
 0x801   :  { %v4359_v38 = vmul.f32 -1.442695, %v3839_v9  ;;  %v13898_v9 = vmax.f32 %v11023_v62, 0.0  ;;  %v13900_v58 = vmax.f32 %v11047_v29, 0.0  ;;  %v13905_v29 = vmax.f32 %v11126_v37, 0.0 }
 0x802   :  { %v4358_v45 = vmul.f32 -1.442695, %v3834_v47 }
 0x809   :  { %v4607_v56 = vpop.eup %4606 }
 0x80a   :  { %v4609_v12 = vpop.eup %4608  ;;  %v3855_v51 = vadd.f32 1.0, %v4607_v56 }
 0x80b   :  { %v3854_v43 = vadd.f32 1.0, %v4609_v12  ;;  %v13896_v12 = vmax.f32 %v10893_v19, 0.0 }
 0x80c   :  { %4610 = vrcp.f32 %v3855_v51 }
 0x80d   :  { %4612 = vrcp.f32 %v3854_v43  ;;  %v13897_v43 = vmax.f32 %v11014_v50, 0.0 }
 0x80e   :  { %4614 = vpow2.f32 %v4359_v38 }
 0x80f   :  { %4616 = vpow2.f32 %v4358_v45 }
 0x812   :  { %v4432_v30 = vpop.f32.mrb[12].mxu1 }
 0x813   :  { %v4051_v15 = vadd.f32 %v4432_v30, %v3735_v48  ;;  %v4045_v6 = vpop.f32.mrb[13].mxu1 }
 0x814   :  { %v4046_v1 = vadd.f32 %v4045_v6, %v3733_v55 }
 0x815   :  { %v4367_v10 = vmul.f32 -1.442695, %v4051_v15 }
 0x816   :  { %v4611_v44 = vpop.eup %4610  ;;  %v4366_v27 = vmul.f32 -1.442695, %v4046_v1  ;;  %v4435_v13 = vpop.f32.mrb[14].mxu1 }
 0x817   :  { %v4613_v26 = vpop.eup %4612  ;;  %4618 = vpow2.f32 %v4367_v10  ;;  %3873 = vperm.xlu1 %4595, %v4611_v44   ;;  %v4061_v31 = vadd.f32 %v4435_v13, %v3739_v46  ;;  %v4055_v28 = vpop.f32.mrb[15].mxu1  ;;  %v13901_v44 = vld [vmem:[#allocation66_spill] sm:$0xff] }
 0x818   :  { %4620 = vpow2.f32 %v4366_v27  ;;  %3868 = vperm.xlu0 %4594, %v4613_v26   ;;  %v4056_v59 = vadd.f32 %v4055_v28, %v3737_v0  ;;  %v4615_v22 = vpop.eup %4614  ;;  %v13902_v27 = vmax.f32 %v13901_v44, 0.0  ;;  %v13903_v26 = vld [vmem:[#allocation198_spill] sm:$0xff] }
 0x819   :  { %v4369_v5 = vmul.f32 -1.442695, %v4061_v31  ;;  %v4617_v23 = vpop.eup %4616  ;;  %v3857_v41 = vadd.f32 1.0, %v4615_v22  ;;  %v13904_v31 = vmax.f32 %v13903_v26, 0.0 }
 0x81a   :  { %v4368_v61 = vmul.f32 -1.442695, %v4056_v59  ;;  %v3856_v35 = vadd.f32 1.0, %v4617_v23 }
 0x81b   :  { %4622 = vpow2.f32 %v4369_v5  ;;  %v13906_v5 = vmax.f32 %v11145_v18, 0.0  ;;  %v4124_v18 = vld [vmem:[%s11424_s6] sm:$0xff] }
 0x81c   :  { %4624 = vpow2.f32 %v4368_v61  ;;  %v13907_v61 = vld [vmem:[#allocation53_spill] sm:$0xff] }
 0x81d   :  { %v13908_v22 = vmax.f32 %v13907_v61, 0.0 }
 0x821   :  { %v4619_v60 = vpop.eup %4618 }
 0x822   :  { %v4621_v63 = vpop.eup %4620  ;;  %v4077_v49 = vadd.f32 1.0, %v4619_v60  ;;  %v13909_v60 = vld [vmem:[#allocation151_spill] sm:$0xff] }
 0x823   :  { %v4076_v57 = vadd.f32 1.0, %v4621_v63  ;;  %v13910_v63 = vmax.f32 %v13909_v60, 0.0 }
 0x824   :  { %4626 = vrcp.f32 %v4077_v49 }
 0x825   :  { %v4623_v53 = vpop.eup %4622  ;;  %4628 = vrcp.f32 %v4076_v57 }
 0x826   :  { %v4625_v2 = vpop.eup %4624  ;;  %4630 = vrcp.f32 %v3857_v41  ;;  %v4079_v20 = vadd.f32 1.0, %v4623_v53 }
 0x827   :  { %4632 = vrcp.f32 %v3856_v35  ;;  %v4078_v55 = vadd.f32 1.0, %v4625_v2 }
 0x828   :  { %4634 = vrcp.f32 %v4079_v20 }
 0x829   :  { %4636 = vrcp.f32 %v4078_v55 }
 0x82e   :  { %v4627_v48 = vpop.eup %4626 }
 0x82f   :  { %v4629_v42 = vpop.eup %4628  ;;  %4095 = vperm.xlu0 %4594, %v4627_v48   ;;  %v4664_v48 = vld [vmem:[%s11417_s0] sm:$0xff] }
 0x830   :  { %4090 = vperm.xlu1 %4595, %v4629_v42   ;;  %v4631_v4 = vpop.eup %4630 }
 0x831   :  { %v4633_v14 = vpop.eup %4632 }
 0x832   :  { %v4635_v11 = vpop.eup %4634 }
 0x833   :  { %3883 = vperm.xlu0 %4594, %v4631_v4   ;;  %v4637_v52 = vpop.eup %4636 }
 0x834   :  { %3878 = vperm.xlu1 %4595, %v4633_v14   ;;  %v4665_v14 = vld [vmem:[%s11417_s0 + $0x8] sm:$0xff] }
 0x837   :  { %4105 = vperm.xlu0 %4594, %v4635_v11  }
 0x838   :  { %4100 = vperm.xlu1 %4595, %v4637_v52  }
 0x83b   :  { %4597 = vset.pattern.permute.xlu0 %v13894_v8 }
 0x83c   :  { %4596 = vset.pattern.permute.xlu1 %v13894_v8  ;;  %4131 = vperm.xlu0 %4597, %v11298_v54  }
 0x83d   :  { %4127 = vperm.xlu1 %4596, %v11272_v21   ;;  %v13899_v21 = vmax.f32 %v11039_v39, 0.0 }
 0x896   :  { %v3874_v34 = vpop.permute.xlu1 %3873 }
 0x897   :  { %v4112_v56 = vmul.f32 %v3874_v34, %v13895_v40  ;;  %v4113_v51 = vmul.f32 %v3874_v34, %v13896_v12  ;;  %v3869_v46 = vpop.permute.xlu0 %3868 }
 0x898   :  { %v4108_v0 = vmul.f32 %v3869_v46, %v13897_v43  ;;  %v4109_v47 = vmul.f32 %v3869_v46, %v13898_v9  ;;  %v4667_v43 = vld [vmem:[%s11417_s0 + $0x10] sm:$0xff]  ;;  %v4668_v9 = vld [vmem:[%s11417_s0 + $0x28] sm:$0xff] }
 0x89a   :  { %v4456_v38 = vpack.c.bf16 %v4113_v51, %v4109_v47  ;;  %v4458_v30 = vpack.c.bf16 %v4112_v56, %v4108_v0  ;;  %v4666_v51 = vld [vmem:[%s11417_s0 + $0x20] sm:$0xff] }
 0x89c   :  { %4457 = vmatprep.subr.bf16.mxu0 %v4456_v38 }
 0x89d   :  { %4459 = vmatpush1.bf16.msra.mxu0 %v4458_v30  ;;  %v4669_v30 = vld [vmem:[%s11417_s0 + $0x18] sm:$0xff] }
 0x8ae   :  { %v4096_v54 = vpop.permute.xlu0 %4095 }
 0x8af   :  { %v4114_v45 = vmul.f32 %v4096_v54, %v13899_v21  ;;  %v4115_v15 = vmul.f32 %v4096_v54, %v13900_v58  ;;  %v4091_v19 = vpop.permute.xlu1 %4090 }
 0x8b0   :  { %v4110_v6 = vmul.f32 %v4091_v19, %v3612_v25  ;;  %v4111_v50 = vmul.f32 %v4091_v19, %v3613_v33 }
 0x8b2   :  { %v4464_v62 = vpack.c.bf16 %v4115_v15, %v4111_v50  ;;  %v4466_v1 = vpack.c.bf16 %v4114_v45, %v4110_v6  ;;  %v3884_v10 = vpop.permute.xlu0 %3883  ;;  %v4670_v15 = vld [vmem:[%s11417_s0 + $0x30] sm:$0xff]  ;;  %v4671_v6 = vld [vmem:[%s11417_s0 + $0x38] sm:$0xff] }
 0x8b3   :  { %v4120_v13 = vmul.f32 %v3884_v10, %v13902_v27  ;;  %v4121_v39 = vmul.f32 %v3884_v10, %v13904_v31  ;;  %v3879_v28 = vpop.permute.xlu1 %3878 }
 0x8b4   :  { %v4116_v59 = vmul.f32 %v3879_v28, %v13905_v29  ;;  %v4117_v36 = vmul.f32 %v3879_v28, %v13906_v5  ;;  %4465 = vmatprep.subr.bf16.mxu1 %v4464_v62 }
 0x8b5   :  { %4467 = vmatpush1.bf16.msra.mxu1 %v4466_v1 }
 0x8b6   :  { %v4460_v24 = vpack.c.bf16 %v4121_v39, %v4117_v36  ;;  %v4462_v25 = vpack.c.bf16 %v4120_v13, %v4116_v59  ;;  %v4106_v33 = vpop.permute.xlu0 %4105 }
 0x8b7   :  { %v4122_v23 = vmul.f32 %v4106_v33, %v13908_v22  ;;  %v4123_v49 = vmul.f32 %v4106_v33, %v13910_v63  ;;  %v4101_v57 = vpop.permute.xlu1 %4100 }
 0x8b8   :  { %v4118_v41 = vmul.f32 %v4101_v57, %v3620_v17  ;;  %v4119_v37 = vmul.f32 %v4101_v57, %v3621_v7  ;;  %4461 = vmatprep.subr.bf16.mxu0 %v4460_v24 }
 0x8b9   :  { %4463 = vmatpush1.bf16.msra.mxu0 %v4462_v25 }
 0x8ba   :  { %v4468_v53 = vpack.c.bf16 %v4123_v49, %v4119_v37  ;;  %v4470_v35 = vpack.c.bf16 %v4122_v23, %v4118_v41 }
 0x8bb   :  { %v4132_v55 = vpop.permute.xlu0 %4131 }
 0x8bc   :  { %4469 = vmatprep.subr.bf16.mxu1 %v4468_v53  ;;  %4370 = vmatmul.mubr.msk.f32.vlgmr.msra.gmra.mrb[12].mxu0 %vm3647_vm10, %v4124_v18  ;;  %v4128_v16 = vpop.permute.xlu1 %4127 }
 0x8bd   :  { %4471 = vmatpush1.bf16.msra.mxu1 %v4470_v35  ;;  %4210 = vmatprep.mubr.f32.mxu0 %v13892_v3 }
 0x8c0   :  { %4372 = vmatmul.mubr.msk.f32.vlgmr.msra.gmra.mrb[16].mxu1 %vm3647_vm10, %v4124_v18  ;;  %4371 = vmatmul.mubr.msk.f32.gmra.mrb[14].mxu0 %vm3647_vm10, %v4125_v32 }
 0x8c1   :  { %4287 = vmatprep.mubr.f32.mxu1 %v13892_v3 }
 0x8c4   :  { %4373 = vmatmul.mubr.msk.f32.gmra.mrb[18].mxu1 %vm3647_vm10, %v4125_v32 }
 0x98f   :  { %v4206_v17 = vpop.f32.mrb[12].mxu0 }
 0x990   :  { %v4208_v7 = vpop.f32.mrb[13].mxu0  ;;  %v4207_v2 = vadd.f32 %v4206_v17, %v4128_v16 }
 0x991   :  { %v4209_v20 = vadd.f32 %v4208_v7, %v4128_v16 }
 0x992   :  { %v4294_v42 = vadd.f32 %v4664_v48, %v4207_v2 }
 0x993   :  { %v4283_v4 = vpop.f32.mrb[16].mxu1  ;;  %v4295_v11 = vadd.f32 %v4665_v14, %v4209_v20  ;;  %v4212_v3 = vpop.f32.mrb[14].mxu0 }
 0x994   :  { %v4285_v52 = vpop.f32.mrb[17].mxu1  ;;  %v4284_v8 = vadd.f32 %v4283_v4, %v4128_v16  ;;  %4302 = vst [vmem:[%s11425_s8] sm:$0xff] %v4294_v42  ;;  %v4213_v34 = vadd.f32 %v4212_v3, %v4132_v55  ;;  %v4214_v40 = vpop.f32.mrb[15].mxu0 }
 0x995   :  { %v4286_v56 = vadd.f32 %v4285_v52, %v4128_v16  ;;  %4303 = vst [vmem:[%s11425_s8 + $0x8] sm:$0xff] %v4295_v11  ;;  %v4215_v12 = vadd.f32 %v4214_v40, %v4132_v55 }
 0x996   :  { %v4296_v46 = vadd.f32 %v4666_v51, %v4284_v8  ;;  %v4298_v0 = vadd.f32 %v4667_v43, %v4213_v34 }
 0x997   :  { %v4297_v47 = vadd.f32 %v4668_v9, %v4286_v56  ;;  %v4289_v38 = vpop.f32.mrb[18].mxu1  ;;  %v4299_v54 = vadd.f32 %v4669_v30, %v4215_v12 }
 0x998   :  { %4374 = vst [vmem:[%s11425_s8 + $0x20] sm:$0xff] %v4296_v46  ;;  %v4290_v21 = vadd.f32 %v4289_v38, %v4132_v55  ;;  %4304 = vst [vmem:[%s11425_s8 + $0x10] sm:$0xff] %v4298_v0  ;;  %v4291_v45 = vpop.f32.mrb[19].mxu1 }
 0x999   :  { %4375 = vst [vmem:[%s11425_s8 + $0x28] sm:$0xff] %v4297_v47  ;;  %4305 = vst [vmem:[%s11425_s8 + $0x18] sm:$0xff] %v4299_v54  ;;  %v4292_v58 = vadd.f32 %v4291_v45, %v4132_v55 }
 0x99a   :  { %v4300_v19 = vadd.f32 %v4670_v15, %v4290_v21 }
 0x99b   :  { %v4301_v50 = vadd.f32 %v4671_v6, %v4292_v58 }
 0x99c   :  { %4376 = vst [vmem:[%s11425_s8 + $0x30] sm:$0xff] %v4300_v19 }
 0x99d   :  { %4377 = vst [vmem:[%s11425_s8 + $0x38] sm:$0xff] %v4301_v50 }

</bundles_post_ra>
